<compile_context>
chip_gen: v7x
topology: tpu7x:2x2x1
jax: 0.10.0
libtpu: 0.0.40
codegen_flags: <defaults>
</compile_context>

<pallas_src>
import functools

import jax
import jax.numpy as jnp
from jax.experimental import pallas as pl
from jax.experimental.pallas import tpu as pltpu

LSTM_SIZE = 40
EMBED_DIM = 40
NUM_LAYERS = 5
PAD = 128                      # lane-aligned padded width for H / E / each gate


def _round_up(x, m):
    return ((x + m - 1) // m) * m


# ----------------------------------------------------------------------------
# Fused Pallas kernel: 5 LSTM layers + final FC, everything VMEM-resident.
# ----------------------------------------------------------------------------
def fused_lstm_fc_kernel(embed_ref, h0_ref, c0_ref, wih_ref, whh_ref, b_ref,
                         fcw_ref, fcb_ref,
                         logits_ref, hT_ref, cT_ref,
                         seq_ref):
    """Shapes (P = PAD = 128, G = 4P):
      embed_ref : (T*B, P)    padded embeddings, row t*B + b
      h0/c0     : (L, B, P)   padded initial state (pad region zero)
      wih/whh   : (L, P, G)   gate g lives in columns [g*P, g*P + H)
      b         : (L, 1, G)   combined b_ih + b_hh, padded the same way
      fcw       : (P, Vp)     fc weight; rows >= H and cols >= V are zero
      fcb       : (1, Vp)
      logits    : (T*B, Vp)
      hT/cT     : (L, B, P)
      seq_ref   : (T*B, P)    VMEM scratch holding the current layer's output
    """
    TB, P = embed_ref.shape
    L, B, _ = h0_ref.shape
    T = TB // B

    x2d = embed_ref[...]                                   # (T*B, P)

    for l in range(L):                                     # static unroll over layers
        wih = wih_ref[l]                                   # (P, 4P)
        whh = whh_ref[l]                                   # (P, 4P)
        b = b_ref[l]                                       # (1, 4P)

        # Hoisted input projection + bias: one matmul for the whole sequence.
        gx = jnp.dot(x2d, wih, preferred_element_type=jnp.float32) + b   # (T*B, 4P)

        h = h0_ref[l]                                      # (B, P)
        c = c0_ref[l]                                      # (B, P)
        for t in range(T):                                 # fully unrolled recurrence
            gates = gx[t * B:(t + 1) * B, :] + jnp.dot(
                h, whh, preferred_element_type=jnp.float32)              # (B, 4P)
            i = jax.nn.sigmoid(gates[:, 0 * P:1 * P])      # lane-aligned gate slices
            f = jax.nn.sigmoid(gates[:, 1 * P:2 * P])
            g = jnp.tanh(gates[:, 2 * P:3 * P])
            o = jax.nn.sigmoid(gates[:, 3 * P:4 * P])
            c = f * c + i * g
            h = o * jnp.tanh(c)
            seq_ref[t * B:(t + 1) * B, :] = h              # layer output for step t

        hT_ref[l] = h
        cT_ref[l] = c
        x2d = seq_ref[...]                                 # input to the next layer
        # TODO(synk): nn.LSTM applies dropout(p=0.2) between layers only in
        # training mode; eval-mode semantics (no dropout) are implemented here.

    # Final FC over the whole sequence, lane-dense output (Vp multiple of 128).
    logits_ref[...] = (jnp.dot(x2d, fcw_ref[...],
                               preferred_element_type=jnp.float32)
                       + fcb_ref[...]).astype(logits_ref.dtype)


# ----------------------------------------------------------------------------
# Forward pass wrapper (embedding gather + pad/unpad glue + single pallas_call)
# ----------------------------------------------------------------------------
def _model2_forward_impl(params, x_tokens, prev_state, n_vocab):
    h0, c0 = prev_state                                    # each (L, B, H)
    L, B, H = h0.shape
    T = x_tokens.shape[0]
    Vp = params["fc_w"].shape[1]

    # Embedding gather (plain-JAX glue); table columns already zero-padded to PAD.
    embed = jnp.take(params["embedding"], x_tokens.reshape(-1), axis=0)  # (T*B, PAD)

    h0p = jnp.zeros((L, B, PAD), jnp.float32).at[:, :, :H].set(h0)
    c0p = jnp.zeros((L, B, PAD), jnp.float32).at[:, :, :H].set(c0)

    vmem = pl.BlockSpec(memory_space=pltpu.MemorySpace.VMEM)
    out_shape = (
        jax.ShapeDtypeStruct((T * B, Vp), jnp.float32),
        jax.ShapeDtypeStruct((L, B, PAD), jnp.float32),
        jax.ShapeDtypeStruct((L, B, PAD), jnp.float32),
    )
    logits_p, hT_p, cT_p = pl.pallas_call(
        fused_lstm_fc_kernel,
        out_shape=out_shape,
        in_specs=[vmem] * 8,
        out_specs=(vmem, vmem, vmem),
        scratch_shapes=[pltpu.VMEM((T * B, PAD), jnp.float32)],
    )(embed, h0p, c0p, params["w_ih"], params["w_hh"], params["b"],
      params["fc_w"], params["fc_b"])

    logits = logits_p[:, :n_vocab].reshape(T, B, n_vocab)
    return logits, (hT_p[:, :, :H], cT_p[:, :, :H])


model2_forward = jax.jit(_model2_forward_impl, static_argnames=("n_vocab",))


# ----------------------------------------------------------------------------
# Parameter init (PyTorch-style uniform(-1/sqrt(H), 1/sqrt(H))) packed into the
# lane-aligned padded layout that the fused kernel expects.
# ----------------------------------------------------------------------------
def _pad_gate_cols(w, H):
    """(R, 4H) -> (R, 4*PAD): gate g placed at columns [g*PAD, g*PAD + H)."""
    R = w.shape[0]
    out = jnp.zeros((R, 4 * PAD), w.dtype)
    for g in range(4):
        out = out.at[:, g * PAD:g * PAD + H].set(w[:, g * H:(g + 1) * H])
    return out


def _pad_rows(w, rows_to):
    return jnp.zeros((rows_to, w.shape[1]), w.dtype).at[:w.shape[0], :].set(w)


def init_params(key, n_vocab):
    H, E = LSTM_SIZE, EMBED_DIM
    Vp = _round_up(n_vocab, 128)
    k = 1.0 / float(H) ** 0.5
    params = {}

    key, sub = jax.random.split(key)
    emb = jax.random.normal(sub, (n_vocab, E), jnp.float32)
    params["embedding"] = jnp.zeros((n_vocab, PAD), jnp.float32).at[:, :E].set(emb)

    wih_l, whh_l, b_l = [], [], []
    for l in range(NUM_LAYERS):
        d_in = E if l == 0 else H
        key, k1, k2, k3, k4 = jax.random.split(key, 5)
        w_ih = jax.random.uniform(k1, (d_in, 4 * H), jnp.float32, -k, k)
        w_hh = jax.random.uniform(k2, (H, 4 * H), jnp.float32, -k, k)
        b_ih = jax.random.uniform(k3, (1, 4 * H), jnp.float32, -k, k)
        b_hh = jax.random.uniform(k4, (1, 4 * H), jnp.float32, -k, k)
        wih_l.append(_pad_rows(_pad_gate_cols(w_ih, H), PAD))
        whh_l.append(_pad_rows(_pad_gate_cols(w_hh, H), PAD))
        b_l.append(_pad_gate_cols(b_ih + b_hh, H))
    params["w_ih"] = jnp.stack(wih_l)        # (L, PAD, 4*PAD)
    params["w_hh"] = jnp.stack(whh_l)        # (L, PAD, 4*PAD)
    params["b"] = jnp.stack(b_l)             # (L, 1, 4*PAD)

    key, k1, k2 = jax.random.split(key, 3)
    fc_w = jax.random.uniform(k1, (H, n_vocab), jnp.float32, -k, k)
    fc_b = jax.random.uniform(k2, (1, n_vocab), jnp.float32, -k, k)
    params["fc_w"] = jnp.zeros((PAD, Vp), jnp.float32).at[:H, :n_vocab].set(fc_w)
    params["fc_b"] = jnp.zeros((1, Vp), jnp.float32).at[:, :n_vocab].set(fc_b)
    return params


def init_state(batch):
    # Mirrors Model2.init_state (zeros for h and c).
    return (jnp.zeros((NUM_LAYERS, batch, LSTM_SIZE), jnp.float32),
            jnp.zeros((NUM_LAYERS, batch, LSTM_SIZE), jnp.float32))


if __name__ == "__main__":
    SEQ_LEN = 8
    BATCH = 2
    N_VOCAB = 32

    key = jax.random.PRNGKey(0)
    key, pkey, xkey = jax.random.split(key, 3)

    params = init_params(pkey, N_VOCAB)
    x_tokens = jax.random.randint(xkey, (SEQ_LEN, BATCH), 0, N_VOCAB, jnp.int32)
    prev_state = init_state(BATCH)

    logits, (hN, cN) = model2_forward(params, x_tokens, prev_state, n_vocab=N_VOCAB)
    jax.block_until_ready(logits)
    jax.block_until_ready(hN)
    jax.block_until_ready(cN)

    assert logits.shape == (SEQ_LEN, BATCH, N_VOCAB)
    assert hN.shape == (NUM_LAYERS, BATCH, LSTM_SIZE)
    assert cN.shape == (NUM_LAYERS, BATCH, LSTM_SIZE)
    assert bool(jnp.all(jnp.isfinite(logits)))
    print("KERNEL_OK")
</pallas_src>

<mosaic_0001>
module attributes {stable_mosaic.version = 11 : i64} {
  func.func @fused_lstm_fc_kernel(%arg0: memref<16x128xf32, #tpu.memory_space<vmem>>, %arg1: memref<5x2x128xf32, #tpu.memory_space<vmem>>, %arg2: memref<5x2x128xf32, #tpu.memory_space<vmem>>, %arg3: memref<5x128x512xf32, #tpu.memory_space<vmem>>, %arg4: memref<5x128x512xf32, #tpu.memory_space<vmem>>, %arg5: memref<5x1x512xf32, #tpu.memory_space<vmem>>, %arg6: memref<128x128xf32, #tpu.memory_space<vmem>>, %arg7: memref<1x128xf32, #tpu.memory_space<vmem>>, %arg8: memref<16x128xf32, #tpu.memory_space<vmem>>, %arg9: memref<5x2x128xf32, #tpu.memory_space<vmem>>, %arg10: memref<5x2x128xf32, #tpu.memory_space<vmem>>, %arg11: memref<16x128xf32, #tpu.memory_space<vmem>>) attributes {dimension_semantics = [], scalar_prefetch = 0 : i64, scratch_operands = 1 : i64, tpu.core_type = #tpu.core_type<tc>} {
    %c0 = arith.constant 0 : index
    %c0_0 = arith.constant 0 : index
    %0 = vector.load %arg0[%c0, %c0_0] : memref<16x128xf32, #tpu.memory_space<vmem>>, vector<16x128xf32>
    %c0_1 = arith.constant 0 : index
    %c0_2 = arith.constant 0 : index
    %c0_3 = arith.constant 0 : index
    %1 = vector.load %arg3[%c0_1, %c0_2, %c0_3] : memref<5x128x512xf32, #tpu.memory_space<vmem>>, vector<1x128x512xf32>
    %2 = vector.shape_cast %1 : vector<1x128x512xf32> to vector<128x512xf32>
    %c0_4 = arith.constant 0 : index
    %c0_5 = arith.constant 0 : index
    %c0_6 = arith.constant 0 : index
    %3 = vector.load %arg4[%c0_4, %c0_5, %c0_6] : memref<5x128x512xf32, #tpu.memory_space<vmem>>, vector<1x128x512xf32>
    %4 = vector.shape_cast %3 : vector<1x128x512xf32> to vector<128x512xf32>
    %c0_7 = arith.constant 0 : index
    %c0_8 = arith.constant 0 : index
    %c0_9 = arith.constant 0 : index
    %5 = vector.load %arg5[%c0_7, %c0_8, %c0_9] : memref<5x1x512xf32, #tpu.memory_space<vmem>>, vector<1x1x512xf32>
    %6 = vector.shape_cast %5 : vector<1x1x512xf32> to vector<1x512xf32>
    %cst = arith.constant dense<0.000000e+00> : vector<16x512xf32>
    %7 = tpu.matmul %0, %2, %cst {dimension_numbers = #tpu.dot_dimension_numbers<[1], [0], [0], [1], [0, 0, 1, 1], [], []>} : vector<16x128xf32>, vector<128x512xf32>, vector<16x512xf32> -> vector<16x512xf32>
    %8 = vector.broadcast %6 : vector<1x512xf32> to vector<16x512xf32>
    %9 = arith.addf %7, %8 : vector<16x512xf32>
    %c0_10 = arith.constant 0 : index
    %c0_11 = arith.constant 0 : index
    %c0_12 = arith.constant 0 : index
    %10 = vector.load %arg1[%c0_10, %c0_11, %c0_12] : memref<5x2x128xf32, #tpu.memory_space<vmem>>, vector<1x2x128xf32>
    %11 = vector.shape_cast %10 : vector<1x2x128xf32> to vector<2x128xf32>
    %c0_13 = arith.constant 0 : index
    %c0_14 = arith.constant 0 : index
    %c0_15 = arith.constant 0 : index
    %12 = vector.load %arg2[%c0_13, %c0_14, %c0_15] : memref<5x2x128xf32, #tpu.memory_space<vmem>>, vector<1x2x128xf32>
    %13 = vector.shape_cast %12 : vector<1x2x128xf32> to vector<2x128xf32>
    %14 = vector.extract_strided_slice %9 {offsets = [0, 0], sizes = [2, 512], strides = [1, 1]} : vector<16x512xf32> to vector<2x512xf32>
    %cst_16 = arith.constant dense<0.000000e+00> : vector<2x512xf32>
    %15 = tpu.matmul %11, %4, %cst_16 {dimension_numbers = #tpu.dot_dimension_numbers<[1], [0], [0], [1], [0, 0, 1, 1], [], []>} : vector<2x128xf32>, vector<128x512xf32>, vector<2x512xf32> -> vector<2x512xf32>
    %16 = arith.addf %14, %15 : vector<2x512xf32>
    %17 = vector.extract_strided_slice %16 {offsets = [0, 0], sizes = [2, 128], strides = [1, 1]} : vector<2x512xf32> to vector<2x128xf32>
    %18 = arith.negf %17 : vector<2x128xf32>
    %19 = math.exp %18 : vector<2x128xf32>
    %cst_17 = arith.constant 1.000000e+00 : f32
    %20 = vector.broadcast %cst_17 : f32 to vector<2x128xf32>
    %21 = arith.addf %20, %19 : vector<2x128xf32>
    %22 = arith.divf %20, %21 : vector<2x128xf32>
    %23 = vector.extract_strided_slice %16 {offsets = [0, 128], sizes = [2, 128], strides = [1, 1]} : vector<2x512xf32> to vector<2x128xf32>
    %24 = arith.negf %23 : vector<2x128xf32>
    %25 = math.exp %24 : vector<2x128xf32>
    %cst_18 = arith.constant 1.000000e+00 : f32
    %26 = vector.broadcast %cst_18 : f32 to vector<2x128xf32>
    %27 = arith.addf %26, %25 : vector<2x128xf32>
    %28 = arith.divf %26, %27 : vector<2x128xf32>
    %29 = vector.extract_strided_slice %16 {offsets = [0, 256], sizes = [2, 128], strides = [1, 1]} : vector<2x512xf32> to vector<2x128xf32>
    %30 = math.tanh %29 : vector<2x128xf32>
    %31 = vector.extract_strided_slice %16 {offsets = [0, 384], sizes = [2, 128], strides = [1, 1]} : vector<2x512xf32> to vector<2x128xf32>
    %32 = arith.negf %31 : vector<2x128xf32>
    %33 = math.exp %32 : vector<2x128xf32>
    %cst_19 = arith.constant 1.000000e+00 : f32
    %34 = vector.broadcast %cst_19 : f32 to vector<2x128xf32>
    %35 = arith.addf %34, %33 : vector<2x128xf32>
    %36 = arith.divf %34, %35 : vector<2x128xf32>
    %37 = arith.mulf %28, %13 : vector<2x128xf32>
    %38 = arith.mulf %22, %30 : vector<2x128xf32>
    %39 = arith.addf %37, %38 : vector<2x128xf32>
    %40 = math.tanh %39 : vector<2x128xf32>
    %41 = arith.mulf %36, %40 : vector<2x128xf32>
    %c0_20 = arith.constant 0 : index
    %c0_21 = arith.constant 0 : index
    %42 = vector.load %arg11[%c0_20, %c0_21] : memref<16x128xf32, #tpu.memory_space<vmem>>, vector<2x128xf32>
    tpu.vector_store %arg11[%c0_20, %c0_21], %41 {strides = array<i32>} : memref<16x128xf32, #tpu.memory_space<vmem>>, vector<2x128xf32>,
    %43 = vector.extract_strided_slice %9 {offsets = [2, 0], sizes = [2, 512], strides = [1, 1]} : vector<16x512xf32> to vector<2x512xf32>
    %cst_22 = arith.constant dense<0.000000e+00> : vector<2x512xf32>
    %44 = tpu.matmul %41, %4, %cst_22 {dimension_numbers = #tpu.dot_dimension_numbers<[1], [0], [0], [1], [0, 0, 1, 1], [], []>} : vector<2x128xf32>, vector<128x512xf32>, vector<2x512xf32> -> vector<2x512xf32>
    %45 = arith.addf %43, %44 : vector<2x512xf32>
    %46 = vector.extract_strided_slice %45 {offsets = [0, 0], sizes = [2, 128], strides = [1, 1]} : vector<2x512xf32> to vector<2x128xf32>
    %47 = arith.negf %46 : vector<2x128xf32>
    %48 = math.exp %47 : vector<2x128xf32>
    %cst_23 = arith.constant 1.000000e+00 : f32
    %49 = vector.broadcast %cst_23 : f32 to vector<2x128xf32>
    %50 = arith.addf %49, %48 : vector<2x128xf32>
    %51 = arith.divf %49, %50 : vector<2x128xf32>
    %52 = vector.extract_strided_slice %45 {offsets = [0, 128], sizes = [2, 128], strides = [1, 1]} : vector<2x512xf32> to vector<2x128xf32>
    %53 = arith.negf %52 : vector<2x128xf32>
    %54 = math.exp %53 : vector<2x128xf32>
    %cst_24 = arith.constant 1.000000e+00 : f32
    %55 = vector.broadcast %cst_24 : f32 to vector<2x128xf32>
    %56 = arith.addf %55, %54 : vector<2x128xf32>
    %57 = arith.divf %55, %56 : vector<2x128xf32>
    %58 = vector.extract_strided_slice %45 {offsets = [0, 256], sizes = [2, 128], strides = [1, 1]} : vector<2x512xf32> to vector<2x128xf32>
    %59 = math.tanh %58 : vector<2x128xf32>
    %60 = vector.extract_strided_slice %45 {offsets = [0, 384], sizes = [2, 128], strides = [1, 1]} : vector<2x512xf32> to vector<2x128xf32>
    %61 = arith.negf %60 : vector<2x128xf32>
    %62 = math.exp %61 : vector<2x128xf32>
    %cst_25 = arith.constant 1.000000e+00 : f32
    %63 = vector.broadcast %cst_25 : f32 to vector<2x128xf32>
    %64 = arith.addf %63, %62 : vector<2x128xf32>
    %65 = arith.divf %63, %64 : vector<2x128xf32>
    %66 = arith.mulf %57, %39 : vector<2x128xf32>
    %67 = arith.mulf %51, %59 : vector<2x128xf32>
    %68 = arith.addf %66, %67 : vector<2x128xf32>
    %69 = math.tanh %68 : vector<2x128xf32>
    %70 = arith.mulf %65, %69 : vector<2x128xf32>
    %c2 = arith.constant 2 : index
    %c0_26 = arith.constant 0 : index
    %71 = vector.load %arg11[%c2, %c0_26] : memref<16x128xf32, #tpu.memory_space<vmem>>, vector<2x128xf32>
    tpu.vector_store %arg11[%c2, %c0_26], %70 {strides = array<i32>} : memref<16x128xf32, #tpu.memory_space<vmem>>, vector<2x128xf32>,
    %72 = vector.extract_strided_slice %9 {offsets = [4, 0], sizes = [2, 512], strides = [1, 1]} : vector<16x512xf32> to vector<2x512xf32>
    %cst_27 = arith.constant dense<0.000000e+00> : vector<2x512xf32>
    %73 = tpu.matmul %70, %4, %cst_27 {dimension_numbers = #tpu.dot_dimension_numbers<[1], [0], [0], [1], [0, 0, 1, 1], [], []>} : vector<2x128xf32>, vector<128x512xf32>, vector<2x512xf32> -> vector<2x512xf32>
    %74 = arith.addf %72, %73 : vector<2x512xf32>
    %75 = vector.extract_strided_slice %74 {offsets = [0, 0], sizes = [2, 128], strides = [1, 1]} : vector<2x512xf32> to vector<2x128xf32>
    %76 = arith.negf %75 : vector<2x128xf32>
    %77 = math.exp %76 : vector<2x128xf32>
    %cst_28 = arith.constant 1.000000e+00 : f32
    %78 = vector.broadcast %cst_28 : f32 to vector<2x128xf32>
    %79 = arith.addf %78, %77 : vector<2x128xf32>
    %80 = arith.divf %78, %79 : vector<2x128xf32>
    %81 = vector.extract_strided_slice %74 {offsets = [0, 128], sizes = [2, 128], strides = [1, 1]} : vector<2x512xf32> to vector<2x128xf32>
    %82 = arith.negf %81 : vector<2x128xf32>
    %83 = math.exp %82 : vector<2x128xf32>
    %cst_29 = arith.constant 1.000000e+00 : f32
    %84 = vector.broadcast %cst_29 : f32 to vector<2x128xf32>
    %85 = arith.addf %84, %83 : vector<2x128xf32>
    %86 = arith.divf %84, %85 : vector<2x128xf32>
    %87 = vector.extract_strided_slice %74 {offsets = [0, 256], sizes = [2, 128], strides = [1, 1]} : vector<2x512xf32> to vector<2x128xf32>
    %88 = math.tanh %87 : vector<2x128xf32>
    %89 = vector.extract_strided_slice %74 {offsets = [0, 384], sizes = [2, 128], strides = [1, 1]} : vector<2x512xf32> to vector<2x128xf32>
    %90 = arith.negf %89 : vector<2x128xf32>
    %91 = math.exp %90 : vector<2x128xf32>
    %cst_30 = arith.constant 1.000000e+00 : f32
    %92 = vector.broadcast %cst_30 : f32 to vector<2x128xf32>
    %93 = arith.addf %92, %91 : vector<2x128xf32>
    %94 = arith.divf %92, %93 : vector<2x128xf32>
    %95 = arith.mulf %86, %68 : vector<2x128xf32>
    %96 = arith.mulf %80, %88 : vector<2x128xf32>
    %97 = arith.addf %95, %96 : vector<2x128xf32>
    %98 = math.tanh %97 : vector<2x128xf32>
    %99 = arith.mulf %94, %98 : vector<2x128xf32>
    %c4 = arith.constant 4 : index
    %c0_31 = arith.constant 0 : index
    %100 = vector.load %arg11[%c4, %c0_31] : memref<16x128xf32, #tpu.memory_space<vmem>>, vector<2x128xf32>
    tpu.vector_store %arg11[%c4, %c0_31], %99 {strides = array<i32>} : memref<16x128xf32, #tpu.memory_space<vmem>>, vector<2x128xf32>,
    %101 = vector.extract_strided_slice %9 {offsets = [6, 0], sizes = [2, 512], strides = [1, 1]} : vector<16x512xf32> to vector<2x512xf32>
    %cst_32 = arith.constant dense<0.000000e+00> : vector<2x512xf32>
    %102 = tpu.matmul %99, %4, %cst_32 {dimension_numbers = #tpu.dot_dimension_numbers<[1], [0], [0], [1], [0, 0, 1, 1], [], []>} : vector<2x128xf32>, vector<128x512xf32>, vector<2x512xf32> -> vector<2x512xf32>
    %103 = arith.addf %101, %102 : vector<2x512xf32>
    %104 = vector.extract_strided_slice %103 {offsets = [0, 0], sizes = [2, 128], strides = [1, 1]} : vector<2x512xf32> to vector<2x128xf32>
    %105 = arith.negf %104 : vector<2x128xf32>
    %106 = math.exp %105 : vector<2x128xf32>
    %cst_33 = arith.constant 1.000000e+00 : f32
    %107 = vector.broadcast %cst_33 : f32 to vector<2x128xf32>
    %108 = arith.addf %107, %106 : vector<2x128xf32>
    %109 = arith.divf %107, %108 : vector<2x128xf32>
    %110 = vector.extract_strided_slice %103 {offsets = [0, 128], sizes = [2, 128], strides = [1, 1]} : vector<2x512xf32> to vector<2x128xf32>
    %111 = arith.negf %110 : vector<2x128xf32>
    %112 = math.exp %111 : vector<2x128xf32>
    %cst_34 = arith.constant 1.000000e+00 : f32
    %113 = vector.broadcast %cst_34 : f32 to vector<2x128xf32>
    %114 = arith.addf %113, %112 : vector<2x128xf32>
    %115 = arith.divf %113, %114 : vector<2x128xf32>
    %116 = vector.extract_strided_slice %103 {offsets = [0, 256], sizes = [2, 128], strides = [1, 1]} : vector<2x512xf32> to vector<2x128xf32>
    %117 = math.tanh %116 : vector<2x128xf32>
    %118 = vector.extract_strided_slice %103 {offsets = [0, 384], sizes = [2, 128], strides = [1, 1]} : vector<2x512xf32> to vector<2x128xf32>
    %119 = arith.negf %118 : vector<2x128xf32>
    %120 = math.exp %119 : vector<2x128xf32>
    %cst_35 = arith.constant 1.000000e+00 : f32
    %121 = vector.broadcast %cst_35 : f32 to vector<2x128xf32>
    %122 = arith.addf %121, %120 : vector<2x128xf32>
    %123 = arith.divf %121, %122 : vector<2x128xf32>
    %124 = arith.mulf %115, %97 : vector<2x128xf32>
    %125 = arith.mulf %109, %117 : vector<2x128xf32>
    %126 = arith.addf %124, %125 : vector<2x128xf32>
    %127 = math.tanh %126 : vector<2x128xf32>
    %128 = arith.mulf %123, %127 : vector<2x128xf32>
    %c6 = arith.constant 6 : index
    %c0_36 = arith.constant 0 : index
    %129 = vector.load %arg11[%c6, %c0_36] : memref<16x128xf32, #tpu.memory_space<vmem>>, vector<2x128xf32>
    tpu.vector_store %arg11[%c6, %c0_36], %128 {strides = array<i32>} : memref<16x128xf32, #tpu.memory_space<vmem>>, vector<2x128xf32>,
    %130 = vector.extract_strided_slice %9 {offsets = [8, 0], sizes = [2, 512], strides = [1, 1]} : vector<16x512xf32> to vector<2x512xf32>
    %cst_37 = arith.constant dense<0.000000e+00> : vector<2x512xf32>
    %131 = tpu.matmul %128, %4, %cst_37 {dimension_numbers = #tpu.dot_dimension_numbers<[1], [0], [0], [1], [0, 0, 1, 1], [], []>} : vector<2x128xf32>, vector<128x512xf32>, vector<2x512xf32> -> vector<2x512xf32>
    %132 = arith.addf %130, %131 : vector<2x512xf32>
    %133 = vector.extract_strided_slice %132 {offsets = [0, 0], sizes = [2, 128], strides = [1, 1]} : vector<2x512xf32> to vector<2x128xf32>
    %134 = arith.negf %133 : vector<2x128xf32>
    %135 = math.exp %134 : vector<2x128xf32>
    %cst_38 = arith.constant 1.000000e+00 : f32
    %136 = vector.broadcast %cst_38 : f32 to vector<2x128xf32>
    %137 = arith.addf %136, %135 : vector<2x128xf32>
    %138 = arith.divf %136, %137 : vector<2x128xf32>
    %139 = vector.extract_strided_slice %132 {offsets = [0, 128], sizes = [2, 128], strides = [1, 1]} : vector<2x512xf32> to vector<2x128xf32>
    %140 = arith.negf %139 : vector<2x128xf32>
    %141 = math.exp %140 : vector<2x128xf32>
    %cst_39 = arith.constant 1.000000e+00 : f32
    %142 = vector.broadcast %cst_39 : f32 to vector<2x128xf32>
    %143 = arith.addf %142, %141 : vector<2x128xf32>
    %144 = arith.divf %142, %143 : vector<2x128xf32>
    %145 = vector.extract_strided_slice %132 {offsets = [0, 256], sizes = [2, 128], strides = [1, 1]} : vector<2x512xf32> to vector<2x128xf32>
    %146 = math.tanh %145 : vector<2x128xf32>
    %147 = vector.extract_strided_slice %132 {offsets = [0, 384], sizes = [2, 128], strides = [1, 1]} : vector<2x512xf32> to vector<2x128xf32>
    %148 = arith.negf %147 : vector<2x128xf32>
    %149 = math.exp %148 : vector<2x128xf32>
    %cst_40 = arith.constant 1.000000e+00 : f32
    %150 = vector.broadcast %cst_40 : f32 to vector<2x128xf32>
    %151 = arith.addf %150, %149 : vector<2x128xf32>
    %152 = arith.divf %150, %151 : vector<2x128xf32>
    %153 = arith.mulf %144, %126 : vector<2x128xf32>
    %154 = arith.mulf %138, %146 : vector<2x128xf32>
    %155 = arith.addf %153, %154 : vector<2x128xf32>
    %156 = math.tanh %155 : vector<2x128xf32>
    %157 = arith.mulf %152, %156 : vector<2x128xf32>
    %c8 = arith.constant 8 : index
    %c0_41 = arith.constant 0 : index
    %158 = vector.load %arg11[%c8, %c0_41] : memref<16x128xf32, #tpu.memory_space<vmem>>, vector<2x128xf32>
    tpu.vector_store %arg11[%c8, %c0_41], %157 {strides = array<i32>} : memref<16x128xf32, #tpu.memory_space<vmem>>, vector<2x128xf32>,
    %159 = vector.extract_strided_slice %9 {offsets = [10, 0], sizes = [2, 512], strides = [1, 1]} : vector<16x512xf32> to vector<2x512xf32>
    %cst_42 = arith.constant dense<0.000000e+00> : vector<2x512xf32>
    %160 = tpu.matmul %157, %4, %cst_42 {dimension_numbers = #tpu.dot_dimension_numbers<[1], [0], [0], [1], [0, 0, 1, 1], [], []>} : vector<2x128xf32>, vector<128x512xf32>, vector<2x512xf32> -> vector<2x512xf32>
    %161 = arith.addf %159, %160 : vector<2x512xf32>
    %162 = vector.extract_strided_slice %161 {offsets = [0, 0], sizes = [2, 128], strides = [1, 1]} : vector<2x512xf32> to vector<2x128xf32>
    %163 = arith.negf %162 : vector<2x128xf32>
    %164 = math.exp %163 : vector<2x128xf32>
    %cst_43 = arith.constant 1.000000e+00 : f32
    %165 = vector.broadcast %cst_43 : f32 to vector<2x128xf32>
    %166 = arith.addf %165, %164 : vector<2x128xf32>
    %167 = arith.divf %165, %166 : vector<2x128xf32>
    %168 = vector.extract_strided_slice %161 {offsets = [0, 128], sizes = [2, 128], strides = [1, 1]} : vector<2x512xf32> to vector<2x128xf32>
    %169 = arith.negf %168 : vector<2x128xf32>
    %170 = math.exp %169 : vector<2x128xf32>
    %cst_44 = arith.constant 1.000000e+00 : f32
    %171 = vector.broadcast %cst_44 : f32 to vector<2x128xf32>
    %172 = arith.addf %171, %170 : vector<2x128xf32>
    %173 = arith.divf %171, %172 : vector<2x128xf32>
    %174 = vector.extract_strided_slice %161 {offsets = [0, 256], sizes = [2, 128], strides = [1, 1]} : vector<2x512xf32> to vector<2x128xf32>
    %175 = math.tanh %174 : vector<2x128xf32>
    %176 = vector.extract_strided_slice %161 {offsets = [0, 384], sizes = [2, 128], strides = [1, 1]} : vector<2x512xf32> to vector<2x128xf32>
    %177 = arith.negf %176 : vector<2x128xf32>
    %178 = math.exp %177 : vector<2x128xf32>
    %cst_45 = arith.constant 1.000000e+00 : f32
    %179 = vector.broadcast %cst_45 : f32 to vector<2x128xf32>
    %180 = arith.addf %179, %178 : vector<2x128xf32>
    %181 = arith.divf %179, %180 : vector<2x128xf32>
    %182 = arith.mulf %173, %155 : vector<2x128xf32>
    %183 = arith.mulf %167, %175 : vector<2x128xf32>
    %184 = arith.addf %182, %183 : vector<2x128xf32>
    %185 = math.tanh %184 : vector<2x128xf32>
    %186 = arith.mulf %181, %185 : vector<2x128xf32>
    %c10 = arith.constant 10 : index
    %c0_46 = arith.constant 0 : index
    %187 = vector.load %arg11[%c10, %c0_46] : memref<16x128xf32, #tpu.memory_space<vmem>>, vector<2x128xf32>
    tpu.vector_store %arg11[%c10, %c0_46], %186 {strides = array<i32>} : memref<16x128xf32, #tpu.memory_space<vmem>>, vector<2x128xf32>,
    %188 = vector.extract_strided_slice %9 {offsets = [12, 0], sizes = [2, 512], strides = [1, 1]} : vector<16x512xf32> to vector<2x512xf32>
    %cst_47 = arith.constant dense<0.000000e+00> : vector<2x512xf32>
    %189 = tpu.matmul %186, %4, %cst_47 {dimension_numbers = #tpu.dot_dimension_numbers<[1], [0], [0], [1], [0, 0, 1, 1], [], []>} : vector<2x128xf32>, vector<128x512xf32>, vector<2x512xf32> -> vector<2x512xf32>
    %190 = arith.addf %188, %189 : vector<2x512xf32>
    %191 = vector.extract_strided_slice %190 {offsets = [0, 0], sizes = [2, 128], strides = [1, 1]} : vector<2x512xf32> to vector<2x128xf32>
    %192 = arith.negf %191 : vector<2x128xf32>
    %193 = math.exp %192 : vector<2x128xf32>
    %cst_48 = arith.constant 1.000000e+00 : f32
    %194 = vector.broadcast %cst_48 : f32 to vector<2x128xf32>
    %195 = arith.addf %194, %193 : vector<2x128xf32>
    %196 = arith.divf %194, %195 : vector<2x128xf32>
    %197 = vector.extract_strided_slice %190 {offsets = [0, 128], sizes = [2, 128], strides = [1, 1]} : vector<2x512xf32> to vector<2x128xf32>
    %198 = arith.negf %197 : vector<2x128xf32>
    %199 = math.exp %198 : vector<2x128xf32>
    %cst_49 = arith.constant 1.000000e+00 : f32
    %200 = vector.broadcast %cst_49 : f32 to vector<2x128xf32>
    %201 = arith.addf %200, %199 : vector<2x128xf32>
    %202 = arith.divf %200, %201 : vector<2x128xf32>
    %203 = vector.extract_strided_slice %190 {offsets = [0, 256], sizes = [2, 128], strides = [1, 1]} : vector<2x512xf32> to vector<2x128xf32>
    %204 = math.tanh %203 : vector<2x128xf32>
    %205 = vector.extract_strided_slice %190 {offsets = [0, 384], sizes = [2, 128], strides = [1, 1]} : vector<2x512xf32> to vector<2x128xf32>
    %206 = arith.negf %205 : vector<2x128xf32>
    %207 = math.exp %206 : vector<2x128xf32>
    %cst_50 = arith.constant 1.000000e+00 : f32
    %208 = vector.broadcast %cst_50 : f32 to vector<2x128xf32>
    %209 = arith.addf %208, %207 : vector<2x128xf32>
    %210 = arith.divf %208, %209 : vector<2x128xf32>
    %211 = arith.mulf %202, %184 : vector<2x128xf32>
    %212 = arith.mulf %196, %204 : vector<2x128xf32>
    %213 = arith.addf %211, %212 : vector<2x128xf32>
    %214 = math.tanh %213 : vector<2x128xf32>
    %215 = arith.mulf %210, %214 : vector<2x128xf32>
    %c12 = arith.constant 12 : index
    %c0_51 = arith.constant 0 : index
    %216 = vector.load %arg11[%c12, %c0_51] : memref<16x128xf32, #tpu.memory_space<vmem>>, vector<2x128xf32>
    tpu.vector_store %arg11[%c12, %c0_51], %215 {strides = array<i32>} : memref<16x128xf32, #tpu.memory_space<vmem>>, vector<2x128xf32>,
    %217 = vector.extract_strided_slice %9 {offsets = [14, 0], sizes = [2, 512], strides = [1, 1]} : vector<16x512xf32> to vector<2x512xf32>
    %cst_52 = arith.constant dense<0.000000e+00> : vector<2x512xf32>
    %218 = tpu.matmul %215, %4, %cst_52 {dimension_numbers = #tpu.dot_dimension_numbers<[1], [0], [0], [1], [0, 0, 1, 1], [], []>} : vector<2x128xf32>, vector<128x512xf32>, vector<2x512xf32> -> vector<2x512xf32>
    %219 = arith.addf %217, %218 : vector<2x512xf32>
    %220 = vector.extract_strided_slice %219 {offsets = [0, 0], sizes = [2, 128], strides = [1, 1]} : vector<2x512xf32> to vector<2x128xf32>
    %221 = arith.negf %220 : vector<2x128xf32>
    %222 = math.exp %221 : vector<2x128xf32>
    %cst_53 = arith.constant 1.000000e+00 : f32
    %223 = vector.broadcast %cst_53 : f32 to vector<2x128xf32>
    %224 = arith.addf %223, %222 : vector<2x128xf32>
    %225 = arith.divf %223, %224 : vector<2x128xf32>
    %226 = vector.extract_strided_slice %219 {offsets = [0, 128], sizes = [2, 128], strides = [1, 1]} : vector<2x512xf32> to vector<2x128xf32>
    %227 = arith.negf %226 : vector<2x128xf32>
    %228 = math.exp %227 : vector<2x128xf32>
    %cst_54 = arith.constant 1.000000e+00 : f32
    %229 = vector.broadcast %cst_54 : f32 to vector<2x128xf32>
    %230 = arith.addf %229, %228 : vector<2x128xf32>
    %231 = arith.divf %229, %230 : vector<2x128xf32>
    %232 = vector.extract_strided_slice %219 {offsets = [0, 256], sizes = [2, 128], strides = [1, 1]} : vector<2x512xf32> to vector<2x128xf32>
    %233 = math.tanh %232 : vector<2x128xf32>
    %234 = vector.extract_strided_slice %219 {offsets = [0, 384], sizes = [2, 128], strides = [1, 1]} : vector<2x512xf32> to vector<2x128xf32>
    %235 = arith.negf %234 : vector<2x128xf32>
    %236 = math.exp %235 : vector<2x128xf32>
    %cst_55 = arith.constant 1.000000e+00 : f32
    %237 = vector.broadcast %cst_55 : f32 to vector<2x128xf32>
    %238 = arith.addf %237, %236 : vector<2x128xf32>
    %239 = arith.divf %237, %238 : vector<2x128xf32>
    %240 = arith.mulf %231, %213 : vector<2x128xf32>
    %241 = arith.mulf %225, %233 : vector<2x128xf32>
    %242 = arith.addf %240, %241 : vector<2x128xf32>
    %243 = math.tanh %242 : vector<2x128xf32>
    %244 = arith.mulf %239, %243 : vector<2x128xf32>
    %c14 = arith.constant 14 : index
    %c0_56 = arith.constant 0 : index
    %245 = vector.load %arg11[%c14, %c0_56] : memref<16x128xf32, #tpu.memory_space<vmem>>, vector<2x128xf32>
    tpu.vector_store %arg11[%c14, %c0_56], %244 {strides = array<i32>} : memref<16x128xf32, #tpu.memory_space<vmem>>, vector<2x128xf32>,
    %c0_57 = arith.constant 0 : index
    %c0_58 = arith.constant 0 : index
    %c0_59 = arith.constant 0 : index
    %246 = vector.load %arg9[%c0_57, %c0_58, %c0_59] : memref<5x2x128xf32, #tpu.memory_space<vmem>>, vector<1x2x128xf32>
    %247 = vector.shape_cast %246 : vector<1x2x128xf32> to vector<2x128xf32>
    %248 = vector.shape_cast %244 : vector<2x128xf32> to vector<1x2x128xf32>
    tpu.vector_store %arg9[%c0_57, %c0_58, %c0_59], %248 {strides = array<i32>} : memref<5x2x128xf32, #tpu.memory_space<vmem>>, vector<1x2x128xf32>,
    %c0_60 = arith.constant 0 : index
    %c0_61 = arith.constant 0 : index
    %c0_62 = arith.constant 0 : index
    %249 = vector.load %arg10[%c0_60, %c0_61, %c0_62] : memref<5x2x128xf32, #tpu.memory_space<vmem>>, vector<1x2x128xf32>
    %250 = vector.shape_cast %249 : vector<1x2x128xf32> to vector<2x128xf32>
    %251 = vector.shape_cast %242 : vector<2x128xf32> to vector<1x2x128xf32>
    tpu.vector_store %arg10[%c0_60, %c0_61, %c0_62], %251 {strides = array<i32>} : memref<5x2x128xf32, #tpu.memory_space<vmem>>, vector<1x2x128xf32>,
    %c0_63 = arith.constant 0 : index
    %c0_64 = arith.constant 0 : index
    %252 = vector.load %arg11[%c0_63, %c0_64] : memref<16x128xf32, #tpu.memory_space<vmem>>, vector<16x128xf32>
    %c1 = arith.constant 1 : index
    %c0_65 = arith.constant 0 : index
    %c0_66 = arith.constant 0 : index
    %253 = vector.load %arg3[%c1, %c0_65, %c0_66] : memref<5x128x512xf32, #tpu.memory_space<vmem>>, vector<1x128x512xf32>
    %254 = vector.shape_cast %253 : vector<1x128x512xf32> to vector<128x512xf32>
    %c1_67 = arith.constant 1 : index
    %c0_68 = arith.constant 0 : index
    %c0_69 = arith.constant 0 : index
    %255 = vector.load %arg4[%c1_67, %c0_68, %c0_69] : memref<5x128x512xf32, #tpu.memory_space<vmem>>, vector<1x128x512xf32>
    %256 = vector.shape_cast %255 : vector<1x128x512xf32> to vector<128x512xf32>
    %c1_70 = arith.constant 1 : index
    %c0_71 = arith.constant 0 : index
    %c0_72 = arith.constant 0 : index
    %257 = vector.load %arg5[%c1_70, %c0_71, %c0_72] : memref<5x1x512xf32, #tpu.memory_space<vmem>>, vector<1x1x512xf32>
    %258 = vector.shape_cast %257 : vector<1x1x512xf32> to vector<1x512xf32>
    %cst_73 = arith.constant dense<0.000000e+00> : vector<16x512xf32>
    %259 = tpu.matmul %252, %254, %cst_73 {dimension_numbers = #tpu.dot_dimension_numbers<[1], [0], [0], [1], [0, 0, 1, 1], [], []>} : vector<16x128xf32>, vector<128x512xf32>, vector<16x512xf32> -> vector<16x512xf32>
    %260 = vector.broadcast %258 : vector<1x512xf32> to vector<16x512xf32>
    %261 = arith.addf %259, %260 : vector<16x512xf32>
    %c1_74 = arith.constant 1 : index
    %c0_75 = arith.constant 0 : index
    %c0_76 = arith.constant 0 : index
    %262 = vector.load %arg1[%c1_74, %c0_75, %c0_76] : memref<5x2x128xf32, #tpu.memory_space<vmem>>, vector<1x2x128xf32>
    %263 = vector.shape_cast %262 : vector<1x2x128xf32> to vector<2x128xf32>
    %c1_77 = arith.constant 1 : index
    %c0_78 = arith.constant 0 : index
    %c0_79 = arith.constant 0 : index
    %264 = vector.load %arg2[%c1_77, %c0_78, %c0_79] : memref<5x2x128xf32, #tpu.memory_space<vmem>>, vector<1x2x128xf32>
    %265 = vector.shape_cast %264 : vector<1x2x128xf32> to vector<2x128xf32>
    %266 = vector.extract_strided_slice %261 {offsets = [0, 0], sizes = [2, 512], strides = [1, 1]} : vector<16x512xf32> to vector<2x512xf32>
    %cst_80 = arith.constant dense<0.000000e+00> : vector<2x512xf32>
    %267 = tpu.matmul %263, %256, %cst_80 {dimension_numbers = #tpu.dot_dimension_numbers<[1], [0], [0], [1], [0, 0, 1, 1], [], []>} : vector<2x128xf32>, vector<128x512xf32>, vector<2x512xf32> -> vector<2x512xf32>
    %268 = arith.addf %266, %267 : vector<2x512xf32>
    %269 = vector.extract_strided_slice %268 {offsets = [0, 0], sizes = [2, 128], strides = [1, 1]} : vector<2x512xf32> to vector<2x128xf32>
    %270 = arith.negf %269 : vector<2x128xf32>
    %271 = math.exp %270 : vector<2x128xf32>
    %cst_81 = arith.constant 1.000000e+00 : f32
    %272 = vector.broadcast %cst_81 : f32 to vector<2x128xf32>
    %273 = arith.addf %272, %271 : vector<2x128xf32>
    %274 = arith.divf %272, %273 : vector<2x128xf32>
    %275 = vector.extract_strided_slice %268 {offsets = [0, 128], sizes = [2, 128], strides = [1, 1]} : vector<2x512xf32> to vector<2x128xf32>
    %276 = arith.negf %275 : vector<2x128xf32>
    %277 = math.exp %276 : vector<2x128xf32>
    %cst_82 = arith.constant 1.000000e+00 : f32
    %278 = vector.broadcast %cst_82 : f32 to vector<2x128xf32>
    %279 = arith.addf %278, %277 : vector<2x128xf32>
    %280 = arith.divf %278, %279 : vector<2x128xf32>
    %281 = vector.extract_strided_slice %268 {offsets = [0, 256], sizes = [2, 128], strides = [1, 1]} : vector<2x512xf32> to vector<2x128xf32>
    %282 = math.tanh %281 : vector<2x128xf32>
    %283 = vector.extract_strided_slice %268 {offsets = [0, 384], sizes = [2, 128], strides = [1, 1]} : vector<2x512xf32> to vector<2x128xf32>
    %284 = arith.negf %283 : vector<2x128xf32>
    %285 = math.exp %284 : vector<2x128xf32>
    %cst_83 = arith.constant 1.000000e+00 : f32
    %286 = vector.broadcast %cst_83 : f32 to vector<2x128xf32>
    %287 = arith.addf %286, %285 : vector<2x128xf32>
    %288 = arith.divf %286, %287 : vector<2x128xf32>
    %289 = arith.mulf %280, %265 : vector<2x128xf32>
    %290 = arith.mulf %274, %282 : vector<2x128xf32>
    %291 = arith.addf %289, %290 : vector<2x128xf32>
    %292 = math.tanh %291 : vector<2x128xf32>
    %293 = arith.mulf %288, %292 : vector<2x128xf32>
    %c0_84 = arith.constant 0 : index
    %c0_85 = arith.constant 0 : index
    %294 = vector.load %arg11[%c0_84, %c0_85] : memref<16x128xf32, #tpu.memory_space<vmem>>, vector<2x128xf32>
    tpu.vector_store %arg11[%c0_84, %c0_85], %293 {strides = array<i32>} : memref<16x128xf32, #tpu.memory_space<vmem>>, vector<2x128xf32>,
    %295 = vector.extract_strided_slice %261 {offsets = [2, 0], sizes = [2, 512], strides = [1, 1]} : vector<16x512xf32> to vector<2x512xf32>
    %cst_86 = arith.constant dense<0.000000e+00> : vector<2x512xf32>
    %296 = tpu.matmul %293, %256, %cst_86 {dimension_numbers = #tpu.dot_dimension_numbers<[1], [0], [0], [1], [0, 0, 1, 1], [], []>} : vector<2x128xf32>, vector<128x512xf32>, vector<2x512xf32> -> vector<2x512xf32>
    %297 = arith.addf %295, %296 : vector<2x512xf32>
    %298 = vector.extract_strided_slice %297 {offsets = [0, 0], sizes = [2, 128], strides = [1, 1]} : vector<2x512xf32> to vector<2x128xf32>
    %299 = arith.negf %298 : vector<2x128xf32>
    %300 = math.exp %299 : vector<2x128xf32>
    %cst_87 = arith.constant 1.000000e+00 : f32
    %301 = vector.broadcast %cst_87 : f32 to vector<2x128xf32>
    %302 = arith.addf %301, %300 : vector<2x128xf32>
    %303 = arith.divf %301, %302 : vector<2x128xf32>
    %304 = vector.extract_strided_slice %297 {offsets = [0, 128], sizes = [2, 128], strides = [1, 1]} : vector<2x512xf32> to vector<2x128xf32>
    %305 = arith.negf %304 : vector<2x128xf32>
    %306 = math.exp %305 : vector<2x128xf32>
    %cst_88 = arith.constant 1.000000e+00 : f32
    %307 = vector.broadcast %cst_88 : f32 to vector<2x128xf32>
    %308 = arith.addf %307, %306 : vector<2x128xf32>
    %309 = arith.divf %307, %308 : vector<2x128xf32>
    %310 = vector.extract_strided_slice %297 {offsets = [0, 256], sizes = [2, 128], strides = [1, 1]} : vector<2x512xf32> to vector<2x128xf32>
    %311 = math.tanh %310 : vector<2x128xf32>
    %312 = vector.extract_strided_slice %297 {offsets = [0, 384], sizes = [2, 128], strides = [1, 1]} : vector<2x512xf32> to vector<2x128xf32>
    %313 = arith.negf %312 : vector<2x128xf32>
    %314 = math.exp %313 : vector<2x128xf32>
    %cst_89 = arith.constant 1.000000e+00 : f32
    %315 = vector.broadcast %cst_89 : f32 to vector<2x128xf32>
    %316 = arith.addf %315, %314 : vector<2x128xf32>
    %317 = arith.divf %315, %316 : vector<2x128xf32>
    %318 = arith.mulf %309, %291 : vector<2x128xf32>
    %319 = arith.mulf %303, %311 : vector<2x128xf32>
    %320 = arith.addf %318, %319 : vector<2x128xf32>
    %321 = math.tanh %320 : vector<2x128xf32>
    %322 = arith.mulf %317, %321 : vector<2x128xf32>
    %c2_90 = arith.constant 2 : index
    %c0_91 = arith.constant 0 : index
    %323 = vector.load %arg11[%c2_90, %c0_91] : memref<16x128xf32, #tpu.memory_space<vmem>>, vector<2x128xf32>
    tpu.vector_store %arg11[%c2_90, %c0_91], %322 {strides = array<i32>} : memref<16x128xf32, #tpu.memory_space<vmem>>, vector<2x128xf32>,
    %324 = vector.extract_strided_slice %261 {offsets = [4, 0], sizes = [2, 512], strides = [1, 1]} : vector<16x512xf32> to vector<2x512xf32>
    %cst_92 = arith.constant dense<0.000000e+00> : vector<2x512xf32>
    %325 = tpu.matmul %322, %256, %cst_92 {dimension_numbers = #tpu.dot_dimension_numbers<[1], [0], [0], [1], [0, 0, 1, 1], [], []>} : vector<2x128xf32>, vector<128x512xf32>, vector<2x512xf32> -> vector<2x512xf32>
    %326 = arith.addf %324, %325 : vector<2x512xf32>
    %327 = vector.extract_strided_slice %326 {offsets = [0, 0], sizes = [2, 128], strides = [1, 1]} : vector<2x512xf32> to vector<2x128xf32>
    %328 = arith.negf %327 : vector<2x128xf32>
    %329 = math.exp %328 : vector<2x128xf32>
    %cst_93 = arith.constant 1.000000e+00 : f32
    %330 = vector.broadcast %cst_93 : f32 to vector<2x128xf32>
    %331 = arith.addf %330, %329 : vector<2x128xf32>
    %332 = arith.divf %330, %331 : vector<2x128xf32>
    %333 = vector.extract_strided_slice %326 {offsets = [0, 128], sizes = [2, 128], strides = [1, 1]} : vector<2x512xf32> to vector<2x128xf32>
    %334 = arith.negf %333 : vector<2x128xf32>
    %335 = math.exp %334 : vector<2x128xf32>
    %cst_94 = arith.constant 1.000000e+00 : f32
    %336 = vector.broadcast %cst_94 : f32 to vector<2x128xf32>
    %337 = arith.addf %336, %335 : vector<2x128xf32>
    %338 = arith.divf %336, %337 : vector<2x128xf32>
    %339 = vector.extract_strided_slice %326 {offsets = [0, 256], sizes = [2, 128], strides = [1, 1]} : vector<2x512xf32> to vector<2x128xf32>
    %340 = math.tanh %339 : vector<2x128xf32>
    %341 = vector.extract_strided_slice %326 {offsets = [0, 384], sizes = [2, 128], strides = [1, 1]} : vector<2x512xf32> to vector<2x128xf32>
    %342 = arith.negf %341 : vector<2x128xf32>
    %343 = math.exp %342 : vector<2x128xf32>
    %cst_95 = arith.constant 1.000000e+00 : f32
    %344 = vector.broadcast %cst_95 : f32 to vector<2x128xf32>
    %345 = arith.addf %344, %343 : vector<2x128xf32>
    %346 = arith.divf %344, %345 : vector<2x128xf32>
    %347 = arith.mulf %338, %320 : vector<2x128xf32>
    %348 = arith.mulf %332, %340 : vector<2x128xf32>
    %349 = arith.addf %347, %348 : vector<2x128xf32>
    %350 = math.tanh %349 : vector<2x128xf32>
    %351 = arith.mulf %346, %350 : vector<2x128xf32>
    %c4_96 = arith.constant 4 : index
    %c0_97 = arith.constant 0 : index
    %352 = vector.load %arg11[%c4_96, %c0_97] : memref<16x128xf32, #tpu.memory_space<vmem>>, vector<2x128xf32>
    tpu.vector_store %arg11[%c4_96, %c0_97], %351 {strides = array<i32>} : memref<16x128xf32, #tpu.memory_space<vmem>>, vector<2x128xf32>,
    %353 = vector.extract_strided_slice %261 {offsets = [6, 0], sizes = [2, 512], strides = [1, 1]} : vector<16x512xf32> to vector<2x512xf32>
    %cst_98 = arith.constant dense<0.000000e+00> : vector<2x512xf32>
    %354 = tpu.matmul %351, %256, %cst_98 {dimension_numbers = #tpu.dot_dimension_numbers<[1], [0], [0], [1], [0, 0, 1, 1], [], []>} : vector<2x128xf32>, vector<128x512xf32>, vector<2x512xf32> -> vector<2x512xf32>
    %355 = arith.addf %353, %354 : vector<2x512xf32>
    %356 = vector.extract_strided_slice %355 {offsets = [0, 0], sizes = [2, 128], strides = [1, 1]} : vector<2x512xf32> to vector<2x128xf32>
    %357 = arith.negf %356 : vector<2x128xf32>
    %358 = math.exp %357 : vector<2x128xf32>
    %cst_99 = arith.constant 1.000000e+00 : f32
    %359 = vector.broadcast %cst_99 : f32 to vector<2x128xf32>
    %360 = arith.addf %359, %358 : vector<2x128xf32>
    %361 = arith.divf %359, %360 : vector<2x128xf32>
    %362 = vector.extract_strided_slice %355 {offsets = [0, 128], sizes = [2, 128], strides = [1, 1]} : vector<2x512xf32> to vector<2x128xf32>
    %363 = arith.negf %362 : vector<2x128xf32>
    %364 = math.exp %363 : vector<2x128xf32>
    %cst_100 = arith.constant 1.000000e+00 : f32
    %365 = vector.broadcast %cst_100 : f32 to vector<2x128xf32>
    %366 = arith.addf %365, %364 : vector<2x128xf32>
    %367 = arith.divf %365, %366 : vector<2x128xf32>
    %368 = vector.extract_strided_slice %355 {offsets = [0, 256], sizes = [2, 128], strides = [1, 1]} : vector<2x512xf32> to vector<2x128xf32>
    %369 = math.tanh %368 : vector<2x128xf32>
    %370 = vector.extract_strided_slice %355 {offsets = [0, 384], sizes = [2, 128], strides = [1, 1]} : vector<2x512xf32> to vector<2x128xf32>
    %371 = arith.negf %370 : vector<2x128xf32>
    %372 = math.exp %371 : vector<2x128xf32>
    %cst_101 = arith.constant 1.000000e+00 : f32
    %373 = vector.broadcast %cst_101 : f32 to vector<2x128xf32>
    %374 = arith.addf %373, %372 : vector<2x128xf32>
    %375 = arith.divf %373, %374 : vector<2x128xf32>
    %376 = arith.mulf %367, %349 : vector<2x128xf32>
    %377 = arith.mulf %361, %369 : vector<2x128xf32>
    %378 = arith.addf %376, %377 : vector<2x128xf32>
    %379 = math.tanh %378 : vector<2x128xf32>
    %380 = arith.mulf %375, %379 : vector<2x128xf32>
    %c6_102 = arith.constant 6 : index
    %c0_103 = arith.constant 0 : index
    %381 = vector.load %arg11[%c6_102, %c0_103] : memref<16x128xf32, #tpu.memory_space<vmem>>, vector<2x128xf32>
    tpu.vector_store %arg11[%c6_102, %c0_103], %380 {strides = array<i32>} : memref<16x128xf32, #tpu.memory_space<vmem>>, vector<2x128xf32>,
    %382 = vector.extract_strided_slice %261 {offsets = [8, 0], sizes = [2, 512], strides = [1, 1]} : vector<16x512xf32> to vector<2x512xf32>
    %cst_104 = arith.constant dense<0.000000e+00> : vector<2x512xf32>
    %383 = tpu.matmul %380, %256, %cst_104 {dimension_numbers = #tpu.dot_dimension_numbers<[1], [0], [0], [1], [0, 0, 1, 1], [], []>} : vector<2x128xf32>, vector<128x512xf32>, vector<2x512xf32> -> vector<2x512xf32>
    %384 = arith.addf %382, %383 : vector<2x512xf32>
    %385 = vector.extract_strided_slice %384 {offsets = [0, 0], sizes = [2, 128], strides = [1, 1]} : vector<2x512xf32> to vector<2x128xf32>
    %386 = arith.negf %385 : vector<2x128xf32>
    %387 = math.exp %386 : vector<2x128xf32>
    %cst_105 = arith.constant 1.000000e+00 : f32
    %388 = vector.broadcast %cst_105 : f32 to vector<2x128xf32>
    %389 = arith.addf %388, %387 : vector<2x128xf32>
    %390 = arith.divf %388, %389 : vector<2x128xf32>
    %391 = vector.extract_strided_slice %384 {offsets = [0, 128], sizes = [2, 128], strides = [1, 1]} : vector<2x512xf32> to vector<2x128xf32>
    %392 = arith.negf %391 : vector<2x128xf32>
    %393 = math.exp %392 : vector<2x128xf32>
    %cst_106 = arith.constant 1.000000e+00 : f32
    %394 = vector.broadcast %cst_106 : f32 to vector<2x128xf32>
    %395 = arith.addf %394, %393 : vector<2x128xf32>
    %396 = arith.divf %394, %395 : vector<2x128xf32>
    %397 = vector.extract_strided_slice %384 {offsets = [0, 256], sizes = [2, 128], strides = [1, 1]} : vector<2x512xf32> to vector<2x128xf32>
    %398 = math.tanh %397 : vector<2x128xf32>
    %399 = vector.extract_strided_slice %384 {offsets = [0, 384], sizes = [2, 128], strides = [1, 1]} : vector<2x512xf32> to vector<2x128xf32>
    %400 = arith.negf %399 : vector<2x128xf32>
    %401 = math.exp %400 : vector<2x128xf32>
    %cst_107 = arith.constant 1.000000e+00 : f32
    %402 = vector.broadcast %cst_107 : f32 to vector<2x128xf32>
    %403 = arith.addf %402, %401 : vector<2x128xf32>
    %404 = arith.divf %402, %403 : vector<2x128xf32>
    %405 = arith.mulf %396, %378 : vector<2x128xf32>
    %406 = arith.mulf %390, %398 : vector<2x128xf32>
    %407 = arith.addf %405, %406 : vector<2x128xf32>
    %408 = math.tanh %407 : vector<2x128xf32>
    %409 = arith.mulf %404, %408 : vector<2x128xf32>
    %c8_108 = arith.constant 8 : index
    %c0_109 = arith.constant 0 : index
    %410 = vector.load %arg11[%c8_108, %c0_109] : memref<16x128xf32, #tpu.memory_space<vmem>>, vector<2x128xf32>
    tpu.vector_store %arg11[%c8_108, %c0_109], %409 {strides = array<i32>} : memref<16x128xf32, #tpu.memory_space<vmem>>, vector<2x128xf32>,
    %411 = vector.extract_strided_slice %261 {offsets = [10, 0], sizes = [2, 512], strides = [1, 1]} : vector<16x512xf32> to vector<2x512xf32>
    %cst_110 = arith.constant dense<0.000000e+00> : vector<2x512xf32>
    %412 = tpu.matmul %409, %256, %cst_110 {dimension_numbers = #tpu.dot_dimension_numbers<[1], [0], [0], [1], [0, 0, 1, 1], [], []>} : vector<2x128xf32>, vector<128x512xf32>, vector<2x512xf32> -> vector<2x512xf32>
    %413 = arith.addf %411, %412 : vector<2x512xf32>
    %414 = vector.extract_strided_slice %413 {offsets = [0, 0], sizes = [2, 128], strides = [1, 1]} : vector<2x512xf32> to vector<2x128xf32>
    %415 = arith.negf %414 : vector<2x128xf32>
    %416 = math.exp %415 : vector<2x128xf32>
    %cst_111 = arith.constant 1.000000e+00 : f32
    %417 = vector.broadcast %cst_111 : f32 to vector<2x128xf32>
    %418 = arith.addf %417, %416 : vector<2x128xf32>
    %419 = arith.divf %417, %418 : vector<2x128xf32>
    %420 = vector.extract_strided_slice %413 {offsets = [0, 128], sizes = [2, 128], strides = [1, 1]} : vector<2x512xf32> to vector<2x128xf32>
    %421 = arith.negf %420 : vector<2x128xf32>
    %422 = math.exp %421 : vector<2x128xf32>
    %cst_112 = arith.constant 1.000000e+00 : f32
    %423 = vector.broadcast %cst_112 : f32 to vector<2x128xf32>
    %424 = arith.addf %423, %422 : vector<2x128xf32>
    %425 = arith.divf %423, %424 : vector<2x128xf32>
    %426 = vector.extract_strided_slice %413 {offsets = [0, 256], sizes = [2, 128], strides = [1, 1]} : vector<2x512xf32> to vector<2x128xf32>
    %427 = math.tanh %426 : vector<2x128xf32>
    %428 = vector.extract_strided_slice %413 {offsets = [0, 384], sizes = [2, 128], strides = [1, 1]} : vector<2x512xf32> to vector<2x128xf32>
    %429 = arith.negf %428 : vector<2x128xf32>
    %430 = math.exp %429 : vector<2x128xf32>
    %cst_113 = arith.constant 1.000000e+00 : f32
    %431 = vector.broadcast %cst_113 : f32 to vector<2x128xf32>
    %432 = arith.addf %431, %430 : vector<2x128xf32>
    %433 = arith.divf %431, %432 : vector<2x128xf32>
    %434 = arith.mulf %425, %407 : vector<2x128xf32>
    %435 = arith.mulf %419, %427 : vector<2x128xf32>
    %436 = arith.addf %434, %435 : vector<2x128xf32>
    %437 = math.tanh %436 : vector<2x128xf32>
    %438 = arith.mulf %433, %437 : vector<2x128xf32>
    %c10_114 = arith.constant 10 : index
    %c0_115 = arith.constant 0 : index
    %439 = vector.load %arg11[%c10_114, %c0_115] : memref<16x128xf32, #tpu.memory_space<vmem>>, vector<2x128xf32>
    tpu.vector_store %arg11[%c10_114, %c0_115], %438 {strides = array<i32>} : memref<16x128xf32, #tpu.memory_space<vmem>>, vector<2x128xf32>,
    %440 = vector.extract_strided_slice %261 {offsets = [12, 0], sizes = [2, 512], strides = [1, 1]} : vector<16x512xf32> to vector<2x512xf32>
    %cst_116 = arith.constant dense<0.000000e+00> : vector<2x512xf32>
    %441 = tpu.matmul %438, %256, %cst_116 {dimension_numbers = #tpu.dot_dimension_numbers<[1], [0], [0], [1], [0, 0, 1, 1], [], []>} : vector<2x128xf32>, vector<128x512xf32>, vector<2x512xf32> -> vector<2x512xf32>
    %442 = arith.addf %440, %441 : vector<2x512xf32>
    %443 = vector.extract_strided_slice %442 {offsets = [0, 0], sizes = [2, 128], strides = [1, 1]} : vector<2x512xf32> to vector<2x128xf32>
    %444 = arith.negf %443 : vector<2x128xf32>
    %445 = math.exp %444 : vector<2x128xf32>
    %cst_117 = arith.constant 1.000000e+00 : f32
    %446 = vector.broadcast %cst_117 : f32 to vector<2x128xf32>
    %447 = arith.addf %446, %445 : vector<2x128xf32>
    %448 = arith.divf %446, %447 : vector<2x128xf32>
    %449 = vector.extract_strided_slice %442 {offsets = [0, 128], sizes = [2, 128], strides = [1, 1]} : vector<2x512xf32> to vector<2x128xf32>
    %450 = arith.negf %449 : vector<2x128xf32>
    %451 = math.exp %450 : vector<2x128xf32>
    %cst_118 = arith.constant 1.000000e+00 : f32
    %452 = vector.broadcast %cst_118 : f32 to vector<2x128xf32>
    %453 = arith.addf %452, %451 : vector<2x128xf32>
    %454 = arith.divf %452, %453 : vector<2x128xf32>
    %455 = vector.extract_strided_slice %442 {offsets = [0, 256], sizes = [2, 128], strides = [1, 1]} : vector<2x512xf32> to vector<2x128xf32>
    %456 = math.tanh %455 : vector<2x128xf32>
    %457 = vector.extract_strided_slice %442 {offsets = [0, 384], sizes = [2, 128], strides = [1, 1]} : vector<2x512xf32> to vector<2x128xf32>
    %458 = arith.negf %457 : vector<2x128xf32>
    %459 = math.exp %458 : vector<2x128xf32>
    %cst_119 = arith.constant 1.000000e+00 : f32
    %460 = vector.broadcast %cst_119 : f32 to vector<2x128xf32>
    %461 = arith.addf %460, %459 : vector<2x128xf32>
    %462 = arith.divf %460, %461 : vector<2x128xf32>
    %463 = arith.mulf %454, %436 : vector<2x128xf32>
    %464 = arith.mulf %448, %456 : vector<2x128xf32>
    %465 = arith.addf %463, %464 : vector<2x128xf32>
    %466 = math.tanh %465 : vector<2x128xf32>
    %467 = arith.mulf %462, %466 : vector<2x128xf32>
    %c12_120 = arith.constant 12 : index
    %c0_121 = arith.constant 0 : index
    %468 = vector.load %arg11[%c12_120, %c0_121] : memref<16x128xf32, #tpu.memory_space<vmem>>, vector<2x128xf32>
    tpu.vector_store %arg11[%c12_120, %c0_121], %467 {strides = array<i32>} : memref<16x128xf32, #tpu.memory_space<vmem>>, vector<2x128xf32>,
    %469 = vector.extract_strided_slice %261 {offsets = [14, 0], sizes = [2, 512], strides = [1, 1]} : vector<16x512xf32> to vector<2x512xf32>
    %cst_122 = arith.constant dense<0.000000e+00> : vector<2x512xf32>
    %470 = tpu.matmul %467, %256, %cst_122 {dimension_numbers = #tpu.dot_dimension_numbers<[1], [0], [0], [1], [0, 0, 1, 1], [], []>} : vector<2x128xf32>, vector<128x512xf32>, vector<2x512xf32> -> vector<2x512xf32>
    %471 = arith.addf %469, %470 : vector<2x512xf32>
    %472 = vector.extract_strided_slice %471 {offsets = [0, 0], sizes = [2, 128], strides = [1, 1]} : vector<2x512xf32> to vector<2x128xf32>
    %473 = arith.negf %472 : vector<2x128xf32>
    %474 = math.exp %473 : vector<2x128xf32>
    %cst_123 = arith.constant 1.000000e+00 : f32
    %475 = vector.broadcast %cst_123 : f32 to vector<2x128xf32>
    %476 = arith.addf %475, %474 : vector<2x128xf32>
    %477 = arith.divf %475, %476 : vector<2x128xf32>
    %478 = vector.extract_strided_slice %471 {offsets = [0, 128], sizes = [2, 128], strides = [1, 1]} : vector<2x512xf32> to vector<2x128xf32>
    %479 = arith.negf %478 : vector<2x128xf32>
    %480 = math.exp %479 : vector<2x128xf32>
    %cst_124 = arith.constant 1.000000e+00 : f32
    %481 = vector.broadcast %cst_124 : f32 to vector<2x128xf32>
    %482 = arith.addf %481, %480 : vector<2x128xf32>
    %483 = arith.divf %481, %482 : vector<2x128xf32>
    %484 = vector.extract_strided_slice %471 {offsets = [0, 256], sizes = [2, 128], strides = [1, 1]} : vector<2x512xf32> to vector<2x128xf32>
    %485 = math.tanh %484 : vector<2x128xf32>
    %486 = vector.extract_strided_slice %471 {offsets = [0, 384], sizes = [2, 128], strides = [1, 1]} : vector<2x512xf32> to vector<2x128xf32>
    %487 = arith.negf %486 : vector<2x128xf32>
    %488 = math.exp %487 : vector<2x128xf32>
    %cst_125 = arith.constant 1.000000e+00 : f32
    %489 = vector.broadcast %cst_125 : f32 to vector<2x128xf32>
    %490 = arith.addf %489, %488 : vector<2x128xf32>
    %491 = arith.divf %489, %490 : vector<2x128xf32>
    %492 = arith.mulf %483, %465 : vector<2x128xf32>
    %493 = arith.mulf %477, %485 : vector<2x128xf32>
    %494 = arith.addf %492, %493 : vector<2x128xf32>
    %495 = math.tanh %494 : vector<2x128xf32>
    %496 = arith.mulf %491, %495 : vector<2x128xf32>
    %c14_126 = arith.constant 14 : index
    %c0_127 = arith.constant 0 : index
    %497 = vector.load %arg11[%c14_126, %c0_127] : memref<16x128xf32, #tpu.memory_space<vmem>>, vector<2x128xf32>
    tpu.vector_store %arg11[%c14_126, %c0_127], %496 {strides = array<i32>} : memref<16x128xf32, #tpu.memory_space<vmem>>, vector<2x128xf32>,
    %c1_128 = arith.constant 1 : index
    %c0_129 = arith.constant 0 : index
    %c0_130 = arith.constant 0 : index
    %498 = vector.load %arg9[%c1_128, %c0_129, %c0_130] : memref<5x2x128xf32, #tpu.memory_space<vmem>>, vector<1x2x128xf32>
    %499 = vector.shape_cast %498 : vector<1x2x128xf32> to vector<2x128xf32>
    %500 = vector.shape_cast %496 : vector<2x128xf32> to vector<1x2x128xf32>
    tpu.vector_store %arg9[%c1_128, %c0_129, %c0_130], %500 {strides = array<i32>} : memref<5x2x128xf32, #tpu.memory_space<vmem>>, vector<1x2x128xf32>,
    %c1_131 = arith.constant 1 : index
    %c0_132 = arith.constant 0 : index
    %c0_133 = arith.constant 0 : index
    %501 = vector.load %arg10[%c1_131, %c0_132, %c0_133] : memref<5x2x128xf32, #tpu.memory_space<vmem>>, vector<1x2x128xf32>
    %502 = vector.shape_cast %501 : vector<1x2x128xf32> to vector<2x128xf32>
    %503 = vector.shape_cast %494 : vector<2x128xf32> to vector<1x2x128xf32>
    tpu.vector_store %arg10[%c1_131, %c0_132, %c0_133], %503 {strides = array<i32>} : memref<5x2x128xf32, #tpu.memory_space<vmem>>, vector<1x2x128xf32>,
    %c0_134 = arith.constant 0 : index
    %c0_135 = arith.constant 0 : index
    %504 = vector.load %arg11[%c0_134, %c0_135] : memref<16x128xf32, #tpu.memory_space<vmem>>, vector<16x128xf32>
    %c2_136 = arith.constant 2 : index
    %c0_137 = arith.constant 0 : index
    %c0_138 = arith.constant 0 : index
    %505 = vector.load %arg3[%c2_136, %c0_137, %c0_138] : memref<5x128x512xf32, #tpu.memory_space<vmem>>, vector<1x128x512xf32>
    %506 = vector.shape_cast %505 : vector<1x128x512xf32> to vector<128x512xf32>
    %c2_139 = arith.constant 2 : index
    %c0_140 = arith.constant 0 : index
    %c0_141 = arith.constant 0 : index
    %507 = vector.load %arg4[%c2_139, %c0_140, %c0_141] : memref<5x128x512xf32, #tpu.memory_space<vmem>>, vector<1x128x512xf32>
    %508 = vector.shape_cast %507 : vector<1x128x512xf32> to vector<128x512xf32>
    %c2_142 = arith.constant 2 : index
    %c0_143 = arith.constant 0 : index
    %c0_144 = arith.constant 0 : index
    %509 = vector.load %arg5[%c2_142, %c0_143, %c0_144] : memref<5x1x512xf32, #tpu.memory_space<vmem>>, vector<1x1x512xf32>
    %510 = vector.shape_cast %509 : vector<1x1x512xf32> to vector<1x512xf32>
    %cst_145 = arith.constant dense<0.000000e+00> : vector<16x512xf32>
    %511 = tpu.matmul %504, %506, %cst_145 {dimension_numbers = #tpu.dot_dimension_numbers<[1], [0], [0], [1], [0, 0, 1, 1], [], []>} : vector<16x128xf32>, vector<128x512xf32>, vector<16x512xf32> -> vector<16x512xf32>
    %512 = vector.broadcast %510 : vector<1x512xf32> to vector<16x512xf32>
    %513 = arith.addf %511, %512 : vector<16x512xf32>
    %c2_146 = arith.constant 2 : index
    %c0_147 = arith.constant 0 : index
    %c0_148 = arith.constant 0 : index
    %514 = vector.load %arg1[%c2_146, %c0_147, %c0_148] : memref<5x2x128xf32, #tpu.memory_space<vmem>>, vector<1x2x128xf32>
    %515 = vector.shape_cast %514 : vector<1x2x128xf32> to vector<2x128xf32>
    %c2_149 = arith.constant 2 : index
    %c0_150 = arith.constant 0 : index
    %c0_151 = arith.constant 0 : index
    %516 = vector.load %arg2[%c2_149, %c0_150, %c0_151] : memref<5x2x128xf32, #tpu.memory_space<vmem>>, vector<1x2x128xf32>
    %517 = vector.shape_cast %516 : vector<1x2x128xf32> to vector<2x128xf32>
    %518 = vector.extract_strided_slice %513 {offsets = [0, 0], sizes = [2, 512], strides = [1, 1]} : vector<16x512xf32> to vector<2x512xf32>
    %cst_152 = arith.constant dense<0.000000e+00> : vector<2x512xf32>
    %519 = tpu.matmul %515, %508, %cst_152 {dimension_numbers = #tpu.dot_dimension_numbers<[1], [0], [0], [1], [0, 0, 1, 1], [], []>} : vector<2x128xf32>, vector<128x512xf32>, vector<2x512xf32> -> vector<2x512xf32>
    %520 = arith.addf %518, %519 : vector<2x512xf32>
    %521 = vector.extract_strided_slice %520 {offsets = [0, 0], sizes = [2, 128], strides = [1, 1]} : vector<2x512xf32> to vector<2x128xf32>
    %522 = arith.negf %521 : vector<2x128xf32>
    %523 = math.exp %522 : vector<2x128xf32>
    %cst_153 = arith.constant 1.000000e+00 : f32
    %524 = vector.broadcast %cst_153 : f32 to vector<2x128xf32>
    %525 = arith.addf %524, %523 : vector<2x128xf32>
    %526 = arith.divf %524, %525 : vector<2x128xf32>
    %527 = vector.extract_strided_slice %520 {offsets = [0, 128], sizes = [2, 128], strides = [1, 1]} : vector<2x512xf32> to vector<2x128xf32>
    %528 = arith.negf %527 : vector<2x128xf32>
    %529 = math.exp %528 : vector<2x128xf32>
    %cst_154 = arith.constant 1.000000e+00 : f32
    %530 = vector.broadcast %cst_154 : f32 to vector<2x128xf32>
    %531 = arith.addf %530, %529 : vector<2x128xf32>
    %532 = arith.divf %530, %531 : vector<2x128xf32>
    %533 = vector.extract_strided_slice %520 {offsets = [0, 256], sizes = [2, 128], strides = [1, 1]} : vector<2x512xf32> to vector<2x128xf32>
    %534 = math.tanh %533 : vector<2x128xf32>
    %535 = vector.extract_strided_slice %520 {offsets = [0, 384], sizes = [2, 128], strides = [1, 1]} : vector<2x512xf32> to vector<2x128xf32>
    %536 = arith.negf %535 : vector<2x128xf32>
    %537 = math.exp %536 : vector<2x128xf32>
    %cst_155 = arith.constant 1.000000e+00 : f32
    %538 = vector.broadcast %cst_155 : f32 to vector<2x128xf32>
    %539 = arith.addf %538, %537 : vector<2x128xf32>
    %540 = arith.divf %538, %539 : vector<2x128xf32>
    %541 = arith.mulf %532, %517 : vector<2x128xf32>
    %542 = arith.mulf %526, %534 : vector<2x128xf32>
    %543 = arith.addf %541, %542 : vector<2x128xf32>
    %544 = math.tanh %543 : vector<2x128xf32>
    %545 = arith.mulf %540, %544 : vector<2x128xf32>
    %c0_156 = arith.constant 0 : index
    %c0_157 = arith.constant 0 : index
    %546 = vector.load %arg11[%c0_156, %c0_157] : memref<16x128xf32, #tpu.memory_space<vmem>>, vector<2x128xf32>
    tpu.vector_store %arg11[%c0_156, %c0_157], %545 {strides = array<i32>} : memref<16x128xf32, #tpu.memory_space<vmem>>, vector<2x128xf32>,
    %547 = vector.extract_strided_slice %513 {offsets = [2, 0], sizes = [2, 512], strides = [1, 1]} : vector<16x512xf32> to vector<2x512xf32>
    %cst_158 = arith.constant dense<0.000000e+00> : vector<2x512xf32>
    %548 = tpu.matmul %545, %508, %cst_158 {dimension_numbers = #tpu.dot_dimension_numbers<[1], [0], [0], [1], [0, 0, 1, 1], [], []>} : vector<2x128xf32>, vector<128x512xf32>, vector<2x512xf32> -> vector<2x512xf32>
    %549 = arith.addf %547, %548 : vector<2x512xf32>
    %550 = vector.extract_strided_slice %549 {offsets = [0, 0], sizes = [2, 128], strides = [1, 1]} : vector<2x512xf32> to vector<2x128xf32>
    %551 = arith.negf %550 : vector<2x128xf32>
    %552 = math.exp %551 : vector<2x128xf32>
    %cst_159 = arith.constant 1.000000e+00 : f32
    %553 = vector.broadcast %cst_159 : f32 to vector<2x128xf32>
    %554 = arith.addf %553, %552 : vector<2x128xf32>
    %555 = arith.divf %553, %554 : vector<2x128xf32>
    %556 = vector.extract_strided_slice %549 {offsets = [0, 128], sizes = [2, 128], strides = [1, 1]} : vector<2x512xf32> to vector<2x128xf32>
    %557 = arith.negf %556 : vector<2x128xf32>
    %558 = math.exp %557 : vector<2x128xf32>
    %cst_160 = arith.constant 1.000000e+00 : f32
    %559 = vector.broadcast %cst_160 : f32 to vector<2x128xf32>
    %560 = arith.addf %559, %558 : vector<2x128xf32>
    %561 = arith.divf %559, %560 : vector<2x128xf32>
    %562 = vector.extract_strided_slice %549 {offsets = [0, 256], sizes = [2, 128], strides = [1, 1]} : vector<2x512xf32> to vector<2x128xf32>
    %563 = math.tanh %562 : vector<2x128xf32>
    %564 = vector.extract_strided_slice %549 {offsets = [0, 384], sizes = [2, 128], strides = [1, 1]} : vector<2x512xf32> to vector<2x128xf32>
    %565 = arith.negf %564 : vector<2x128xf32>
    %566 = math.exp %565 : vector<2x128xf32>
    %cst_161 = arith.constant 1.000000e+00 : f32
    %567 = vector.broadcast %cst_161 : f32 to vector<2x128xf32>
    %568 = arith.addf %567, %566 : vector<2x128xf32>
    %569 = arith.divf %567, %568 : vector<2x128xf32>
    %570 = arith.mulf %561, %543 : vector<2x128xf32>
    %571 = arith.mulf %555, %563 : vector<2x128xf32>
    %572 = arith.addf %570, %571 : vector<2x128xf32>
    %573 = math.tanh %572 : vector<2x128xf32>
    %574 = arith.mulf %569, %573 : vector<2x128xf32>
    %c2_162 = arith.constant 2 : index
    %c0_163 = arith.constant 0 : index
    %575 = vector.load %arg11[%c2_162, %c0_163] : memref<16x128xf32, #tpu.memory_space<vmem>>, vector<2x128xf32>
    tpu.vector_store %arg11[%c2_162, %c0_163], %574 {strides = array<i32>} : memref<16x128xf32, #tpu.memory_space<vmem>>, vector<2x128xf32>,
    %576 = vector.extract_strided_slice %513 {offsets = [4, 0], sizes = [2, 512], strides = [1, 1]} : vector<16x512xf32> to vector<2x512xf32>
    %cst_164 = arith.constant dense<0.000000e+00> : vector<2x512xf32>
    %577 = tpu.matmul %574, %508, %cst_164 {dimension_numbers = #tpu.dot_dimension_numbers<[1], [0], [0], [1], [0, 0, 1, 1], [], []>} : vector<2x128xf32>, vector<128x512xf32>, vector<2x512xf32> -> vector<2x512xf32>
    %578 = arith.addf %576, %577 : vector<2x512xf32>
    %579 = vector.extract_strided_slice %578 {offsets = [0, 0], sizes = [2, 128], strides = [1, 1]} : vector<2x512xf32> to vector<2x128xf32>
    %580 = arith.negf %579 : vector<2x128xf32>
    %581 = math.exp %580 : vector<2x128xf32>
    %cst_165 = arith.constant 1.000000e+00 : f32
    %582 = vector.broadcast %cst_165 : f32 to vector<2x128xf32>
    %583 = arith.addf %582, %581 : vector<2x128xf32>
    %584 = arith.divf %582, %583 : vector<2x128xf32>
    %585 = vector.extract_strided_slice %578 {offsets = [0, 128], sizes = [2, 128], strides = [1, 1]} : vector<2x512xf32> to vector<2x128xf32>
    %586 = arith.negf %585 : vector<2x128xf32>
    %587 = math.exp %586 : vector<2x128xf32>
    %cst_166 = arith.constant 1.000000e+00 : f32
    %588 = vector.broadcast %cst_166 : f32 to vector<2x128xf32>
    %589 = arith.addf %588, %587 : vector<2x128xf32>
    %590 = arith.divf %588, %589 : vector<2x128xf32>
    %591 = vector.extract_strided_slice %578 {offsets = [0, 256], sizes = [2, 128], strides = [1, 1]} : vector<2x512xf32> to vector<2x128xf32>
    %592 = math.tanh %591 : vector<2x128xf32>
    %593 = vector.extract_strided_slice %578 {offsets = [0, 384], sizes = [2, 128], strides = [1, 1]} : vector<2x512xf32> to vector<2x128xf32>
    %594 = arith.negf %593 : vector<2x128xf32>
    %595 = math.exp %594 : vector<2x128xf32>
    %cst_167 = arith.constant 1.000000e+00 : f32
    %596 = vector.broadcast %cst_167 : f32 to vector<2x128xf32>
    %597 = arith.addf %596, %595 : vector<2x128xf32>
    %598 = arith.divf %596, %597 : vector<2x128xf32>
    %599 = arith.mulf %590, %572 : vector<2x128xf32>
    %600 = arith.mulf %584, %592 : vector<2x128xf32>
    %601 = arith.addf %599, %600 : vector<2x128xf32>
    %602 = math.tanh %601 : vector<2x128xf32>
    %603 = arith.mulf %598, %602 : vector<2x128xf32>
    %c4_168 = arith.constant 4 : index
    %c0_169 = arith.constant 0 : index
    %604 = vector.load %arg11[%c4_168, %c0_169] : memref<16x128xf32, #tpu.memory_space<vmem>>, vector<2x128xf32>
    tpu.vector_store %arg11[%c4_168, %c0_169], %603 {strides = array<i32>} : memref<16x128xf32, #tpu.memory_space<vmem>>, vector<2x128xf32>,
    %605 = vector.extract_strided_slice %513 {offsets = [6, 0], sizes = [2, 512], strides = [1, 1]} : vector<16x512xf32> to vector<2x512xf32>
    %cst_170 = arith.constant dense<0.000000e+00> : vector<2x512xf32>
    %606 = tpu.matmul %603, %508, %cst_170 {dimension_numbers = #tpu.dot_dimension_numbers<[1], [0], [0], [1], [0, 0, 1, 1], [], []>} : vector<2x128xf32>, vector<128x512xf32>, vector<2x512xf32> -> vector<2x512xf32>
    %607 = arith.addf %605, %606 : vector<2x512xf32>
    %608 = vector.extract_strided_slice %607 {offsets = [0, 0], sizes = [2, 128], strides = [1, 1]} : vector<2x512xf32> to vector<2x128xf32>
    %609 = arith.negf %608 : vector<2x128xf32>
    %610 = math.exp %609 : vector<2x128xf32>
    %cst_171 = arith.constant 1.000000e+00 : f32
    %611 = vector.broadcast %cst_171 : f32 to vector<2x128xf32>
    %612 = arith.addf %611, %610 : vector<2x128xf32>
    %613 = arith.divf %611, %612 : vector<2x128xf32>
    %614 = vector.extract_strided_slice %607 {offsets = [0, 128], sizes = [2, 128], strides = [1, 1]} : vector<2x512xf32> to vector<2x128xf32>
    %615 = arith.negf %614 : vector<2x128xf32>
    %616 = math.exp %615 : vector<2x128xf32>
    %cst_172 = arith.constant 1.000000e+00 : f32
    %617 = vector.broadcast %cst_172 : f32 to vector<2x128xf32>
    %618 = arith.addf %617, %616 : vector<2x128xf32>
    %619 = arith.divf %617, %618 : vector<2x128xf32>
    %620 = vector.extract_strided_slice %607 {offsets = [0, 256], sizes = [2, 128], strides = [1, 1]} : vector<2x512xf32> to vector<2x128xf32>
    %621 = math.tanh %620 : vector<2x128xf32>
    %622 = vector.extract_strided_slice %607 {offsets = [0, 384], sizes = [2, 128], strides = [1, 1]} : vector<2x512xf32> to vector<2x128xf32>
    %623 = arith.negf %622 : vector<2x128xf32>
    %624 = math.exp %623 : vector<2x128xf32>
    %cst_173 = arith.constant 1.000000e+00 : f32
    %625 = vector.broadcast %cst_173 : f32 to vector<2x128xf32>
    %626 = arith.addf %625, %624 : vector<2x128xf32>
    %627 = arith.divf %625, %626 : vector<2x128xf32>
    %628 = arith.mulf %619, %601 : vector<2x128xf32>
    %629 = arith.mulf %613, %621 : vector<2x128xf32>
    %630 = arith.addf %628, %629 : vector<2x128xf32>
    %631 = math.tanh %630 : vector<2x128xf32>
    %632 = arith.mulf %627, %631 : vector<2x128xf32>
    %c6_174 = arith.constant 6 : index
    %c0_175 = arith.constant 0 : index
    %633 = vector.load %arg11[%c6_174, %c0_175] : memref<16x128xf32, #tpu.memory_space<vmem>>, vector<2x128xf32>
    tpu.vector_store %arg11[%c6_174, %c0_175], %632 {strides = array<i32>} : memref<16x128xf32, #tpu.memory_space<vmem>>, vector<2x128xf32>,
    %634 = vector.extract_strided_slice %513 {offsets = [8, 0], sizes = [2, 512], strides = [1, 1]} : vector<16x512xf32> to vector<2x512xf32>
    %cst_176 = arith.constant dense<0.000000e+00> : vector<2x512xf32>
    %635 = tpu.matmul %632, %508, %cst_176 {dimension_numbers = #tpu.dot_dimension_numbers<[1], [0], [0], [1], [0, 0, 1, 1], [], []>} : vector<2x128xf32>, vector<128x512xf32>, vector<2x512xf32> -> vector<2x512xf32>
    %636 = arith.addf %634, %635 : vector<2x512xf32>
    %637 = vector.extract_strided_slice %636 {offsets = [0, 0], sizes = [2, 128], strides = [1, 1]} : vector<2x512xf32> to vector<2x128xf32>
    %638 = arith.negf %637 : vector<2x128xf32>
    %639 = math.exp %638 : vector<2x128xf32>
    %cst_177 = arith.constant 1.000000e+00 : f32
    %640 = vector.broadcast %cst_177 : f32 to vector<2x128xf32>
    %641 = arith.addf %640, %639 : vector<2x128xf32>
    %642 = arith.divf %640, %641 : vector<2x128xf32>
    %643 = vector.extract_strided_slice %636 {offsets = [0, 128], sizes = [2, 128], strides = [1, 1]} : vector<2x512xf32> to vector<2x128xf32>
    %644 = arith.negf %643 : vector<2x128xf32>
    %645 = math.exp %644 : vector<2x128xf32>
    %cst_178 = arith.constant 1.000000e+00 : f32
    %646 = vector.broadcast %cst_178 : f32 to vector<2x128xf32>
    %647 = arith.addf %646, %645 : vector<2x128xf32>
    %648 = arith.divf %646, %647 : vector<2x128xf32>
    %649 = vector.extract_strided_slice %636 {offsets = [0, 256], sizes = [2, 128], strides = [1, 1]} : vector<2x512xf32> to vector<2x128xf32>
    %650 = math.tanh %649 : vector<2x128xf32>
    %651 = vector.extract_strided_slice %636 {offsets = [0, 384], sizes = [2, 128], strides = [1, 1]} : vector<2x512xf32> to vector<2x128xf32>
    %652 = arith.negf %651 : vector<2x128xf32>
    %653 = math.exp %652 : vector<2x128xf32>
    %cst_179 = arith.constant 1.000000e+00 : f32
    %654 = vector.broadcast %cst_179 : f32 to vector<2x128xf32>
    %655 = arith.addf %654, %653 : vector<2x128xf32>
    %656 = arith.divf %654, %655 : vector<2x128xf32>
    %657 = arith.mulf %648, %630 : vector<2x128xf32>
    %658 = arith.mulf %642, %650 : vector<2x128xf32>
    %659 = arith.addf %657, %658 : vector<2x128xf32>
    %660 = math.tanh %659 : vector<2x128xf32>
    %661 = arith.mulf %656, %660 : vector<2x128xf32>
    %c8_180 = arith.constant 8 : index
    %c0_181 = arith.constant 0 : index
    %662 = vector.load %arg11[%c8_180, %c0_181] : memref<16x128xf32, #tpu.memory_space<vmem>>, vector<2x128xf32>
    tpu.vector_store %arg11[%c8_180, %c0_181], %661 {strides = array<i32>} : memref<16x128xf32, #tpu.memory_space<vmem>>, vector<2x128xf32>,
    %663 = vector.extract_strided_slice %513 {offsets = [10, 0], sizes = [2, 512], strides = [1, 1]} : vector<16x512xf32> to vector<2x512xf32>
    %cst_182 = arith.constant dense<0.000000e+00> : vector<2x512xf32>
    %664 = tpu.matmul %661, %508, %cst_182 {dimension_numbers = #tpu.dot_dimension_numbers<[1], [0], [0], [1], [0, 0, 1, 1], [], []>} : vector<2x128xf32>, vector<128x512xf32>, vector<2x512xf32> -> vector<2x512xf32>
    %665 = arith.addf %663, %664 : vector<2x512xf32>
    %666 = vector.extract_strided_slice %665 {offsets = [0, 0], sizes = [2, 128], strides = [1, 1]} : vector<2x512xf32> to vector<2x128xf32>
    %667 = arith.negf %666 : vector<2x128xf32>
    %668 = math.exp %667 : vector<2x128xf32>
    %cst_183 = arith.constant 1.000000e+00 : f32
    %669 = vector.broadcast %cst_183 : f32 to vector<2x128xf32>
    %670 = arith.addf %669, %668 : vector<2x128xf32>
    %671 = arith.divf %669, %670 : vector<2x128xf32>
    %672 = vector.extract_strided_slice %665 {offsets = [0, 128], sizes = [2, 128], strides = [1, 1]} : vector<2x512xf32> to vector<2x128xf32>
    %673 = arith.negf %672 : vector<2x128xf32>
    %674 = math.exp %673 : vector<2x128xf32>
    %cst_184 = arith.constant 1.000000e+00 : f32
    %675 = vector.broadcast %cst_184 : f32 to vector<2x128xf32>
    %676 = arith.addf %675, %674 : vector<2x128xf32>
    %677 = arith.divf %675, %676 : vector<2x128xf32>
    %678 = vector.extract_strided_slice %665 {offsets = [0, 256], sizes = [2, 128], strides = [1, 1]} : vector<2x512xf32> to vector<2x128xf32>
    %679 = math.tanh %678 : vector<2x128xf32>
    %680 = vector.extract_strided_slice %665 {offsets = [0, 384], sizes = [2, 128], strides = [1, 1]} : vector<2x512xf32> to vector<2x128xf32>
    %681 = arith.negf %680 : vector<2x128xf32>
    %682 = math.exp %681 : vector<2x128xf32>
    %cst_185 = arith.constant 1.000000e+00 : f32
    %683 = vector.broadcast %cst_185 : f32 to vector<2x128xf32>
    %684 = arith.addf %683, %682 : vector<2x128xf32>
    %685 = arith.divf %683, %684 : vector<2x128xf32>
    %686 = arith.mulf %677, %659 : vector<2x128xf32>
    %687 = arith.mulf %671, %679 : vector<2x128xf32>
    %688 = arith.addf %686, %687 : vector<2x128xf32>
    %689 = math.tanh %688 : vector<2x128xf32>
    %690 = arith.mulf %685, %689 : vector<2x128xf32>
    %c10_186 = arith.constant 10 : index
    %c0_187 = arith.constant 0 : index
    %691 = vector.load %arg11[%c10_186, %c0_187] : memref<16x128xf32, #tpu.memory_space<vmem>>, vector<2x128xf32>
    tpu.vector_store %arg11[%c10_186, %c0_187], %690 {strides = array<i32>} : memref<16x128xf32, #tpu.memory_space<vmem>>, vector<2x128xf32>,
    %692 = vector.extract_strided_slice %513 {offsets = [12, 0], sizes = [2, 512], strides = [1, 1]} : vector<16x512xf32> to vector<2x512xf32>
    %cst_188 = arith.constant dense<0.000000e+00> : vector<2x512xf32>
    %693 = tpu.matmul %690, %508, %cst_188 {dimension_numbers = #tpu.dot_dimension_numbers<[1], [0], [0], [1], [0, 0, 1, 1], [], []>} : vector<2x128xf32>, vector<128x512xf32>, vector<2x512xf32> -> vector<2x512xf32>
    %694 = arith.addf %692, %693 : vector<2x512xf32>
    %695 = vector.extract_strided_slice %694 {offsets = [0, 0], sizes = [2, 128], strides = [1, 1]} : vector<2x512xf32> to vector<2x128xf32>
    %696 = arith.negf %695 : vector<2x128xf32>
    %697 = math.exp %696 : vector<2x128xf32>
    %cst_189 = arith.constant 1.000000e+00 : f32
    %698 = vector.broadcast %cst_189 : f32 to vector<2x128xf32>
    %699 = arith.addf %698, %697 : vector<2x128xf32>
    %700 = arith.divf %698, %699 : vector<2x128xf32>
    %701 = vector.extract_strided_slice %694 {offsets = [0, 128], sizes = [2, 128], strides = [1, 1]} : vector<2x512xf32> to vector<2x128xf32>
    %702 = arith.negf %701 : vector<2x128xf32>
    %703 = math.exp %702 : vector<2x128xf32>
    %cst_190 = arith.constant 1.000000e+00 : f32
    %704 = vector.broadcast %cst_190 : f32 to vector<2x128xf32>
    %705 = arith.addf %704, %703 : vector<2x128xf32>
    %706 = arith.divf %704, %705 : vector<2x128xf32>
    %707 = vector.extract_strided_slice %694 {offsets = [0, 256], sizes = [2, 128], strides = [1, 1]} : vector<2x512xf32> to vector<2x128xf32>
    %708 = math.tanh %707 : vector<2x128xf32>
    %709 = vector.extract_strided_slice %694 {offsets = [0, 384], sizes = [2, 128], strides = [1, 1]} : vector<2x512xf32> to vector<2x128xf32>
    %710 = arith.negf %709 : vector<2x128xf32>
    %711 = math.exp %710 : vector<2x128xf32>
    %cst_191 = arith.constant 1.000000e+00 : f32
    %712 = vector.broadcast %cst_191 : f32 to vector<2x128xf32>
    %713 = arith.addf %712, %711 : vector<2x128xf32>
    %714 = arith.divf %712, %713 : vector<2x128xf32>
    %715 = arith.mulf %706, %688 : vector<2x128xf32>
    %716 = arith.mulf %700, %708 : vector<2x128xf32>
    %717 = arith.addf %715, %716 : vector<2x128xf32>
    %718 = math.tanh %717 : vector<2x128xf32>
    %719 = arith.mulf %714, %718 : vector<2x128xf32>
    %c12_192 = arith.constant 12 : index
    %c0_193 = arith.constant 0 : index
    %720 = vector.load %arg11[%c12_192, %c0_193] : memref<16x128xf32, #tpu.memory_space<vmem>>, vector<2x128xf32>
    tpu.vector_store %arg11[%c12_192, %c0_193], %719 {strides = array<i32>} : memref<16x128xf32, #tpu.memory_space<vmem>>, vector<2x128xf32>,
    %721 = vector.extract_strided_slice %513 {offsets = [14, 0], sizes = [2, 512], strides = [1, 1]} : vector<16x512xf32> to vector<2x512xf32>
    %cst_194 = arith.constant dense<0.000000e+00> : vector<2x512xf32>
    %722 = tpu.matmul %719, %508, %cst_194 {dimension_numbers = #tpu.dot_dimension_numbers<[1], [0], [0], [1], [0, 0, 1, 1], [], []>} : vector<2x128xf32>, vector<128x512xf32>, vector<2x512xf32> -> vector<2x512xf32>
    %723 = arith.addf %721, %722 : vector<2x512xf32>
    %724 = vector.extract_strided_slice %723 {offsets = [0, 0], sizes = [2, 128], strides = [1, 1]} : vector<2x512xf32> to vector<2x128xf32>
    %725 = arith.negf %724 : vector<2x128xf32>
    %726 = math.exp %725 : vector<2x128xf32>
    %cst_195 = arith.constant 1.000000e+00 : f32
    %727 = vector.broadcast %cst_195 : f32 to vector<2x128xf32>
    %728 = arith.addf %727, %726 : vector<2x128xf32>
    %729 = arith.divf %727, %728 : vector<2x128xf32>
    %730 = vector.extract_strided_slice %723 {offsets = [0, 128], sizes = [2, 128], strides = [1, 1]} : vector<2x512xf32> to vector<2x128xf32>
    %731 = arith.negf %730 : vector<2x128xf32>
    %732 = math.exp %731 : vector<2x128xf32>
    %cst_196 = arith.constant 1.000000e+00 : f32
    %733 = vector.broadcast %cst_196 : f32 to vector<2x128xf32>
    %734 = arith.addf %733, %732 : vector<2x128xf32>
    %735 = arith.divf %733, %734 : vector<2x128xf32>
    %736 = vector.extract_strided_slice %723 {offsets = [0, 256], sizes = [2, 128], strides = [1, 1]} : vector<2x512xf32> to vector<2x128xf32>
    %737 = math.tanh %736 : vector<2x128xf32>
    %738 = vector.extract_strided_slice %723 {offsets = [0, 384], sizes = [2, 128], strides = [1, 1]} : vector<2x512xf32> to vector<2x128xf32>
    %739 = arith.negf %738 : vector<2x128xf32>
    %740 = math.exp %739 : vector<2x128xf32>
    %cst_197 = arith.constant 1.000000e+00 : f32
    %741 = vector.broadcast %cst_197 : f32 to vector<2x128xf32>
    %742 = arith.addf %741, %740 : vector<2x128xf32>
    %743 = arith.divf %741, %742 : vector<2x128xf32>
    %744 = arith.mulf %735, %717 : vector<2x128xf32>
    %745 = arith.mulf %729, %737 : vector<2x128xf32>
    %746 = arith.addf %744, %745 : vector<2x128xf32>
    %747 = math.tanh %746 : vector<2x128xf32>
    %748 = arith.mulf %743, %747 : vector<2x128xf32>
    %c14_198 = arith.constant 14 : index
    %c0_199 = arith.constant 0 : index
    %749 = vector.load %arg11[%c14_198, %c0_199] : memref<16x128xf32, #tpu.memory_space<vmem>>, vector<2x128xf32>
    tpu.vector_store %arg11[%c14_198, %c0_199], %748 {strides = array<i32>} : memref<16x128xf32, #tpu.memory_space<vmem>>, vector<2x128xf32>,
    %c2_200 = arith.constant 2 : index
    %c0_201 = arith.constant 0 : index
    %c0_202 = arith.constant 0 : index
    %750 = vector.load %arg9[%c2_200, %c0_201, %c0_202] : memref<5x2x128xf32, #tpu.memory_space<vmem>>, vector<1x2x128xf32>
    %751 = vector.shape_cast %750 : vector<1x2x128xf32> to vector<2x128xf32>
    %752 = vector.shape_cast %748 : vector<2x128xf32> to vector<1x2x128xf32>
    tpu.vector_store %arg9[%c2_200, %c0_201, %c0_202], %752 {strides = array<i32>} : memref<5x2x128xf32, #tpu.memory_space<vmem>>, vector<1x2x128xf32>,
    %c2_203 = arith.constant 2 : index
    %c0_204 = arith.constant 0 : index
    %c0_205 = arith.constant 0 : index
    %753 = vector.load %arg10[%c2_203, %c0_204, %c0_205] : memref<5x2x128xf32, #tpu.memory_space<vmem>>, vector<1x2x128xf32>
    %754 = vector.shape_cast %753 : vector<1x2x128xf32> to vector<2x128xf32>
    %755 = vector.shape_cast %746 : vector<2x128xf32> to vector<1x2x128xf32>
    tpu.vector_store %arg10[%c2_203, %c0_204, %c0_205], %755 {strides = array<i32>} : memref<5x2x128xf32, #tpu.memory_space<vmem>>, vector<1x2x128xf32>,
    %c0_206 = arith.constant 0 : index
    %c0_207 = arith.constant 0 : index
    %756 = vector.load %arg11[%c0_206, %c0_207] : memref<16x128xf32, #tpu.memory_space<vmem>>, vector<16x128xf32>
    %c3 = arith.constant 3 : index
    %c0_208 = arith.constant 0 : index
    %c0_209 = arith.constant 0 : index
    %757 = vector.load %arg3[%c3, %c0_208, %c0_209] : memref<5x128x512xf32, #tpu.memory_space<vmem>>, vector<1x128x512xf32>
    %758 = vector.shape_cast %757 : vector<1x128x512xf32> to vector<128x512xf32>
    %c3_210 = arith.constant 3 : index
    %c0_211 = arith.constant 0 : index
    %c0_212 = arith.constant 0 : index
    %759 = vector.load %arg4[%c3_210, %c0_211, %c0_212] : memref<5x128x512xf32, #tpu.memory_space<vmem>>, vector<1x128x512xf32>
    %760 = vector.shape_cast %759 : vector<1x128x512xf32> to vector<128x512xf32>
    %c3_213 = arith.constant 3 : index
    %c0_214 = arith.constant 0 : index
    %c0_215 = arith.constant 0 : index
    %761 = vector.load %arg5[%c3_213, %c0_214, %c0_215] : memref<5x1x512xf32, #tpu.memory_space<vmem>>, vector<1x1x512xf32>
    %762 = vector.shape_cast %761 : vector<1x1x512xf32> to vector<1x512xf32>
    %cst_216 = arith.constant dense<0.000000e+00> : vector<16x512xf32>
    %763 = tpu.matmul %756, %758, %cst_216 {dimension_numbers = #tpu.dot_dimension_numbers<[1], [0], [0], [1], [0, 0, 1, 1], [], []>} : vector<16x128xf32>, vector<128x512xf32>, vector<16x512xf32> -> vector<16x512xf32>
    %764 = vector.broadcast %762 : vector<1x512xf32> to vector<16x512xf32>
    %765 = arith.addf %763, %764 : vector<16x512xf32>
    %c3_217 = arith.constant 3 : index
    %c0_218 = arith.constant 0 : index
    %c0_219 = arith.constant 0 : index
    %766 = vector.load %arg1[%c3_217, %c0_218, %c0_219] : memref<5x2x128xf32, #tpu.memory_space<vmem>>, vector<1x2x128xf32>
    %767 = vector.shape_cast %766 : vector<1x2x128xf32> to vector<2x128xf32>
    %c3_220 = arith.constant 3 : index
    %c0_221 = arith.constant 0 : index
    %c0_222 = arith.constant 0 : index
    %768 = vector.load %arg2[%c3_220, %c0_221, %c0_222] : memref<5x2x128xf32, #tpu.memory_space<vmem>>, vector<1x2x128xf32>
    %769 = vector.shape_cast %768 : vector<1x2x128xf32> to vector<2x128xf32>
    %770 = vector.extract_strided_slice %765 {offsets = [0, 0], sizes = [2, 512], strides = [1, 1]} : vector<16x512xf32> to vector<2x512xf32>
    %cst_223 = arith.constant dense<0.000000e+00> : vector<2x512xf32>
    %771 = tpu.matmul %767, %760, %cst_223 {dimension_numbers = #tpu.dot_dimension_numbers<[1], [0], [0], [1], [0, 0, 1, 1], [], []>} : vector<2x128xf32>, vector<128x512xf32>, vector<2x512xf32> -> vector<2x512xf32>
    %772 = arith.addf %770, %771 : vector<2x512xf32>
    %773 = vector.extract_strided_slice %772 {offsets = [0, 0], sizes = [2, 128], strides = [1, 1]} : vector<2x512xf32> to vector<2x128xf32>
    %774 = arith.negf %773 : vector<2x128xf32>
    %775 = math.exp %774 : vector<2x128xf32>
    %cst_224 = arith.constant 1.000000e+00 : f32
    %776 = vector.broadcast %cst_224 : f32 to vector<2x128xf32>
    %777 = arith.addf %776, %775 : vector<2x128xf32>
    %778 = arith.divf %776, %777 : vector<2x128xf32>
    %779 = vector.extract_strided_slice %772 {offsets = [0, 128], sizes = [2, 128], strides = [1, 1]} : vector<2x512xf32> to vector<2x128xf32>
    %780 = arith.negf %779 : vector<2x128xf32>
    %781 = math.exp %780 : vector<2x128xf32>
    %cst_225 = arith.constant 1.000000e+00 : f32
    %782 = vector.broadcast %cst_225 : f32 to vector<2x128xf32>
    %783 = arith.addf %782, %781 : vector<2x128xf32>
    %784 = arith.divf %782, %783 : vector<2x128xf32>
    %785 = vector.extract_strided_slice %772 {offsets = [0, 256], sizes = [2, 128], strides = [1, 1]} : vector<2x512xf32> to vector<2x128xf32>
    %786 = math.tanh %785 : vector<2x128xf32>
    %787 = vector.extract_strided_slice %772 {offsets = [0, 384], sizes = [2, 128], strides = [1, 1]} : vector<2x512xf32> to vector<2x128xf32>
    %788 = arith.negf %787 : vector<2x128xf32>
    %789 = math.exp %788 : vector<2x128xf32>
    %cst_226 = arith.constant 1.000000e+00 : f32
    %790 = vector.broadcast %cst_226 : f32 to vector<2x128xf32>
    %791 = arith.addf %790, %789 : vector<2x128xf32>
    %792 = arith.divf %790, %791 : vector<2x128xf32>
    %793 = arith.mulf %784, %769 : vector<2x128xf32>
    %794 = arith.mulf %778, %786 : vector<2x128xf32>
    %795 = arith.addf %793, %794 : vector<2x128xf32>
    %796 = math.tanh %795 : vector<2x128xf32>
    %797 = arith.mulf %792, %796 : vector<2x128xf32>
    %c0_227 = arith.constant 0 : index
    %c0_228 = arith.constant 0 : index
    %798 = vector.load %arg11[%c0_227, %c0_228] : memref<16x128xf32, #tpu.memory_space<vmem>>, vector<2x128xf32>
    tpu.vector_store %arg11[%c0_227, %c0_228], %797 {strides = array<i32>} : memref<16x128xf32, #tpu.memory_space<vmem>>, vector<2x128xf32>,
    %799 = vector.extract_strided_slice %765 {offsets = [2, 0], sizes = [2, 512], strides = [1, 1]} : vector<16x512xf32> to vector<2x512xf32>
    %cst_229 = arith.constant dense<0.000000e+00> : vector<2x512xf32>
    %800 = tpu.matmul %797, %760, %cst_229 {dimension_numbers = #tpu.dot_dimension_numbers<[1], [0], [0], [1], [0, 0, 1, 1], [], []>} : vector<2x128xf32>, vector<128x512xf32>, vector<2x512xf32> -> vector<2x512xf32>
    %801 = arith.addf %799, %800 : vector<2x512xf32>
    %802 = vector.extract_strided_slice %801 {offsets = [0, 0], sizes = [2, 128], strides = [1, 1]} : vector<2x512xf32> to vector<2x128xf32>
    %803 = arith.negf %802 : vector<2x128xf32>
    %804 = math.exp %803 : vector<2x128xf32>
    %cst_230 = arith.constant 1.000000e+00 : f32
    %805 = vector.broadcast %cst_230 : f32 to vector<2x128xf32>
    %806 = arith.addf %805, %804 : vector<2x128xf32>
    %807 = arith.divf %805, %806 : vector<2x128xf32>
    %808 = vector.extract_strided_slice %801 {offsets = [0, 128], sizes = [2, 128], strides = [1, 1]} : vector<2x512xf32> to vector<2x128xf32>
    %809 = arith.negf %808 : vector<2x128xf32>
    %810 = math.exp %809 : vector<2x128xf32>
    %cst_231 = arith.constant 1.000000e+00 : f32
    %811 = vector.broadcast %cst_231 : f32 to vector<2x128xf32>
    %812 = arith.addf %811, %810 : vector<2x128xf32>
    %813 = arith.divf %811, %812 : vector<2x128xf32>
    %814 = vector.extract_strided_slice %801 {offsets = [0, 256], sizes = [2, 128], strides = [1, 1]} : vector<2x512xf32> to vector<2x128xf32>
    %815 = math.tanh %814 : vector<2x128xf32>
    %816 = vector.extract_strided_slice %801 {offsets = [0, 384], sizes = [2, 128], strides = [1, 1]} : vector<2x512xf32> to vector<2x128xf32>
    %817 = arith.negf %816 : vector<2x128xf32>
    %818 = math.exp %817 : vector<2x128xf32>
    %cst_232 = arith.constant 1.000000e+00 : f32
    %819 = vector.broadcast %cst_232 : f32 to vector<2x128xf32>
    %820 = arith.addf %819, %818 : vector<2x128xf32>
    %821 = arith.divf %819, %820 : vector<2x128xf32>
    %822 = arith.mulf %813, %795 : vector<2x128xf32>
    %823 = arith.mulf %807, %815 : vector<2x128xf32>
    %824 = arith.addf %822, %823 : vector<2x128xf32>
    %825 = math.tanh %824 : vector<2x128xf32>
    %826 = arith.mulf %821, %825 : vector<2x128xf32>
    %c2_233 = arith.constant 2 : index
    %c0_234 = arith.constant 0 : index
    %827 = vector.load %arg11[%c2_233, %c0_234] : memref<16x128xf32, #tpu.memory_space<vmem>>, vector<2x128xf32>
    tpu.vector_store %arg11[%c2_233, %c0_234], %826 {strides = array<i32>} : memref<16x128xf32, #tpu.memory_space<vmem>>, vector<2x128xf32>,
    %828 = vector.extract_strided_slice %765 {offsets = [4, 0], sizes = [2, 512], strides = [1, 1]} : vector<16x512xf32> to vector<2x512xf32>
    %cst_235 = arith.constant dense<0.000000e+00> : vector<2x512xf32>
    %829 = tpu.matmul %826, %760, %cst_235 {dimension_numbers = #tpu.dot_dimension_numbers<[1], [0], [0], [1], [0, 0, 1, 1], [], []>} : vector<2x128xf32>, vector<128x512xf32>, vector<2x512xf32> -> vector<2x512xf32>
    %830 = arith.addf %828, %829 : vector<2x512xf32>
    %831 = vector.extract_strided_slice %830 {offsets = [0, 0], sizes = [2, 128], strides = [1, 1]} : vector<2x512xf32> to vector<2x128xf32>
    %832 = arith.negf %831 : vector<2x128xf32>
    %833 = math.exp %832 : vector<2x128xf32>
    %cst_236 = arith.constant 1.000000e+00 : f32
    %834 = vector.broadcast %cst_236 : f32 to vector<2x128xf32>
    %835 = arith.addf %834, %833 : vector<2x128xf32>
    %836 = arith.divf %834, %835 : vector<2x128xf32>
    %837 = vector.extract_strided_slice %830 {offsets = [0, 128], sizes = [2, 128], strides = [1, 1]} : vector<2x512xf32> to vector<2x128xf32>
    %838 = arith.negf %837 : vector<2x128xf32>
    %839 = math.exp %838 : vector<2x128xf32>
    %cst_237 = arith.constant 1.000000e+00 : f32
    %840 = vector.broadcast %cst_237 : f32 to vector<2x128xf32>
    %841 = arith.addf %840, %839 : vector<2x128xf32>
    %842 = arith.divf %840, %841 : vector<2x128xf32>
    %843 = vector.extract_strided_slice %830 {offsets = [0, 256], sizes = [2, 128], strides = [1, 1]} : vector<2x512xf32> to vector<2x128xf32>
    %844 = math.tanh %843 : vector<2x128xf32>
    %845 = vector.extract_strided_slice %830 {offsets = [0, 384], sizes = [2, 128], strides = [1, 1]} : vector<2x512xf32> to vector<2x128xf32>
    %846 = arith.negf %845 : vector<2x128xf32>
    %847 = math.exp %846 : vector<2x128xf32>
    %cst_238 = arith.constant 1.000000e+00 : f32
    %848 = vector.broadcast %cst_238 : f32 to vector<2x128xf32>
    %849 = arith.addf %848, %847 : vector<2x128xf32>
    %850 = arith.divf %848, %849 : vector<2x128xf32>
    %851 = arith.mulf %842, %824 : vector<2x128xf32>
    %852 = arith.mulf %836, %844 : vector<2x128xf32>
    %853 = arith.addf %851, %852 : vector<2x128xf32>
    %854 = math.tanh %853 : vector<2x128xf32>
    %855 = arith.mulf %850, %854 : vector<2x128xf32>
    %c4_239 = arith.constant 4 : index
    %c0_240 = arith.constant 0 : index
    %856 = vector.load %arg11[%c4_239, %c0_240] : memref<16x128xf32, #tpu.memory_space<vmem>>, vector<2x128xf32>
    tpu.vector_store %arg11[%c4_239, %c0_240], %855 {strides = array<i32>} : memref<16x128xf32, #tpu.memory_space<vmem>>, vector<2x128xf32>,
    %857 = vector.extract_strided_slice %765 {offsets = [6, 0], sizes = [2, 512], strides = [1, 1]} : vector<16x512xf32> to vector<2x512xf32>
    %cst_241 = arith.constant dense<0.000000e+00> : vector<2x512xf32>
    %858 = tpu.matmul %855, %760, %cst_241 {dimension_numbers = #tpu.dot_dimension_numbers<[1], [0], [0], [1], [0, 0, 1, 1], [], []>} : vector<2x128xf32>, vector<128x512xf32>, vector<2x512xf32> -> vector<2x512xf32>
    %859 = arith.addf %857, %858 : vector<2x512xf32>
    %860 = vector.extract_strided_slice %859 {offsets = [0, 0], sizes = [2, 128], strides = [1, 1]} : vector<2x512xf32> to vector<2x128xf32>
    %861 = arith.negf %860 : vector<2x128xf32>
    %862 = math.exp %861 : vector<2x128xf32>
    %cst_242 = arith.constant 1.000000e+00 : f32
    %863 = vector.broadcast %cst_242 : f32 to vector<2x128xf32>
    %864 = arith.addf %863, %862 : vector<2x128xf32>
    %865 = arith.divf %863, %864 : vector<2x128xf32>
    %866 = vector.extract_strided_slice %859 {offsets = [0, 128], sizes = [2, 128], strides = [1, 1]} : vector<2x512xf32> to vector<2x128xf32>
    %867 = arith.negf %866 : vector<2x128xf32>
    %868 = math.exp %867 : vector<2x128xf32>
    %cst_243 = arith.constant 1.000000e+00 : f32
    %869 = vector.broadcast %cst_243 : f32 to vector<2x128xf32>
    %870 = arith.addf %869, %868 : vector<2x128xf32>
    %871 = arith.divf %869, %870 : vector<2x128xf32>
    %872 = vector.extract_strided_slice %859 {offsets = [0, 256], sizes = [2, 128], strides = [1, 1]} : vector<2x512xf32> to vector<2x128xf32>
    %873 = math.tanh %872 : vector<2x128xf32>
    %874 = vector.extract_strided_slice %859 {offsets = [0, 384], sizes = [2, 128], strides = [1, 1]} : vector<2x512xf32> to vector<2x128xf32>
    %875 = arith.negf %874 : vector<2x128xf32>
    %876 = math.exp %875 : vector<2x128xf32>
    %cst_244 = arith.constant 1.000000e+00 : f32
    %877 = vector.broadcast %cst_244 : f32 to vector<2x128xf32>
    %878 = arith.addf %877, %876 : vector<2x128xf32>
    %879 = arith.divf %877, %878 : vector<2x128xf32>
    %880 = arith.mulf %871, %853 : vector<2x128xf32>
    %881 = arith.mulf %865, %873 : vector<2x128xf32>
    %882 = arith.addf %880, %881 : vector<2x128xf32>
    %883 = math.tanh %882 : vector<2x128xf32>
    %884 = arith.mulf %879, %883 : vector<2x128xf32>
    %c6_245 = arith.constant 6 : index
    %c0_246 = arith.constant 0 : index
    %885 = vector.load %arg11[%c6_245, %c0_246] : memref<16x128xf32, #tpu.memory_space<vmem>>, vector<2x128xf32>
    tpu.vector_store %arg11[%c6_245, %c0_246], %884 {strides = array<i32>} : memref<16x128xf32, #tpu.memory_space<vmem>>, vector<2x128xf32>,
    %886 = vector.extract_strided_slice %765 {offsets = [8, 0], sizes = [2, 512], strides = [1, 1]} : vector<16x512xf32> to vector<2x512xf32>
    %cst_247 = arith.constant dense<0.000000e+00> : vector<2x512xf32>
    %887 = tpu.matmul %884, %760, %cst_247 {dimension_numbers = #tpu.dot_dimension_numbers<[1], [0], [0], [1], [0, 0, 1, 1], [], []>} : vector<2x128xf32>, vector<128x512xf32>, vector<2x512xf32> -> vector<2x512xf32>
    %888 = arith.addf %886, %887 : vector<2x512xf32>
    %889 = vector.extract_strided_slice %888 {offsets = [0, 0], sizes = [2, 128], strides = [1, 1]} : vector<2x512xf32> to vector<2x128xf32>
    %890 = arith.negf %889 : vector<2x128xf32>
    %891 = math.exp %890 : vector<2x128xf32>
    %cst_248 = arith.constant 1.000000e+00 : f32
    %892 = vector.broadcast %cst_248 : f32 to vector<2x128xf32>
    %893 = arith.addf %892, %891 : vector<2x128xf32>
    %894 = arith.divf %892, %893 : vector<2x128xf32>
    %895 = vector.extract_strided_slice %888 {offsets = [0, 128], sizes = [2, 128], strides = [1, 1]} : vector<2x512xf32> to vector<2x128xf32>
    %896 = arith.negf %895 : vector<2x128xf32>
    %897 = math.exp %896 : vector<2x128xf32>
    %cst_249 = arith.constant 1.000000e+00 : f32
    %898 = vector.broadcast %cst_249 : f32 to vector<2x128xf32>
    %899 = arith.addf %898, %897 : vector<2x128xf32>
    %900 = arith.divf %898, %899 : vector<2x128xf32>
    %901 = vector.extract_strided_slice %888 {offsets = [0, 256], sizes = [2, 128], strides = [1, 1]} : vector<2x512xf32> to vector<2x128xf32>
    %902 = math.tanh %901 : vector<2x128xf32>
    %903 = vector.extract_strided_slice %888 {offsets = [0, 384], sizes = [2, 128], strides = [1, 1]} : vector<2x512xf32> to vector<2x128xf32>
    %904 = arith.negf %903 : vector<2x128xf32>
    %905 = math.exp %904 : vector<2x128xf32>
    %cst_250 = arith.constant 1.000000e+00 : f32
    %906 = vector.broadcast %cst_250 : f32 to vector<2x128xf32>
    %907 = arith.addf %906, %905 : vector<2x128xf32>
    %908 = arith.divf %906, %907 : vector<2x128xf32>
    %909 = arith.mulf %900, %882 : vector<2x128xf32>
    %910 = arith.mulf %894, %902 : vector<2x128xf32>
    %911 = arith.addf %909, %910 : vector<2x128xf32>
    %912 = math.tanh %911 : vector<2x128xf32>
    %913 = arith.mulf %908, %912 : vector<2x128xf32>
    %c8_251 = arith.constant 8 : index
    %c0_252 = arith.constant 0 : index
    %914 = vector.load %arg11[%c8_251, %c0_252] : memref<16x128xf32, #tpu.memory_space<vmem>>, vector<2x128xf32>
    tpu.vector_store %arg11[%c8_251, %c0_252], %913 {strides = array<i32>} : memref<16x128xf32, #tpu.memory_space<vmem>>, vector<2x128xf32>,
    %915 = vector.extract_strided_slice %765 {offsets = [10, 0], sizes = [2, 512], strides = [1, 1]} : vector<16x512xf32> to vector<2x512xf32>
    %cst_253 = arith.constant dense<0.000000e+00> : vector<2x512xf32>
    %916 = tpu.matmul %913, %760, %cst_253 {dimension_numbers = #tpu.dot_dimension_numbers<[1], [0], [0], [1], [0, 0, 1, 1], [], []>} : vector<2x128xf32>, vector<128x512xf32>, vector<2x512xf32> -> vector<2x512xf32>
    %917 = arith.addf %915, %916 : vector<2x512xf32>
    %918 = vector.extract_strided_slice %917 {offsets = [0, 0], sizes = [2, 128], strides = [1, 1]} : vector<2x512xf32> to vector<2x128xf32>
    %919 = arith.negf %918 : vector<2x128xf32>
    %920 = math.exp %919 : vector<2x128xf32>
    %cst_254 = arith.constant 1.000000e+00 : f32
    %921 = vector.broadcast %cst_254 : f32 to vector<2x128xf32>
    %922 = arith.addf %921, %920 : vector<2x128xf32>
    %923 = arith.divf %921, %922 : vector<2x128xf32>
    %924 = vector.extract_strided_slice %917 {offsets = [0, 128], sizes = [2, 128], strides = [1, 1]} : vector<2x512xf32> to vector<2x128xf32>
    %925 = arith.negf %924 : vector<2x128xf32>
    %926 = math.exp %925 : vector<2x128xf32>
    %cst_255 = arith.constant 1.000000e+00 : f32
    %927 = vector.broadcast %cst_255 : f32 to vector<2x128xf32>
    %928 = arith.addf %927, %926 : vector<2x128xf32>
    %929 = arith.divf %927, %928 : vector<2x128xf32>
    %930 = vector.extract_strided_slice %917 {offsets = [0, 256], sizes = [2, 128], strides = [1, 1]} : vector<2x512xf32> to vector<2x128xf32>
    %931 = math.tanh %930 : vector<2x128xf32>
    %932 = vector.extract_strided_slice %917 {offsets = [0, 384], sizes = [2, 128], strides = [1, 1]} : vector<2x512xf32> to vector<2x128xf32>
    %933 = arith.negf %932 : vector<2x128xf32>
    %934 = math.exp %933 : vector<2x128xf32>
    %cst_256 = arith.constant 1.000000e+00 : f32
    %935 = vector.broadcast %cst_256 : f32 to vector<2x128xf32>
    %936 = arith.addf %935, %934 : vector<2x128xf32>
    %937 = arith.divf %935, %936 : vector<2x128xf32>
    %938 = arith.mulf %929, %911 : vector<2x128xf32>
    %939 = arith.mulf %923, %931 : vector<2x128xf32>
    %940 = arith.addf %938, %939 : vector<2x128xf32>
    %941 = math.tanh %940 : vector<2x128xf32>
    %942 = arith.mulf %937, %941 : vector<2x128xf32>
    %c10_257 = arith.constant 10 : index
    %c0_258 = arith.constant 0 : index
    %943 = vector.load %arg11[%c10_257, %c0_258] : memref<16x128xf32, #tpu.memory_space<vmem>>, vector<2x128xf32>
    tpu.vector_store %arg11[%c10_257, %c0_258], %942 {strides = array<i32>} : memref<16x128xf32, #tpu.memory_space<vmem>>, vector<2x128xf32>,
    %944 = vector.extract_strided_slice %765 {offsets = [12, 0], sizes = [2, 512], strides = [1, 1]} : vector<16x512xf32> to vector<2x512xf32>
    %cst_259 = arith.constant dense<0.000000e+00> : vector<2x512xf32>
    %945 = tpu.matmul %942, %760, %cst_259 {dimension_numbers = #tpu.dot_dimension_numbers<[1], [0], [0], [1], [0, 0, 1, 1], [], []>} : vector<2x128xf32>, vector<128x512xf32>, vector<2x512xf32> -> vector<2x512xf32>
    %946 = arith.addf %944, %945 : vector<2x512xf32>
    %947 = vector.extract_strided_slice %946 {offsets = [0, 0], sizes = [2, 128], strides = [1, 1]} : vector<2x512xf32> to vector<2x128xf32>
    %948 = arith.negf %947 : vector<2x128xf32>
    %949 = math.exp %948 : vector<2x128xf32>
    %cst_260 = arith.constant 1.000000e+00 : f32
    %950 = vector.broadcast %cst_260 : f32 to vector<2x128xf32>
    %951 = arith.addf %950, %949 : vector<2x128xf32>
    %952 = arith.divf %950, %951 : vector<2x128xf32>
    %953 = vector.extract_strided_slice %946 {offsets = [0, 128], sizes = [2, 128], strides = [1, 1]} : vector<2x512xf32> to vector<2x128xf32>
    %954 = arith.negf %953 : vector<2x128xf32>
    %955 = math.exp %954 : vector<2x128xf32>
    %cst_261 = arith.constant 1.000000e+00 : f32
    %956 = vector.broadcast %cst_261 : f32 to vector<2x128xf32>
    %957 = arith.addf %956, %955 : vector<2x128xf32>
    %958 = arith.divf %956, %957 : vector<2x128xf32>
    %959 = vector.extract_strided_slice %946 {offsets = [0, 256], sizes = [2, 128], strides = [1, 1]} : vector<2x512xf32> to vector<2x128xf32>
    %960 = math.tanh %959 : vector<2x128xf32>
    %961 = vector.extract_strided_slice %946 {offsets = [0, 384], sizes = [2, 128], strides = [1, 1]} : vector<2x512xf32> to vector<2x128xf32>
    %962 = arith.negf %961 : vector<2x128xf32>
    %963 = math.exp %962 : vector<2x128xf32>
    %cst_262 = arith.constant 1.000000e+00 : f32
    %964 = vector.broadcast %cst_262 : f32 to vector<2x128xf32>
    %965 = arith.addf %964, %963 : vector<2x128xf32>
    %966 = arith.divf %964, %965 : vector<2x128xf32>
    %967 = arith.mulf %958, %940 : vector<2x128xf32>
    %968 = arith.mulf %952, %960 : vector<2x128xf32>
    %969 = arith.addf %967, %968 : vector<2x128xf32>
    %970 = math.tanh %969 : vector<2x128xf32>
    %971 = arith.mulf %966, %970 : vector<2x128xf32>
    %c12_263 = arith.constant 12 : index
    %c0_264 = arith.constant 0 : index
    %972 = vector.load %arg11[%c12_263, %c0_264] : memref<16x128xf32, #tpu.memory_space<vmem>>, vector<2x128xf32>
    tpu.vector_store %arg11[%c12_263, %c0_264], %971 {strides = array<i32>} : memref<16x128xf32, #tpu.memory_space<vmem>>, vector<2x128xf32>,
    %973 = vector.extract_strided_slice %765 {offsets = [14, 0], sizes = [2, 512], strides = [1, 1]} : vector<16x512xf32> to vector<2x512xf32>
    %cst_265 = arith.constant dense<0.000000e+00> : vector<2x512xf32>
    %974 = tpu.matmul %971, %760, %cst_265 {dimension_numbers = #tpu.dot_dimension_numbers<[1], [0], [0], [1], [0, 0, 1, 1], [], []>} : vector<2x128xf32>, vector<128x512xf32>, vector<2x512xf32> -> vector<2x512xf32>
    %975 = arith.addf %973, %974 : vector<2x512xf32>
    %976 = vector.extract_strided_slice %975 {offsets = [0, 0], sizes = [2, 128], strides = [1, 1]} : vector<2x512xf32> to vector<2x128xf32>
    %977 = arith.negf %976 : vector<2x128xf32>
    %978 = math.exp %977 : vector<2x128xf32>
    %cst_266 = arith.constant 1.000000e+00 : f32
    %979 = vector.broadcast %cst_266 : f32 to vector<2x128xf32>
    %980 = arith.addf %979, %978 : vector<2x128xf32>
    %981 = arith.divf %979, %980 : vector<2x128xf32>
    %982 = vector.extract_strided_slice %975 {offsets = [0, 128], sizes = [2, 128], strides = [1, 1]} : vector<2x512xf32> to vector<2x128xf32>
    %983 = arith.negf %982 : vector<2x128xf32>
    %984 = math.exp %983 : vector<2x128xf32>
    %cst_267 = arith.constant 1.000000e+00 : f32
    %985 = vector.broadcast %cst_267 : f32 to vector<2x128xf32>
    %986 = arith.addf %985, %984 : vector<2x128xf32>
    %987 = arith.divf %985, %986 : vector<2x128xf32>
    %988 = vector.extract_strided_slice %975 {offsets = [0, 256], sizes = [2, 128], strides = [1, 1]} : vector<2x512xf32> to vector<2x128xf32>
    %989 = math.tanh %988 : vector<2x128xf32>
    %990 = vector.extract_strided_slice %975 {offsets = [0, 384], sizes = [2, 128], strides = [1, 1]} : vector<2x512xf32> to vector<2x128xf32>
    %991 = arith.negf %990 : vector<2x128xf32>
    %992 = math.exp %991 : vector<2x128xf32>
    %cst_268 = arith.constant 1.000000e+00 : f32
    %993 = vector.broadcast %cst_268 : f32 to vector<2x128xf32>
    %994 = arith.addf %993, %992 : vector<2x128xf32>
    %995 = arith.divf %993, %994 : vector<2x128xf32>
    %996 = arith.mulf %987, %969 : vector<2x128xf32>
    %997 = arith.mulf %981, %989 : vector<2x128xf32>
    %998 = arith.addf %996, %997 : vector<2x128xf32>
    %999 = math.tanh %998 : vector<2x128xf32>
    %1000 = arith.mulf %995, %999 : vector<2x128xf32>
    %c14_269 = arith.constant 14 : index
    %c0_270 = arith.constant 0 : index
    %1001 = vector.load %arg11[%c14_269, %c0_270] : memref<16x128xf32, #tpu.memory_space<vmem>>, vector<2x128xf32>
    tpu.vector_store %arg11[%c14_269, %c0_270], %1000 {strides = array<i32>} : memref<16x128xf32, #tpu.memory_space<vmem>>, vector<2x128xf32>,
    %c3_271 = arith.constant 3 : index
    %c0_272 = arith.constant 0 : index
    %c0_273 = arith.constant 0 : index
    %1002 = vector.load %arg9[%c3_271, %c0_272, %c0_273] : memref<5x2x128xf32, #tpu.memory_space<vmem>>, vector<1x2x128xf32>
    %1003 = vector.shape_cast %1002 : vector<1x2x128xf32> to vector<2x128xf32>
    %1004 = vector.shape_cast %1000 : vector<2x128xf32> to vector<1x2x128xf32>
    tpu.vector_store %arg9[%c3_271, %c0_272, %c0_273], %1004 {strides = array<i32>} : memref<5x2x128xf32, #tpu.memory_space<vmem>>, vector<1x2x128xf32>,
    %c3_274 = arith.constant 3 : index
    %c0_275 = arith.constant 0 : index
    %c0_276 = arith.constant 0 : index
    %1005 = vector.load %arg10[%c3_274, %c0_275, %c0_276] : memref<5x2x128xf32, #tpu.memory_space<vmem>>, vector<1x2x128xf32>
    %1006 = vector.shape_cast %1005 : vector<1x2x128xf32> to vector<2x128xf32>
    %1007 = vector.shape_cast %998 : vector<2x128xf32> to vector<1x2x128xf32>
    tpu.vector_store %arg10[%c3_274, %c0_275, %c0_276], %1007 {strides = array<i32>} : memref<5x2x128xf32, #tpu.memory_space<vmem>>, vector<1x2x128xf32>,
    %c0_277 = arith.constant 0 : index
    %c0_278 = arith.constant 0 : index
    %1008 = vector.load %arg11[%c0_277, %c0_278] : memref<16x128xf32, #tpu.memory_space<vmem>>, vector<16x128xf32>
    %c4_279 = arith.constant 4 : index
    %c0_280 = arith.constant 0 : index
    %c0_281 = arith.constant 0 : index
    %1009 = vector.load %arg3[%c4_279, %c0_280, %c0_281] : memref<5x128x512xf32, #tpu.memory_space<vmem>>, vector<1x128x512xf32>
    %1010 = vector.shape_cast %1009 : vector<1x128x512xf32> to vector<128x512xf32>
    %c4_282 = arith.constant 4 : index
    %c0_283 = arith.constant 0 : index
    %c0_284 = arith.constant 0 : index
    %1011 = vector.load %arg4[%c4_282, %c0_283, %c0_284] : memref<5x128x512xf32, #tpu.memory_space<vmem>>, vector<1x128x512xf32>
    %1012 = vector.shape_cast %1011 : vector<1x128x512xf32> to vector<128x512xf32>
    %c4_285 = arith.constant 4 : index
    %c0_286 = arith.constant 0 : index
    %c0_287 = arith.constant 0 : index
    %1013 = vector.load %arg5[%c4_285, %c0_286, %c0_287] : memref<5x1x512xf32, #tpu.memory_space<vmem>>, vector<1x1x512xf32>
    %1014 = vector.shape_cast %1013 : vector<1x1x512xf32> to vector<1x512xf32>
    %cst_288 = arith.constant dense<0.000000e+00> : vector<16x512xf32>
    %1015 = tpu.matmul %1008, %1010, %cst_288 {dimension_numbers = #tpu.dot_dimension_numbers<[1], [0], [0], [1], [0, 0, 1, 1], [], []>} : vector<16x128xf32>, vector<128x512xf32>, vector<16x512xf32> -> vector<16x512xf32>
    %1016 = vector.broadcast %1014 : vector<1x512xf32> to vector<16x512xf32>
    %1017 = arith.addf %1015, %1016 : vector<16x512xf32>
    %c4_289 = arith.constant 4 : index
    %c0_290 = arith.constant 0 : index
    %c0_291 = arith.constant 0 : index
    %1018 = vector.load %arg1[%c4_289, %c0_290, %c0_291] : memref<5x2x128xf32, #tpu.memory_space<vmem>>, vector<1x2x128xf32>
    %1019 = vector.shape_cast %1018 : vector<1x2x128xf32> to vector<2x128xf32>
    %c4_292 = arith.constant 4 : index
    %c0_293 = arith.constant 0 : index
    %c0_294 = arith.constant 0 : index
    %1020 = vector.load %arg2[%c4_292, %c0_293, %c0_294] : memref<5x2x128xf32, #tpu.memory_space<vmem>>, vector<1x2x128xf32>
    %1021 = vector.shape_cast %1020 : vector<1x2x128xf32> to vector<2x128xf32>
    %1022 = vector.extract_strided_slice %1017 {offsets = [0, 0], sizes = [2, 512], strides = [1, 1]} : vector<16x512xf32> to vector<2x512xf32>
    %cst_295 = arith.constant dense<0.000000e+00> : vector<2x512xf32>
    %1023 = tpu.matmul %1019, %1012, %cst_295 {dimension_numbers = #tpu.dot_dimension_numbers<[1], [0], [0], [1], [0, 0, 1, 1], [], []>} : vector<2x128xf32>, vector<128x512xf32>, vector<2x512xf32> -> vector<2x512xf32>
    %1024 = arith.addf %1022, %1023 : vector<2x512xf32>
    %1025 = vector.extract_strided_slice %1024 {offsets = [0, 0], sizes = [2, 128], strides = [1, 1]} : vector<2x512xf32> to vector<2x128xf32>
    %1026 = arith.negf %1025 : vector<2x128xf32>
    %1027 = math.exp %1026 : vector<2x128xf32>
    %cst_296 = arith.constant 1.000000e+00 : f32
    %1028 = vector.broadcast %cst_296 : f32 to vector<2x128xf32>
    %1029 = arith.addf %1028, %1027 : vector<2x128xf32>
    %1030 = arith.divf %1028, %1029 : vector<2x128xf32>
    %1031 = vector.extract_strided_slice %1024 {offsets = [0, 128], sizes = [2, 128], strides = [1, 1]} : vector<2x512xf32> to vector<2x128xf32>
    %1032 = arith.negf %1031 : vector<2x128xf32>
    %1033 = math.exp %1032 : vector<2x128xf32>
    %cst_297 = arith.constant 1.000000e+00 : f32
    %1034 = vector.broadcast %cst_297 : f32 to vector<2x128xf32>
    %1035 = arith.addf %1034, %1033 : vector<2x128xf32>
    %1036 = arith.divf %1034, %1035 : vector<2x128xf32>
    %1037 = vector.extract_strided_slice %1024 {offsets = [0, 256], sizes = [2, 128], strides = [1, 1]} : vector<2x512xf32> to vector<2x128xf32>
    %1038 = math.tanh %1037 : vector<2x128xf32>
    %1039 = vector.extract_strided_slice %1024 {offsets = [0, 384], sizes = [2, 128], strides = [1, 1]} : vector<2x512xf32> to vector<2x128xf32>
    %1040 = arith.negf %1039 : vector<2x128xf32>
    %1041 = math.exp %1040 : vector<2x128xf32>
    %cst_298 = arith.constant 1.000000e+00 : f32
    %1042 = vector.broadcast %cst_298 : f32 to vector<2x128xf32>
    %1043 = arith.addf %1042, %1041 : vector<2x128xf32>
    %1044 = arith.divf %1042, %1043 : vector<2x128xf32>
    %1045 = arith.mulf %1036, %1021 : vector<2x128xf32>
    %1046 = arith.mulf %1030, %1038 : vector<2x128xf32>
    %1047 = arith.addf %1045, %1046 : vector<2x128xf32>
    %1048 = math.tanh %1047 : vector<2x128xf32>
    %1049 = arith.mulf %1044, %1048 : vector<2x128xf32>
    %c0_299 = arith.constant 0 : index
    %c0_300 = arith.constant 0 : index
    %1050 = vector.load %arg11[%c0_299, %c0_300] : memref<16x128xf32, #tpu.memory_space<vmem>>, vector<2x128xf32>
    tpu.vector_store %arg11[%c0_299, %c0_300], %1049 {strides = array<i32>} : memref<16x128xf32, #tpu.memory_space<vmem>>, vector<2x128xf32>,
    %1051 = vector.extract_strided_slice %1017 {offsets = [2, 0], sizes = [2, 512], strides = [1, 1]} : vector<16x512xf32> to vector<2x512xf32>
    %cst_301 = arith.constant dense<0.000000e+00> : vector<2x512xf32>
    %1052 = tpu.matmul %1049, %1012, %cst_301 {dimension_numbers = #tpu.dot_dimension_numbers<[1], [0], [0], [1], [0, 0, 1, 1], [], []>} : vector<2x128xf32>, vector<128x512xf32>, vector<2x512xf32> -> vector<2x512xf32>
    %1053 = arith.addf %1051, %1052 : vector<2x512xf32>
    %1054 = vector.extract_strided_slice %1053 {offsets = [0, 0], sizes = [2, 128], strides = [1, 1]} : vector<2x512xf32> to vector<2x128xf32>
    %1055 = arith.negf %1054 : vector<2x128xf32>
    %1056 = math.exp %1055 : vector<2x128xf32>
    %cst_302 = arith.constant 1.000000e+00 : f32
    %1057 = vector.broadcast %cst_302 : f32 to vector<2x128xf32>
    %1058 = arith.addf %1057, %1056 : vector<2x128xf32>
    %1059 = arith.divf %1057, %1058 : vector<2x128xf32>
    %1060 = vector.extract_strided_slice %1053 {offsets = [0, 128], sizes = [2, 128], strides = [1, 1]} : vector<2x512xf32> to vector<2x128xf32>
    %1061 = arith.negf %1060 : vector<2x128xf32>
    %1062 = math.exp %1061 : vector<2x128xf32>
    %cst_303 = arith.constant 1.000000e+00 : f32
    %1063 = vector.broadcast %cst_303 : f32 to vector<2x128xf32>
    %1064 = arith.addf %1063, %1062 : vector<2x128xf32>
    %1065 = arith.divf %1063, %1064 : vector<2x128xf32>
    %1066 = vector.extract_strided_slice %1053 {offsets = [0, 256], sizes = [2, 128], strides = [1, 1]} : vector<2x512xf32> to vector<2x128xf32>
    %1067 = math.tanh %1066 : vector<2x128xf32>
    %1068 = vector.extract_strided_slice %1053 {offsets = [0, 384], sizes = [2, 128], strides = [1, 1]} : vector<2x512xf32> to vector<2x128xf32>
    %1069 = arith.negf %1068 : vector<2x128xf32>
    %1070 = math.exp %1069 : vector<2x128xf32>
    %cst_304 = arith.constant 1.000000e+00 : f32
    %1071 = vector.broadcast %cst_304 : f32 to vector<2x128xf32>
    %1072 = arith.addf %1071, %1070 : vector<2x128xf32>
    %1073 = arith.divf %1071, %1072 : vector<2x128xf32>
    %1074 = arith.mulf %1065, %1047 : vector<2x128xf32>
    %1075 = arith.mulf %1059, %1067 : vector<2x128xf32>
    %1076 = arith.addf %1074, %1075 : vector<2x128xf32>
    %1077 = math.tanh %1076 : vector<2x128xf32>
    %1078 = arith.mulf %1073, %1077 : vector<2x128xf32>
    %c2_305 = arith.constant 2 : index
    %c0_306 = arith.constant 0 : index
    %1079 = vector.load %arg11[%c2_305, %c0_306] : memref<16x128xf32, #tpu.memory_space<vmem>>, vector<2x128xf32>
    tpu.vector_store %arg11[%c2_305, %c0_306], %1078 {strides = array<i32>} : memref<16x128xf32, #tpu.memory_space<vmem>>, vector<2x128xf32>,
    %1080 = vector.extract_strided_slice %1017 {offsets = [4, 0], sizes = [2, 512], strides = [1, 1]} : vector<16x512xf32> to vector<2x512xf32>
    %cst_307 = arith.constant dense<0.000000e+00> : vector<2x512xf32>
    %1081 = tpu.matmul %1078, %1012, %cst_307 {dimension_numbers = #tpu.dot_dimension_numbers<[1], [0], [0], [1], [0, 0, 1, 1], [], []>} : vector<2x128xf32>, vector<128x512xf32>, vector<2x512xf32> -> vector<2x512xf32>
    %1082 = arith.addf %1080, %1081 : vector<2x512xf32>
    %1083 = vector.extract_strided_slice %1082 {offsets = [0, 0], sizes = [2, 128], strides = [1, 1]} : vector<2x512xf32> to vector<2x128xf32>
    %1084 = arith.negf %1083 : vector<2x128xf32>
    %1085 = math.exp %1084 : vector<2x128xf32>
    %cst_308 = arith.constant 1.000000e+00 : f32
    %1086 = vector.broadcast %cst_308 : f32 to vector<2x128xf32>
    %1087 = arith.addf %1086, %1085 : vector<2x128xf32>
    %1088 = arith.divf %1086, %1087 : vector<2x128xf32>
    %1089 = vector.extract_strided_slice %1082 {offsets = [0, 128], sizes = [2, 128], strides = [1, 1]} : vector<2x512xf32> to vector<2x128xf32>
    %1090 = arith.negf %1089 : vector<2x128xf32>
    %1091 = math.exp %1090 : vector<2x128xf32>
    %cst_309 = arith.constant 1.000000e+00 : f32
    %1092 = vector.broadcast %cst_309 : f32 to vector<2x128xf32>
    %1093 = arith.addf %1092, %1091 : vector<2x128xf32>
    %1094 = arith.divf %1092, %1093 : vector<2x128xf32>
    %1095 = vector.extract_strided_slice %1082 {offsets = [0, 256], sizes = [2, 128], strides = [1, 1]} : vector<2x512xf32> to vector<2x128xf32>
    %1096 = math.tanh %1095 : vector<2x128xf32>
    %1097 = vector.extract_strided_slice %1082 {offsets = [0, 384], sizes = [2, 128], strides = [1, 1]} : vector<2x512xf32> to vector<2x128xf32>
    %1098 = arith.negf %1097 : vector<2x128xf32>
    %1099 = math.exp %1098 : vector<2x128xf32>
    %cst_310 = arith.constant 1.000000e+00 : f32
    %1100 = vector.broadcast %cst_310 : f32 to vector<2x128xf32>
    %1101 = arith.addf %1100, %1099 : vector<2x128xf32>
    %1102 = arith.divf %1100, %1101 : vector<2x128xf32>
    %1103 = arith.mulf %1094, %1076 : vector<2x128xf32>
    %1104 = arith.mulf %1088, %1096 : vector<2x128xf32>
    %1105 = arith.addf %1103, %1104 : vector<2x128xf32>
    %1106 = math.tanh %1105 : vector<2x128xf32>
    %1107 = arith.mulf %1102, %1106 : vector<2x128xf32>
    %c4_311 = arith.constant 4 : index
    %c0_312 = arith.constant 0 : index
    %1108 = vector.load %arg11[%c4_311, %c0_312] : memref<16x128xf32, #tpu.memory_space<vmem>>, vector<2x128xf32>
    tpu.vector_store %arg11[%c4_311, %c0_312], %1107 {strides = array<i32>} : memref<16x128xf32, #tpu.memory_space<vmem>>, vector<2x128xf32>,
    %1109 = vector.extract_strided_slice %1017 {offsets = [6, 0], sizes = [2, 512], strides = [1, 1]} : vector<16x512xf32> to vector<2x512xf32>
    %cst_313 = arith.constant dense<0.000000e+00> : vector<2x512xf32>
    %1110 = tpu.matmul %1107, %1012, %cst_313 {dimension_numbers = #tpu.dot_dimension_numbers<[1], [0], [0], [1], [0, 0, 1, 1], [], []>} : vector<2x128xf32>, vector<128x512xf32>, vector<2x512xf32> -> vector<2x512xf32>
    %1111 = arith.addf %1109, %1110 : vector<2x512xf32>
    %1112 = vector.extract_strided_slice %1111 {offsets = [0, 0], sizes = [2, 128], strides = [1, 1]} : vector<2x512xf32> to vector<2x128xf32>
    %1113 = arith.negf %1112 : vector<2x128xf32>
    %1114 = math.exp %1113 : vector<2x128xf32>
    %cst_314 = arith.constant 1.000000e+00 : f32
    %1115 = vector.broadcast %cst_314 : f32 to vector<2x128xf32>
    %1116 = arith.addf %1115, %1114 : vector<2x128xf32>
    %1117 = arith.divf %1115, %1116 : vector<2x128xf32>
    %1118 = vector.extract_strided_slice %1111 {offsets = [0, 128], sizes = [2, 128], strides = [1, 1]} : vector<2x512xf32> to vector<2x128xf32>
    %1119 = arith.negf %1118 : vector<2x128xf32>
    %1120 = math.exp %1119 : vector<2x128xf32>
    %cst_315 = arith.constant 1.000000e+00 : f32
    %1121 = vector.broadcast %cst_315 : f32 to vector<2x128xf32>
    %1122 = arith.addf %1121, %1120 : vector<2x128xf32>
    %1123 = arith.divf %1121, %1122 : vector<2x128xf32>
    %1124 = vector.extract_strided_slice %1111 {offsets = [0, 256], sizes = [2, 128], strides = [1, 1]} : vector<2x512xf32> to vector<2x128xf32>
    %1125 = math.tanh %1124 : vector<2x128xf32>
    %1126 = vector.extract_strided_slice %1111 {offsets = [0, 384], sizes = [2, 128], strides = [1, 1]} : vector<2x512xf32> to vector<2x128xf32>
    %1127 = arith.negf %1126 : vector<2x128xf32>
    %1128 = math.exp %1127 : vector<2x128xf32>
    %cst_316 = arith.constant 1.000000e+00 : f32
    %1129 = vector.broadcast %cst_316 : f32 to vector<2x128xf32>
    %1130 = arith.addf %1129, %1128 : vector<2x128xf32>
    %1131 = arith.divf %1129, %1130 : vector<2x128xf32>
    %1132 = arith.mulf %1123, %1105 : vector<2x128xf32>
    %1133 = arith.mulf %1117, %1125 : vector<2x128xf32>
    %1134 = arith.addf %1132, %1133 : vector<2x128xf32>
    %1135 = math.tanh %1134 : vector<2x128xf32>
    %1136 = arith.mulf %1131, %1135 : vector<2x128xf32>
    %c6_317 = arith.constant 6 : index
    %c0_318 = arith.constant 0 : index
    %1137 = vector.load %arg11[%c6_317, %c0_318] : memref<16x128xf32, #tpu.memory_space<vmem>>, vector<2x128xf32>
    tpu.vector_store %arg11[%c6_317, %c0_318], %1136 {strides = array<i32>} : memref<16x128xf32, #tpu.memory_space<vmem>>, vector<2x128xf32>,
    %1138 = vector.extract_strided_slice %1017 {offsets = [8, 0], sizes = [2, 512], strides = [1, 1]} : vector<16x512xf32> to vector<2x512xf32>
    %cst_319 = arith.constant dense<0.000000e+00> : vector<2x512xf32>
    %1139 = tpu.matmul %1136, %1012, %cst_319 {dimension_numbers = #tpu.dot_dimension_numbers<[1], [0], [0], [1], [0, 0, 1, 1], [], []>} : vector<2x128xf32>, vector<128x512xf32>, vector<2x512xf32> -> vector<2x512xf32>
    %1140 = arith.addf %1138, %1139 : vector<2x512xf32>
    %1141 = vector.extract_strided_slice %1140 {offsets = [0, 0], sizes = [2, 128], strides = [1, 1]} : vector<2x512xf32> to vector<2x128xf32>
    %1142 = arith.negf %1141 : vector<2x128xf32>
    %1143 = math.exp %1142 : vector<2x128xf32>
    %cst_320 = arith.constant 1.000000e+00 : f32
    %1144 = vector.broadcast %cst_320 : f32 to vector<2x128xf32>
    %1145 = arith.addf %1144, %1143 : vector<2x128xf32>
    %1146 = arith.divf %1144, %1145 : vector<2x128xf32>
    %1147 = vector.extract_strided_slice %1140 {offsets = [0, 128], sizes = [2, 128], strides = [1, 1]} : vector<2x512xf32> to vector<2x128xf32>
    %1148 = arith.negf %1147 : vector<2x128xf32>
    %1149 = math.exp %1148 : vector<2x128xf32>
    %cst_321 = arith.constant 1.000000e+00 : f32
    %1150 = vector.broadcast %cst_321 : f32 to vector<2x128xf32>
    %1151 = arith.addf %1150, %1149 : vector<2x128xf32>
    %1152 = arith.divf %1150, %1151 : vector<2x128xf32>
    %1153 = vector.extract_strided_slice %1140 {offsets = [0, 256], sizes = [2, 128], strides = [1, 1]} : vector<2x512xf32> to vector<2x128xf32>
    %1154 = math.tanh %1153 : vector<2x128xf32>
    %1155 = vector.extract_strided_slice %1140 {offsets = [0, 384], sizes = [2, 128], strides = [1, 1]} : vector<2x512xf32> to vector<2x128xf32>
    %1156 = arith.negf %1155 : vector<2x128xf32>
    %1157 = math.exp %1156 : vector<2x128xf32>
    %cst_322 = arith.constant 1.000000e+00 : f32
    %1158 = vector.broadcast %cst_322 : f32 to vector<2x128xf32>
    %1159 = arith.addf %1158, %1157 : vector<2x128xf32>
    %1160 = arith.divf %1158, %1159 : vector<2x128xf32>
    %1161 = arith.mulf %1152, %1134 : vector<2x128xf32>
    %1162 = arith.mulf %1146, %1154 : vector<2x128xf32>
    %1163 = arith.addf %1161, %1162 : vector<2x128xf32>
    %1164 = math.tanh %1163 : vector<2x128xf32>
    %1165 = arith.mulf %1160, %1164 : vector<2x128xf32>
    %c8_323 = arith.constant 8 : index
    %c0_324 = arith.constant 0 : index
    %1166 = vector.load %arg11[%c8_323, %c0_324] : memref<16x128xf32, #tpu.memory_space<vmem>>, vector<2x128xf32>
    tpu.vector_store %arg11[%c8_323, %c0_324], %1165 {strides = array<i32>} : memref<16x128xf32, #tpu.memory_space<vmem>>, vector<2x128xf32>,
    %1167 = vector.extract_strided_slice %1017 {offsets = [10, 0], sizes = [2, 512], strides = [1, 1]} : vector<16x512xf32> to vector<2x512xf32>
    %cst_325 = arith.constant dense<0.000000e+00> : vector<2x512xf32>
    %1168 = tpu.matmul %1165, %1012, %cst_325 {dimension_numbers = #tpu.dot_dimension_numbers<[1], [0], [0], [1], [0, 0, 1, 1], [], []>} : vector<2x128xf32>, vector<128x512xf32>, vector<2x512xf32> -> vector<2x512xf32>
    %1169 = arith.addf %1167, %1168 : vector<2x512xf32>
    %1170 = vector.extract_strided_slice %1169 {offsets = [0, 0], sizes = [2, 128], strides = [1, 1]} : vector<2x512xf32> to vector<2x128xf32>
    %1171 = arith.negf %1170 : vector<2x128xf32>
    %1172 = math.exp %1171 : vector<2x128xf32>
    %cst_326 = arith.constant 1.000000e+00 : f32
    %1173 = vector.broadcast %cst_326 : f32 to vector<2x128xf32>
    %1174 = arith.addf %1173, %1172 : vector<2x128xf32>
    %1175 = arith.divf %1173, %1174 : vector<2x128xf32>
    %1176 = vector.extract_strided_slice %1169 {offsets = [0, 128], sizes = [2, 128], strides = [1, 1]} : vector<2x512xf32> to vector<2x128xf32>
    %1177 = arith.negf %1176 : vector<2x128xf32>
    %1178 = math.exp %1177 : vector<2x128xf32>
    %cst_327 = arith.constant 1.000000e+00 : f32
    %1179 = vector.broadcast %cst_327 : f32 to vector<2x128xf32>
    %1180 = arith.addf %1179, %1178 : vector<2x128xf32>
    %1181 = arith.divf %1179, %1180 : vector<2x128xf32>
    %1182 = vector.extract_strided_slice %1169 {offsets = [0, 256], sizes = [2, 128], strides = [1, 1]} : vector<2x512xf32> to vector<2x128xf32>
    %1183 = math.tanh %1182 : vector<2x128xf32>
    %1184 = vector.extract_strided_slice %1169 {offsets = [0, 384], sizes = [2, 128], strides = [1, 1]} : vector<2x512xf32> to vector<2x128xf32>
    %1185 = arith.negf %1184 : vector<2x128xf32>
    %1186 = math.exp %1185 : vector<2x128xf32>
    %cst_328 = arith.constant 1.000000e+00 : f32
    %1187 = vector.broadcast %cst_328 : f32 to vector<2x128xf32>
    %1188 = arith.addf %1187, %1186 : vector<2x128xf32>
    %1189 = arith.divf %1187, %1188 : vector<2x128xf32>
    %1190 = arith.mulf %1181, %1163 : vector<2x128xf32>
    %1191 = arith.mulf %1175, %1183 : vector<2x128xf32>
    %1192 = arith.addf %1190, %1191 : vector<2x128xf32>
    %1193 = math.tanh %1192 : vector<2x128xf32>
    %1194 = arith.mulf %1189, %1193 : vector<2x128xf32>
    %c10_329 = arith.constant 10 : index
    %c0_330 = arith.constant 0 : index
    %1195 = vector.load %arg11[%c10_329, %c0_330] : memref<16x128xf32, #tpu.memory_space<vmem>>, vector<2x128xf32>
    tpu.vector_store %arg11[%c10_329, %c0_330], %1194 {strides = array<i32>} : memref<16x128xf32, #tpu.memory_space<vmem>>, vector<2x128xf32>,
    %1196 = vector.extract_strided_slice %1017 {offsets = [12, 0], sizes = [2, 512], strides = [1, 1]} : vector<16x512xf32> to vector<2x512xf32>
    %cst_331 = arith.constant dense<0.000000e+00> : vector<2x512xf32>
    %1197 = tpu.matmul %1194, %1012, %cst_331 {dimension_numbers = #tpu.dot_dimension_numbers<[1], [0], [0], [1], [0, 0, 1, 1], [], []>} : vector<2x128xf32>, vector<128x512xf32>, vector<2x512xf32> -> vector<2x512xf32>
    %1198 = arith.addf %1196, %1197 : vector<2x512xf32>
    %1199 = vector.extract_strided_slice %1198 {offsets = [0, 0], sizes = [2, 128], strides = [1, 1]} : vector<2x512xf32> to vector<2x128xf32>
    %1200 = arith.negf %1199 : vector<2x128xf32>
    %1201 = math.exp %1200 : vector<2x128xf32>
    %cst_332 = arith.constant 1.000000e+00 : f32
    %1202 = vector.broadcast %cst_332 : f32 to vector<2x128xf32>
    %1203 = arith.addf %1202, %1201 : vector<2x128xf32>
    %1204 = arith.divf %1202, %1203 : vector<2x128xf32>
    %1205 = vector.extract_strided_slice %1198 {offsets = [0, 128], sizes = [2, 128], strides = [1, 1]} : vector<2x512xf32> to vector<2x128xf32>
    %1206 = arith.negf %1205 : vector<2x128xf32>
    %1207 = math.exp %1206 : vector<2x128xf32>
    %cst_333 = arith.constant 1.000000e+00 : f32
    %1208 = vector.broadcast %cst_333 : f32 to vector<2x128xf32>
    %1209 = arith.addf %1208, %1207 : vector<2x128xf32>
    %1210 = arith.divf %1208, %1209 : vector<2x128xf32>
    %1211 = vector.extract_strided_slice %1198 {offsets = [0, 256], sizes = [2, 128], strides = [1, 1]} : vector<2x512xf32> to vector<2x128xf32>
    %1212 = math.tanh %1211 : vector<2x128xf32>
    %1213 = vector.extract_strided_slice %1198 {offsets = [0, 384], sizes = [2, 128], strides = [1, 1]} : vector<2x512xf32> to vector<2x128xf32>
    %1214 = arith.negf %1213 : vector<2x128xf32>
    %1215 = math.exp %1214 : vector<2x128xf32>
    %cst_334 = arith.constant 1.000000e+00 : f32
    %1216 = vector.broadcast %cst_334 : f32 to vector<2x128xf32>
    %1217 = arith.addf %1216, %1215 : vector<2x128xf32>
    %1218 = arith.divf %1216, %1217 : vector<2x128xf32>
    %1219 = arith.mulf %1210, %1192 : vector<2x128xf32>
    %1220 = arith.mulf %1204, %1212 : vector<2x128xf32>
    %1221 = arith.addf %1219, %1220 : vector<2x128xf32>
    %1222 = math.tanh %1221 : vector<2x128xf32>
    %1223 = arith.mulf %1218, %1222 : vector<2x128xf32>
    %c12_335 = arith.constant 12 : index
    %c0_336 = arith.constant 0 : index
    %1224 = vector.load %arg11[%c12_335, %c0_336] : memref<16x128xf32, #tpu.memory_space<vmem>>, vector<2x128xf32>
    tpu.vector_store %arg11[%c12_335, %c0_336], %1223 {strides = array<i32>} : memref<16x128xf32, #tpu.memory_space<vmem>>, vector<2x128xf32>,
    %1225 = vector.extract_strided_slice %1017 {offsets = [14, 0], sizes = [2, 512], strides = [1, 1]} : vector<16x512xf32> to vector<2x512xf32>
    %cst_337 = arith.constant dense<0.000000e+00> : vector<2x512xf32>
    %1226 = tpu.matmul %1223, %1012, %cst_337 {dimension_numbers = #tpu.dot_dimension_numbers<[1], [0], [0], [1], [0, 0, 1, 1], [], []>} : vector<2x128xf32>, vector<128x512xf32>, vector<2x512xf32> -> vector<2x512xf32>
    %1227 = arith.addf %1225, %1226 : vector<2x512xf32>
    %1228 = vector.extract_strided_slice %1227 {offsets = [0, 0], sizes = [2, 128], strides = [1, 1]} : vector<2x512xf32> to vector<2x128xf32>
    %1229 = arith.negf %1228 : vector<2x128xf32>
    %1230 = math.exp %1229 : vector<2x128xf32>
    %cst_338 = arith.constant 1.000000e+00 : f32
    %1231 = vector.broadcast %cst_338 : f32 to vector<2x128xf32>
    %1232 = arith.addf %1231, %1230 : vector<2x128xf32>
    %1233 = arith.divf %1231, %1232 : vector<2x128xf32>
    %1234 = vector.extract_strided_slice %1227 {offsets = [0, 128], sizes = [2, 128], strides = [1, 1]} : vector<2x512xf32> to vector<2x128xf32>
    %1235 = arith.negf %1234 : vector<2x128xf32>
    %1236 = math.exp %1235 : vector<2x128xf32>
    %cst_339 = arith.constant 1.000000e+00 : f32
    %1237 = vector.broadcast %cst_339 : f32 to vector<2x128xf32>
    %1238 = arith.addf %1237, %1236 : vector<2x128xf32>
    %1239 = arith.divf %1237, %1238 : vector<2x128xf32>
    %1240 = vector.extract_strided_slice %1227 {offsets = [0, 256], sizes = [2, 128], strides = [1, 1]} : vector<2x512xf32> to vector<2x128xf32>
    %1241 = math.tanh %1240 : vector<2x128xf32>
    %1242 = vector.extract_strided_slice %1227 {offsets = [0, 384], sizes = [2, 128], strides = [1, 1]} : vector<2x512xf32> to vector<2x128xf32>
    %1243 = arith.negf %1242 : vector<2x128xf32>
    %1244 = math.exp %1243 : vector<2x128xf32>
    %cst_340 = arith.constant 1.000000e+00 : f32
    %1245 = vector.broadcast %cst_340 : f32 to vector<2x128xf32>
    %1246 = arith.addf %1245, %1244 : vector<2x128xf32>
    %1247 = arith.divf %1245, %1246 : vector<2x128xf32>
    %1248 = arith.mulf %1239, %1221 : vector<2x128xf32>
    %1249 = arith.mulf %1233, %1241 : vector<2x128xf32>
    %1250 = arith.addf %1248, %1249 : vector<2x128xf32>
    %1251 = math.tanh %1250 : vector<2x128xf32>
    %1252 = arith.mulf %1247, %1251 : vector<2x128xf32>
    %c14_341 = arith.constant 14 : index
    %c0_342 = arith.constant 0 : index
    %1253 = vector.load %arg11[%c14_341, %c0_342] : memref<16x128xf32, #tpu.memory_space<vmem>>, vector<2x128xf32>
    tpu.vector_store %arg11[%c14_341, %c0_342], %1252 {strides = array<i32>} : memref<16x128xf32, #tpu.memory_space<vmem>>, vector<2x128xf32>,
    %c4_343 = arith.constant 4 : index
    %c0_344 = arith.constant 0 : index
    %c0_345 = arith.constant 0 : index
    %1254 = vector.load %arg9[%c4_343, %c0_344, %c0_345] : memref<5x2x128xf32, #tpu.memory_space<vmem>>, vector<1x2x128xf32>
    %1255 = vector.shape_cast %1254 : vector<1x2x128xf32> to vector<2x128xf32>
    %1256 = vector.shape_cast %1252 : vector<2x128xf32> to vector<1x2x128xf32>
    tpu.vector_store %arg9[%c4_343, %c0_344, %c0_345], %1256 {strides = array<i32>} : memref<5x2x128xf32, #tpu.memory_space<vmem>>, vector<1x2x128xf32>,
    %c4_346 = arith.constant 4 : index
    %c0_347 = arith.constant 0 : index
    %c0_348 = arith.constant 0 : index
    %1257 = vector.load %arg10[%c4_346, %c0_347, %c0_348] : memref<5x2x128xf32, #tpu.memory_space<vmem>>, vector<1x2x128xf32>
    %1258 = vector.shape_cast %1257 : vector<1x2x128xf32> to vector<2x128xf32>
    %1259 = vector.shape_cast %1250 : vector<2x128xf32> to vector<1x2x128xf32>
    tpu.vector_store %arg10[%c4_346, %c0_347, %c0_348], %1259 {strides = array<i32>} : memref<5x2x128xf32, #tpu.memory_space<vmem>>, vector<1x2x128xf32>,
    %c0_349 = arith.constant 0 : index
    %c0_350 = arith.constant 0 : index
    %1260 = vector.load %arg11[%c0_349, %c0_350] : memref<16x128xf32, #tpu.memory_space<vmem>>, vector<16x128xf32>
    %c0_351 = arith.constant 0 : index
    %c0_352 = arith.constant 0 : index
    %1261 = vector.load %arg6[%c0_351, %c0_352] : memref<128x128xf32, #tpu.memory_space<vmem>>, vector<128x128xf32>
    %cst_353 = arith.constant dense<0.000000e+00> : vector<16x128xf32>
    %1262 = tpu.matmul %1260, %1261, %cst_353 {dimension_numbers = #tpu.dot_dimension_numbers<[1], [0], [0], [1], [0, 0, 1, 1], [], []>} : vector<16x128xf32>, vector<128x128xf32>, vector<16x128xf32> -> vector<16x128xf32>
    %c0_354 = arith.constant 0 : index
    %c0_355 = arith.constant 0 : index
    %1263 = vector.load %arg7[%c0_354, %c0_355] : memref<1x128xf32, #tpu.memory_space<vmem>>, vector<1x128xf32>
    %1264 = vector.broadcast %1263 : vector<1x128xf32> to vector<16x128xf32>
    %1265 = arith.addf %1262, %1264 : vector<16x128xf32>
    %c0_356 = arith.constant 0 : index
    %c0_357 = arith.constant 0 : index
    %1266 = vector.load %arg8[%c0_356, %c0_357] : memref<16x128xf32, #tpu.memory_space<vmem>>, vector<16x128xf32>
    tpu.vector_store %arg8[%c0_356, %c0_357], %1265 {strides = array<i32>} : memref<16x128xf32, #tpu.memory_space<vmem>>, vector<16x128xf32>,
    return
  }
}

</mosaic_0001>

<bundles_post_ra>
// kernel: _model2_forward_impl.1
= control target key start
LH: loop header
LB: loop body
LE: loop exit
PB: predicated region body
PF: predicated region fallthrough
CT: control target
= control target key end

     0   :  { %16 = vsyncpa [#allocation4], 0  ;;  %s15623_s0 = inlined_call_operand.vmem [shape: f32[16,128], index: 0, kind: input, shape index: {}]   ;;  %s15624_s1 = inlined_call_operand.vmem [shape: f32[5,2,128], index: 1, kind: input, shape index: {}]   ;;  %s15625_s2 = inlined_call_operand.vmem [shape: f32[5,2,128], index: 2, kind: input, shape index: {}]   ;;  %s15626_s3 = inlined_call_operand.hbm [shape: f32[5,128,512], index: 3, kind: input, shape index: {}]   ;;  %s15627_s4 = inlined_call_operand.hbm [shape: f32[5,128,512], index: 4, kind: input, shape index: {}]   ;;  %s15628_s5 = inlined_call_operand.hbm [shape: f32[5,1,512], index: 5, kind: input, shape index: {}]   ;;  %s15629_s6 = inlined_call_operand.hbm [shape: f32[128,128], index: 6, kind: input, shape index: {}]   ;;  %s15630_s7 = inlined_call_operand.hbm [shape: f32[1,128], index: 7, kind: input, shape index: {}]   ;;  %s15631_s8 = inlined_call_operand.hbm [shape: f32[16,128], index: 8, kind: output, shape index: {0}]   ;;  %s15632_s9 = inlined_call_operand.hbm [shape: f32[5,2,128], index: 9, kind: output, shape index: {1}]   ;;  %s15633_s10 = inlined_call_operand.hbm [shape: f32[5,2,128], index: 10, kind: output, shape index: {2}]  }
   0x1   :  { %17 = vsyncpa [#allocation7], 0 }
   0x2   :  { %18 = vsyncpa [#allocation10], 0 }
   0x3   :  { %19 = vsyncpa [#allocation5], 0 }
   0x4   :  { %20 = vsyncpa [#allocation14], 0  ;;  %s13146_s13 = smov [#allocation6]   ;;  %s13147_s15 = smov [#allocation9]  }
   0x5   :  { %s44_s14 = sshll.u32 %s13146_s13, 4  ;;  %s68_s16 = sshll.u32 %s13147_s15, 4  ;;  %s45_s14 = int_to_ptr.vmem [resolvable:$true] %s44_s14  ;;  %s13217_s16 = int_to_ptr.vmem [resolvable:$true] %s68_s16 }
   0x6   :  { %s12960_s19 = scalar_lea.hbm %s15627_s4, 40960 }
   0x7   :  { %p12961_p0 = scmp.ne.s32.totalorder %s15627_s4, %s12960_s19  ;;  %p12964_p1 = scmp.lt.u32.totalorder %s12960_s19, %s15627_s4 }
   0x9   :  { %p12966_p2 = pnand %p12964_p1, %p12961_p0 }
   0xb   :  { %12969 = shalt.err (!%p12966_p2)
}
   0xc   :  { %s12970_s24 = scalar_lea.vmem %s45_s14, 40960  ;;  %p12975_p4 = scmp.lt.s32.totalorder %s45_s14, %s45_s14 }
   0xd   :  { %p12971_p3 = scmp.ne.s32.totalorder %s45_s14, %s12970_s24  ;;  %p12976_p5 = scmp.lt.s32.totalorder %s12970_s24, %s12970_s24 }
   0xf   :  { %p12977_p6 = por %p12976_p5, %p12975_p4 }
  0x11   :  { %p12978_p7 = pnand %p12977_p6, %p12971_p3 }
  0x13   :  { %12981 = shalt.err (!%p12978_p7)
}
  0x14   :  { %s13148_s25 = smov 512   ;;  %s13149_s26 = smov 32  }
  0x15   :  { %50 = dma.hbm_to_vmem [thread:$0]  %s15627_s4, 40960, %s45_s14, [#allocation7], %s13148_s25, %s13148_s25, %s13149_s26  }
  0x16   :  { %s12982_s11 = scalar_lea.hbm %s15629_s6, 2048 }
  0x17   :  { %p12983_p8 = scmp.ne.s32.totalorder %s15629_s6, %s12982_s11  ;;  %p12986_p9 = scmp.lt.u32.totalorder %s12982_s11, %s15629_s6 }
  0x19   :  { %p12988_p10 = pnand %p12986_p9, %p12983_p8 }
  0x1b   :  { %12991 = shalt.err (!%p12988_p10)
}
  0x1c   :  { %s12992_s18 = scalar_lea.vmem %s13217_s16, 2048  ;;  %p12997_p12 = scmp.lt.s32.totalorder %s13217_s16, %s13217_s16 }
  0x1d   :  { %p12993_p11 = scmp.ne.s32.totalorder %s13217_s16, %s12992_s18  ;;  %p12998_p13 = scmp.lt.s32.totalorder %s12992_s18, %s12992_s18 }
  0x1f   :  { %p12999_p0 = por %p12998_p13, %p12997_p12 }
  0x21   :  { %p13000_p1 = pnand %p12999_p0, %p12993_p11 }
  0x23   :  { %13003 = shalt.err (!%p13000_p1)
}
  0x24   :  { %s13150_s4 = smov 128   ;;  %s13151_s14 = smov 8  }
  0x25   :  { %74 = dma.hbm_to_vmem [thread:$0]  %s15629_s6, 2048, %s13217_s16, [#allocation10], %s13150_s4, %s13150_s4, %s13151_s14  }
  0x26   :  { %s13152_s21 = smov [#allocation3]   ;;  %s13153_s23 = smov [#allocation8]  }
  0x27   :  { %s32_s22 = sshll.u32 %s13152_s21, 4  ;;  %s56_s24 = sshll.u32 %s13153_s23, 4  ;;  %s33_s22 = int_to_ptr.vmem [resolvable:$true] %s32_s22  ;;  %s13254_s24 = int_to_ptr.vmem [resolvable:$true] %s56_s24 }
  0x28   :  { %s13004_s29 = scalar_lea.hbm %s15626_s3, 40960 }
  0x29   :  { %p13005_p2 = scmp.ne.s32.totalorder %s15626_s3, %s13004_s29  ;;  %p13008_p3 = scmp.lt.u32.totalorder %s13004_s29, %s15626_s3 }
  0x2b   :  { %p13010_p4 = pnand %p13008_p3, %p13005_p2 }
  0x2d   :  { %13013 = shalt.err (!%p13010_p4)
}
  0x2e   :  { %s13014_s6 = scalar_lea.vmem %s33_s22, 40960  ;;  %p13019_p6 = scmp.lt.s32.totalorder %s33_s22, %s33_s22 }
  0x2f   :  { %p13015_p5 = scmp.ne.s32.totalorder %s33_s22, %s13014_s6  ;;  %p13020_p7 = scmp.lt.s32.totalorder %s13014_s6, %s13014_s6 }
  0x31   :  { %p13021_p8 = por %p13020_p7, %p13019_p6 }
  0x33   :  { %p13022_p9 = pnand %p13021_p8, %p13015_p5 }
  0x35   :  { %13025 = shalt.err (!%p13022_p9)
}
  0x36   :  { %38 = dma.hbm_to_vmem [thread:$0]  %s15626_s3, 40960, %s33_s22, [#allocation4], %s13148_s25, %s13148_s25, %s13149_s26  }
  0x37   :  { %s13026_s19 = scalar_lea.hbm %s15628_s5, 320 }
  0x38   :  { %p13027_p10 = scmp.ne.s32.totalorder %s15628_s5, %s13026_s19  ;;  %p13030_p11 = scmp.lt.u32.totalorder %s13026_s19, %s15628_s5 }
  0x3a   :  { %p13032_p12 = pnand %p13030_p11, %p13027_p10 }
  0x3c   :  { %13035 = shalt.err (!%p13032_p12)
}
  0x3d   :  { %s13036_s28 = scalar_lea.vmem %s13254_s24, 320  ;;  %p13041_p0 = scmp.lt.s32.totalorder %s13254_s24, %s13254_s24 }
  0x3e   :  { %p13037_p13 = scmp.ne.s32.totalorder %s13254_s24, %s13036_s28  ;;  %p13042_p1 = scmp.lt.s32.totalorder %s13036_s28, %s13036_s28 }
  0x40   :  { %p13043_p2 = por %p13042_p1, %p13041_p0 }
  0x42   :  { %p13044_p3 = pnand %p13043_p2, %p13037_p13 }
  0x44   :  { %13047 = shalt.err (!%p13044_p3)
}
  0x45   :  { %s13154_s3 = smov 64   ;;  %s13155_s25 = smov 4  }
  0x46   :  { %62 = dma.hbm_to_vmem [thread:$0]  %s15628_s5, 320, %s13254_s24, [#allocation7], %s13154_s3, %s13154_s3, %s13155_s25  }
  0x47   :  { %s13156_s30 = smov [#allocation11]   ;;  %s13048_s6 = scalar_lea.hbm %s15630_s7, 16 }
  0x48   :  { %s81_s11 = sshll.u32 %s13156_s30, 4  ;;  %p13049_p4 = scmp.ne.s32.totalorder %s15630_s7, %s13048_s6  ;;  %s82_s11 = int_to_ptr.vmem [resolvable:$true] %s81_s11 }
  0x49   :  { %p13052_p5 = scmp.lt.u32.totalorder %s13048_s6, %s15630_s7 }
  0x4b   :  { %p13054_p6 = pnand %p13052_p5, %p13049_p4 }
  0x4d   :  { %13057 = shalt.err (!%p13054_p6)
}
  0x4e   :  { %s13058_s19 = scalar_lea.vmem %s82_s11, 16  ;;  %s13062_s5 = scalar_lea.vmem %s82_s11, 32 }
  0x4f   :  { %p13059_p7 = scmp.ne.s32.totalorder %s82_s11, %s13058_s19  ;;  %p13063_p8 = scmp.lt.s32.totalorder %s82_s11, %s82_s11 }
  0x50   :  { %p13064_p9 = scmp.lt.s32.totalorder %s13062_s5, %s13058_s19 }
  0x52   :  { %p13065_p10 = por %p13064_p9, %p13063_p8 }
  0x54   :  { %p13066_p11 = pnand %p13065_p10, %p13059_p7 }
  0x56   :  { %13069 = shalt.err (!%p13066_p11)
}
  0x57   :  { %84 = dma.hbm_to_vmem [thread:$0]  %s15630_s7, 16, %s82_s11, [#allocation10]  }
  0x58   :  { %13136 = dma.done.wait [#allocation4], 40960  }
  0x59   :  { %13137 = vsyncadd [#allocation4], 4294926336 }
  0x5a   :  { %13138 = dma.done.wait [#allocation7], 41280  }
  0x5b   :  { %13139 = vsyncadd [#allocation7], 4294926016 }
  0x5c   :  { %13140 = dma.done.wait [#allocation10], 2064  }
  0x5d   :  { %13141 = vsyncadd [#allocation10], 4294965232  ;;  %v15634_v0 = vmov 0.0   ;;  %v103_v1 = vld [vmem:[#allocation3 + $0x8] sm:$0xff]  ;;  %v105_v3 = vld [vmem:[#allocation3 + $0x18] sm:$0xff] }
  0x5e   :  { %316 = vmatprep.mubr.f32.mxu0 %v15634_v0  ;;  %393 = vmatprep.mubr.f32.mxu1 %v15634_v0  ;;  %v107_v2 = vld [vmem:[#allocation3 + $0x28] sm:$0xff]  ;;  %v109_v5 = vld [vmem:[#allocation3 + $0x38] sm:$0xff]  ;;  %v102_v6 = vld [vmem:[#allocation3] sm:$0xff] }
  0x5f   :  { %v9392_v4 = vpack.c.bf16 %v107_v2, %v103_v1  ;;  %v106_v7 = vld [vmem:[#allocation3 + $0x20] sm:$0xff]  ;;  %v9424_v8 = vpack.c.bf16 %v109_v5, %v105_v3  ;;  %v104_v10 = vld [vmem:[#allocation3 + $0x10] sm:$0xff]  ;;  %v111_v12 = vld [vmem:[#allocation3 + $0x48] sm:$0xff] }
  0x60   :  { %v9394_v9 = vpack.c.bf16 %v106_v7, %v102_v6  ;;  %v108_v11 = vld [vmem:[#allocation3 + $0x30] sm:$0xff]  ;;  %v115_v14 = vld [vmem:[#allocation3 + $0x68] sm:$0xff]  ;;  %v113_v15 = vld [vmem:[#allocation3 + $0x58] sm:$0xff] }
  0x61   :  { %9393 = vmatprep.subr.bf16.mxu0 %v9392_v4  ;;  %v9426_v13 = vpack.c.bf16 %v108_v11, %v104_v10  ;;  %v117_v16 = vld [vmem:[#allocation3 + $0x78] sm:$0xff]  ;;  %9425 = vmatprep.subr.bf16.mxu1 %v9424_v8  ;;  %v9396_v17 = vpack.c.bf16 %v115_v14, %v111_v12  ;;  %v110_v19 = vld [vmem:[#allocation3 + $0x40] sm:$0xff]  ;;  %v112_v21 = vld [vmem:[#allocation3 + $0x50] sm:$0xff] }
  0x62   :  { %9395 = vmatpush1.bf16.msra.mxu0 %v9394_v9  ;;  %v9428_v18 = vpack.c.bf16 %v117_v16, %v113_v15  ;;  %v114_v20 = vld [vmem:[#allocation3 + $0x60] sm:$0xff]  ;;  %v116_v23 = vld [vmem:[#allocation3 + $0x70] sm:$0xff]  ;;  %v119_v24 = vld [vmem:[#allocation3 + $0x88] sm:$0xff] }
  0x63   :  { %9427 = vmatpush1.bf16.msra.mxu1 %v9426_v13  ;;  %v9398_v22 = vpack.c.bf16 %v114_v20, %v110_v19  ;;  %v123_v25 = vld [vmem:[#allocation3 + $0xa8] sm:$0xff]  ;;  %9397 = vmatprep.subr.bf16.mxu0 %v9396_v17  ;;  %v9430_v26 = vpack.c.bf16 %v116_v23, %v112_v21  ;;  %v121_v28 = vld [vmem:[#allocation3 + $0x98] sm:$0xff]  ;;  %v118_v30 = vld [vmem:[#allocation3 + $0x80] sm:$0xff] }
  0x64   :  { %9429 = vmatprep.subr.bf16.mxu1 %v9428_v18  ;;  %v9400_v27 = vpack.c.bf16 %v123_v25, %v119_v24  ;;  %v125_v29 = vld [vmem:[#allocation3 + $0xb8] sm:$0xff]  ;;  %v122_v32 = vld [vmem:[#allocation3 + $0xa0] sm:$0xff]  ;;  %v120_v33 = vld [vmem:[#allocation3 + $0x90] sm:$0xff] }
  0x65   :  { %v9432_v31 = vpack.c.bf16 %v125_v29, %v121_v28  ;;  %v124_v34 = vld [vmem:[#allocation3 + $0xb0] sm:$0xff]  ;;  %v9402_v35 = vpack.c.bf16 %v122_v32, %v118_v30  ;;  %v127_v36 = vld [vmem:[#allocation3 + $0xc8] sm:$0xff]  ;;  %v129_v38 = vld [vmem:[#allocation3 + $0xd8] sm:$0xff] }
  0x66   :  { %9399 = vmatpush1.bf16.msra.mxu0 %v9398_v22  ;;  %v131_v37 = vld [vmem:[#allocation3 + $0xe8] sm:$0xff]  ;;  %v9434_v39 = vpack.c.bf16 %v124_v34, %v120_v33  ;;  %v133_v41 = vld [vmem:[#allocation3 + $0xf8] sm:$0xff]  ;;  %v126_v42 = vld [vmem:[#allocation3 + $0xc0] sm:$0xff] }
  0x67   :  { %9431 = vmatpush1.bf16.msra.mxu1 %v9430_v26  ;;  %9401 = vmatprep.subr.bf16.mxu0 %v9400_v27  ;;  %v9404_v40 = vpack.c.bf16 %v131_v37, %v127_v36  ;;  %v130_v43 = vld [vmem:[#allocation3 + $0xe0] sm:$0xff]  ;;  %v9436_v44 = vpack.c.bf16 %v133_v41, %v129_v38  ;;  %v128_v45 = vld [vmem:[#allocation3 + $0xd0] sm:$0xff]  ;;  %v135_v47 = vld [vmem:[#allocation3 + $0x108] sm:$0xff] }
  0x68   :  { %9433 = vmatprep.subr.bf16.mxu1 %v9432_v31  ;;  %v132_v46 = vld [vmem:[#allocation3 + $0xf0] sm:$0xff]  ;;  %v139_v48 = vld [vmem:[#allocation3 + $0x128] sm:$0xff]  ;;  %v137_v49 = vld [vmem:[#allocation3 + $0x118] sm:$0xff]  ;;  %v9406_v51 = vpack.c.bf16 %v130_v43, %v126_v42 }
  0x69   :  { %v141_v50 = vld [vmem:[#allocation3 + $0x138] sm:$0xff]  ;;  %v9438_v52 = vpack.c.bf16 %v132_v46, %v128_v45  ;;  %v9408_v53 = vpack.c.bf16 %v139_v48, %v135_v47  ;;  %v134_v54 = vld [vmem:[#allocation3 + $0x100] sm:$0xff]  ;;  %v136_v56 = vld [vmem:[#allocation3 + $0x110] sm:$0xff] }
  0x6a   :  { %9403 = vmatpush1.bf16.msra.mxu0 %v9402_v35  ;;  %v138_v55 = vld [vmem:[#allocation3 + $0x120] sm:$0xff]  ;;  %v9440_v57 = vpack.c.bf16 %v141_v50, %v137_v49  ;;  %v140_v58 = vld [vmem:[#allocation3 + $0x130] sm:$0xff]  ;;  %v143_v59 = vld [vmem:[#allocation3 + $0x148] sm:$0xff] }
  0x6b   :  { %9435 = vmatpush1.bf16.msra.mxu1 %v9434_v39  ;;  %9405 = vmatprep.subr.bf16.mxu0 %v9404_v40  ;;  %v147_v60 = vld [vmem:[#allocation3 + $0x168] sm:$0xff]  ;;  %v145_v61 = vld [vmem:[#allocation3 + $0x158] sm:$0xff]  ;;  %v9410_v63 = vpack.c.bf16 %v138_v55, %v134_v54  ;;  %v9442_v1 = vpack.c.bf16 %v140_v58, %v136_v56  ;;  %v142_v3 = vld [vmem:[#allocation3 + $0x140] sm:$0xff] }
  0x6c   :  { %9437 = vmatprep.subr.bf16.mxu1 %v9436_v44  ;;  %v149_v62 = vld [vmem:[#allocation3 + $0x178] sm:$0xff]  ;;  %v9412_v2 = vpack.c.bf16 %v147_v60, %v143_v59  ;;  %v146_v4 = vld [vmem:[#allocation3 + $0x160] sm:$0xff]  ;;  %v144_v5 = vld [vmem:[#allocation3 + $0x150] sm:$0xff] }
  0x6d   :  { %v9444_v6 = vpack.c.bf16 %v149_v62, %v145_v61  ;;  %v148_v7 = vld [vmem:[#allocation3 + $0x170] sm:$0xff]  ;;  %v151_v8 = vld [vmem:[#allocation3 + $0x188] sm:$0xff]  ;;  %v153_v10 = vld [vmem:[#allocation3 + $0x198] sm:$0xff]  ;;  %v9414_v12 = vpack.c.bf16 %v146_v4, %v142_v3 }
  0x6e   :  { %9407 = vmatpush1.bf16.msra.mxu0 %v9406_v51  ;;  %v155_v9 = vld [vmem:[#allocation3 + $0x1a8] sm:$0xff]  ;;  %v157_v11 = vld [vmem:[#allocation3 + $0x1b8] sm:$0xff]  ;;  %v9446_v13 = vpack.c.bf16 %v148_v7, %v144_v5  ;;  %v150_v15 = vld [vmem:[#allocation3 + $0x180] sm:$0xff] }
  0x6f   :  { %9439 = vmatpush1.bf16.msra.mxu1 %v9438_v52  ;;  %9409 = vmatprep.subr.bf16.mxu0 %v9408_v53  ;;  %v9416_v14 = vpack.c.bf16 %v155_v9, %v151_v8  ;;  %v154_v16 = vld [vmem:[#allocation3 + $0x1a0] sm:$0xff]  ;;  %v152_v17 = vld [vmem:[#allocation3 + $0x190] sm:$0xff]  ;;  %v9448_v18 = vpack.c.bf16 %v157_v11, %v153_v10  ;;  %v159_v20 = vld [vmem:[#allocation3 + $0x1c8] sm:$0xff] }
  0x70   :  { %9441 = vmatprep.subr.bf16.mxu1 %v9440_v57  ;;  %v156_v19 = vld [vmem:[#allocation3 + $0x1b0] sm:$0xff]  ;;  %v163_v21 = vld [vmem:[#allocation3 + $0x1e8] sm:$0xff]  ;;  %v161_v22 = vld [vmem:[#allocation3 + $0x1d8] sm:$0xff]  ;;  %v9418_v24 = vpack.c.bf16 %v154_v16, %v150_v15 }
  0x71   :  { %v165_v23 = vld [vmem:[#allocation3 + $0x1f8] sm:$0xff]  ;;  %v9450_v25 = vpack.c.bf16 %v156_v19, %v152_v17  ;;  %v9420_v26 = vpack.c.bf16 %v163_v21, %v159_v20  ;;  %v158_v27 = vld [vmem:[#allocation3 + $0x1c0] sm:$0xff]  ;;  %v160_v29 = vld [vmem:[#allocation3 + $0x1d0] sm:$0xff] }
  0x72   :  { %9411 = vmatpush1.bf16.msra.mxu0 %v9410_v63  ;;  %v162_v28 = vld [vmem:[#allocation3 + $0x1e0] sm:$0xff]  ;;  %v9452_v30 = vpack.c.bf16 %v165_v23, %v161_v22  ;;  %v164_v31 = vld [vmem:[#allocation3 + $0x1f0] sm:$0xff]  ;;  %v167_v32 = vld [vmem:[#allocation6 + $0x8] sm:$0xff] }
  0x73   :  { %9443 = vmatpush1.bf16.msra.mxu1 %v9442_v1  ;;  %9413 = vmatprep.subr.bf16.mxu0 %v9412_v2  ;;  %v171_v33 = vld [vmem:[#allocation6 + $0x28] sm:$0xff]  ;;  %v169_v34 = vld [vmem:[#allocation6 + $0x18] sm:$0xff]  ;;  %v9422_v36 = vpack.c.bf16 %v162_v28, %v158_v27  ;;  %v9454_v37 = vpack.c.bf16 %v164_v31, %v160_v29  ;;  %v166_v39 = vld [vmem:[#allocation6] sm:$0xff] }
  0x74   :  { %9445 = vmatprep.subr.bf16.mxu1 %v9444_v6  ;;  %v173_v35 = vld [vmem:[#allocation6 + $0x38] sm:$0xff]  ;;  %v13302_v38 = vpack.c.bf16 %v171_v33, %v167_v32  ;;  %v170_v40 = vld [vmem:[#allocation6 + $0x20] sm:$0xff]  ;;  %v168_v41 = vld [vmem:[#allocation6 + $0x10] sm:$0xff] }
  0x75   :  { %v13304_v42 = vpack.c.bf16 %v173_v35, %v169_v34  ;;  %v172_v43 = vld [vmem:[#allocation6 + $0x30] sm:$0xff]  ;;  %v175_v44 = vld [vmem:[#allocation6 + $0x48] sm:$0xff]  ;;  %v177_v46 = vld [vmem:[#allocation6 + $0x58] sm:$0xff]  ;;  %v13309_v49 = vpack.c.bf16 %v170_v40, %v166_v39 }
  0x76   :  { %9415 = vmatpush1.bf16.msra.mxu0 %v9414_v12  ;;  %v179_v45 = vld [vmem:[#allocation6 + $0x68] sm:$0xff]  ;;  %v181_v47 = vld [vmem:[#allocation6 + $0x78] sm:$0xff]  ;;  %v100_v48 = vld [vmem:[%s15623_s0] sm:$0xff]  ;;  %v13312_v50 = vpack.c.bf16 %v172_v43, %v168_v41 }
  0x77   :  { %9447 = vmatpush1.bf16.msra.mxu1 %v9446_v13  ;;  %9417 = vmatprep.subr.bf16.mxu0 %v9416_v14  ;;  %v13314_v51 = vpack.c.bf16 %v179_v45, %v175_v44  ;;  %v174_v52 = vld [vmem:[#allocation6 + $0x40] sm:$0xff]  ;;  %v176_v54 = vld [vmem:[#allocation6 + $0x50] sm:$0xff]  ;;  %v13317_v55 = vpack.c.bf16 %v181_v47, %v177_v46  ;;  %v183_v57 = vld [vmem:[#allocation6 + $0x88] sm:$0xff] }
  0x78   :  { %9449 = vmatprep.subr.bf16.mxu1 %v9448_v18  ;;  %v178_v53 = vld [vmem:[#allocation6 + $0x60] sm:$0xff]  ;;  %v180_v56 = vld [vmem:[#allocation6 + $0x70] sm:$0xff]  ;;  %v187_v58 = vld [vmem:[#allocation6 + $0xa8] sm:$0xff] }
  0x79   :  { %v185_v59 = vld [vmem:[#allocation6 + $0x98] sm:$0xff]  ;;  %v13320_v61 = vpack.c.bf16 %v178_v53, %v174_v52  ;;  %v13324_v62 = vpack.c.bf16 %v180_v56, %v176_v54  ;;  %v13326_v63 = vpack.c.bf16 %v187_v58, %v183_v57  ;;  %v182_v1 = vld [vmem:[#allocation6 + $0x80] sm:$0xff]  ;;  %v184_v3 = vld [vmem:[#allocation6 + $0x90] sm:$0xff] }
  0x7a   :  { %9419 = vmatpush1.bf16.msra.mxu0 %v9418_v24  ;;  %v189_v60 = vld [vmem:[#allocation6 + $0xb8] sm:$0xff]  ;;  %v186_v2 = vld [vmem:[#allocation6 + $0xa0] sm:$0xff]  ;;  %v188_v5 = vld [vmem:[#allocation6 + $0xb0] sm:$0xff] }
  0x7b   :  { %9451 = vmatpush1.bf16.msra.mxu1 %v9450_v25  ;;  %9421 = vmatprep.subr.bf16.mxu0 %v9420_v26  ;;  %v13329_v4 = vpack.c.bf16 %v189_v60, %v185_v59  ;;  %v191_v6 = vld [vmem:[#allocation6 + $0xc8] sm:$0xff]  ;;  %v193_v8 = vld [vmem:[#allocation6 + $0xd8] sm:$0xff]  ;;  %v13334_v10 = vpack.c.bf16 %v186_v2, %v182_v1  ;;  %v13341_v12 = vpack.c.bf16 %v188_v5, %v184_v3  ;;  %v190_v14 = vld [vmem:[#allocation6 + $0xc0] sm:$0xff] }
  0x7c   :  { %9453 = vmatprep.subr.bf16.mxu1 %v9452_v30  ;;  %v195_v7 = vld [vmem:[#allocation6 + $0xe8] sm:$0xff]  ;;  %v197_v9 = vld [vmem:[#allocation6 + $0xf8] sm:$0xff]  ;;  %v194_v15 = vld [vmem:[#allocation6 + $0xe0] sm:$0xff] }
  0x7d   :  { %v101_v11 = vld [vmem:[%s15623_s0 + $0x8] sm:$0xff]  ;;  %v13343_v13 = vpack.c.bf16 %v195_v7, %v191_v6  ;;  %v192_v16 = vld [vmem:[#allocation6 + $0xd0] sm:$0xff]  ;;  %v13346_v17 = vpack.c.bf16 %v197_v9, %v193_v8  ;;  %v199_v19 = vld [vmem:[#allocation6 + $0x108] sm:$0xff]  ;;  %v13350_v23 = vpack.c.bf16 %v194_v15, %v190_v14 }
  0x7e   :  { %9423 = vmatpush1.bf16.msra.mxu0 %v9422_v36  ;;  %v196_v18 = vld [vmem:[#allocation6 + $0xf0] sm:$0xff]  ;;  %v203_v20 = vld [vmem:[#allocation6 + $0x128] sm:$0xff]  ;;  %v201_v21 = vld [vmem:[#allocation6 + $0x118] sm:$0xff] }
  0x7f   :  { %9455 = vmatpush1.bf16.msra.mxu1 %v9454_v37  ;;  %9457 = vmatprep.subr.bf16.mxu0 %v13302_v38  ;;  %v205_v22 = vld [vmem:[#allocation6 + $0x138] sm:$0xff]  ;;  %v13355_v24 = vpack.c.bf16 %v196_v18, %v192_v16  ;;  %v13357_v25 = vpack.c.bf16 %v203_v20, %v199_v19  ;;  %v198_v26 = vld [vmem:[#allocation6 + $0x100] sm:$0xff]  ;;  %v200_v28 = vld [vmem:[#allocation6 + $0x110] sm:$0xff] }
  0x80   :  { %9489 = vmatprep.subr.bf16.mxu1 %v13304_v42  ;;  %v202_v27 = vld [vmem:[#allocation6 + $0x120] sm:$0xff]  ;;  %v13360_v29 = vpack.c.bf16 %v205_v22, %v201_v21  ;;  %v204_v30 = vld [vmem:[#allocation6 + $0x130] sm:$0xff]  ;;  %v207_v31 = vld [vmem:[#allocation6 + $0x148] sm:$0xff]  ;;  %v232_v21 = vlaneseq }
  0x81   :  { %317 = vmatmul.mubr.f32.vlgmr.msra.gmra.mrb[0].mxu0 %v100_v48  ;;  %v211_v32 = vld [vmem:[#allocation6 + $0x168] sm:$0xff]  ;;  %v209_v33 = vld [vmem:[#allocation6 + $0x158] sm:$0xff]  ;;  %v13363_v35 = vpack.c.bf16 %v202_v27, %v198_v26  ;;  %v13367_v36 = vpack.c.bf16 %v204_v30, %v200_v28  ;;  %v206_v39 = vld [vmem:[#allocation6 + $0x140] sm:$0xff] }
  0x82   :  { %394 = vmatmul.mubr.f32.vlgmr.msra.gmra.mrb[0].mxu1 %v100_v48  ;;  %9459 = vmatpush1.bf16.msra.mxu0 %v13309_v49  ;;  %v213_v34 = vld [vmem:[#allocation6 + $0x178] sm:$0xff]  ;;  %v13369_v37 = vpack.c.bf16 %v211_v32, %v207_v31  ;;  %v210_v40 = vld [vmem:[#allocation6 + $0x160] sm:$0xff]  ;;  %v208_v41 = vld [vmem:[#allocation6 + $0x150] sm:$0xff]  ;;  %v233_v22 = vshrl.u32 %v232_v21, 7 }
  0x83   :  { %9491 = vmatpush1.bf16.msra.mxu1 %v13312_v50  ;;  %9461 = vmatprep.subr.bf16.mxu0 %v13314_v51  ;;  %v13372_v43 = vpack.c.bf16 %v213_v34, %v209_v33  ;;  %v212_v44 = vld [vmem:[#allocation6 + $0x170] sm:$0xff]  ;;  %v215_v45 = vld [vmem:[#allocation6 + $0x188] sm:$0xff]  ;;  %v217_v47 = vld [vmem:[#allocation6 + $0x198] sm:$0xff]  ;;  %v13375_v52 = vpack.c.bf16 %v210_v40, %v206_v39 }
  0x84   :  { %9493 = vmatprep.subr.bf16.mxu1 %v13317_v55  ;;  %322 = vmatprep.mubr.f32.mxu0 %v15634_v0  ;;  %v219_v46 = vld [vmem:[#allocation6 + $0x1a8] sm:$0xff]  ;;  %v221_v48 = vld [vmem:[#allocation6 + $0x1b8] sm:$0xff]  ;;  %v13379_v53 = vpack.c.bf16 %v212_v44, %v208_v41  ;;  %v214_v56 = vld [vmem:[#allocation6 + $0x180] sm:$0xff]  ;;  %v13447_v30 = vsub.s32 0, %v233_v22  ;;  %v13449_v33 = vsub.s32 1, %v233_v22  ;;  %v13451_v34 = vsub.s32 2, %v233_v22 }
  0x85   :  { %399 = vmatprep.mubr.f32.mxu1 %v15634_v0  ;;  %323 = vmatmul.mubr.f32.gmra.mrb[2].mxu0 %v101_v11  ;;  %v13381_v54 = vpack.c.bf16 %v219_v46, %v215_v45  ;;  %v218_v57 = vld [vmem:[#allocation6 + $0x1a0] sm:$0xff]  ;;  %v216_v58 = vld [vmem:[#allocation6 + $0x190] sm:$0xff]  ;;  %v13384_v59 = vpack.c.bf16 %v221_v48, %v217_v47  ;;  %v223_v1 = vld [vmem:[#allocation6 + $0x1c8] sm:$0xff]  ;;  %v13453_v39 = vsub.s32 3, %v233_v22 }
  0x86   :  { %9463 = vmatpush1.bf16.msra.mxu0 %v13320_v61  ;;  %400 = vmatmul.mubr.f32.gmra.mrb[2].mxu1 %v101_v11  ;;  %v220_v60 = vld [vmem:[#allocation6 + $0x1b0] sm:$0xff]  ;;  %v227_v2 = vld [vmem:[#allocation6 + $0x1e8] sm:$0xff]  ;;  %v225_v3 = vld [vmem:[#allocation6 + $0x1d8] sm:$0xff]  ;;  %v13387_v6 = vpack.c.bf16 %v218_v57, %v214_v56  ;;  %15642 = vst [vmem:[#allocation21_spill] sm:$0xff] %v13449_v33 }
  0x87   :  { %9495 = vmatpush1.bf16.msra.mxu1 %v13324_v62  ;;  %9465 = vmatprep.subr.bf16.mxu0 %v13326_v63  ;;  %v229_v5 = vld [vmem:[#allocation6 + $0x1f8] sm:$0xff]  ;;  %v13391_v7 = vpack.c.bf16 %v220_v60, %v216_v58  ;;  %v13393_v8 = vpack.c.bf16 %v227_v2, %v223_v1  ;;  %v222_v9 = vld [vmem:[#allocation6 + $0x1c0] sm:$0xff]  ;;  %v224_v15 = vld [vmem:[#allocation6 + $0x1d0] sm:$0xff]  ;;  %15643 = vst [vmem:[#allocation22_spill] sm:$0xff] %v13451_v34 }
  0x88   :  { %9497 = vmatprep.subr.bf16.mxu1 %v13329_v4  ;;  %472 = vmatprep.mubr.f32.mxu0 %v15634_v0  ;;  %v226_v11 = vld [vmem:[#allocation6 + $0x1e0] sm:$0xff]  ;;  %v13396_v14 = vpack.c.bf16 %v229_v5, %v225_v3  ;;  %v228_v16 = vld [vmem:[#allocation6 + $0x1f0] sm:$0xff]  ;;  %15644 = vst [vmem:[#allocation23_spill] sm:$0xff] %v13453_v39 }
  0x89   :  { %543 = vmatprep.mubr.f32.mxu1 %v15634_v0  ;;  %v13399_v18 = vpack.c.bf16 %v226_v11, %v222_v9  ;;  %v13403_v19 = vpack.c.bf16 %v228_v16, %v224_v15  ;;  %v406_v20 = vld [vmem:[%s15624_s1] sm:$0x3]  ;;  %v230_v32 = vld [vmem:[#allocation8] sm:$0xf] }
  0x8a   :  { %9467 = vmatpush1.bf16.msra.mxu0 %v13334_v10  ;;  %v235_v40 = vrot.slane %v230_v32, %v13447_v30  ;;  %v239_v41 = vrot.slane %v230_v32, %v13449_v33  ;;  %v243_v44 = vrot.slane %v230_v32, %v13451_v34  ;;  %v247_v46 = vrot.slane %v230_v32, %v13453_v39 }
  0x8b   :  { %9499 = vmatpush1.bf16.msra.mxu1 %v13341_v12  ;;  %9469 = vmatprep.subr.bf16.mxu0 %v13343_v13 }
  0x8c   :  { %9501 = vmatprep.subr.bf16.mxu1 %v13346_v17 }
  0x8e   :  { %9471 = vmatpush1.bf16.msra.mxu0 %v13350_v23 }
  0x8f   :  { %9503 = vmatpush1.bf16.msra.mxu1 %v13355_v24  ;;  %9473 = vmatprep.subr.bf16.mxu0 %v13357_v25 }
  0x90   :  { %9505 = vmatprep.subr.bf16.mxu1 %v13360_v29 }
  0x92   :  { %9475 = vmatpush1.bf16.msra.mxu0 %v13363_v35 }
  0x93   :  { %9507 = vmatpush1.bf16.msra.mxu1 %v13367_v36  ;;  %9477 = vmatprep.subr.bf16.mxu0 %v13369_v37 }
  0x94   :  { %9509 = vmatprep.subr.bf16.mxu1 %v13372_v43 }
  0x96   :  { %9479 = vmatpush1.bf16.msra.mxu0 %v13375_v52 }
  0x97   :  { %9511 = vmatpush1.bf16.msra.mxu1 %v13379_v53  ;;  %9481 = vmatprep.subr.bf16.mxu0 %v13381_v54 }
  0x98   :  { %9513 = vmatprep.subr.bf16.mxu1 %v13384_v59 }
  0x9a   :  { %9483 = vmatpush1.bf16.msra.mxu0 %v13387_v6 }
  0x9b   :  { %9515 = vmatpush1.bf16.msra.mxu1 %v13391_v7  ;;  %9485 = vmatprep.subr.bf16.mxu0 %v13393_v8 }
  0x9c   :  { %9517 = vmatprep.subr.bf16.mxu1 %v13396_v14 }
  0x9e   :  { %9487 = vmatpush1.bf16.msra.mxu0 %v13399_v18 }
  0x9f   :  { %9519 = vmatpush1.bf16.msra.mxu1 %v13403_v19  ;;  %9521 = vmatprep.subr.bf16.mxu0 %v13302_v38 }
  0xa0   :  { %9553 = vmatprep.subr.bf16.mxu1 %v13304_v42 }
  0xa1   :  { %473 = vmatmul.mubr.f32.vlgmr.msra.gmra.mrb[4].mxu0 %v406_v20 }
  0xa2   :  { %544 = vmatmul.mubr.f32.vlgmr.msra.gmra.mrb[4].mxu1 %v406_v20  ;;  %9523 = vmatpush1.bf16.msra.mxu0 %v13309_v49 }
  0xa3   :  { %9555 = vmatpush1.bf16.msra.mxu1 %v13312_v50  ;;  %9525 = vmatprep.subr.bf16.mxu0 %v13314_v51 }
  0xa4   :  { %9557 = vmatprep.subr.bf16.mxu1 %v13317_v55  ;;  %643 = vmatprep.mubr.f32.mxu0 %v15634_v0 }
  0xa5   :  { %714 = vmatprep.mubr.f32.mxu1 %v15634_v0 }
  0xa6   :  { %9527 = vmatpush1.bf16.msra.mxu0 %v13320_v61 }
  0xa7   :  { %9559 = vmatpush1.bf16.msra.mxu1 %v13324_v62  ;;  %9529 = vmatprep.subr.bf16.mxu0 %v13326_v63 }
  0xa8   :  { %9561 = vmatprep.subr.bf16.mxu1 %v13329_v4 }
  0xaa   :  { %9531 = vmatpush1.bf16.msra.mxu0 %v13334_v10 }
  0xab   :  { %9563 = vmatpush1.bf16.msra.mxu1 %v13341_v12  ;;  %9533 = vmatprep.subr.bf16.mxu0 %v13343_v13 }
  0xac   :  { %9565 = vmatprep.subr.bf16.mxu1 %v13346_v17 }
  0xae   :  { %9535 = vmatpush1.bf16.msra.mxu0 %v13350_v23 }
  0xaf   :  { %9567 = vmatpush1.bf16.msra.mxu1 %v13355_v24  ;;  %9537 = vmatprep.subr.bf16.mxu0 %v13357_v25 }
  0xb0   :  { %9569 = vmatprep.subr.bf16.mxu1 %v13360_v29 }
  0xb2   :  { %9539 = vmatpush1.bf16.msra.mxu0 %v13363_v35 }
  0xb3   :  { %9571 = vmatpush1.bf16.msra.mxu1 %v13367_v36  ;;  %9541 = vmatprep.subr.bf16.mxu0 %v13369_v37 }
  0xb4   :  { %9573 = vmatprep.subr.bf16.mxu1 %v13372_v43 }
  0xb6   :  { %9543 = vmatpush1.bf16.msra.mxu0 %v13375_v52 }
  0xb7   :  { %9575 = vmatpush1.bf16.msra.mxu1 %v13379_v53  ;;  %9545 = vmatprep.subr.bf16.mxu0 %v13381_v54 }
  0xb8   :  { %9577 = vmatprep.subr.bf16.mxu1 %v13384_v59 }
  0xba   :  { %9547 = vmatpush1.bf16.msra.mxu0 %v13387_v6 }
  0xbb   :  { %9579 = vmatpush1.bf16.msra.mxu1 %v13391_v7  ;;  %9549 = vmatprep.subr.bf16.mxu0 %v13393_v8 }
  0xbc   :  { %9581 = vmatprep.subr.bf16.mxu1 %v13396_v14 }
  0xbe   :  { %9551 = vmatpush1.bf16.msra.mxu0 %v13399_v18 }
  0xbf   :  { %9583 = vmatpush1.bf16.msra.mxu1 %v13403_v19  ;;  %9585 = vmatprep.subr.bf16.mxu0 %v13302_v38 }
  0xc0   :  { %9617 = vmatprep.subr.bf16.mxu1 %v13304_v42 }
 0x154   :  { %v318_v26 = vpop.f32.mrb[0].mxu0 }
 0x155   :  { %v320_v27 = vpop.f32.mrb[1].mxu0  ;;  %v395_v28 = vpop.f32.mrb[0].mxu1  ;;  %v13467_v2 = vadd.f32 %v318_v26, %v235_v40 }
 0x156   :  { %v397_v31 = vpop.f32.mrb[1].mxu1  ;;  %v13469_v3 = vadd.f32 %v320_v27, %v239_v41  ;;  %v13476_v26 = vadd.f32 %v395_v28, %v243_v44 }
 0x157   :  { %v13473_v32 = vadd.f32 %v397_v31, %v247_v46  ;;  %v407_v31 = vld [vmem:[%s15625_s2] sm:$0x3] }
 0x158   :  { %v324_v45 = vpop.f32.mrb[2].mxu0 }
 0x159   :  { %v13459_v47 = vadd.f32 %v324_v45, %v235_v40  ;;  %v326_v48 = vpop.f32.mrb[3].mxu0  ;;  %v401_v56 = vpop.f32.mrb[2].mxu1 }
 0x15a   :  { %v13461_v57 = vadd.f32 %v326_v48, %v239_v41  ;;  %v13463_v58 = vadd.f32 %v401_v56, %v243_v44  ;;  %v403_v60 = vpop.f32.mrb[3].mxu1 }
 0x15b   :  { %v13465_v1 = vadd.f32 %v403_v60, %v247_v46 }
 0x174   :  { %v474_v5 = vpop.f32.mrb[4].mxu0 }
 0x175   :  { %v550_v9 = vadd.f32 %v474_v5, %v13467_v2  ;;  %v545_v11 = vpop.f32.mrb[4].mxu1  ;;  %v476_v15 = vpop.f32.mrb[5].mxu0 }
 0x176   :  { %v551_v16 = vadd.f32 %v476_v15, %v13469_v3  ;;  %v547_v20 = vpop.f32.mrb[5].mxu1  ;;  %v552_v40 = vadd.f32 %v545_v11, %v13476_v26 }
 0x177   :  { %v9210_v21 = vmul.f32 -1.442695, %v550_v9  ;;  %v553_v45 = vadd.f32 %v547_v20, %v13473_v32 }
 0x178   :  { %v9211_v22 = vmul.f32 -1.442695, %v551_v16 }
 0x179   :  { %12320 = vpow2.f32 %v9210_v21  ;;  %v9212_v27 = vmul.f32 -1.442695, %v553_v45 }
 0x17a   :  { %12322 = vpow2.f32 %v9211_v22 }
 0x17b   :  { %12324 = vpow2.f32 %v9212_v27 }
 0x17c   :  { %12326 = vtanh.f32 %v552_v40 }
 0x183   :  { %v12321_v41 = vpop.eup %12320 }
 0x184   :  { %v12323_v48 = vpop.eup %12322  ;;  %v557_v56 = vadd.f32 1.0, %v12321_v41 }
 0x185   :  { %v563_v60 = vadd.f32 1.0, %v12323_v48  ;;  %v12325_v5 = vpop.eup %12324 }
 0x186   :  { %12328 = vrcp.f32 %v557_v56  ;;  %v12327_v9 = vpop.eup %12326  ;;  %v570_v15 = vadd.f32 1.0, %v12325_v5 }
 0x187   :  { %12330 = vrcp.f32 %v563_v60 }
 0x188   :  { %12332 = vrcp.f32 %v570_v15 }
 0x190   :  { %v12329_v46 = vpop.eup %12328 }
 0x191   :  { %v12331_v28 = vpop.eup %12330  ;;  %v574_v44 = vmul.f32 %v12329_v46, %v12327_v9 }
 0x192   :  { %v573_v16 = vmul.f32 %v12331_v28, %v407_v31  ;;  %v12333_v20 = vpop.eup %12332 }
 0x194   :  { %v13482_v11 = vadd.f32 %v574_v44, %v573_v16 }
 0x196   :  { %12334 = vtanh.f32 %v13482_v11 }
 0x1a0   :  { %v12335_v21 = vpop.eup %12334 }
 0x1a1   :  { %v577_v22 = vmul.f32 %v12335_v21, %v12333_v20 }
 0x1a3   :  { %578 = vst [vmem:[#allocation2] sm:$0x3] %v577_v22  ;;  %644 = vmatmul.mubr.f32.vlgmr.msra.gmra.mrb[6].mxu0 %v577_v22  ;;  %715 = vmatmul.mubr.f32.vlgmr.msra.gmra.mrb[6].mxu1 %v577_v22 }
 0x1a4   :  { %9587 = vmatpush1.bf16.msra.mxu0 %v13309_v49  ;;  %9619 = vmatpush1.bf16.msra.mxu1 %v13312_v50 }
 0x1a5   :  { %9589 = vmatprep.subr.bf16.mxu0 %v13314_v51  ;;  %9621 = vmatprep.subr.bf16.mxu1 %v13317_v55 }
 0x1a6   :  { %832 = vmatprep.mubr.f32.mxu0 %v15634_v0  ;;  %903 = vmatprep.mubr.f32.mxu1 %v15634_v0 }
 0x1a8   :  { %9591 = vmatpush1.bf16.msra.mxu0 %v13320_v61  ;;  %9623 = vmatpush1.bf16.msra.mxu1 %v13324_v62 }
 0x1a9   :  { %9593 = vmatprep.subr.bf16.mxu0 %v13326_v63  ;;  %9625 = vmatprep.subr.bf16.mxu1 %v13329_v4 }
 0x1ac   :  { %9595 = vmatpush1.bf16.msra.mxu0 %v13334_v10  ;;  %9627 = vmatpush1.bf16.msra.mxu1 %v13341_v12 }
 0x1ad   :  { %9597 = vmatprep.subr.bf16.mxu0 %v13343_v13  ;;  %9629 = vmatprep.subr.bf16.mxu1 %v13346_v17 }
 0x1b0   :  { %9599 = vmatpush1.bf16.msra.mxu0 %v13350_v23  ;;  %9631 = vmatpush1.bf16.msra.mxu1 %v13355_v24 }
 0x1b1   :  { %9601 = vmatprep.subr.bf16.mxu0 %v13357_v25  ;;  %9633 = vmatprep.subr.bf16.mxu1 %v13360_v29 }
 0x1b4   :  { %9603 = vmatpush1.bf16.msra.mxu0 %v13363_v35  ;;  %9635 = vmatpush1.bf16.msra.mxu1 %v13367_v36 }
 0x1b5   :  { %9605 = vmatprep.subr.bf16.mxu0 %v13369_v37  ;;  %9637 = vmatprep.subr.bf16.mxu1 %v13372_v43 }
 0x1b8   :  { %9607 = vmatpush1.bf16.msra.mxu0 %v13375_v52  ;;  %9639 = vmatpush1.bf16.msra.mxu1 %v13379_v53 }
 0x1b9   :  { %9609 = vmatprep.subr.bf16.mxu0 %v13381_v54  ;;  %9641 = vmatprep.subr.bf16.mxu1 %v13384_v59 }
 0x1bc   :  { %9611 = vmatpush1.bf16.msra.mxu0 %v13387_v6  ;;  %9643 = vmatpush1.bf16.msra.mxu1 %v13391_v7 }
 0x1bd   :  { %9613 = vmatprep.subr.bf16.mxu0 %v13393_v8  ;;  %9645 = vmatprep.subr.bf16.mxu1 %v13396_v14 }
 0x1c0   :  { %9615 = vmatpush1.bf16.msra.mxu0 %v13399_v18  ;;  %9647 = vmatpush1.bf16.msra.mxu1 %v13403_v19 }
 0x1c1   :  { %9649 = vmatprep.subr.bf16.mxu0 %v13302_v38  ;;  %9681 = vmatprep.subr.bf16.mxu1 %v13304_v42 }
 0x276   :  { %v645_v45 = vpop.f32.mrb[6].mxu0  ;;  %v716_v27 = vpop.f32.mrb[6].mxu1 }
 0x277   :  { %v725_v40 = vrot.slane %v645_v45, 6  ;;  %v647_v41 = vpop.f32.mrb[7].mxu0  ;;  %v718_v48 = vpop.f32.mrb[7].mxu1  ;;  %v727_v44 = vrot.slane %v716_v27, 6 }
 0x278   :  { %v726_v56 = vrot.slane %v647_v41, 6  ;;  %v728_v46 = vrot.slane %v718_v48, 6  ;;  %v757_v48 = vrot.slane %v13482_v11, 6 }
 0x279   :  { %v733_v60 = vadd.f32 %v725_v40, %v13467_v2  ;;  %v735_v16 = vadd.f32 %v727_v44, %v13476_v26 }
 0x27a   :  { %v734_v5 = vadd.f32 %v726_v56, %v13469_v3  ;;  %v736_v28 = vadd.f32 %v728_v46, %v13473_v32 }
 0x27b   :  { %v9213_v9 = vmul.f32 -1.442695, %v733_v60 }
 0x27c   :  { %v9214_v31 = vmul.f32 -1.442695, %v734_v5  ;;  %v9215_v15 = vmul.f32 -1.442695, %v736_v28 }
 0x27d   :  { %12336 = vpow2.f32 %v9213_v9 }
 0x27e   :  { %12338 = vpow2.f32 %v9214_v31 }
 0x27f   :  { %12340 = vpow2.f32 %v9215_v15 }
 0x280   :  { %12342 = vtanh.f32 %v735_v16 }
 0x287   :  { %v12337_v20 = vpop.eup %12336 }
 0x288   :  { %v12339_v21 = vpop.eup %12338  ;;  %v740_v22 = vadd.f32 1.0, %v12337_v20 }
 0x289   :  { %v746_v45 = vadd.f32 1.0, %v12339_v21  ;;  %v12341_v40 = vpop.eup %12340 }
 0x28a   :  { %12344 = vrcp.f32 %v740_v22  ;;  %v12343_v41 = vpop.eup %12342  ;;  %v753_v9 = vadd.f32 1.0, %v12341_v40 }
 0x28b   :  { %12346 = vrcp.f32 %v746_v45 }
 0x28c   :  { %12348 = vrcp.f32 %v753_v9 }
 0x294   :  { %v12345_v56 = vpop.eup %12344 }
 0x295   :  { %v12347_v60 = vpop.eup %12346  ;;  %v760_v5 = vmul.f32 %v12345_v56, %v12343_v41 }
 0x296   :  { %v759_v27 = vmul.f32 %v12347_v60, %v757_v48  ;;  %v12349_v46 = vpop.eup %12348 }
 0x298   :  { %v13524_v31 = vadd.f32 %v760_v5, %v759_v27 }
 0x29a   :  { %12350 = vtanh.f32 %v13524_v31 }
 0x2a4   :  { %v12351_v28 = vpop.eup %12350 }
 0x2a5   :  { %v763_v44 = vmul.f32 %v12351_v28, %v12349_v46 }
 0x2a7   :  { %764 = vst [vmem:[#allocation2] sm:$0xc] %v763_v44  ;;  %v766_v15 = vrot.slane %v763_v44, 2 }
 0x2a9   :  { %833 = vmatmul.mubr.f32.vlgmr.msra.gmra.mrb[8].mxu0 %v766_v15  ;;  %904 = vmatmul.mubr.f32.vlgmr.msra.gmra.mrb[8].mxu1 %v766_v15 }
 0x2aa   :  { %9651 = vmatpush1.bf16.msra.mxu0 %v13309_v49  ;;  %9683 = vmatpush1.bf16.msra.mxu1 %v13312_v50 }
 0x2ab   :  { %9653 = vmatprep.subr.bf16.mxu0 %v13314_v51  ;;  %9685 = vmatprep.subr.bf16.mxu1 %v13317_v55 }
 0x2ac   :  { %1021 = vmatprep.mubr.f32.mxu0 %v15634_v0  ;;  %1092 = vmatprep.mubr.f32.mxu1 %v15634_v0 }
 0x2ae   :  { %9655 = vmatpush1.bf16.msra.mxu0 %v13320_v61  ;;  %9687 = vmatpush1.bf16.msra.mxu1 %v13324_v62 }
 0x2af   :  { %9657 = vmatprep.subr.bf16.mxu0 %v13326_v63  ;;  %9689 = vmatprep.subr.bf16.mxu1 %v13329_v4 }
 0x2b2   :  { %9659 = vmatpush1.bf16.msra.mxu0 %v13334_v10  ;;  %9691 = vmatpush1.bf16.msra.mxu1 %v13341_v12 }
 0x2b3   :  { %9661 = vmatprep.subr.bf16.mxu0 %v13343_v13  ;;  %9693 = vmatprep.subr.bf16.mxu1 %v13346_v17 }
 0x2b6   :  { %9663 = vmatpush1.bf16.msra.mxu0 %v13350_v23  ;;  %9695 = vmatpush1.bf16.msra.mxu1 %v13355_v24 }
 0x2b7   :  { %9665 = vmatprep.subr.bf16.mxu0 %v13357_v25  ;;  %9697 = vmatprep.subr.bf16.mxu1 %v13360_v29 }
 0x2ba   :  { %9667 = vmatpush1.bf16.msra.mxu0 %v13363_v35  ;;  %9699 = vmatpush1.bf16.msra.mxu1 %v13367_v36 }
 0x2bb   :  { %9669 = vmatprep.subr.bf16.mxu0 %v13369_v37  ;;  %9701 = vmatprep.subr.bf16.mxu1 %v13372_v43 }
 0x2be   :  { %9671 = vmatpush1.bf16.msra.mxu0 %v13375_v52  ;;  %9703 = vmatpush1.bf16.msra.mxu1 %v13379_v53 }
 0x2bf   :  { %9673 = vmatprep.subr.bf16.mxu0 %v13381_v54  ;;  %9705 = vmatprep.subr.bf16.mxu1 %v13384_v59 }
 0x2c2   :  { %9675 = vmatpush1.bf16.msra.mxu0 %v13387_v6  ;;  %9707 = vmatpush1.bf16.msra.mxu1 %v13391_v7 }
 0x2c3   :  { %9677 = vmatprep.subr.bf16.mxu0 %v13393_v8  ;;  %9709 = vmatprep.subr.bf16.mxu1 %v13396_v14 }
 0x2c6   :  { %9679 = vmatpush1.bf16.msra.mxu0 %v13399_v18  ;;  %9711 = vmatpush1.bf16.msra.mxu1 %v13403_v19 }
 0x2c7   :  { %9713 = vmatprep.subr.bf16.mxu0 %v13302_v38  ;;  %9745 = vmatprep.subr.bf16.mxu1 %v13304_v42 }
 0x37c   :  { %v834_v11 = vpop.f32.mrb[8].mxu0  ;;  %v905_v16 = vpop.f32.mrb[8].mxu1 }
 0x37d   :  { %v914_v20 = vrot.slane %v834_v11, 4  ;;  %v836_v21 = vpop.f32.mrb[9].mxu0  ;;  %v907_v22 = vpop.f32.mrb[9].mxu1  ;;  %v916_v9 = vrot.slane %v905_v16, 4 }
 0x37e   :  { %v915_v45 = vrot.slane %v836_v21, 4  ;;  %v917_v60 = vrot.slane %v907_v22, 4  ;;  %v946_v22 = vrot.slane %v13524_v31, 6 }
 0x37f   :  { %v922_v40 = vadd.f32 %v914_v20, %v13467_v2  ;;  %v924_v46 = vadd.f32 %v916_v9, %v13476_v26 }
 0x380   :  { %v923_v41 = vadd.f32 %v915_v45, %v13469_v3  ;;  %v925_v5 = vadd.f32 %v917_v60, %v13473_v32 }
 0x381   :  { %v9216_v56 = vmul.f32 -1.442695, %v922_v40 }
 0x382   :  { %v9217_v48 = vmul.f32 -1.442695, %v923_v41  ;;  %v9218_v27 = vmul.f32 -1.442695, %v925_v5 }
 0x383   :  { %12352 = vpow2.f32 %v9216_v56 }
 0x384   :  { %12354 = vpow2.f32 %v9217_v48 }
 0x385   :  { %12356 = vpow2.f32 %v9218_v27 }
 0x386   :  { %12358 = vtanh.f32 %v924_v46 }
 0x38d   :  { %v12353_v28 = vpop.eup %12352 }
 0x38e   :  { %v12355_v44 = vpop.eup %12354  ;;  %v929_v15 = vadd.f32 1.0, %v12353_v28 }
 0x38f   :  { %v935_v11 = vadd.f32 1.0, %v12355_v44  ;;  %v12357_v20 = vpop.eup %12356 }
 0x390   :  { %12360 = vrcp.f32 %v929_v15  ;;  %v12359_v21 = vpop.eup %12358  ;;  %v942_v56 = vadd.f32 1.0, %v12357_v20 }
 0x391   :  { %12362 = vrcp.f32 %v935_v11 }
 0x392   :  { %12364 = vrcp.f32 %v942_v56 }
 0x39a   :  { %v12361_v45 = vpop.eup %12360 }
 0x39b   :  { %v12363_v40 = vpop.eup %12362  ;;  %v949_v41 = vmul.f32 %v12361_v45, %v12359_v21 }
 0x39c   :  { %v948_v16 = vmul.f32 %v12363_v40, %v946_v22  ;;  %v12365_v60 = vpop.eup %12364 }
 0x39e   :  { %v13566_v48 = vadd.f32 %v949_v41, %v948_v16 }
 0x3a0   :  { %12366 = vtanh.f32 %v13566_v48 }
 0x3aa   :  { %v12367_v5 = vpop.eup %12366 }
 0x3ab   :  { %v952_v9 = vmul.f32 %v12367_v5, %v12365_v60 }
 0x3ad   :  { %953 = vst [vmem:[#allocation2] sm:$0x30] %v952_v9  ;;  %v955_v27 = vrot.slane %v952_v9, 4 }
 0x3af   :  { %1022 = vmatmul.mubr.f32.vlgmr.msra.gmra.mrb[10].mxu0 %v955_v27  ;;  %1093 = vmatmul.mubr.f32.vlgmr.msra.gmra.mrb[10].mxu1 %v955_v27 }
 0x3b0   :  { %9715 = vmatpush1.bf16.msra.mxu0 %v13309_v49  ;;  %9747 = vmatpush1.bf16.msra.mxu1 %v13312_v50 }
 0x3b1   :  { %9717 = vmatprep.subr.bf16.mxu0 %v13314_v51  ;;  %9749 = vmatprep.subr.bf16.mxu1 %v13317_v55 }
 0x3b2   :  { %1210 = vmatprep.mubr.f32.mxu0 %v15634_v0  ;;  %1281 = vmatprep.mubr.f32.mxu1 %v15634_v0 }
 0x3b4   :  { %9719 = vmatpush1.bf16.msra.mxu0 %v13320_v61  ;;  %9751 = vmatpush1.bf16.msra.mxu1 %v13324_v62 }
 0x3b5   :  { %9721 = vmatprep.subr.bf16.mxu0 %v13326_v63  ;;  %9753 = vmatprep.subr.bf16.mxu1 %v13329_v4 }
 0x3b8   :  { %9723 = vmatpush1.bf16.msra.mxu0 %v13334_v10  ;;  %9755 = vmatpush1.bf16.msra.mxu1 %v13341_v12 }
 0x3b9   :  { %9725 = vmatprep.subr.bf16.mxu0 %v13343_v13  ;;  %9757 = vmatprep.subr.bf16.mxu1 %v13346_v17 }
 0x3bc   :  { %9727 = vmatpush1.bf16.msra.mxu0 %v13350_v23  ;;  %9759 = vmatpush1.bf16.msra.mxu1 %v13355_v24 }
 0x3bd   :  { %9729 = vmatprep.subr.bf16.mxu0 %v13357_v25  ;;  %9761 = vmatprep.subr.bf16.mxu1 %v13360_v29 }
 0x3c0   :  { %9731 = vmatpush1.bf16.msra.mxu0 %v13363_v35  ;;  %9763 = vmatpush1.bf16.msra.mxu1 %v13367_v36 }
 0x3c1   :  { %9733 = vmatprep.subr.bf16.mxu0 %v13369_v37  ;;  %9765 = vmatprep.subr.bf16.mxu1 %v13372_v43 }
 0x3c4   :  { %9735 = vmatpush1.bf16.msra.mxu0 %v13375_v52  ;;  %9767 = vmatpush1.bf16.msra.mxu1 %v13379_v53 }
 0x3c5   :  { %9737 = vmatprep.subr.bf16.mxu0 %v13381_v54  ;;  %9769 = vmatprep.subr.bf16.mxu1 %v13384_v59 }
 0x3c8   :  { %9739 = vmatpush1.bf16.msra.mxu0 %v13387_v6  ;;  %9771 = vmatpush1.bf16.msra.mxu1 %v13391_v7 }
 0x3c9   :  { %9741 = vmatprep.subr.bf16.mxu0 %v13393_v8  ;;  %9773 = vmatprep.subr.bf16.mxu1 %v13396_v14 }
 0x3cc   :  { %9743 = vmatpush1.bf16.msra.mxu0 %v13399_v18  ;;  %9775 = vmatpush1.bf16.msra.mxu1 %v13403_v19 }
 0x3cd   :  { %9777 = vmatprep.subr.bf16.mxu0 %v13302_v38  ;;  %9809 = vmatprep.subr.bf16.mxu1 %v13304_v42 }
 0x482   :  { %v1023_v31 = vpop.f32.mrb[10].mxu0  ;;  %v1094_v46 = vpop.f32.mrb[10].mxu1 }
 0x483   :  { %v1103_v28 = vrot.slane %v1023_v31, 2  ;;  %v1025_v44 = vpop.f32.mrb[11].mxu0  ;;  %v1096_v15 = vpop.f32.mrb[11].mxu1  ;;  %v1105_v56 = vrot.slane %v1094_v46, 2 }
 0x484   :  { %v1104_v11 = vrot.slane %v1025_v44, 2  ;;  %v1106_v40 = vrot.slane %v1096_v15, 2  ;;  %v1135_v44 = vrot.slane %v13566_v48, 6 }
 0x485   :  { %v1111_v20 = vadd.f32 %v1103_v28, %v13467_v2  ;;  %v1113_v60 = vadd.f32 %v1105_v56, %v13476_v26 }
 0x486   :  { %v1112_v21 = vadd.f32 %v1104_v11, %v13469_v3  ;;  %v1114_v41 = vadd.f32 %v1106_v40, %v13473_v32 }
 0x487   :  { %v9219_v45 = vmul.f32 -1.442695, %v1111_v20 }
 0x488   :  { %v9220_v22 = vmul.f32 -1.442695, %v1112_v21  ;;  %v9221_v16 = vmul.f32 -1.442695, %v1114_v41 }
 0x489   :  { %12368 = vpow2.f32 %v9219_v45 }
 0x48a   :  { %12370 = vpow2.f32 %v9220_v22 }
 0x48b   :  { %12372 = vpow2.f32 %v9221_v16 }
 0x48c   :  { %12374 = vtanh.f32 %v1113_v60 }
 0x493   :  { %v12369_v5 = vpop.eup %12368 }
 0x494   :  { %v12371_v9 = vpop.eup %12370  ;;  %v1118_v27 = vadd.f32 1.0, %v12369_v5 }
 0x495   :  { %v1124_v31 = vadd.f32 1.0, %v12371_v9  ;;  %v12373_v2 = vpop.eup %12372 }
 0x496   :  { %12376 = vrcp.f32 %v1118_v27  ;;  %v12375_v3 = vpop.eup %12374  ;;  %v1131_v32 = vadd.f32 1.0, %v12373_v2 }
 0x497   :  { %12378 = vrcp.f32 %v1124_v31 }
 0x498   :  { %12380 = vrcp.f32 %v1131_v32 }
 0x4a0   :  { %v12377_v28 = vpop.eup %12376 }
 0x4a1   :  { %v12379_v15 = vpop.eup %12378  ;;  %v1138_v11 = vmul.f32 %v12377_v28, %v12375_v3 }
 0x4a2   :  { %v1137_v46 = vmul.f32 %v12379_v15, %v1135_v44  ;;  %v12381_v26 = vpop.eup %12380 }
 0x4a4   :  { %v13608_v20 = vadd.f32 %v1138_v11, %v1137_v46 }
 0x4a6   :  { %12382 = vtanh.f32 %v13608_v20 }
 0x4b0   :  { %v12383_v21 = vpop.eup %12382 }
 0x4b1   :  { %v1141_v45 = vmul.f32 %v12383_v21, %v12381_v26  ;;  %v1312_v26 = vrot.slane %v13608_v20, 6 }
 0x4b3   :  { %1142 = vst [vmem:[#allocation2] sm:$0xc0] %v1141_v45  ;;  %v1144_v22 = vrot.slane %v1141_v45, 6 }
 0x4b5   :  { %1211 = vmatmul.mubr.f32.vlgmr.msra.gmra.mrb[12].mxu0 %v1144_v22  ;;  %1282 = vmatmul.mubr.f32.vlgmr.msra.gmra.mrb[12].mxu1 %v1144_v22 }
 0x4b6   :  { %9779 = vmatpush1.bf16.msra.mxu0 %v13309_v49  ;;  %9811 = vmatpush1.bf16.msra.mxu1 %v13312_v50 }
 0x4b7   :  { %9781 = vmatprep.subr.bf16.mxu0 %v13314_v51  ;;  %9813 = vmatprep.subr.bf16.mxu1 %v13317_v55 }
 0x4b8   :  { %1384 = vmatprep.mubr.f32.mxu0 %v15634_v0  ;;  %1455 = vmatprep.mubr.f32.mxu1 %v15634_v0 }
 0x4ba   :  { %9783 = vmatpush1.bf16.msra.mxu0 %v13320_v61  ;;  %9815 = vmatpush1.bf16.msra.mxu1 %v13324_v62 }
 0x4bb   :  { %9785 = vmatprep.subr.bf16.mxu0 %v13326_v63  ;;  %9817 = vmatprep.subr.bf16.mxu1 %v13329_v4 }
 0x4be   :  { %9787 = vmatpush1.bf16.msra.mxu0 %v13334_v10  ;;  %9819 = vmatpush1.bf16.msra.mxu1 %v13341_v12 }
 0x4bf   :  { %9789 = vmatprep.subr.bf16.mxu0 %v13343_v13  ;;  %9821 = vmatprep.subr.bf16.mxu1 %v13346_v17 }
 0x4c2   :  { %9791 = vmatpush1.bf16.msra.mxu0 %v13350_v23  ;;  %9823 = vmatpush1.bf16.msra.mxu1 %v13355_v24 }
 0x4c3   :  { %9793 = vmatprep.subr.bf16.mxu0 %v13357_v25  ;;  %9825 = vmatprep.subr.bf16.mxu1 %v13360_v29 }
 0x4c6   :  { %9795 = vmatpush1.bf16.msra.mxu0 %v13363_v35  ;;  %9827 = vmatpush1.bf16.msra.mxu1 %v13367_v36 }
 0x4c7   :  { %9797 = vmatprep.subr.bf16.mxu0 %v13369_v37  ;;  %9829 = vmatprep.subr.bf16.mxu1 %v13372_v43 }
 0x4ca   :  { %9799 = vmatpush1.bf16.msra.mxu0 %v13375_v52  ;;  %9831 = vmatpush1.bf16.msra.mxu1 %v13379_v53 }
 0x4cb   :  { %9801 = vmatprep.subr.bf16.mxu0 %v13381_v54  ;;  %9833 = vmatprep.subr.bf16.mxu1 %v13384_v59 }
 0x4ce   :  { %9803 = vmatpush1.bf16.msra.mxu0 %v13387_v6  ;;  %9835 = vmatpush1.bf16.msra.mxu1 %v13391_v7 }
 0x4cf   :  { %9805 = vmatprep.subr.bf16.mxu0 %v13393_v8  ;;  %9837 = vmatprep.subr.bf16.mxu1 %v13396_v14 }
 0x4d2   :  { %9807 = vmatpush1.bf16.msra.mxu0 %v13399_v18  ;;  %9839 = vmatpush1.bf16.msra.mxu1 %v13403_v19 }
 0x4d3   :  { %9841 = vmatprep.subr.bf16.mxu0 %v13302_v38  ;;  %9873 = vmatprep.subr.bf16.mxu1 %v13304_v42 }
 0x588   :  { %v1212_v48 = vpop.f32.mrb[12].mxu0  ;;  %v1283_v40 = vpop.f32.mrb[12].mxu1 }
 0x589   :  { %v1288_v41 = vadd.f32 %v1212_v48, %v13459_v47  ;;  %v1214_v56 = vpop.f32.mrb[13].mxu0  ;;  %v1285_v16 = vpop.f32.mrb[13].mxu1  ;;  %v1290_v2 = vadd.f32 %v1283_v40, %v13463_v58 }
 0x58a   :  { %v1289_v60 = vadd.f32 %v1214_v56, %v13461_v57  ;;  %v1291_v27 = vadd.f32 %v1285_v16, %v13465_v1 }
 0x58b   :  { %v9222_v5 = vmul.f32 -1.442695, %v1288_v41 }
 0x58c   :  { %v9223_v9 = vmul.f32 -1.442695, %v1289_v60  ;;  %v9224_v31 = vmul.f32 -1.442695, %v1291_v27 }
 0x58d   :  { %12384 = vpow2.f32 %v9222_v5 }
 0x58e   :  { %12386 = vpow2.f32 %v9223_v9 }
 0x58f   :  { %12388 = vpow2.f32 %v9224_v31 }
 0x590   :  { %12390 = vtanh.f32 %v1290_v2 }
 0x597   :  { %v12385_v3 = vpop.eup %12384 }
 0x598   :  { %v12387_v28 = vpop.eup %12386  ;;  %v1295_v44 = vadd.f32 1.0, %v12385_v3 }
 0x599   :  { %v1301_v15 = vadd.f32 1.0, %v12387_v28  ;;  %v12389_v11 = vpop.eup %12388 }
 0x59a   :  { %12392 = vrcp.f32 %v1295_v44  ;;  %v12391_v32 = vpop.eup %12390  ;;  %v1308_v22 = vadd.f32 1.0, %v12389_v11 }
 0x59b   :  { %12394 = vrcp.f32 %v1301_v15 }
 0x59c   :  { %12396 = vrcp.f32 %v1308_v22 }
 0x5a4   :  { %v12393_v46 = vpop.eup %12392 }
 0x5a5   :  { %v12395_v21 = vpop.eup %12394  ;;  %v1315_v45 = vmul.f32 %v12393_v46, %v12391_v32 }
 0x5a6   :  { %v1314_v48 = vmul.f32 %v12395_v21, %v1312_v26  ;;  %v12397_v40 = vpop.eup %12396 }
 0x5a8   :  { %v13650_v41 = vadd.f32 %v1315_v45, %v1314_v48 }
 0x5aa   :  { %12398 = vtanh.f32 %v13650_v41 }
 0x5b4   :  { %v12399_v56 = vpop.eup %12398 }
 0x5b5   :  { %v1318_v16 = vmul.f32 %v12399_v56, %v12397_v40  ;;  %v1498_v56 = vrot.slane %v13650_v41, 6 }
 0x5b7   :  { %1319 = vst [vmem:[#allocation2 + $0x8] sm:$0x3] %v1318_v16  ;;  %1385 = vmatmul.mubr.f32.vlgmr.msra.gmra.mrb[14].mxu0 %v1318_v16  ;;  %1456 = vmatmul.mubr.f32.vlgmr.msra.gmra.mrb[14].mxu1 %v1318_v16 }
 0x5b8   :  { %9843 = vmatpush1.bf16.msra.mxu0 %v13309_v49  ;;  %9875 = vmatpush1.bf16.msra.mxu1 %v13312_v50 }
 0x5b9   :  { %9845 = vmatprep.subr.bf16.mxu0 %v13314_v51  ;;  %9877 = vmatprep.subr.bf16.mxu1 %v13317_v55 }
 0x5ba   :  { %1573 = vmatprep.mubr.f32.mxu0 %v15634_v0  ;;  %1644 = vmatprep.mubr.f32.mxu1 %v15634_v0 }
 0x5bc   :  { %9847 = vmatpush1.bf16.msra.mxu0 %v13320_v61  ;;  %9879 = vmatpush1.bf16.msra.mxu1 %v13324_v62 }
 0x5bd   :  { %9849 = vmatprep.subr.bf16.mxu0 %v13326_v63  ;;  %9881 = vmatprep.subr.bf16.mxu1 %v13329_v4 }
 0x5c0   :  { %9851 = vmatpush1.bf16.msra.mxu0 %v13334_v10  ;;  %9883 = vmatpush1.bf16.msra.mxu1 %v13341_v12 }
 0x5c1   :  { %9853 = vmatprep.subr.bf16.mxu0 %v13343_v13  ;;  %9885 = vmatprep.subr.bf16.mxu1 %v13346_v17 }
 0x5c4   :  { %9855 = vmatpush1.bf16.msra.mxu0 %v13350_v23  ;;  %9887 = vmatpush1.bf16.msra.mxu1 %v13355_v24 }
 0x5c5   :  { %9857 = vmatprep.subr.bf16.mxu0 %v13357_v25  ;;  %9889 = vmatprep.subr.bf16.mxu1 %v13360_v29 }
 0x5c8   :  { %9859 = vmatpush1.bf16.msra.mxu0 %v13363_v35  ;;  %9891 = vmatpush1.bf16.msra.mxu1 %v13367_v36 }
 0x5c9   :  { %9861 = vmatprep.subr.bf16.mxu0 %v13369_v37  ;;  %9893 = vmatprep.subr.bf16.mxu1 %v13372_v43 }
 0x5cc   :  { %9863 = vmatpush1.bf16.msra.mxu0 %v13375_v52  ;;  %9895 = vmatpush1.bf16.msra.mxu1 %v13379_v53 }
 0x5cd   :  { %9865 = vmatprep.subr.bf16.mxu0 %v13381_v54  ;;  %9897 = vmatprep.subr.bf16.mxu1 %v13384_v59 }
 0x5d0   :  { %9867 = vmatpush1.bf16.msra.mxu0 %v13387_v6  ;;  %9899 = vmatpush1.bf16.msra.mxu1 %v13391_v7 }
 0x5d1   :  { %9869 = vmatprep.subr.bf16.mxu0 %v13393_v8  ;;  %9901 = vmatprep.subr.bf16.mxu1 %v13396_v14 }
 0x5d4   :  { %9871 = vmatpush1.bf16.msra.mxu0 %v13399_v18  ;;  %9903 = vmatpush1.bf16.msra.mxu1 %v13403_v19 }
 0x5d5   :  { %9905 = vmatprep.subr.bf16.mxu0 %v13302_v38  ;;  %9937 = vmatprep.subr.bf16.mxu1 %v13304_v42 }
 0x68a   :  { %v1386_v20 = vpop.f32.mrb[14].mxu0  ;;  %v1457_v60 = vpop.f32.mrb[14].mxu1 }
 0x68b   :  { %v1466_v5 = vrot.slane %v1386_v20, 6  ;;  %v1388_v9 = vpop.f32.mrb[15].mxu0  ;;  %v1459_v27 = vpop.f32.mrb[15].mxu1  ;;  %v1468_v38 = vrot.slane %v1457_v60, 6 }
 0x68c   :  { %v1467_v31 = vrot.slane %v1388_v9, 6  ;;  %v1469_v15 = vrot.slane %v1459_v27, 6 }
 0x68d   :  { %v1474_v2 = vadd.f32 %v1466_v5, %v13459_v47  ;;  %v1476_v42 = vadd.f32 %v1468_v38, %v13463_v58  ;;  %v1893_v38 = vld [vmem:[#allocation3 + $0x220] sm:$0xff] }
 0x68e   :  { %v1475_v3 = vadd.f32 %v1467_v31, %v13461_v57  ;;  %v1477_v11 = vadd.f32 %v1469_v15, %v13465_v1 }
 0x68f   :  { %v9225_v28 = vmul.f32 -1.442695, %v1474_v2 }
 0x690   :  { %v9226_v44 = vmul.f32 -1.442695, %v1475_v3  ;;  %v9227_v32 = vmul.f32 -1.442695, %v1477_v11  ;;  %v1889_v11 = vld [vmem:[#allocation3 + $0x200] sm:$0xff] }
 0x691   :  { %12400 = vpow2.f32 %v9225_v28 }
 0x692   :  { %12402 = vpow2.f32 %v9226_v44 }
 0x693   :  { %12404 = vpow2.f32 %v9227_v32 }
 0x694   :  { %12406 = vtanh.f32 %v1476_v42  ;;  %v1891_v42 = vld [vmem:[#allocation3 + $0x210] sm:$0xff] }
 0x69b   :  { %v12401_v46 = vpop.eup %12400 }
 0x69c   :  { %v12403_v26 = vpop.eup %12402  ;;  %v1481_v21 = vadd.f32 1.0, %v12401_v46  ;;  %v1895_v46 = vld [vmem:[#allocation3 + $0x230] sm:$0xff] }
 0x69d   :  { %v1487_v45 = vadd.f32 1.0, %v12403_v26  ;;  %v12405_v22 = vpop.eup %12404  ;;  %v1898_v26 = vld [vmem:[#allocation3 + $0x248] sm:$0xff] }
 0x69e   :  { %12408 = vrcp.f32 %v1481_v21  ;;  %v12407_v48 = vpop.eup %12406  ;;  %v1494_v5 = vadd.f32 1.0, %v12405_v22  ;;  %v1900_v22 = vld [vmem:[#allocation3 + $0x258] sm:$0xff] }
 0x69f   :  { %12410 = vrcp.f32 %v1487_v45  ;;  %v1902_v45 = vld [vmem:[#allocation3 + $0x268] sm:$0xff] }
 0x6a0   :  { %12412 = vrcp.f32 %v1494_v5  ;;  %v1901_v5 = vld [vmem:[#allocation3 + $0x260] sm:$0xff] }
 0x6a8   :  { %v12409_v40 = vpop.eup %12408 }
 0x6a9   :  { %v12411_v16 = vpop.eup %12410  ;;  %v1501_v20 = vmul.f32 %v12409_v40, %v12407_v48  ;;  %v1904_v48 = vld [vmem:[#allocation3 + $0x278] sm:$0xff] }
 0x6aa   :  { %v1500_v60 = vmul.f32 %v12411_v16, %v1498_v56  ;;  %v12413_v27 = vpop.eup %12412  ;;  %v9970_v56 = vpack.c.bf16 %v1893_v38, %v1889_v11  ;;  %v10002_v16 = vpack.c.bf16 %v1895_v46, %v1891_v42  ;;  %v1923_v11 = vld [vmem:[#allocation3 + $0x310] sm:$0xff]  ;;  %v1934_v42 = vld [vmem:[#allocation3 + $0x368] sm:$0xff]  ;;  %v1932_v46 = vld [vmem:[#allocation3 + $0x358] sm:$0xff] }
 0x6ab   :  { %v1927_v38 = vld [vmem:[#allocation3 + $0x330] sm:$0xff] }
 0x6ac   :  { %v13692_v9 = vadd.f32 %v1501_v20, %v1500_v60  ;;  %v1897_v20 = vld [vmem:[#allocation3 + $0x240] sm:$0xff] }
 0x6ae   :  { %12414 = vtanh.f32 %v13692_v9 }
 0x6b8   :  { %v12415_v31 = vpop.eup %12414 }
 0x6b9   :  { %v1504_v2 = vmul.f32 %v12415_v31, %v12413_v27  ;;  %v10004_v27 = vpack.c.bf16 %v1904_v48, %v1900_v22  ;;  %v1899_v31 = vld [vmem:[#allocation3 + $0x250] sm:$0xff]  ;;  %v1929_v22 = vld [vmem:[#allocation3 + $0x340] sm:$0xff] }
 0x6ba   :  { %v1933_v48 = vld [vmem:[#allocation3 + $0x360] sm:$0xff] }
 0x6bb   :  { %1505 = vst [vmem:[#allocation2 + $0x8] sm:$0xc] %v1504_v2  ;;  %v1507_v3 = vrot.slane %v1504_v2, 2  ;;  %v1903_v2 = vld [vmem:[#allocation3 + $0x270] sm:$0xff] }
 0x6bd   :  { %1574 = vmatmul.mubr.f32.vlgmr.msra.gmra.mrb[16].mxu0 %v1507_v3  ;;  %1645 = vmatmul.mubr.f32.vlgmr.msra.gmra.mrb[16].mxu1 %v1507_v3  ;;  %v1906_v3 = vld [vmem:[#allocation3 + $0x288] sm:$0xff] }
 0x6be   :  { %9907 = vmatpush1.bf16.msra.mxu0 %v13309_v49  ;;  %9939 = vmatpush1.bf16.msra.mxu1 %v13312_v50  ;;  %v1890_v49 = vld [vmem:[#allocation3 + $0x208] sm:$0xff] }
 0x6bf   :  { %9909 = vmatprep.subr.bf16.mxu0 %v13314_v51  ;;  %9941 = vmatprep.subr.bf16.mxu1 %v13317_v55  ;;  %v1894_v50 = vld [vmem:[#allocation3 + $0x228] sm:$0xff]  ;;  %v1892_v51 = vld [vmem:[#allocation3 + $0x218] sm:$0xff] }
 0x6c0   :  { %1762 = vmatprep.mubr.f32.mxu0 %v15634_v0  ;;  %1833 = vmatprep.mubr.f32.mxu1 %v15634_v0  ;;  %v9968_v55 = vpack.c.bf16 %v1894_v50, %v1890_v49  ;;  %v1910_v49 = vld [vmem:[#allocation3 + $0x2a8] sm:$0xff]  ;;  %v1908_v50 = vld [vmem:[#allocation3 + $0x298] sm:$0xff] }
 0x6c2   :  { %9911 = vmatpush1.bf16.msra.mxu0 %v13320_v61  ;;  %9943 = vmatpush1.bf16.msra.mxu1 %v13324_v62  ;;  %v1896_v61 = vld [vmem:[#allocation3 + $0x238] sm:$0xff] }
 0x6c3   :  { %9913 = vmatprep.subr.bf16.mxu0 %v13326_v63  ;;  %9945 = vmatprep.subr.bf16.mxu1 %v13329_v4  ;;  %v10000_v62 = vpack.c.bf16 %v1896_v61, %v1892_v51  ;;  %v1912_v51 = vld [vmem:[#allocation3 + $0x2b8] sm:$0xff]  ;;  %v10006_v61 = vpack.c.bf16 %v1903_v2, %v1899_v31  ;;  %v9990_v31 = vpack.c.bf16 %v1933_v48, %v1929_v22  ;;  %v1964_v22 = vld [vmem:[#allocation6 + $0x250] sm:$0xff] }
 0x6c4   :  { %v1968_v48 = vld [vmem:[#allocation6 + $0x270] sm:$0xff] }
 0x6c6   :  { %9915 = vmatpush1.bf16.msra.mxu0 %v13334_v10  ;;  %9947 = vmatpush1.bf16.msra.mxu1 %v13341_v12 }
 0x6c7   :  { %9917 = vmatprep.subr.bf16.mxu0 %v13343_v13  ;;  %9949 = vmatprep.subr.bf16.mxu1 %v13346_v17 }
 0x6ca   :  { %9919 = vmatpush1.bf16.msra.mxu0 %v13350_v23  ;;  %9951 = vmatpush1.bf16.msra.mxu1 %v13355_v24 }
 0x6cb   :  { %9921 = vmatprep.subr.bf16.mxu0 %v13357_v25  ;;  %9953 = vmatprep.subr.bf16.mxu1 %v13360_v29 }
 0x6ce   :  { %9923 = vmatpush1.bf16.msra.mxu0 %v13363_v35  ;;  %9955 = vmatpush1.bf16.msra.mxu1 %v13367_v36 }
 0x6cf   :  { %9925 = vmatprep.subr.bf16.mxu0 %v13369_v37  ;;  %9957 = vmatprep.subr.bf16.mxu1 %v13372_v43 }
 0x6d2   :  { %9927 = vmatpush1.bf16.msra.mxu0 %v13375_v52  ;;  %9959 = vmatpush1.bf16.msra.mxu1 %v13379_v53 }
 0x6d3   :  { %9929 = vmatprep.subr.bf16.mxu0 %v13381_v54  ;;  %9961 = vmatprep.subr.bf16.mxu1 %v13384_v59 }
 0x6d6   :  { %9931 = vmatpush1.bf16.msra.mxu0 %v13387_v6  ;;  %9963 = vmatpush1.bf16.msra.mxu1 %v13391_v7 }
 0x6d7   :  { %9933 = vmatprep.subr.bf16.mxu0 %v13393_v8  ;;  %9965 = vmatprep.subr.bf16.mxu1 %v13396_v14 }
 0x6da   :  { %9935 = vmatpush1.bf16.msra.mxu0 %v13399_v18  ;;  %9967 = vmatpush1.bf16.msra.mxu1 %v13403_v19  ;;  %v1687_v18 = vrot.slane %v13692_v9, 6  ;;  %v9972_v9 = vpack.c.bf16 %v1902_v45, %v1898_v26  ;;  %v1936_v26 = vld [vmem:[#allocation3 + $0x378] sm:$0xff]  ;;  %v10018_v45 = vpack.c.bf16 %v1927_v38, %v1923_v11  ;;  %v1967_v11 = vld [vmem:[#allocation6 + $0x268] sm:$0xff] }
 0x6db   :  { %9969 = vmatprep.subr.bf16.mxu0 %v9968_v55  ;;  %10001 = vmatprep.subr.bf16.mxu1 %v10000_v62  ;;  %v9974_v55 = vpack.c.bf16 %v1901_v5, %v1897_v20  ;;  %v1905_v62 = vld [vmem:[#allocation3 + $0x280] sm:$0xff]  ;;  %v1935_v20 = vld [vmem:[#allocation3 + $0x370] sm:$0xff]  ;;  %v1938_v5 = vld [vmem:[#allocation3 + $0x388] sm:$0xff] }
 0x6dc   :  { %v1965_v38 = vld [vmem:[#allocation6 + $0x258] sm:$0xff] }
 0x790   :  { %v1575_v63 = vpop.f32.mrb[16].mxu0  ;;  %v1646_v4 = vpop.f32.mrb[16].mxu1 }
 0x791   :  { %v1655_v10 = vrot.slane %v1575_v63, 4  ;;  %v1577_v12 = vpop.f32.mrb[17].mxu0  ;;  %v1648_v13 = vpop.f32.mrb[17].mxu1  ;;  %v1657_v37 = vrot.slane %v1646_v4, 4  ;;  %v1909_v63 = vld [vmem:[#allocation3 + $0x2a0] sm:$0xff]  ;;  %v9976_v4 = vpack.c.bf16 %v1910_v49, %v1906_v3 }
 0x792   :  { %v1656_v17 = vrot.slane %v1577_v12, 4  ;;  %v1658_v35 = vrot.slane %v1648_v13, 4  ;;  %v1907_v12 = vld [vmem:[#allocation3 + $0x290] sm:$0xff]  ;;  %v1937_v3 = vld [vmem:[#allocation3 + $0x380] sm:$0xff] }
 0x793   :  { %v1663_v23 = vadd.f32 %v1655_v10, %v13459_v47  ;;  %v1665_v52 = vadd.f32 %v1657_v37, %v13463_v58  ;;  %v10008_v10 = vpack.c.bf16 %v1912_v51, %v1908_v50  ;;  %v1911_v13 = vld [vmem:[#allocation3 + $0x2b0] sm:$0xff]  ;;  %v1917_v37 = vld [vmem:[#allocation3 + $0x2e0] sm:$0xff] }
 0x794   :  { %v1664_v24 = vadd.f32 %v1656_v17, %v13461_v57  ;;  %v1666_v36 = vadd.f32 %v1658_v35, %v13465_v1  ;;  %v1914_v17 = vld [vmem:[#allocation3 + $0x2c8] sm:$0xff]  ;;  %v10010_v35 = vpack.c.bf16 %v1911_v13, %v1907_v12  ;;  %v1941_v49 = vld [vmem:[#allocation3 + $0x3a0] sm:$0xff] }
 0x795   :  { %v9228_v25 = vmul.f32 -1.442695, %v1663_v23  ;;  %v1918_v23 = vld [vmem:[#allocation3 + $0x2e8] sm:$0xff]  ;;  %v9994_v12 = vpack.c.bf16 %v1941_v49, %v1937_v3  ;;  %v1972_v3 = vld [vmem:[#allocation6 + $0x290] sm:$0xff] }
 0x796   :  { %v9229_v29 = vmul.f32 -1.442695, %v1664_v24  ;;  %v9230_v43 = vmul.f32 -1.442695, %v1666_v36  ;;  %v1916_v24 = vld [vmem:[#allocation3 + $0x2d8] sm:$0xff]  ;;  %v1913_v36 = vld [vmem:[#allocation3 + $0x2c0] sm:$0xff] }
 0x797   :  { %12416 = vpow2.f32 %v9228_v25  ;;  %v1920_v25 = vld [vmem:[#allocation3 + $0x2f8] sm:$0xff]  ;;  %v1976_v49 = vld [vmem:[#allocation6 + $0x2b0] sm:$0xff] }
 0x798   :  { %12418 = vpow2.f32 %v9229_v29  ;;  %v9978_v29 = vpack.c.bf16 %v1909_v63, %v1905_v62  ;;  %v1946_v62 = vld [vmem:[#allocation3 + $0x3c8] sm:$0xff] }
 0x799   :  { %12420 = vpow2.f32 %v9230_v43  ;;  %v9980_v43 = vpack.c.bf16 %v1918_v23, %v1914_v17  ;;  %v1950_v63 = vld [vmem:[#allocation3 + $0x3e8] sm:$0xff]  ;;  %v1945_v17 = vld [vmem:[#allocation3 + $0x3c0] sm:$0xff] }
 0x79a   :  { %12422 = vtanh.f32 %v1665_v52  ;;  %v10012_v52 = vpack.c.bf16 %v1920_v25, %v1916_v24  ;;  %v9996_v23 = vpack.c.bf16 %v1950_v63, %v1946_v62  ;;  %v1949_v25 = vld [vmem:[#allocation3 + $0x3e0] sm:$0xff]  ;;  %v1985_v63 = vld [vmem:[#allocation6 + $0x2f8] sm:$0xff] }
 0x7a1   :  { %v12417_v53 = vpop.eup %12416 }
 0x7a2   :  { %v12419_v54 = vpop.eup %12418  ;;  %v1670_v59 = vadd.f32 1.0, %v12417_v53  ;;  %v1915_v53 = vld [vmem:[#allocation3 + $0x2d0] sm:$0xff] }
 0x7a3   :  { %v1676_v6 = vadd.f32 1.0, %v12419_v54  ;;  %v12421_v7 = vpop.eup %12420  ;;  %v1919_v54 = vld [vmem:[#allocation3 + $0x2f0] sm:$0xff] }
 0x7a4   :  { %12424 = vrcp.f32 %v1670_v59  ;;  %v12423_v8 = vpop.eup %12422  ;;  %v1683_v28 = vadd.f32 1.0, %v12421_v7  ;;  %v1922_v59 = vld [vmem:[#allocation3 + $0x308] sm:$0xff]  ;;  %v1924_v7 = vld [vmem:[#allocation3 + $0x318] sm:$0xff] }
 0x7a5   :  { %12426 = vrcp.f32 %v1676_v6  ;;  %v1926_v6 = vld [vmem:[#allocation3 + $0x328] sm:$0xff] }
 0x7a6   :  { %12428 = vrcp.f32 %v1683_v28  ;;  %v9984_v28 = vpack.c.bf16 %v1926_v6, %v1922_v59  ;;  %v1961_v6 = vld [vmem:[#allocation6 + $0x238] sm:$0xff] }
 0x7ae   :  { %v12425_v14 = vpop.eup %12424 }
 0x7af   :  { %v12427_v19 = vpop.eup %12426  ;;  %v1690_v41 = vmul.f32 %v12425_v14, %v12423_v8  ;;  %v1928_v8 = vld [vmem:[#allocation3 + $0x338] sm:$0xff]  ;;  %v9982_v14 = vpack.c.bf16 %v1917_v37, %v1913_v36  ;;  %v9998_v36 = vpack.c.bf16 %v1949_v25, %v1945_v17  ;;  %v1980_v17 = vld [vmem:[#allocation6 + $0x2d0] sm:$0xff]  ;;  %v1987_v25 = vld [vmem:[#allocation6 + $0x308] sm:$0xff] }
 0x7b0   :  { %v1689_v44 = vmul.f32 %v12427_v19, %v1687_v18  ;;  %v12429_v32 = vpop.eup %12428  ;;  %v10014_v18 = vpack.c.bf16 %v1919_v54, %v1915_v53  ;;  %v1921_v19 = vld [vmem:[#allocation3 + $0x300] sm:$0xff]  ;;  %v1959_v53 = vld [vmem:[#allocation6 + $0x228] sm:$0xff]  ;;  %v1957_v54 = vld [vmem:[#allocation6 + $0x218] sm:$0xff] }
 0x7b2   :  { %v13732_v15 = vadd.f32 %v1690_v41, %v1689_v44  ;;  %v1925_v41 = vld [vmem:[#allocation3 + $0x320] sm:$0xff]  ;;  %v10016_v44 = vpack.c.bf16 %v1928_v8, %v1924_v7 }
 0x7b3   :  { %v1954_v7 = vld [vmem:[#allocation6 + $0x200] sm:$0xff] }
 0x7b4   :  { %12430 = vtanh.f32 %v13732_v15  ;;  %v1958_v8 = vld [vmem:[#allocation6 + $0x220] sm:$0xff] }
 0x7be   :  { %v12431_v21 = vpop.eup %12430 }
 0x7bf   :  { %v1693_v40 = vmul.f32 %v12431_v21, %v12429_v32  ;;  %v1930_v32 = vld [vmem:[#allocation3 + $0x348] sm:$0xff]  ;;  %v9986_v21 = vpack.c.bf16 %v1925_v41, %v1921_v19  ;;  %v1956_v19 = vld [vmem:[#allocation6 + $0x210] sm:$0xff] }
 0x7c0   :  { %v1960_v41 = vld [vmem:[#allocation6 + $0x230] sm:$0xff] }
 0x7c1   :  { %1694 = vst [vmem:[#allocation2 + $0x8] sm:$0x30] %v1693_v40  ;;  %v1696_v60 = vrot.slane %v1693_v40, 4  ;;  %v9988_v40 = vpack.c.bf16 %v1934_v42, %v1930_v32  ;;  %v1969_v42 = vld [vmem:[#allocation6 + $0x278] sm:$0xff] }
 0x7c3   :  { %1763 = vmatmul.mubr.f32.vlgmr.msra.gmra.mrb[18].mxu0 %v1696_v60  ;;  %1834 = vmatmul.mubr.f32.vlgmr.msra.gmra.mrb[18].mxu1 %v1696_v60  ;;  %v1942_v60 = vld [vmem:[#allocation3 + $0x3a8] sm:$0xff] }
 0x7c4   :  { %9971 = vmatpush1.bf16.msra.mxu0 %v9970_v56  ;;  %10003 = vmatpush1.bf16.msra.mxu1 %v10002_v16  ;;  %v10020_v56 = vpack.c.bf16 %v1936_v26, %v1932_v46  ;;  %v1931_v16 = vld [vmem:[#allocation3 + $0x350] sm:$0xff]  ;;  %v9992_v50 = vpack.c.bf16 %v1942_v60, %v1938_v5  ;;  %v1962_v46 = vld [vmem:[#allocation6 + $0x240] sm:$0xff]  ;;  %v1977_v60 = vld [vmem:[#allocation6 + $0x2b8] sm:$0xff] }
 0x7c5   :  { %9973 = vmatprep.subr.bf16.mxu0 %v9972_v9  ;;  %10005 = vmatprep.subr.bf16.mxu1 %v10004_v27  ;;  %v1940_v9 = vld [vmem:[#allocation3 + $0x398] sm:$0xff]  ;;  %v10022_v2 = vpack.c.bf16 %v1935_v20, %v1931_v16  ;;  %v1966_v26 = vld [vmem:[#allocation6 + $0x260] sm:$0xff]  ;;  %v1975_v16 = vld [vmem:[#allocation6 + $0x2a8] sm:$0xff] }
 0x7c6   :  { %2105 = vmatprep.mubr.f32.mxu0 %v15634_v0  ;;  %2182 = vmatprep.mubr.f32.mxu1 %v15634_v0  ;;  %v1944_v27 = vld [vmem:[#allocation3 + $0x3b8] sm:$0xff] }
 0x7c7   :  { %v10024_v51 = vpack.c.bf16 %v1944_v27, %v1940_v9  ;;  %v1973_v20 = vld [vmem:[#allocation6 + $0x298] sm:$0xff]  ;;  %v1970_v9 = vld [vmem:[#allocation6 + $0x280] sm:$0xff] }
 0x7c8   :  { %9975 = vmatpush1.bf16.msra.mxu0 %v9974_v55  ;;  %10007 = vmatpush1.bf16.msra.mxu1 %v10006_v61  ;;  %v1939_v55 = vld [vmem:[#allocation3 + $0x390] sm:$0xff]  ;;  %v1974_v27 = vld [vmem:[#allocation6 + $0x2a0] sm:$0xff] }
 0x7c9   :  { %9977 = vmatprep.subr.bf16.mxu0 %v9976_v4  ;;  %10009 = vmatprep.subr.bf16.mxu1 %v10008_v10  ;;  %v1943_v61 = vld [vmem:[#allocation3 + $0x3b0] sm:$0xff]  ;;  %v1948_v4 = vld [vmem:[#allocation3 + $0x3d8] sm:$0xff] }
 0x7ca   :  { %v1952_v10 = vld [vmem:[#allocation3 + $0x3f8] sm:$0xff]  ;;  %v10026_v13 = vpack.c.bf16 %v1943_v61, %v1939_v55  ;;  %v1983_v55 = vld [vmem:[#allocation6 + $0x2e8] sm:$0xff] }
 0x7cb   :  { %v10028_v24 = vpack.c.bf16 %v1952_v10, %v1948_v4  ;;  %v1981_v61 = vld [vmem:[#allocation6 + $0x2d8] sm:$0xff]  ;;  %v1978_v4 = vld [vmem:[#allocation6 + $0x2c0] sm:$0xff] }
 0x7cc   :  { %9979 = vmatpush1.bf16.msra.mxu0 %v9978_v29  ;;  %10011 = vmatpush1.bf16.msra.mxu1 %v10010_v35  ;;  %v1947_v29 = vld [vmem:[#allocation3 + $0x3d0] sm:$0xff]  ;;  %v1982_v10 = vld [vmem:[#allocation6 + $0x2e0] sm:$0xff] }
 0x7cd   :  { %9981 = vmatprep.subr.bf16.mxu0 %v9980_v43  ;;  %10013 = vmatprep.subr.bf16.mxu1 %v10012_v52  ;;  %v1951_v35 = vld [vmem:[#allocation3 + $0x3f0] sm:$0xff]  ;;  %v1955_v52 = vld [vmem:[#allocation6 + $0x208] sm:$0xff] }
 0x7ce   :  { %v10030_v37 = vpack.c.bf16 %v1951_v35, %v1947_v29  ;;  %v1886_v43 = vld [vmem:[#allocation2] sm:$0xff]  ;;  %v13739_v59 = vpack.c.bf16 %v1959_v53, %v1955_v52  ;;  %v1991_v29 = vld [vmem:[#allocation6 + $0x328] sm:$0xff]  ;;  %v1989_v35 = vld [vmem:[#allocation6 + $0x318] sm:$0xff] }
 0x7cf   :  { %v1990_v52 = vld [vmem:[#allocation6 + $0x320] sm:$0xff] }
 0x7d0   :  { %9983 = vmatpush1.bf16.msra.mxu0 %v9982_v14  ;;  %10015 = vmatpush1.bf16.msra.mxu1 %v10014_v18  ;;  %v13741_v14 = vpack.c.bf16 %v1961_v6, %v1957_v54  ;;  %v13743_v18 = vpack.c.bf16 %v1958_v8, %v1954_v7  ;;  %v1988_v6 = vld [vmem:[#allocation6 + $0x310] sm:$0xff] }
 0x7d1   :  { %9985 = vmatprep.subr.bf16.mxu0 %v9984_v28  ;;  %10017 = vmatprep.subr.bf16.mxu1 %v10016_v44  ;;  %v13746_v28 = vpack.c.bf16 %v1960_v41, %v1956_v19  ;;  %v1963_v44 = vld [vmem:[#allocation6 + $0x248] sm:$0xff]  ;;  %v1992_v7 = vld [vmem:[#allocation6 + $0x330] sm:$0xff] }
 0x7d2   :  { %v13751_v32 = vpack.c.bf16 %v1967_v11, %v1963_v44  ;;  %v13794_v8 = vpack.c.bf16 %v1992_v7, %v1988_v6  ;;  %v1995_v19 = vld [vmem:[#allocation6 + $0x348] sm:$0xff]  ;;  %v1997_v44 = vld [vmem:[#allocation6 + $0x358] sm:$0xff]  ;;  %v2012_v7 = vld [vmem:[#allocation6 + $0x3d0] sm:$0xff] }
 0x7d3   :  { %v1999_v41 = vld [vmem:[#allocation6 + $0x368] sm:$0xff] }
 0x7d4   :  { %9987 = vmatpush1.bf16.msra.mxu0 %v9986_v21  ;;  %10019 = vmatpush1.bf16.msra.mxu1 %v10018_v45  ;;  %v13753_v21 = vpack.c.bf16 %v1969_v42, %v1965_v38  ;;  %v13755_v45 = vpack.c.bf16 %v1966_v26, %v1962_v46  ;;  %v13799_v11 = vpack.c.bf16 %v1999_v41, %v1995_v19  ;;  %v2001_v38 = vld [vmem:[#allocation6 + $0x378] sm:$0xff]  ;;  %v1994_v42 = vld [vmem:[#allocation6 + $0x340] sm:$0xff]  ;;  %v2016_v19 = vld [vmem:[#allocation6 + $0x3f0] sm:$0xff] }
 0x7d5   :  { %9989 = vmatprep.subr.bf16.mxu0 %v9988_v40  ;;  %10021 = vmatprep.subr.bf16.mxu1 %v10020_v56  ;;  %v13758_v40 = vpack.c.bf16 %v1968_v48, %v1964_v22  ;;  %v1971_v56 = vld [vmem:[#allocation6 + $0x288] sm:$0xff]  ;;  %v1998_v46 = vld [vmem:[#allocation6 + $0x360] sm:$0xff]  ;;  %v13801_v26 = vpack.c.bf16 %v2001_v38, %v1997_v44  ;;  %v1996_v48 = vld [vmem:[#allocation6 + $0x350] sm:$0xff]  ;;  %v13830_v41 = vpack.c.bf16 %v2016_v19, %v2012_v7  ;;  %v1876_v7 = vrot.slane %v13732_v15, 6 }
 0x7d6   :  { %v13763_v5 = vpack.c.bf16 %v1975_v16, %v1971_v56  ;;  %v13803_v22 = vpack.c.bf16 %v1998_v46, %v1994_v42  ;;  %v2000_v56 = vld [vmem:[#allocation6 + $0x370] sm:$0xff] }
 0x7d7   :  { %v13806_v16 = vpack.c.bf16 %v2000_v56, %v1996_v48 }
 0x7d8   :  { %9991 = vmatpush1.bf16.msra.mxu0 %v9990_v31  ;;  %10023 = vmatpush1.bf16.msra.mxu1 %v10022_v2  ;;  %v13765_v31 = vpack.c.bf16 %v1977_v60, %v1973_v20  ;;  %v13767_v2 = vpack.c.bf16 %v1974_v27, %v1970_v9  ;;  %v2003_v20 = vld [vmem:[#allocation6 + $0x388] sm:$0xff]  ;;  %v2005_v9 = vld [vmem:[#allocation6 + $0x398] sm:$0xff] }
 0x7d9   :  { %9993 = vmatprep.subr.bf16.mxu0 %v9992_v50  ;;  %10025 = vmatprep.subr.bf16.mxu1 %v10024_v51  ;;  %v13770_v50 = vpack.c.bf16 %v1976_v49, %v1972_v3  ;;  %v1979_v51 = vld [vmem:[#allocation6 + $0x2c8] sm:$0xff]  ;;  %v2009_v3 = vld [vmem:[#allocation6 + $0x3b8] sm:$0xff]  ;;  %v2002_v49 = vld [vmem:[#allocation6 + $0x380] sm:$0xff] }
 0x7da   :  { %v13775_v62 = vpack.c.bf16 %v1983_v55, %v1979_v51  ;;  %v2007_v60 = vld [vmem:[#allocation6 + $0x3a8] sm:$0xff]  ;;  %v2006_v51 = vld [vmem:[#allocation6 + $0x3a0] sm:$0xff]  ;;  %v13813_v55 = vpack.c.bf16 %v2009_v3, %v2005_v9 }
 0x7db   :  { %v13811_v27 = vpack.c.bf16 %v2007_v60, %v2003_v20 }
 0x7dc   :  { %9995 = vmatpush1.bf16.msra.mxu0 %v9994_v12  ;;  %10027 = vmatpush1.bf16.msra.mxu1 %v10026_v13  ;;  %v13777_v12 = vpack.c.bf16 %v1985_v63, %v1981_v61  ;;  %v13779_v13 = vpack.c.bf16 %v1982_v10, %v1978_v4  ;;  %v13815_v61 = vpack.c.bf16 %v2006_v51, %v2002_v49  ;;  %v2004_v63 = vld [vmem:[#allocation6 + $0x390] sm:$0xff] }
 0x7dd   :  { %9997 = vmatprep.subr.bf16.mxu0 %v9996_v23  ;;  %10029 = vmatprep.subr.bf16.mxu1 %v10028_v24  ;;  %v1984_v23 = vld [vmem:[#allocation6 + $0x2f0] sm:$0xff] }
 0x7de   :  { %v13782_v24 = vpack.c.bf16 %v1984_v23, %v1980_v17  ;;  %v2008_v4 = vld [vmem:[#allocation6 + $0x3b0] sm:$0xff]  ;;  %v2011_v17 = vld [vmem:[#allocation6 + $0x3c8] sm:$0xff] }
 0x7df   :  { %v13818_v10 = vpack.c.bf16 %v2008_v4, %v2004_v63  ;;  %v2015_v23 = vld [vmem:[#allocation6 + $0x3e8] sm:$0xff] }
 0x7e0   :  { %9999 = vmatpush1.bf16.msra.mxu0 %v9998_v36  ;;  %10031 = vmatpush1.bf16.msra.mxu1 %v10030_v37  ;;  %v13787_v36 = vpack.c.bf16 %v1991_v29, %v1987_v25  ;;  %v1993_v37 = vld [vmem:[#allocation6 + $0x338] sm:$0xff]  ;;  %v13823_v29 = vpack.c.bf16 %v2015_v23, %v2011_v17 }
 0x7e1   :  { %10033 = vmatprep.subr.bf16.mxu0 %v13739_v59  ;;  %10065 = vmatprep.subr.bf16.mxu1 %v13741_v14  ;;  %v13789_v53 = vpack.c.bf16 %v1993_v37, %v1989_v35  ;;  %v2013_v25 = vld [vmem:[#allocation6 + $0x3d8] sm:$0xff]  ;;  %v2010_v37 = vld [vmem:[#allocation6 + $0x3c0] sm:$0xff] }
 0x7e2   :  { %v2017_v35 = vld [vmem:[#allocation6 + $0x3f8] sm:$0xff] }
 0x7e3   :  { %2106 = vmatmul.mubr.f32.vlgmr.msra.gmra.mrb[20].mxu0 %v1886_v43  ;;  %2183 = vmatmul.mubr.f32.vlgmr.msra.gmra.mrb[20].mxu1 %v1886_v43  ;;  %v1986_v43 = vld [vmem:[#allocation6 + $0x300] sm:$0xff] }
 0x7e4   :  { %2111 = vmatprep.mubr.f32.mxu0 %v15634_v0  ;;  %2188 = vmatprep.mubr.f32.mxu1 %v15634_v0  ;;  %v13791_v54 = vpack.c.bf16 %v1990_v52, %v1986_v43  ;;  %v2014_v43 = vld [vmem:[#allocation6 + $0x3e0] sm:$0xff]  ;;  %v13825_v52 = vpack.c.bf16 %v2017_v35, %v2013_v25 }
 0x7e5   :  { %10035 = vmatpush1.bf16.msra.mxu0 %v13743_v18  ;;  %10067 = vmatpush1.bf16.msra.mxu1 %v13746_v28  ;;  %v13827_v6 = vpack.c.bf16 %v2014_v43, %v2010_v37 }
 0x7e6   :  { %10037 = vmatprep.subr.bf16.mxu0 %v13751_v32  ;;  %10069 = vmatprep.subr.bf16.mxu1 %v13753_v21 }
 0x7e9   :  { %10039 = vmatpush1.bf16.msra.mxu0 %v13755_v45  ;;  %10071 = vmatpush1.bf16.msra.mxu1 %v13758_v40 }
 0x7ea   :  { %10041 = vmatprep.subr.bf16.mxu0 %v13763_v5  ;;  %10073 = vmatprep.subr.bf16.mxu1 %v13765_v31 }
 0x7ed   :  { %10043 = vmatpush1.bf16.msra.mxu0 %v13767_v2  ;;  %10075 = vmatpush1.bf16.msra.mxu1 %v13770_v50 }
 0x7ee   :  { %10045 = vmatprep.subr.bf16.mxu0 %v13775_v62  ;;  %10077 = vmatprep.subr.bf16.mxu1 %v13777_v12 }
 0x7f1   :  { %10047 = vmatpush1.bf16.msra.mxu0 %v13779_v13  ;;  %10079 = vmatpush1.bf16.msra.mxu1 %v13782_v24 }
 0x7f2   :  { %10049 = vmatprep.subr.bf16.mxu0 %v13787_v36  ;;  %10081 = vmatprep.subr.bf16.mxu1 %v13789_v53 }
 0x7f5   :  { %10051 = vmatpush1.bf16.msra.mxu0 %v13791_v54  ;;  %10083 = vmatpush1.bf16.msra.mxu1 %v13794_v8 }
 0x7f6   :  { %10053 = vmatprep.subr.bf16.mxu0 %v13799_v11  ;;  %10085 = vmatprep.subr.bf16.mxu1 %v13801_v26 }
 0x7f9   :  { %10055 = vmatpush1.bf16.msra.mxu0 %v13803_v22  ;;  %10087 = vmatpush1.bf16.msra.mxu1 %v13806_v16 }
 0x7fa   :  { %10057 = vmatprep.subr.bf16.mxu0 %v13811_v27  ;;  %10089 = vmatprep.subr.bf16.mxu1 %v13813_v55 }
 0x7fd   :  { %10059 = vmatpush1.bf16.msra.mxu0 %v13815_v61  ;;  %10091 = vmatpush1.bf16.msra.mxu1 %v13818_v10 }
 0x7fe   :  { %10061 = vmatprep.subr.bf16.mxu0 %v13823_v29  ;;  %10093 = vmatprep.subr.bf16.mxu1 %v13825_v52 }
 0x801   :  { %10063 = vmatpush1.bf16.msra.mxu0 %v13827_v6  ;;  %10095 = vmatpush1.bf16.msra.mxu1 %v13830_v41 }
 0x802   :  { %10097 = vmatprep.subr.bf16.mxu0 %v13739_v59  ;;  %10129 = vmatprep.subr.bf16.mxu1 %v13741_v14 }
 0x896   :  { %v1764_v44 = vpop.f32.mrb[18].mxu0  ;;  %v1835_v38 = vpop.f32.mrb[18].mxu1 }
 0x897   :  { %v1844_v42 = vrot.slane %v1764_v44, 2  ;;  %v1766_v46 = vpop.f32.mrb[19].mxu0  ;;  %v1837_v48 = vpop.f32.mrb[19].mxu1  ;;  %v1846_v63 = vrot.slane %v1835_v38, 2 }
 0x898   :  { %v1845_v56 = vrot.slane %v1766_v46, 2  ;;  %v1847_v49 = vrot.slane %v1837_v48, 2 }
 0x899   :  { %v1852_v20 = vadd.f32 %v1844_v42, %v13459_v47  ;;  %v1854_v17 = vadd.f32 %v1846_v63, %v13463_v58 }
 0x89a   :  { %v1853_v60 = vadd.f32 %v1845_v56, %v13461_v57  ;;  %v1855_v51 = vadd.f32 %v1847_v49, %v13465_v1  ;;  %v2019_v49 = vld [vmem:[#allocation8 + $0x4] sm:$0xf] }
 0x89b   :  { %v9231_v9 = vmul.f32 -1.442695, %v1852_v20  ;;  %v13889_v63 = vrot.slane %v2019_v49, %v13449_v33 }
 0x89c   :  { %v9232_v3 = vmul.f32 -1.442695, %v1853_v60  ;;  %v9233_v4 = vmul.f32 -1.442695, %v1855_v51  ;;  %v13886_v51 = vrot.slane %v2019_v49, %v13447_v30 }
 0x89d   :  { %12432 = vpow2.f32 %v9231_v9 }
 0x89e   :  { %12434 = vpow2.f32 %v9232_v3  ;;  %v9234_v3 = vld [vmem:[%s15624_s1 + $0x2] sm:$0x3] }
 0x89f   :  { %12436 = vpow2.f32 %v9233_v4 }
 0x8a0   :  { %12438 = vtanh.f32 %v1854_v17 }
 0x8a7   :  { %v12433_v23 = vpop.eup %12432 }
 0x8a8   :  { %v12435_v25 = vpop.eup %12434  ;;  %v1859_v35 = vadd.f32 1.0, %v12433_v23 }
 0x8a9   :  { %v1865_v37 = vadd.f32 1.0, %v12435_v25  ;;  %v12437_v47 = vpop.eup %12436 }
 0x8aa   :  { %12440 = vrcp.f32 %v1859_v35  ;;  %v12439_v57 = vpop.eup %12438  ;;  %v1872_v1 = vadd.f32 1.0, %v12437_v47 }
 0x8ab   :  { %12442 = vrcp.f32 %v1865_v37 }
 0x8ac   :  { %12444 = vrcp.f32 %v1872_v1 }
 0x8b4   :  { %v12441_v43 = vpop.eup %12440 }
 0x8b5   :  { %v12443_v19 = vpop.eup %12442  ;;  %v1879_v44 = vmul.f32 %v12441_v43, %v12439_v57 }
 0x8b6   :  { %v1878_v38 = vmul.f32 %v12443_v19, %v1876_v7  ;;  %v2107_v42 = vpop.f32.mrb[20].mxu0  ;;  %v13842_v46 = vpop.f32.mrb[20].mxu1 }
 0x8b7   :  { %v2109_v58 = vpop.f32.mrb[21].mxu0  ;;  %v13844_v48 = vpop.f32.mrb[21].mxu1  ;;  %v13900_v35 = vadd.f32 %v2107_v42, %v13886_v51 }
 0x8b8   :  { %v1880_v56 = vadd.f32 %v1879_v44, %v1878_v38  ;;  %v12445_v20 = vpop.eup %12444  ;;  %v13903_v37 = vadd.f32 %v2109_v58, %v13889_v63  ;;  %v13907_v44 = vrot.slane %v2019_v49, %v13453_v39  ;;  %v13915_v58 = vrot.slane %v2019_v49, %v13451_v34 }
 0x8ba   :  { %12446 = vtanh.f32 %v1880_v56  ;;  %1885 = vst [vmem:[#allocation15 - $0x6] sm:$0xc0] %v1880_v56  ;;  %v13912_v42 = vadd.f32 %v13844_v48, %v13907_v44 }
 0x8c4   :  { %v12447_v60 = vpop.eup %12446 }
 0x8c5   :  { %v1882_v9 = vmul.f32 %v12447_v60, %v12445_v20  ;;  %v13920_v60 = vadd.f32 %v13842_v46, %v13915_v58 }
 0x8c7   :  { %1883 = vst [vmem:[#allocation2 + $0x8] sm:$0xc0] %v1882_v9  ;;  %1884 = vst [vmem:[#allocation13 - $0x6] sm:$0xc0] %v1882_v9 }
 0x8ce   :  { %v1887_v15 = vld [vmem:[#allocation2 + $0x8] sm:$0xff] }
 0x8cf   :  { %2112 = vmatmul.mubr.f32.gmra.mrb[22].mxu0 %v1887_v15  ;;  %2189 = vmatmul.mubr.f32.gmra.mrb[22].mxu1 %v1887_v15 }
 0x8d0   :  { %2263 = vmatprep.mubr.f32.mxu0 %v15634_v0  ;;  %2334 = vmatprep.mubr.f32.mxu1 %v15634_v0 }
 0x8d3   :  { %2264 = vmatmul.mubr.f32.vlgmr.msra.gmra.mrb[24].mxu0 %v9234_v3  ;;  %2335 = vmatmul.mubr.f32.vlgmr.msra.gmra.mrb[24].mxu1 %v9234_v3 }
 0x8d4   :  { %10099 = vmatpush1.bf16.msra.mxu0 %v13743_v18  ;;  %10131 = vmatpush1.bf16.msra.mxu1 %v13746_v28 }
 0x8d5   :  { %10101 = vmatprep.subr.bf16.mxu0 %v13751_v32  ;;  %10133 = vmatprep.subr.bf16.mxu1 %v13753_v21 }
 0x8d6   :  { %2434 = vmatprep.mubr.f32.mxu0 %v15634_v0  ;;  %2505 = vmatprep.mubr.f32.mxu1 %v15634_v0 }
 0x8d8   :  { %10103 = vmatpush1.bf16.msra.mxu0 %v13755_v45  ;;  %10135 = vmatpush1.bf16.msra.mxu1 %v13758_v40 }
 0x8d9   :  { %10105 = vmatprep.subr.bf16.mxu0 %v13763_v5  ;;  %10137 = vmatprep.subr.bf16.mxu1 %v13765_v31 }
 0x8dc   :  { %10107 = vmatpush1.bf16.msra.mxu0 %v13767_v2  ;;  %10139 = vmatpush1.bf16.msra.mxu1 %v13770_v50 }
 0x8dd   :  { %10109 = vmatprep.subr.bf16.mxu0 %v13775_v62  ;;  %10141 = vmatprep.subr.bf16.mxu1 %v13777_v12 }
 0x8e0   :  { %10111 = vmatpush1.bf16.msra.mxu0 %v13779_v13  ;;  %10143 = vmatpush1.bf16.msra.mxu1 %v13782_v24 }
 0x8e1   :  { %10113 = vmatprep.subr.bf16.mxu0 %v13787_v36  ;;  %10145 = vmatprep.subr.bf16.mxu1 %v13789_v53 }
 0x8e4   :  { %10115 = vmatpush1.bf16.msra.mxu0 %v13791_v54  ;;  %10147 = vmatpush1.bf16.msra.mxu1 %v13794_v8 }
 0x8e5   :  { %10117 = vmatprep.subr.bf16.mxu0 %v13799_v11  ;;  %10149 = vmatprep.subr.bf16.mxu1 %v13801_v26 }
 0x8e8   :  { %10119 = vmatpush1.bf16.msra.mxu0 %v13803_v22  ;;  %10151 = vmatpush1.bf16.msra.mxu1 %v13806_v16 }
 0x8e9   :  { %10121 = vmatprep.subr.bf16.mxu0 %v13811_v27  ;;  %10153 = vmatprep.subr.bf16.mxu1 %v13813_v55 }
 0x8ec   :  { %10123 = vmatpush1.bf16.msra.mxu0 %v13815_v61  ;;  %10155 = vmatpush1.bf16.msra.mxu1 %v13818_v10 }
 0x8ed   :  { %10125 = vmatprep.subr.bf16.mxu0 %v13823_v29  ;;  %10157 = vmatprep.subr.bf16.mxu1 %v13825_v52 }
 0x8f0   :  { %10127 = vmatpush1.bf16.msra.mxu0 %v13827_v6  ;;  %10159 = vmatpush1.bf16.msra.mxu1 %v13830_v41 }
 0x8f1   :  { %10161 = vmatprep.subr.bf16.mxu0 %v13739_v59  ;;  %10193 = vmatprep.subr.bf16.mxu1 %v13741_v14 }
 0x9a2   :  { %v13891_v4 = vpop.f32.mrb[22].mxu0  ;;  %v13893_v17 = vpop.f32.mrb[22].mxu1 }
 0x9a3   :  { %v13895_v23 = vpop.f32.mrb[23].mxu0  ;;  %v13897_v25 = vpop.f32.mrb[23].mxu1 }
 0x9a6   :  { %v2265_v47 = vpop.f32.mrb[24].mxu0  ;;  %v2336_v57 = vpop.f32.mrb[24].mxu1 }
 0x9a7   :  { %v2341_v43 = vadd.f32 %v2265_v47, %v13900_v35  ;;  %v2267_v7 = vpop.f32.mrb[25].mxu0  ;;  %v2338_v19 = vpop.f32.mrb[25].mxu1  ;;  %v2343_v15 = vadd.f32 %v2336_v57, %v13920_v60 }
 0x9a8   :  { %v2342_v1 = vadd.f32 %v2267_v7, %v13903_v37  ;;  %v2344_v20 = vadd.f32 %v2338_v19, %v13912_v42  ;;  %v9235_v19 = vld [vmem:[%s15625_s2 + $0x2] sm:$0x3] }
 0x9a9   :  { %v9236_v38 = vmul.f32 -1.442695, %v2341_v43 }
 0x9aa   :  { %v9237_v56 = vmul.f32 -1.442695, %v2342_v1  ;;  %v9238_v9 = vmul.f32 -1.442695, %v2344_v20 }
 0x9ab   :  { %12448 = vpow2.f32 %v9236_v38 }
 0x9ac   :  { %12450 = vpow2.f32 %v9237_v56 }
 0x9ad   :  { %12452 = vpow2.f32 %v9238_v9 }
 0x9ae   :  { %12454 = vtanh.f32 %v2343_v15 }
 0x9b5   :  { %v12449_v3 = vpop.eup %12448 }
 0x9b6   :  { %v12451_v47 = vpop.eup %12450  ;;  %v2348_v43 = vadd.f32 1.0, %v12449_v3 }
 0x9b7   :  { %v2354_v48 = vadd.f32 1.0, %v12451_v47  ;;  %v12453_v7 = vpop.eup %12452 }
 0x9b8   :  { %12456 = vrcp.f32 %v2348_v43  ;;  %v12455_v49 = vpop.eup %12454  ;;  %v2361_v56 = vadd.f32 1.0, %v12453_v7 }
 0x9b9   :  { %12458 = vrcp.f32 %v2354_v48 }
 0x9ba   :  { %12460 = vrcp.f32 %v2361_v56 }
 0x9c2   :  { %v12457_v1 = vpop.eup %12456 }
 0x9c3   :  { %v12459_v46 = vpop.eup %12458  ;;  %v2365_v38 = vmul.f32 %v12457_v1, %v12455_v49 }
 0x9c4   :  { %v2364_v20 = vmul.f32 %v12459_v46, %v9235_v19  ;;  %v12461_v9 = vpop.eup %12460 }
 0x9c6   :  { %v13926_v57 = vadd.f32 %v2365_v38, %v2364_v20 }
 0x9c8   :  { %12462 = vtanh.f32 %v13926_v57 }
 0x9d2   :  { %v12463_v15 = vpop.eup %12462 }
 0x9d3   :  { %v2368_v3 = vmul.f32 %v12463_v15, %v12461_v9 }
 0x9d5   :  { %2369 = vst [vmem:[#allocation2] sm:$0x3] %v2368_v3  ;;  %2435 = vmatmul.mubr.f32.vlgmr.msra.gmra.mrb[26].mxu0 %v2368_v3  ;;  %2506 = vmatmul.mubr.f32.vlgmr.msra.gmra.mrb[26].mxu1 %v2368_v3 }
 0x9d6   :  { %10163 = vmatpush1.bf16.msra.mxu0 %v13743_v18  ;;  %10195 = vmatpush1.bf16.msra.mxu1 %v13746_v28 }
 0x9d7   :  { %10165 = vmatprep.subr.bf16.mxu0 %v13751_v32  ;;  %10197 = vmatprep.subr.bf16.mxu1 %v13753_v21 }
 0x9d8   :  { %2623 = vmatprep.mubr.f32.mxu0 %v15634_v0  ;;  %2694 = vmatprep.mubr.f32.mxu1 %v15634_v0 }
 0x9da   :  { %10167 = vmatpush1.bf16.msra.mxu0 %v13755_v45  ;;  %10199 = vmatpush1.bf16.msra.mxu1 %v13758_v40 }
 0x9db   :  { %10169 = vmatprep.subr.bf16.mxu0 %v13763_v5  ;;  %10201 = vmatprep.subr.bf16.mxu1 %v13765_v31 }
 0x9de   :  { %10171 = vmatpush1.bf16.msra.mxu0 %v13767_v2  ;;  %10203 = vmatpush1.bf16.msra.mxu1 %v13770_v50 }
 0x9df   :  { %10173 = vmatprep.subr.bf16.mxu0 %v13775_v62  ;;  %10205 = vmatprep.subr.bf16.mxu1 %v13777_v12 }
 0x9e2   :  { %10175 = vmatpush1.bf16.msra.mxu0 %v13779_v13  ;;  %10207 = vmatpush1.bf16.msra.mxu1 %v13782_v24 }
 0x9e3   :  { %10177 = vmatprep.subr.bf16.mxu0 %v13787_v36  ;;  %10209 = vmatprep.subr.bf16.mxu1 %v13789_v53 }
 0x9e6   :  { %10179 = vmatpush1.bf16.msra.mxu0 %v13791_v54  ;;  %10211 = vmatpush1.bf16.msra.mxu1 %v13794_v8 }
 0x9e7   :  { %10181 = vmatprep.subr.bf16.mxu0 %v13799_v11  ;;  %10213 = vmatprep.subr.bf16.mxu1 %v13801_v26 }
 0x9ea   :  { %10183 = vmatpush1.bf16.msra.mxu0 %v13803_v22  ;;  %10215 = vmatpush1.bf16.msra.mxu1 %v13806_v16 }
 0x9eb   :  { %10185 = vmatprep.subr.bf16.mxu0 %v13811_v27  ;;  %10217 = vmatprep.subr.bf16.mxu1 %v13813_v55 }
 0x9ee   :  { %10187 = vmatpush1.bf16.msra.mxu0 %v13815_v61  ;;  %10219 = vmatpush1.bf16.msra.mxu1 %v13818_v10 }
 0x9ef   :  { %10189 = vmatprep.subr.bf16.mxu0 %v13823_v29  ;;  %10221 = vmatprep.subr.bf16.mxu1 %v13825_v52 }
 0x9f2   :  { %10191 = vmatpush1.bf16.msra.mxu0 %v13827_v6  ;;  %10223 = vmatpush1.bf16.msra.mxu1 %v13830_v41 }
 0x9f3   :  { %10225 = vmatprep.subr.bf16.mxu0 %v13739_v59  ;;  %10257 = vmatprep.subr.bf16.mxu1 %v13741_v14 }
 0xaa8   :  { %v2436_v47 = vpop.f32.mrb[26].mxu0  ;;  %v2507_v43 = vpop.f32.mrb[26].mxu1 }
 0xaa9   :  { %v2516_v48 = vrot.slane %v2436_v47, 6  ;;  %v2438_v7 = vpop.f32.mrb[27].mxu0  ;;  %v2509_v49 = vpop.f32.mrb[27].mxu1  ;;  %v2518_v15 = vrot.slane %v2507_v43, 6 }
 0xaaa   :  { %v2517_v19 = vrot.slane %v2438_v7, 6  ;;  %v2519_v20 = vrot.slane %v2509_v49, 6  ;;  %v2548_v49 = vrot.slane %v13926_v57, 6  ;;  %v15645_v57 = vmov 0.0  }
 0xaab   :  { %v2524_v1 = vadd.f32 %v2516_v48, %v13900_v35  ;;  %v2526_v0 = vadd.f32 %v2518_v15, %v13920_v60 }
 0xaac   :  { %v2525_v46 = vadd.f32 %v2517_v19, %v13903_v37  ;;  %v2527_v9 = vadd.f32 %v2519_v20, %v13912_v42 }
 0xaad   :  { %v9239_v38 = vmul.f32 -1.442695, %v2524_v1 }
 0xaae   :  { %v9240_v56 = vmul.f32 -1.442695, %v2525_v46  ;;  %v9241_v3 = vmul.f32 -1.442695, %v2527_v9 }
 0xaaf   :  { %12464 = vpow2.f32 %v9239_v38 }
 0xab0   :  { %12466 = vpow2.f32 %v9240_v56 }
 0xab1   :  { %12468 = vpow2.f32 %v9241_v3 }
 0xab2   :  { %12470 = vtanh.f32 %v2526_v0 }
 0xab9   :  { %v12465_v34 = vpop.eup %12464 }
 0xaba   :  { %v12467_v47 = vpop.eup %12466  ;;  %v2531_v39 = vadd.f32 1.0, %v12465_v34 }
 0xabb   :  { %v2537_v7 = vadd.f32 1.0, %v12467_v47  ;;  %v12469_v48 = vpop.eup %12468 }
 0xabc   :  { %12472 = vrcp.f32 %v2531_v39  ;;  %v12471_v19 = vpop.eup %12470  ;;  %v2544_v56 = vadd.f32 1.0, %v12469_v48 }
 0xabd   :  { %12474 = vrcp.f32 %v2537_v7 }
 0xabe   :  { %12476 = vrcp.f32 %v2544_v56 }
 0xac6   :  { %v12473_v1 = vpop.eup %12472 }
 0xac7   :  { %v12475_v46 = vpop.eup %12474  ;;  %v2551_v38 = vmul.f32 %v12473_v1, %v12471_v19 }
 0xac8   :  { %v2550_v43 = vmul.f32 %v12475_v46, %v2548_v49  ;;  %v12477_v34 = vpop.eup %12476 }
 0xaca   :  { %v13968_v20 = vadd.f32 %v2551_v38, %v2550_v43 }
 0xacc   :  { %12478 = vtanh.f32 %v13968_v20 }
 0xad6   :  { %v12479_v9 = vpop.eup %12478 }
 0xad7   :  { %v2554_v0 = vmul.f32 %v12479_v9, %v12477_v34 }
 0xad9   :  { %2555 = vst [vmem:[#allocation2] sm:$0xc] %v2554_v0  ;;  %v2557_v39 = vrot.slane %v2554_v0, 2 }
 0xadb   :  { %2624 = vmatmul.mubr.f32.vlgmr.msra.gmra.mrb[28].mxu0 %v2557_v39  ;;  %2695 = vmatmul.mubr.f32.vlgmr.msra.gmra.mrb[28].mxu1 %v2557_v39 }
 0xadc   :  { %10227 = vmatpush1.bf16.msra.mxu0 %v13743_v18  ;;  %10259 = vmatpush1.bf16.msra.mxu1 %v13746_v28 }
 0xadd   :  { %10229 = vmatprep.subr.bf16.mxu0 %v13751_v32  ;;  %10261 = vmatprep.subr.bf16.mxu1 %v13753_v21 }
 0xade   :  { %2812 = vmatprep.mubr.f32.mxu0 %v15645_v57  ;;  %2883 = vmatprep.mubr.f32.mxu1 %v15645_v57 }
 0xae0   :  { %10231 = vmatpush1.bf16.msra.mxu0 %v13755_v45  ;;  %10263 = vmatpush1.bf16.msra.mxu1 %v13758_v40 }
 0xae1   :  { %10233 = vmatprep.subr.bf16.mxu0 %v13763_v5  ;;  %10265 = vmatprep.subr.bf16.mxu1 %v13765_v31 }
 0xae4   :  { %10235 = vmatpush1.bf16.msra.mxu0 %v13767_v2  ;;  %10267 = vmatpush1.bf16.msra.mxu1 %v13770_v50 }
 0xae5   :  { %10237 = vmatprep.subr.bf16.mxu0 %v13775_v62  ;;  %10269 = vmatprep.subr.bf16.mxu1 %v13777_v12 }
 0xae8   :  { %10239 = vmatpush1.bf16.msra.mxu0 %v13779_v13  ;;  %10271 = vmatpush1.bf16.msra.mxu1 %v13782_v24 }
 0xae9   :  { %10241 = vmatprep.subr.bf16.mxu0 %v13787_v36  ;;  %10273 = vmatprep.subr.bf16.mxu1 %v13789_v53 }
 0xaec   :  { %10243 = vmatpush1.bf16.msra.mxu0 %v13791_v54  ;;  %10275 = vmatpush1.bf16.msra.mxu1 %v13794_v8 }
 0xaed   :  { %10245 = vmatprep.subr.bf16.mxu0 %v13799_v11  ;;  %10277 = vmatprep.subr.bf16.mxu1 %v13801_v26 }
 0xaf0   :  { %10247 = vmatpush1.bf16.msra.mxu0 %v13803_v22  ;;  %10279 = vmatpush1.bf16.msra.mxu1 %v13806_v16 }
 0xaf1   :  { %10249 = vmatprep.subr.bf16.mxu0 %v13811_v27  ;;  %10281 = vmatprep.subr.bf16.mxu1 %v13813_v55 }
 0xaf4   :  { %10251 = vmatpush1.bf16.msra.mxu0 %v13815_v61  ;;  %10283 = vmatpush1.bf16.msra.mxu1 %v13818_v10 }
 0xaf5   :  { %10253 = vmatprep.subr.bf16.mxu0 %v13823_v29  ;;  %10285 = vmatprep.subr.bf16.mxu1 %v13825_v52 }
 0xaf8   :  { %10255 = vmatpush1.bf16.msra.mxu0 %v13827_v6  ;;  %10287 = vmatpush1.bf16.msra.mxu1 %v13830_v41 }
 0xaf9   :  { %10289 = vmatprep.subr.bf16.mxu0 %v13739_v59  ;;  %10321 = vmatprep.subr.bf16.mxu1 %v13741_v14 }
 0xbae   :  { %v2625_v15 = vpop.f32.mrb[28].mxu0  ;;  %v2696_v3 = vpop.f32.mrb[28].mxu1 }
 0xbaf   :  { %v2705_v47 = vrot.slane %v2625_v15, 4  ;;  %v2627_v7 = vpop.f32.mrb[29].mxu0  ;;  %v2698_v48 = vpop.f32.mrb[29].mxu1  ;;  %v2707_v34 = vrot.slane %v2696_v3, 4 }
 0xbb0   :  { %v2706_v19 = vrot.slane %v2627_v7, 4  ;;  %v2708_v56 = vrot.slane %v2698_v48, 4  ;;  %v2737_v48 = vrot.slane %v13968_v20, 6 }
 0xbb1   :  { %v2713_v1 = vadd.f32 %v2705_v47, %v13900_v35  ;;  %v2715_v0 = vadd.f32 %v2707_v34, %v13920_v60 }
 0xbb2   :  { %v2714_v49 = vadd.f32 %v2706_v19, %v13903_v37  ;;  %v2716_v43 = vadd.f32 %v2708_v56, %v13912_v42 }
 0xbb3   :  { %v9242_v46 = vmul.f32 -1.442695, %v2713_v1 }
 0xbb4   :  { %v9243_v38 = vmul.f32 -1.442695, %v2714_v49  ;;  %v9244_v9 = vmul.f32 -1.442695, %v2716_v43 }
 0xbb5   :  { %12480 = vpow2.f32 %v9242_v46 }
 0xbb6   :  { %12482 = vpow2.f32 %v9243_v38 }
 0xbb7   :  { %12484 = vpow2.f32 %v9244_v9 }
 0xbb8   :  { %12486 = vtanh.f32 %v2715_v0 }
 0xbbf   :  { %v12481_v39 = vpop.eup %12480 }
 0xbc0   :  { %v12483_v15 = vpop.eup %12482  ;;  %v2720_v33 = vadd.f32 1.0, %v12481_v39 }
 0xbc1   :  { %v2726_v7 = vadd.f32 1.0, %v12483_v15  ;;  %v12485_v47 = vpop.eup %12484 }
 0xbc2   :  { %12488 = vrcp.f32 %v2720_v33  ;;  %v12487_v19 = vpop.eup %12486  ;;  %v2733_v38 = vadd.f32 1.0, %v12485_v47 }
 0xbc3   :  { %12490 = vrcp.f32 %v2726_v7 }
 0xbc4   :  { %12492 = vrcp.f32 %v2733_v38 }
 0xbcc   :  { %v12489_v1 = vpop.eup %12488 }
 0xbcd   :  { %v12491_v49 = vpop.eup %12490  ;;  %v2740_v46 = vmul.f32 %v12489_v1, %v12487_v19 }
 0xbce   :  { %v2739_v3 = vmul.f32 %v12491_v49, %v2737_v48  ;;  %v12493_v43 = vpop.eup %12492 }
 0xbd0   :  { %v14010_v56 = vadd.f32 %v2740_v46, %v2739_v3 }
 0xbd2   :  { %12494 = vtanh.f32 %v14010_v56 }
 0xbdc   :  { %v12495_v34 = vpop.eup %12494 }
 0xbdd   :  { %v2743_v9 = vmul.f32 %v12495_v34, %v12493_v43 }
 0xbdf   :  { %2744 = vst [vmem:[#allocation2] sm:$0x30] %v2743_v9  ;;  %v2746_v33 = vrot.slane %v2743_v9, 4 }
 0xbe1   :  { %2813 = vmatmul.mubr.f32.vlgmr.msra.gmra.mrb[30].mxu0 %v2746_v33  ;;  %2884 = vmatmul.mubr.f32.vlgmr.msra.gmra.mrb[30].mxu1 %v2746_v33 }
 0xbe2   :  { %10291 = vmatpush1.bf16.msra.mxu0 %v13743_v18  ;;  %10323 = vmatpush1.bf16.msra.mxu1 %v13746_v28 }
 0xbe3   :  { %10293 = vmatprep.subr.bf16.mxu0 %v13751_v32  ;;  %10325 = vmatprep.subr.bf16.mxu1 %v13753_v21 }
 0xbe4   :  { %3001 = vmatprep.mubr.f32.mxu0 %v15645_v57  ;;  %3072 = vmatprep.mubr.f32.mxu1 %v15645_v57 }
 0xbe6   :  { %10295 = vmatpush1.bf16.msra.mxu0 %v13755_v45  ;;  %10327 = vmatpush1.bf16.msra.mxu1 %v13758_v40 }
 0xbe7   :  { %10297 = vmatprep.subr.bf16.mxu0 %v13763_v5  ;;  %10329 = vmatprep.subr.bf16.mxu1 %v13765_v31 }
 0xbea   :  { %10299 = vmatpush1.bf16.msra.mxu0 %v13767_v2  ;;  %10331 = vmatpush1.bf16.msra.mxu1 %v13770_v50 }
 0xbeb   :  { %10301 = vmatprep.subr.bf16.mxu0 %v13775_v62  ;;  %10333 = vmatprep.subr.bf16.mxu1 %v13777_v12 }
 0xbee   :  { %10303 = vmatpush1.bf16.msra.mxu0 %v13779_v13  ;;  %10335 = vmatpush1.bf16.msra.mxu1 %v13782_v24 }
 0xbef   :  { %10305 = vmatprep.subr.bf16.mxu0 %v13787_v36  ;;  %10337 = vmatprep.subr.bf16.mxu1 %v13789_v53 }
 0xbf2   :  { %10307 = vmatpush1.bf16.msra.mxu0 %v13791_v54  ;;  %10339 = vmatpush1.bf16.msra.mxu1 %v13794_v8 }
 0xbf3   :  { %10309 = vmatprep.subr.bf16.mxu0 %v13799_v11  ;;  %10341 = vmatprep.subr.bf16.mxu1 %v13801_v26 }
 0xbf6   :  { %10311 = vmatpush1.bf16.msra.mxu0 %v13803_v22  ;;  %10343 = vmatpush1.bf16.msra.mxu1 %v13806_v16 }
 0xbf7   :  { %10313 = vmatprep.subr.bf16.mxu0 %v13811_v27  ;;  %10345 = vmatprep.subr.bf16.mxu1 %v13813_v55 }
 0xbfa   :  { %10315 = vmatpush1.bf16.msra.mxu0 %v13815_v61  ;;  %10347 = vmatpush1.bf16.msra.mxu1 %v13818_v10 }
 0xbfb   :  { %10317 = vmatprep.subr.bf16.mxu0 %v13823_v29  ;;  %10349 = vmatprep.subr.bf16.mxu1 %v13825_v52 }
 0xbfe   :  { %10319 = vmatpush1.bf16.msra.mxu0 %v13827_v6  ;;  %10351 = vmatpush1.bf16.msra.mxu1 %v13830_v41 }
 0xbff   :  { %10353 = vmatprep.subr.bf16.mxu0 %v13739_v59  ;;  %10385 = vmatprep.subr.bf16.mxu1 %v13741_v14 }
 0xcb4   :  { %v2814_v20 = vpop.f32.mrb[30].mxu0  ;;  %v2885_v0 = vpop.f32.mrb[30].mxu1 }
 0xcb5   :  { %v2894_v39 = vrot.slane %v2814_v20, 2  ;;  %v2816_v15 = vpop.f32.mrb[31].mxu0  ;;  %v2887_v7 = vpop.f32.mrb[31].mxu1  ;;  %v2896_v3 = vrot.slane %v2885_v0, 2 }
 0xcb6   :  { %v2895_v47 = vrot.slane %v2816_v15, 2  ;;  %v2897_v46 = vrot.slane %v2887_v7, 2  ;;  %v2926_v7 = vrot.slane %v14010_v56, 6  ;;  %v14091_v56 = vadd.f32 %v13891_v4, %v13886_v51 }
 0xcb7   :  { %v2902_v19 = vadd.f32 %v2894_v39, %v13900_v35  ;;  %v2904_v34 = vadd.f32 %v2896_v3, %v13920_v60 }
 0xcb8   :  { %v2903_v1 = vadd.f32 %v2895_v47, %v13903_v37  ;;  %v2905_v38 = vadd.f32 %v2897_v46, %v13912_v42 }
 0xcb9   :  { %v9245_v48 = vmul.f32 -1.442695, %v2902_v19 }
 0xcba   :  { %v9246_v49 = vmul.f32 -1.442695, %v2903_v1  ;;  %v9247_v43 = vmul.f32 -1.442695, %v2905_v38  ;;  %v14095_v38 = vadd.f32 %v13895_v23, %v13889_v63  ;;  %v14106_v63 = vadd.f32 %v13893_v17, %v13915_v58 }
 0xcbb   :  { %12496 = vpow2.f32 %v9245_v48 }
 0xcbc   :  { %12498 = vpow2.f32 %v9246_v49 }
 0xcbd   :  { %12500 = vpow2.f32 %v9247_v43 }
 0xcbe   :  { %12502 = vtanh.f32 %v2904_v34 }
 0xcc5   :  { %v12497_v9 = vpop.eup %12496 }
 0xcc6   :  { %v12499_v33 = vpop.eup %12498  ;;  %v2909_v20 = vadd.f32 1.0, %v12497_v9 }
 0xcc7   :  { %v2915_v15 = vadd.f32 1.0, %v12499_v33  ;;  %v12501_v35 = vpop.eup %12500 }
 0xcc8   :  { %12504 = vrcp.f32 %v2909_v20  ;;  %v12503_v37 = vpop.eup %12502  ;;  %v2922_v42 = vadd.f32 1.0, %v12501_v35 }
 0xcc9   :  { %12506 = vrcp.f32 %v2915_v15 }
 0xcca   :  { %12508 = vrcp.f32 %v2922_v42 }
 0xcd2   :  { %v12505_v39 = vpop.eup %12504 }
 0xcd3   :  { %v12507_v47 = vpop.eup %12506  ;;  %v2929_v19 = vmul.f32 %v12505_v39, %v12503_v37  ;;  %v14101_v37 = vadd.f32 %v13897_v25, %v13907_v44 }
 0xcd4   :  { %v2928_v0 = vmul.f32 %v12507_v47, %v2926_v7  ;;  %v12509_v60 = vpop.eup %12508 }
 0xcd6   :  { %v14052_v1 = vadd.f32 %v2929_v19, %v2928_v0 }
 0xcd8   :  { %12510 = vtanh.f32 %v14052_v1  ;;  %v3103_v0 = vrot.slane %v14052_v1, 6 }
 0xce2   :  { %v12511_v48 = vpop.eup %12510 }
 0xce3   :  { %v2932_v49 = vmul.f32 %v12511_v48, %v12509_v60 }
 0xce5   :  { %2933 = vst [vmem:[#allocation2] sm:$0xc0] %v2932_v49  ;;  %v2935_v46 = vrot.slane %v2932_v49, 6 }
 0xce7   :  { %3002 = vmatmul.mubr.f32.vlgmr.msra.gmra.mrb[32].mxu0 %v2935_v46  ;;  %3073 = vmatmul.mubr.f32.vlgmr.msra.gmra.mrb[32].mxu1 %v2935_v46 }
 0xce8   :  { %10355 = vmatpush1.bf16.msra.mxu0 %v13743_v18  ;;  %10387 = vmatpush1.bf16.msra.mxu1 %v13746_v28 }
 0xce9   :  { %10357 = vmatprep.subr.bf16.mxu0 %v13751_v32  ;;  %10389 = vmatprep.subr.bf16.mxu1 %v13753_v21 }
 0xcea   :  { %3175 = vmatprep.mubr.f32.mxu0 %v15645_v57  ;;  %3246 = vmatprep.mubr.f32.mxu1 %v15645_v57 }
 0xcec   :  { %10359 = vmatpush1.bf16.msra.mxu0 %v13755_v45  ;;  %10391 = vmatpush1.bf16.msra.mxu1 %v13758_v40 }
 0xced   :  { %10361 = vmatprep.subr.bf16.mxu0 %v13763_v5  ;;  %10393 = vmatprep.subr.bf16.mxu1 %v13765_v31 }
 0xcf0   :  { %10363 = vmatpush1.bf16.msra.mxu0 %v13767_v2  ;;  %10395 = vmatpush1.bf16.msra.mxu1 %v13770_v50 }
 0xcf1   :  { %10365 = vmatprep.subr.bf16.mxu0 %v13775_v62  ;;  %10397 = vmatprep.subr.bf16.mxu1 %v13777_v12 }
 0xcf4   :  { %10367 = vmatpush1.bf16.msra.mxu0 %v13779_v13  ;;  %10399 = vmatpush1.bf16.msra.mxu1 %v13782_v24 }
 0xcf5   :  { %10369 = vmatprep.subr.bf16.mxu0 %v13787_v36  ;;  %10401 = vmatprep.subr.bf16.mxu1 %v13789_v53 }
 0xcf8   :  { %10371 = vmatpush1.bf16.msra.mxu0 %v13791_v54  ;;  %10403 = vmatpush1.bf16.msra.mxu1 %v13794_v8 }
 0xcf9   :  { %10373 = vmatprep.subr.bf16.mxu0 %v13799_v11  ;;  %10405 = vmatprep.subr.bf16.mxu1 %v13801_v26 }
 0xcfc   :  { %10375 = vmatpush1.bf16.msra.mxu0 %v13803_v22  ;;  %10407 = vmatpush1.bf16.msra.mxu1 %v13806_v16 }
 0xcfd   :  { %10377 = vmatprep.subr.bf16.mxu0 %v13811_v27  ;;  %10409 = vmatprep.subr.bf16.mxu1 %v13813_v55 }
 0xd00   :  { %10379 = vmatpush1.bf16.msra.mxu0 %v13815_v61  ;;  %10411 = vmatpush1.bf16.msra.mxu1 %v13818_v10 }
 0xd01   :  { %10381 = vmatprep.subr.bf16.mxu0 %v13823_v29  ;;  %10413 = vmatprep.subr.bf16.mxu1 %v13825_v52 }
 0xd04   :  { %10383 = vmatpush1.bf16.msra.mxu0 %v13827_v6  ;;  %10415 = vmatpush1.bf16.msra.mxu1 %v13830_v41 }
 0xd05   :  { %10417 = vmatprep.subr.bf16.mxu0 %v13739_v59  ;;  %10449 = vmatprep.subr.bf16.mxu1 %v13741_v14 }
 0xdba   :  { %v3003_v3 = vpop.f32.mrb[32].mxu0  ;;  %v3074_v43 = vpop.f32.mrb[32].mxu1 }
 0xdbb   :  { %v3079_v34 = vadd.f32 %v3003_v3, %v14091_v56  ;;  %v3005_v9 = vpop.f32.mrb[33].mxu0  ;;  %v3076_v33 = vpop.f32.mrb[33].mxu1  ;;  %v3081_v23 = vadd.f32 %v3074_v43, %v14106_v63 }
 0xdbc   :  { %v3080_v20 = vadd.f32 %v3005_v9, %v14095_v38  ;;  %v3082_v51 = vadd.f32 %v3076_v33, %v14101_v37 }
 0xdbd   :  { %v9248_v15 = vmul.f32 -1.442695, %v3079_v34 }
 0xdbe   :  { %v9249_v35 = vmul.f32 -1.442695, %v3080_v20  ;;  %v9250_v4 = vmul.f32 -1.442695, %v3082_v51 }
 0xdbf   :  { %12512 = vpow2.f32 %v9248_v15 }
 0xdc0   :  { %12514 = vpow2.f32 %v9249_v35 }
 0xdc1   :  { %12516 = vpow2.f32 %v9250_v4 }
 0xdc2   :  { %12518 = vtanh.f32 %v3081_v23 }
 0xdc9   :  { %v12513_v39 = vpop.eup %12512 }
 0xdca   :  { %v12515_v7 = vpop.eup %12514  ;;  %v3086_v47 = vadd.f32 1.0, %v12513_v39 }
 0xdcb   :  { %v3092_v19 = vadd.f32 1.0, %v12515_v7  ;;  %v12517_v25 = vpop.eup %12516 }
 0xdcc   :  { %12520 = vrcp.f32 %v3086_v47  ;;  %v12519_v44 = vpop.eup %12518  ;;  %v3099_v17 = vadd.f32 1.0, %v12517_v25 }
 0xdcd   :  { %12522 = vrcp.f32 %v3092_v19 }
 0xdce   :  { %12524 = vrcp.f32 %v3099_v17 }
 0xdd6   :  { %v12521_v42 = vpop.eup %12520 }
 0xdd7   :  { %v12523_v60 = vpop.eup %12522  ;;  %v3106_v48 = vmul.f32 %v12521_v42, %v12519_v44 }
 0xdd8   :  { %v3105_v58 = vmul.f32 %v12523_v60, %v3103_v0  ;;  %v12525_v46 = vpop.eup %12524 }
 0xdda   :  { %v14110_v49 = vadd.f32 %v3106_v48, %v3105_v58 }
 0xddc   :  { %12526 = vtanh.f32 %v14110_v49  ;;  %v3289_v17 = vrot.slane %v14110_v49, 6 }
 0xde6   :  { %v12527_v3 = vpop.eup %12526 }
 0xde7   :  { %v3109_v43 = vmul.f32 %v12527_v3, %v12525_v46 }
 0xde9   :  { %3110 = vst [vmem:[#allocation2 + $0x8] sm:$0x3] %v3109_v43  ;;  %3176 = vmatmul.mubr.f32.vlgmr.msra.gmra.mrb[34].mxu0 %v3109_v43  ;;  %3247 = vmatmul.mubr.f32.vlgmr.msra.gmra.mrb[34].mxu1 %v3109_v43 }
 0xdea   :  { %10419 = vmatpush1.bf16.msra.mxu0 %v13743_v18  ;;  %10451 = vmatpush1.bf16.msra.mxu1 %v13746_v28 }
 0xdeb   :  { %10421 = vmatprep.subr.bf16.mxu0 %v13751_v32  ;;  %10453 = vmatprep.subr.bf16.mxu1 %v13753_v21 }
 0xdec   :  { %3364 = vmatprep.mubr.f32.mxu0 %v15645_v57  ;;  %3435 = vmatprep.mubr.f32.mxu1 %v15645_v57 }
 0xdee   :  { %10423 = vmatpush1.bf16.msra.mxu0 %v13755_v45  ;;  %10455 = vmatpush1.bf16.msra.mxu1 %v13758_v40 }
 0xdef   :  { %10425 = vmatprep.subr.bf16.mxu0 %v13763_v5  ;;  %10457 = vmatprep.subr.bf16.mxu1 %v13765_v31 }
 0xdf2   :  { %10427 = vmatpush1.bf16.msra.mxu0 %v13767_v2  ;;  %10459 = vmatpush1.bf16.msra.mxu1 %v13770_v50 }
 0xdf3   :  { %10429 = vmatprep.subr.bf16.mxu0 %v13775_v62  ;;  %10461 = vmatprep.subr.bf16.mxu1 %v13777_v12 }
 0xdf6   :  { %10431 = vmatpush1.bf16.msra.mxu0 %v13779_v13  ;;  %10463 = vmatpush1.bf16.msra.mxu1 %v13782_v24 }
 0xdf7   :  { %10433 = vmatprep.subr.bf16.mxu0 %v13787_v36  ;;  %10465 = vmatprep.subr.bf16.mxu1 %v13789_v53 }
 0xdfa   :  { %10435 = vmatpush1.bf16.msra.mxu0 %v13791_v54  ;;  %10467 = vmatpush1.bf16.msra.mxu1 %v13794_v8 }
 0xdfb   :  { %10437 = vmatprep.subr.bf16.mxu0 %v13799_v11  ;;  %10469 = vmatprep.subr.bf16.mxu1 %v13801_v26 }
 0xdfe   :  { %10439 = vmatpush1.bf16.msra.mxu0 %v13803_v22  ;;  %10471 = vmatpush1.bf16.msra.mxu1 %v13806_v16 }
 0xdff   :  { %10441 = vmatprep.subr.bf16.mxu0 %v13811_v27  ;;  %10473 = vmatprep.subr.bf16.mxu1 %v13813_v55 }
 0xe02   :  { %10443 = vmatpush1.bf16.msra.mxu0 %v13815_v61  ;;  %10475 = vmatpush1.bf16.msra.mxu1 %v13818_v10 }
 0xe03   :  { %10445 = vmatprep.subr.bf16.mxu0 %v13823_v29  ;;  %10477 = vmatprep.subr.bf16.mxu1 %v13825_v52 }
 0xe06   :  { %10447 = vmatpush1.bf16.msra.mxu0 %v13827_v6  ;;  %10479 = vmatpush1.bf16.msra.mxu1 %v13830_v41 }
 0xe07   :  { %10481 = vmatprep.subr.bf16.mxu0 %v13739_v59  ;;  %10513 = vmatprep.subr.bf16.mxu1 %v13741_v14 }
 0xebc   :  { %v3177_v1 = vpop.f32.mrb[34].mxu0  ;;  %v3248_v34 = vpop.f32.mrb[34].mxu1 }
 0xebd   :  { %v3257_v9 = vrot.slane %v3177_v1, 6  ;;  %v3179_v33 = vpop.f32.mrb[35].mxu0  ;;  %v3250_v20 = vpop.f32.mrb[35].mxu1  ;;  %v3259_v59 = vrot.slane %v3248_v34, 6 }
 0xebe   :  { %v3258_v15 = vrot.slane %v3179_v33, 6  ;;  %v3260_v39 = vrot.slane %v3250_v20, 6 }
 0xebf   :  { %v3265_v35 = vadd.f32 %v3257_v9, %v14091_v56  ;;  %v3267_v14 = vadd.f32 %v3259_v59, %v14106_v63  ;;  %v3688_v59 = vld [vmem:[#allocation3 + $0x430] sm:$0xff] }
 0xec0   :  { %v3266_v51 = vadd.f32 %v3258_v15, %v14095_v38  ;;  %v3268_v7 = vadd.f32 %v3260_v39, %v14101_v37 }
 0xec1   :  { %v9251_v4 = vmul.f32 -1.442695, %v3265_v35 }
 0xec2   :  { %v9252_v23 = vmul.f32 -1.442695, %v3266_v51  ;;  %v9253_v47 = vmul.f32 -1.442695, %v3268_v7  ;;  %v3684_v7 = vld [vmem:[#allocation3 + $0x410] sm:$0xff] }
 0xec3   :  { %12528 = vpow2.f32 %v9251_v4  ;;  %v3682_v4 = vld [vmem:[#allocation3 + $0x400] sm:$0xff] }
 0xec4   :  { %12530 = vpow2.f32 %v9252_v23  ;;  %v3686_v23 = vld [vmem:[#allocation3 + $0x420] sm:$0xff] }
 0xec5   :  { %12532 = vpow2.f32 %v9253_v47  ;;  %v3691_v47 = vld [vmem:[#allocation3 + $0x448] sm:$0xff] }
 0xec6   :  { %12534 = vtanh.f32 %v3267_v14 }
 0xecd   :  { %v12529_v19 = vpop.eup %12528 }
 0xece   :  { %v12531_v25 = vpop.eup %12530  ;;  %v3272_v44 = vadd.f32 1.0, %v12529_v19  ;;  %v3695_v19 = vld [vmem:[#allocation3 + $0x468] sm:$0xff] }
 0xecf   :  { %v3278_v42 = vadd.f32 1.0, %v12531_v25  ;;  %v12533_v0 = vpop.eup %12532  ;;  %v3693_v25 = vld [vmem:[#allocation3 + $0x458] sm:$0xff] }
 0xed0   :  { %12536 = vrcp.f32 %v3272_v44  ;;  %v12535_v60 = vpop.eup %12534  ;;  %v3285_v3 = vadd.f32 1.0, %v12533_v0  ;;  %v3697_v44 = vld [vmem:[#allocation3 + $0x478] sm:$0xff]  ;;  %v10546_v0 = vpack.c.bf16 %v3686_v23, %v3682_v4  ;;  %v3727_v4 = vld [vmem:[#allocation3 + $0x568] sm:$0xff] }
 0xed1   :  { %12538 = vrcp.f32 %v3278_v42  ;;  %v3725_v23 = vld [vmem:[#allocation3 + $0x558] sm:$0xff] }
 0xed2   :  { %12540 = vrcp.f32 %v3285_v3  ;;  %v10580_v3 = vpack.c.bf16 %v3697_v44, %v3693_v25  ;;  %v3724_v44 = vld [vmem:[#allocation3 + $0x550] sm:$0xff] }
 0xeda   :  { %v12537_v48 = vpop.eup %12536 }
 0xedb   :  { %v12539_v58 = vpop.eup %12538  ;;  %v3292_v46 = vmul.f32 %v12537_v48, %v12535_v60  ;;  %v10578_v60 = vpack.c.bf16 %v3688_v59, %v3684_v7  ;;  %v3690_v48 = vld [vmem:[#allocation3 + $0x440] sm:$0xff] }
 0xedc   :  { %v3291_v43 = vmul.f32 %v12539_v58, %v3289_v17  ;;  %v12541_v34 = vpop.eup %12540  ;;  %v3694_v17 = vld [vmem:[#allocation3 + $0x460] sm:$0xff] }
 0xede   :  { %v14152_v1 = vadd.f32 %v3292_v46, %v3291_v43  ;;  %v10548_v46 = vpack.c.bf16 %v3695_v19, %v3691_v47  ;;  %v3692_v43 = vld [vmem:[#allocation3 + $0x450] sm:$0xff]  ;;  %v3722_v47 = vld [vmem:[#allocation3 + $0x540] sm:$0xff] }
 0xee0   :  { %12542 = vtanh.f32 %v14152_v1 }
 0xeea   :  { %v12543_v9 = vpop.eup %12542 }
 0xeeb   :  { %v3295_v33 = vmul.f32 %v12543_v9, %v12541_v34  ;;  %v3699_v34 = vld [vmem:[#allocation3 + $0x488] sm:$0xff] }
 0xeec   :  { %v3703_v9 = vld [vmem:[#allocation3 + $0x4a8] sm:$0xff] }
 0xeed   :  { %3296 = vst [vmem:[#allocation2 + $0x8] sm:$0xc] %v3295_v33  ;;  %v3298_v20 = vrot.slane %v3295_v33, 2  ;;  %v3701_v33 = vld [vmem:[#allocation3 + $0x498] sm:$0xff] }
 0xeef   :  { %3365 = vmatmul.mubr.f32.vlgmr.msra.gmra.mrb[36].mxu0 %v3298_v20  ;;  %3436 = vmatmul.mubr.f32.vlgmr.msra.gmra.mrb[36].mxu1 %v3298_v20  ;;  %v3705_v20 = vld [vmem:[#allocation3 + $0x4b8] sm:$0xff] }
 0xef0   :  { %10483 = vmatpush1.bf16.msra.mxu0 %v13743_v18  ;;  %10515 = vmatpush1.bf16.msra.mxu1 %v13746_v28  ;;  %v3683_v18 = vld [vmem:[#allocation3 + $0x408] sm:$0xff] }
 0xef1   :  { %10485 = vmatprep.subr.bf16.mxu0 %v13751_v32  ;;  %10517 = vmatprep.subr.bf16.mxu1 %v13753_v21  ;;  %v3687_v28 = vld [vmem:[#allocation3 + $0x428] sm:$0xff]  ;;  %v3685_v32 = vld [vmem:[#allocation3 + $0x418] sm:$0xff] }
 0xef2   :  { %3553 = vmatprep.mubr.f32.mxu0 %v15645_v57  ;;  %3624 = vmatprep.mubr.f32.mxu1 %v15645_v57  ;;  %v10544_v21 = vpack.c.bf16 %v3687_v28, %v3683_v18  ;;  %v10550_v18 = vpack.c.bf16 %v3694_v17, %v3690_v48  ;;  %v3733_v48 = vld [vmem:[#allocation3 + $0x598] sm:$0xff] }
 0xef3   :  { %v3737_v17 = vld [vmem:[#allocation3 + $0x5b8] sm:$0xff] }
 0xef4   :  { %10487 = vmatpush1.bf16.msra.mxu0 %v13755_v45  ;;  %10519 = vmatpush1.bf16.msra.mxu1 %v13758_v40  ;;  %v3689_v45 = vld [vmem:[#allocation3 + $0x438] sm:$0xff] }
 0xef5   :  { %10489 = vmatprep.subr.bf16.mxu0 %v13763_v5  ;;  %10521 = vmatprep.subr.bf16.mxu1 %v13765_v31  ;;  %v10576_v40 = vpack.c.bf16 %v3689_v45, %v3685_v32  ;;  %v3698_v32 = vld [vmem:[#allocation3 + $0x480] sm:$0xff]  ;;  %v10552_v45 = vpack.c.bf16 %v3703_v9, %v3699_v34  ;;  %v10600_v34 = vpack.c.bf16 %v3737_v17, %v3733_v48  ;;  %v3732_v9 = vld [vmem:[#allocation3 + $0x590] sm:$0xff] }
 0xef6   :  { %v3765_v17 = vld [vmem:[#allocation6 + $0x490] sm:$0xff] }
 0xef8   :  { %10491 = vmatpush1.bf16.msra.mxu0 %v13767_v2  ;;  %10523 = vmatpush1.bf16.msra.mxu1 %v13770_v50 }
 0xef9   :  { %10493 = vmatprep.subr.bf16.mxu0 %v13775_v62  ;;  %10525 = vmatprep.subr.bf16.mxu1 %v13777_v12 }
 0xefc   :  { %10495 = vmatpush1.bf16.msra.mxu0 %v13779_v13  ;;  %10527 = vmatpush1.bf16.msra.mxu1 %v13782_v24 }
 0xefd   :  { %10497 = vmatprep.subr.bf16.mxu0 %v13787_v36  ;;  %10529 = vmatprep.subr.bf16.mxu1 %v13789_v53 }
 0xf00   :  { %10499 = vmatpush1.bf16.msra.mxu0 %v13791_v54  ;;  %10531 = vmatpush1.bf16.msra.mxu1 %v13794_v8 }
 0xf01   :  { %10501 = vmatprep.subr.bf16.mxu0 %v13799_v11  ;;  %10533 = vmatprep.subr.bf16.mxu1 %v13801_v26 }
 0xf04   :  { %10503 = vmatpush1.bf16.msra.mxu0 %v13803_v22  ;;  %10535 = vmatpush1.bf16.msra.mxu1 %v13806_v16 }
 0xf05   :  { %10505 = vmatprep.subr.bf16.mxu0 %v13811_v27  ;;  %10537 = vmatprep.subr.bf16.mxu1 %v13813_v55 }
 0xf08   :  { %10507 = vmatpush1.bf16.msra.mxu0 %v13815_v61  ;;  %10539 = vmatpush1.bf16.msra.mxu1 %v13818_v10 }
 0xf09   :  { %10509 = vmatprep.subr.bf16.mxu0 %v13823_v29  ;;  %10541 = vmatprep.subr.bf16.mxu1 %v13825_v52 }
 0xf0c   :  { %10511 = vmatpush1.bf16.msra.mxu0 %v13827_v6  ;;  %10543 = vmatpush1.bf16.msra.mxu1 %v13830_v41  ;;  %v3478_v6 = vrot.slane %v14152_v1, 6  ;;  %v3696_v1 = vld [vmem:[#allocation3 + $0x470] sm:$0xff] }
 0xf0d   :  { %10545 = vmatprep.subr.bf16.mxu0 %v10544_v21  ;;  %10577 = vmatprep.subr.bf16.mxu1 %v10576_v40  ;;  %v10582_v28 = vpack.c.bf16 %v3696_v1, %v3692_v43  ;;  %v3702_v21 = vld [vmem:[#allocation3 + $0x4a0] sm:$0xff]  ;;  %v10584_v40 = vpack.c.bf16 %v3705_v20, %v3701_v33  ;;  %v3736_v33 = vld [vmem:[#allocation3 + $0x5b0] sm:$0xff]  ;;  %v3739_v20 = vld [vmem:[#allocation3 + $0x5c8] sm:$0xff] }
 0xf0e   :  { %v3734_v43 = vld [vmem:[#allocation3 + $0x5a0] sm:$0xff] }
 0xfc2   :  { %v3366_v5 = vpop.f32.mrb[36].mxu0  ;;  %v3437_v31 = vpop.f32.mrb[36].mxu1 }
 0xfc3   :  { %v3446_v2 = vrot.slane %v3366_v5, 4  ;;  %v3368_v50 = vpop.f32.mrb[37].mxu0  ;;  %v3439_v62 = vpop.f32.mrb[37].mxu1  ;;  %v3448_v11 = vrot.slane %v3437_v31, 4  ;;  %v3700_v5 = vld [vmem:[#allocation3 + $0x490] sm:$0xff] }
 0xfc4   :  { %v3447_v12 = vrot.slane %v3368_v50, 4  ;;  %v3449_v54 = vrot.slane %v3439_v62, 4  ;;  %v3704_v31 = vld [vmem:[#allocation3 + $0x4b0] sm:$0xff]  ;;  %v3711_v50 = vld [vmem:[#allocation3 + $0x4e8] sm:$0xff]  ;;  %v3709_v62 = vld [vmem:[#allocation3 + $0x4d8] sm:$0xff] }
 0xfc5   :  { %v3454_v13 = vadd.f32 %v3446_v2, %v14091_v56  ;;  %v3456_v22 = vadd.f32 %v3448_v11, %v14106_v63  ;;  %v3707_v2 = vld [vmem:[#allocation3 + $0x4c8] sm:$0xff]  ;;  %v3708_v11 = vld [vmem:[#allocation3 + $0x4d0] sm:$0xff] }
 0xfc6   :  { %v3455_v24 = vadd.f32 %v3447_v12, %v14095_v38  ;;  %v3457_v8 = vadd.f32 %v3449_v54, %v14101_v37  ;;  %v3713_v12 = vld [vmem:[#allocation3 + $0x4f8] sm:$0xff]  ;;  %v10556_v54 = vpack.c.bf16 %v3711_v50, %v3707_v2  ;;  %v3742_v2 = vld [vmem:[#allocation3 + $0x5e0] sm:$0xff]  ;;  %v3740_v50 = vld [vmem:[#allocation3 + $0x5d0] sm:$0xff] }
 0xfc7   :  { %v9254_v36 = vmul.f32 -1.442695, %v3454_v13  ;;  %v10554_v13 = vpack.c.bf16 %v3702_v21, %v3698_v32  ;;  %v3745_v32 = vld [vmem:[#allocation3 + $0x5f8] sm:$0xff] }
 0xfc8   :  { %v9255_v53 = vmul.f32 -1.442695, %v3455_v24  ;;  %v9256_v26 = vmul.f32 -1.442695, %v3457_v8  ;;  %v10586_v24 = vpack.c.bf16 %v3704_v31, %v3700_v5  ;;  %v10588_v8 = vpack.c.bf16 %v3713_v12, %v3709_v62  ;;  %v3744_v62 = vld [vmem:[#allocation3 + $0x5f0] sm:$0xff] }
 0xfc9   :  { %12544 = vpow2.f32 %v9254_v36  ;;  %v3706_v36 = vld [vmem:[#allocation3 + $0x4c0] sm:$0xff] }
 0xfca   :  { %12546 = vpow2.f32 %v9255_v53  ;;  %v3710_v53 = vld [vmem:[#allocation3 + $0x4e0] sm:$0xff] }
 0xfcb   :  { %12548 = vpow2.f32 %v9256_v26  ;;  %v3712_v26 = vld [vmem:[#allocation3 + $0x4f0] sm:$0xff] }
 0xfcc   :  { %12550 = vtanh.f32 %v3456_v22  ;;  %v3715_v22 = vld [vmem:[#allocation3 + $0x508] sm:$0xff] }
 0xfd3   :  { %v12545_v16 = vpop.eup %12544 }
 0xfd4   :  { %v12547_v27 = vpop.eup %12546  ;;  %v3461_v55 = vadd.f32 1.0, %v12545_v16  ;;  %v3719_v16 = vld [vmem:[#allocation3 + $0x528] sm:$0xff] }
 0xfd5   :  { %v3467_v61 = vadd.f32 1.0, %v12547_v27  ;;  %v12549_v10 = vpop.eup %12548  ;;  %v3717_v27 = vld [vmem:[#allocation3 + $0x518] sm:$0xff] }
 0xfd6   :  { %12552 = vrcp.f32 %v3461_v55  ;;  %v12551_v29 = vpop.eup %12550  ;;  %v3474_v15 = vadd.f32 1.0, %v12549_v10  ;;  %v3721_v55 = vld [vmem:[#allocation3 + $0x538] sm:$0xff]  ;;  %v10590_v10 = vpack.c.bf16 %v3712_v26, %v3708_v11  ;;  %v3747_v26 = vld [vmem:[#allocation6 + $0x400] sm:$0xff] }
 0xfd7   :  { %12554 = vrcp.f32 %v3467_v61  ;;  %v10558_v61 = vpack.c.bf16 %v3710_v53, %v3706_v36  ;;  %v3748_v36 = vld [vmem:[#allocation6 + $0x408] sm:$0xff]  ;;  %v3754_v11 = vld [vmem:[#allocation6 + $0x438] sm:$0xff] }
 0xfd8   :  { %12556 = vrcp.f32 %v3474_v15  ;;  %v3720_v15 = vld [vmem:[#allocation3 + $0x530] sm:$0xff]  ;;  %v3752_v53 = vld [vmem:[#allocation6 + $0x428] sm:$0xff] }
 0xfe0   :  { %v12553_v52 = vpop.eup %12552 }
 0xfe1   :  { %v12555_v41 = vpop.eup %12554  ;;  %v3481_v49 = vmul.f32 %v12553_v52, %v12551_v29  ;;  %v3714_v29 = vld [vmem:[#allocation3 + $0x500] sm:$0xff] }
 0xfe2   :  { %v3480_v35 = vmul.f32 %v12555_v41, %v3478_v6  ;;  %v12557_v39 = vpop.eup %12556  ;;  %v3718_v52 = vld [vmem:[#allocation3 + $0x520] sm:$0xff]  ;;  %v10560_v6 = vpack.c.bf16 %v3719_v16, %v3715_v22  ;;  %v10592_v41 = vpack.c.bf16 %v3721_v55, %v3717_v27  ;;  %v3749_v55 = vld [vmem:[#allocation6 + $0x410] sm:$0xff] }
 0xfe3   :  { %v10562_v7 = vpack.c.bf16 %v3718_v52, %v3714_v29  ;;  %v3751_v22 = vld [vmem:[#allocation6 + $0x420] sm:$0xff]  ;;  %v3756_v29 = vld [vmem:[#allocation6 + $0x448] sm:$0xff] }
 0xfe4   :  { %v14192_v51 = vadd.f32 %v3481_v49, %v3480_v35  ;;  %v3716_v49 = vld [vmem:[#allocation3 + $0x510] sm:$0xff]  ;;  %v3723_v35 = vld [vmem:[#allocation3 + $0x548] sm:$0xff]  ;;  %v14203_v27 = vpack.c.bf16 %v3751_v22, %v3747_v26  ;;  %v3790_v22 = vld [vmem:[#allocation6 + $0x558] sm:$0xff] }
 0xfe5   :  { %v10594_v59 = vpack.c.bf16 %v3720_v15, %v3716_v49  ;;  %v10564_v19 = vpack.c.bf16 %v3727_v4, %v3723_v35  ;;  %v3760_v52 = vld [vmem:[#allocation6 + $0x468] sm:$0xff]  ;;  %v3762_v49 = vld [vmem:[#allocation6 + $0x478] sm:$0xff]  ;;  %v3755_v15 = vld [vmem:[#allocation6 + $0x440] sm:$0xff] }
 0xfe6   :  { %12558 = vtanh.f32 %v14192_v51  ;;  %v3759_v35 = vld [vmem:[#allocation6 + $0x460] sm:$0xff]  ;;  %v3792_v26 = vld [vmem:[#allocation6 + $0x568] sm:$0xff] }
 0xff0   :  { %v12559_v14 = vpop.eup %12558 }
 0xff1   :  { %v3484_v42 = vmul.f32 %v12559_v14, %v12557_v39  ;;  %v3729_v39 = vld [vmem:[#allocation3 + $0x578] sm:$0xff]  ;;  %v3726_v14 = vld [vmem:[#allocation3 + $0x560] sm:$0xff] }
 0xff2   :  { %v10596_v25 = vpack.c.bf16 %v3729_v39, %v3725_v23  ;;  %v14215_v23 = vpack.c.bf16 %v3759_v35, %v3755_v15  ;;  %v3757_v39 = vld [vmem:[#allocation6 + $0x450] sm:$0xff] }
 0xff3   :  { %3485 = vst [vmem:[#allocation2 + $0x8] sm:$0x30] %v3484_v42  ;;  %v3487_v58 = vrot.slane %v3484_v42, 4  ;;  %v3728_v42 = vld [vmem:[#allocation3 + $0x570] sm:$0xff] }
 0xff4   :  { %v3789_v15 = vld [vmem:[#allocation6 + $0x550] sm:$0xff] }
 0xff5   :  { %3554 = vmatmul.mubr.f32.vlgmr.msra.gmra.mrb[38].mxu0 %v3487_v58  ;;  %3625 = vmatmul.mubr.f32.vlgmr.msra.gmra.mrb[38].mxu1 %v3487_v58  ;;  %v10566_v58 = vpack.c.bf16 %v3726_v14, %v3722_v47  ;;  %v3764_v47 = vld [vmem:[#allocation6 + $0x488] sm:$0xff]  ;;  %v3793_v35 = vld [vmem:[#allocation6 + $0x570] sm:$0xff] }
 0xff6   :  { %10547 = vmatpush1.bf16.msra.mxu0 %v10546_v0  ;;  %10579 = vmatpush1.bf16.msra.mxu1 %v10578_v60  ;;  %v3731_v0 = vld [vmem:[#allocation3 + $0x588] sm:$0xff] }
 0xff7   :  { %10549 = vmatprep.subr.bf16.mxu0 %v10548_v46  ;;  %10581 = vmatprep.subr.bf16.mxu1 %v10580_v3  ;;  %v3735_v60 = vld [vmem:[#allocation3 + $0x5a8] sm:$0xff]  ;;  %v10598_v46 = vpack.c.bf16 %v3728_v42, %v3724_v44  ;;  %v3730_v3 = vld [vmem:[#allocation3 + $0x580] sm:$0xff]  ;;  %v3770_v44 = vld [vmem:[#allocation6 + $0x4b8] sm:$0xff] }
 0xff8   :  { %3898 = vmatprep.mubr.f32.mxu0 %v15645_v57  ;;  %3975 = vmatprep.mubr.f32.mxu1 %v15645_v57  ;;  %v10568_v1 = vpack.c.bf16 %v3735_v60, %v3731_v0  ;;  %v10570_v21 = vpack.c.bf16 %v3734_v43, %v3730_v3  ;;  %v3768_v14 = vld [vmem:[#allocation6 + $0x4a8] sm:$0xff]  ;;  %v3763_v42 = vld [vmem:[#allocation6 + $0x480] sm:$0xff] }
 0xff9   :  { %v3767_v0 = vld [vmem:[#allocation6 + $0x4a0] sm:$0xff]  ;;  %v3772_v3 = vld [vmem:[#allocation6 + $0x4c8] sm:$0xff] }
 0xffa   :  { %10551 = vmatpush1.bf16.msra.mxu0 %v10550_v18  ;;  %10583 = vmatpush1.bf16.msra.mxu1 %v10582_v28  ;;  %v3743_v18 = vld [vmem:[#allocation3 + $0x5e8] sm:$0xff]  ;;  %v3741_v28 = vld [vmem:[#allocation3 + $0x5d8] sm:$0xff]  ;;  %v14227_v48 = vpack.c.bf16 %v3767_v0, %v3763_v42  ;;  %v3795_v0 = vld [vmem:[#allocation6 + $0x580] sm:$0xff] }
 0xffb   :  { %10553 = vmatprep.subr.bf16.mxu0 %v10552_v45  ;;  %10585 = vmatprep.subr.bf16.mxu1 %v10584_v40  ;;  %v10602_v45 = vpack.c.bf16 %v3736_v33, %v3732_v9  ;;  %v3738_v40 = vld [vmem:[#allocation3 + $0x5c0] sm:$0xff]  ;;  %v10572_v5 = vpack.c.bf16 %v3743_v18, %v3739_v20  ;;  %v10604_v31 = vpack.c.bf16 %v3745_v32, %v3741_v28  ;;  %v3776_v43 = vld [vmem:[#allocation6 + $0x4e8] sm:$0xff]  ;;  %v3778_v9 = vld [vmem:[#allocation6 + $0x4f8] sm:$0xff] }
 0xffc   :  { %v10574_v12 = vpack.c.bf16 %v3742_v2, %v3738_v40  ;;  %v3771_v33 = vld [vmem:[#allocation6 + $0x4c0] sm:$0xff]  ;;  %v3773_v32 = vld [vmem:[#allocation6 + $0x4d0] sm:$0xff]  ;;  %v3780_v40 = vld [vmem:[#allocation6 + $0x508] sm:$0xff] }
 0xffd   :  { %v3775_v20 = vld [vmem:[#allocation6 + $0x4e0] sm:$0xff] }
 0xffe   :  { %10555 = vmatpush1.bf16.msra.mxu0 %v10554_v13  ;;  %10587 = vmatpush1.bf16.msra.mxu1 %v10586_v24  ;;  %v10606_v13 = vpack.c.bf16 %v3744_v62, %v3740_v50  ;;  %v3679_v24 = vld [vmem:[#allocation2] sm:$0xff]  ;;  %v14239_v28 = vpack.c.bf16 %v3775_v20, %v3771_v33  ;;  %v3786_v50 = vld [vmem:[#allocation6 + $0x538] sm:$0xff]  ;;  %v3779_v62 = vld [vmem:[#allocation6 + $0x500] sm:$0xff] }
 0xfff   :  { %10557 = vmatprep.subr.bf16.mxu0 %v10556_v54  ;;  %10589 = vmatprep.subr.bf16.mxu1 %v10588_v8  ;;  %v3750_v54 = vld [vmem:[#allocation6 + $0x418] sm:$0xff]  ;;  %v14199_v8 = vpack.c.bf16 %v3752_v53, %v3748_v36  ;;  %v3781_v36 = vld [vmem:[#allocation6 + $0x510] sm:$0xff]  ;;  %v3808_v33 = vld [vmem:[#allocation6 + $0x5e8] sm:$0xff] }
0x1000   :  { %v14201_v16 = vpack.c.bf16 %v3754_v11, %v3750_v54  ;;  %v3785_v53 = vld [vmem:[#allocation6 + $0x530] sm:$0xff]  ;;  %v3788_v11 = vld [vmem:[#allocation6 + $0x548] sm:$0xff]  ;;  %v3806_v20 = vld [vmem:[#allocation6 + $0x5d8] sm:$0xff] }
0x1001   :  { %v14254_v54 = vpack.c.bf16 %v3785_v53, %v3781_v36 }
0x1002   :  { %10559 = vmatpush1.bf16.msra.mxu0 %v10558_v61  ;;  %10591 = vmatpush1.bf16.msra.mxu1 %v10590_v10  ;;  %v3753_v61 = vld [vmem:[#allocation6 + $0x430] sm:$0xff] }
0x1003   :  { %10561 = vmatprep.subr.bf16.mxu0 %v10560_v6  ;;  %10593 = vmatprep.subr.bf16.mxu1 %v10592_v41  ;;  %v14206_v10 = vpack.c.bf16 %v3753_v61, %v3749_v55  ;;  %v3758_v6 = vld [vmem:[#allocation6 + $0x458] sm:$0xff]  ;;  %v14211_v41 = vpack.c.bf16 %v3760_v52, %v3756_v29  ;;  %v14259_v55 = vpack.c.bf16 %v3792_v26, %v3788_v11  ;;  %v3787_v29 = vld [vmem:[#allocation6 + $0x540] sm:$0xff] }
0x1004   :  { %v14213_v4 = vpack.c.bf16 %v3762_v49, %v3758_v6  ;;  %v3794_v61 = vld [vmem:[#allocation6 + $0x578] sm:$0xff]  ;;  %v3791_v52 = vld [vmem:[#allocation6 + $0x560] sm:$0xff] }
0x1005   :  { %v14261_v6 = vpack.c.bf16 %v3794_v61, %v3790_v22  ;;  %v14263_v49 = vpack.c.bf16 %v3791_v52, %v3787_v29 }
0x1006   :  { %10563 = vmatpush1.bf16.msra.mxu0 %v10562_v7  ;;  %10595 = vmatpush1.bf16.msra.mxu1 %v10594_v59  ;;  %v3761_v7 = vld [vmem:[#allocation6 + $0x470] sm:$0xff] }
0x1007   :  { %10565 = vmatprep.subr.bf16.mxu0 %v10564_v19  ;;  %10597 = vmatprep.subr.bf16.mxu1 %v10596_v25  ;;  %v14218_v59 = vpack.c.bf16 %v3761_v7, %v3757_v39  ;;  %v3766_v19 = vld [vmem:[#allocation6 + $0x498] sm:$0xff]  ;;  %v14223_v25 = vpack.c.bf16 %v3768_v14, %v3764_v47  ;;  %v3796_v39 = vld [vmem:[#allocation6 + $0x588] sm:$0xff]  ;;  %v14266_v7 = vpack.c.bf16 %v3793_v35, %v3789_v15 }
0x1008   :  { %v14225_v60 = vpack.c.bf16 %v3770_v44, %v3766_v19  ;;  %v3800_v47 = vld [vmem:[#allocation6 + $0x5a8] sm:$0xff]  ;;  %v3798_v14 = vld [vmem:[#allocation6 + $0x598] sm:$0xff] }
0x1009   :  { %v3802_v19 = vld [vmem:[#allocation6 + $0x5b8] sm:$0xff]  ;;  %v14270_v44 = vpack.c.bf16 %v3800_v47, %v3796_v39 }
0x100a   :  { %10567 = vmatpush1.bf16.msra.mxu0 %v10566_v58  ;;  %10599 = vmatpush1.bf16.msra.mxu1 %v10598_v46  ;;  %v3769_v58 = vld [vmem:[#allocation6 + $0x4b0] sm:$0xff]  ;;  %v14272_v42 = vpack.c.bf16 %v3802_v19, %v3798_v14 }
0x100b   :  { %10569 = vmatprep.subr.bf16.mxu0 %v10568_v1  ;;  %10601 = vmatprep.subr.bf16.mxu1 %v10600_v34  ;;  %v14230_v46 = vpack.c.bf16 %v3769_v58, %v3765_v17  ;;  %v3774_v1 = vld [vmem:[#allocation6 + $0x4d8] sm:$0xff]  ;;  %v14235_v34 = vpack.c.bf16 %v3776_v43, %v3772_v3  ;;  %v3799_v17 = vld [vmem:[#allocation6 + $0x5a0] sm:$0xff]  ;;  %v3797_v58 = vld [vmem:[#allocation6 + $0x590] sm:$0xff] }
0x100c   :  { %v14237_v18 = vpack.c.bf16 %v3778_v9, %v3774_v1  ;;  %v14275_v3 = vpack.c.bf16 %v3799_v17, %v3795_v0  ;;  %v3801_v43 = vld [vmem:[#allocation6 + $0x5b0] sm:$0xff]  ;;  %v3804_v9 = vld [vmem:[#allocation6 + $0x5c8] sm:$0xff] }
0x100d   :  { %v14279_v1 = vpack.c.bf16 %v3801_v43, %v3797_v58 }
0x100e   :  { %10571 = vmatpush1.bf16.msra.mxu0 %v10570_v21  ;;  %10603 = vmatpush1.bf16.msra.mxu1 %v10602_v45  ;;  %v3777_v21 = vld [vmem:[#allocation6 + $0x4f0] sm:$0xff] }
0x100f   :  { %10573 = vmatprep.subr.bf16.mxu0 %v10572_v5  ;;  %10605 = vmatprep.subr.bf16.mxu1 %v10604_v31  ;;  %v14242_v45 = vpack.c.bf16 %v3777_v21, %v3773_v32  ;;  %v3784_v5 = vld [vmem:[#allocation6 + $0x528] sm:$0xff]  ;;  %v3782_v31 = vld [vmem:[#allocation6 + $0x518] sm:$0xff]  ;;  %v14283_v32 = vpack.c.bf16 %v3808_v33, %v3804_v9 }
0x1010   :  { %v14247_v2 = vpack.c.bf16 %v3784_v5, %v3780_v40  ;;  %v3810_v21 = vld [vmem:[#allocation6 + $0x5f8] sm:$0xff]  ;;  %v3803_v40 = vld [vmem:[#allocation6 + $0x5c0] sm:$0xff] }
0x1011   :  { %v3807_v5 = vld [vmem:[#allocation6 + $0x5e0] sm:$0xff] }
0x1012   :  { %10575 = vmatpush1.bf16.msra.mxu0 %v10574_v12  ;;  %10607 = vmatpush1.bf16.msra.mxu1 %v10606_v13  ;;  %v3783_v12 = vld [vmem:[#allocation6 + $0x520] sm:$0xff]  ;;  %v14249_v13 = vpack.c.bf16 %v3786_v50, %v3782_v31  ;;  %v14285_v31 = vpack.c.bf16 %v3810_v21, %v3806_v20  ;;  %v14287_v50 = vpack.c.bf16 %v3807_v5, %v3803_v40  ;;  %v3667_v21 = vrot.slane %v14192_v51, 6 }
0x1013   :  { %10609 = vmatprep.subr.bf16.mxu0 %v14199_v8  ;;  %10641 = vmatprep.subr.bf16.mxu1 %v14201_v16 }
0x1015   :  { %3899 = vmatmul.mubr.f32.vlgmr.msra.gmra.mrb[40].mxu0 %v3679_v24  ;;  %3976 = vmatmul.mubr.f32.vlgmr.msra.gmra.mrb[40].mxu1 %v3679_v24  ;;  %v14251_v24 = vpack.c.bf16 %v3783_v12, %v3779_v62  ;;  %v3805_v62 = vld [vmem:[#allocation6 + $0x5d0] sm:$0xff] }
0x1016   :  { %3904 = vmatprep.mubr.f32.mxu0 %v15645_v57  ;;  %3981 = vmatprep.mubr.f32.mxu1 %v15645_v57  ;;  %v3809_v12 = vld [vmem:[#allocation6 + $0x5f0] sm:$0xff] }
0x1017   :  { %10611 = vmatpush1.bf16.msra.mxu0 %v14203_v27  ;;  %10643 = vmatpush1.bf16.msra.mxu1 %v14206_v10  ;;  %v14290_v36 = vpack.c.bf16 %v3809_v12, %v3805_v62 }
0x1018   :  { %10613 = vmatprep.subr.bf16.mxu0 %v14211_v41  ;;  %10645 = vmatprep.subr.bf16.mxu1 %v14213_v4 }
0x101b   :  { %10615 = vmatpush1.bf16.msra.mxu0 %v14215_v23  ;;  %10647 = vmatpush1.bf16.msra.mxu1 %v14218_v59 }
0x101c   :  { %10617 = vmatprep.subr.bf16.mxu0 %v14223_v25  ;;  %10649 = vmatprep.subr.bf16.mxu1 %v14225_v60 }
0x101f   :  { %10619 = vmatpush1.bf16.msra.mxu0 %v14227_v48  ;;  %10651 = vmatpush1.bf16.msra.mxu1 %v14230_v46 }
0x1020   :  { %10621 = vmatprep.subr.bf16.mxu0 %v14235_v34  ;;  %10653 = vmatprep.subr.bf16.mxu1 %v14237_v18 }
0x1023   :  { %10623 = vmatpush1.bf16.msra.mxu0 %v14239_v28  ;;  %10655 = vmatpush1.bf16.msra.mxu1 %v14242_v45 }
0x1024   :  { %10625 = vmatprep.subr.bf16.mxu0 %v14247_v2  ;;  %10657 = vmatprep.subr.bf16.mxu1 %v14249_v13 }
0x1027   :  { %10627 = vmatpush1.bf16.msra.mxu0 %v14251_v24  ;;  %10659 = vmatpush1.bf16.msra.mxu1 %v14254_v54 }
0x1028   :  { %10629 = vmatprep.subr.bf16.mxu0 %v14259_v55  ;;  %10661 = vmatprep.subr.bf16.mxu1 %v14261_v6 }
0x102b   :  { %10631 = vmatpush1.bf16.msra.mxu0 %v14263_v49  ;;  %10663 = vmatpush1.bf16.msra.mxu1 %v14266_v7 }
0x102c   :  { %10633 = vmatprep.subr.bf16.mxu0 %v14270_v44  ;;  %10665 = vmatprep.subr.bf16.mxu1 %v14272_v42 }
0x102f   :  { %10635 = vmatpush1.bf16.msra.mxu0 %v14275_v3  ;;  %10667 = vmatpush1.bf16.msra.mxu1 %v14279_v1 }
0x1030   :  { %10637 = vmatprep.subr.bf16.mxu0 %v14283_v32  ;;  %10669 = vmatprep.subr.bf16.mxu1 %v14285_v31 }
0x1033   :  { %10639 = vmatpush1.bf16.msra.mxu0 %v14287_v50  ;;  %10671 = vmatpush1.bf16.msra.mxu1 %v14290_v36 }
0x1034   :  { %10673 = vmatprep.subr.bf16.mxu0 %v14199_v8  ;;  %10705 = vmatprep.subr.bf16.mxu1 %v14201_v16 }
0x10c8   :  { %v3555_v53 = vpop.f32.mrb[38].mxu0  ;;  %v3626_v11 = vpop.f32.mrb[38].mxu1 }
0x10c9   :  { %v3635_v26 = vrot.slane %v3555_v53, 2  ;;  %v3557_v22 = vpop.f32.mrb[39].mxu0  ;;  %v3628_v61 = vpop.f32.mrb[39].mxu1  ;;  %v3637_v19 = vrot.slane %v3626_v11, 2 }
0x10ca   :  { %v3636_v29 = vrot.slane %v3557_v22, 2  ;;  %v3638_v47 = vrot.slane %v3628_v61, 2 }
0x10cb   :  { %v3643_v52 = vadd.f32 %v3635_v26, %v14091_v56  ;;  %v3645_v17 = vadd.f32 %v3637_v19, %v14106_v63 }
0x10cc   :  { %v3644_v15 = vadd.f32 %v3636_v29, %v14095_v38  ;;  %v3646_v14 = vadd.f32 %v3638_v47, %v14101_v37 }
0x10cd   :  { %v9257_v35 = vmul.f32 -1.442695, %v3643_v52  ;;  %v9260_v52 = vld [vmem:[%s15624_s1 + $0x4] sm:$0x3] }
0x10ce   :  { %v9258_v39 = vmul.f32 -1.442695, %v3644_v15  ;;  %v9259_v0 = vmul.f32 -1.442695, %v3646_v14  ;;  %v3812_v15 = vld [vmem:[#allocation8 + $0x8] sm:$0xf] }
0x10cf   :  { %12560 = vpow2.f32 %v9257_v35  ;;  %v14346_v35 = vrot.slane %v3812_v15, %v13447_v30 }
0x10d0   :  { %12562 = vpow2.f32 %v9258_v39  ;;  %v15646_v39 = vld [vmem:[#allocation21_spill] sm:$0xff] }
0x10d1   :  { %12564 = vpow2.f32 %v9259_v0  ;;  %v14349_v47 = vrot.slane %v3812_v15, %v15646_v39 }
0x10d2   :  { %12566 = vtanh.f32 %v3645_v17 }
0x10d9   :  { %v12561_v58 = vpop.eup %12560 }
0x10da   :  { %v12563_v43 = vpop.eup %12562  ;;  %v3650_v9 = vadd.f32 1.0, %v12561_v58 }
0x10db   :  { %v3656_v33 = vadd.f32 1.0, %v12563_v43  ;;  %v12565_v56 = vpop.eup %12564 }
0x10dc   :  { %12568 = vrcp.f32 %v3650_v9  ;;  %v12567_v38 = vpop.eup %12566  ;;  %v3663_v37 = vadd.f32 1.0, %v12565_v56 }
0x10dd   :  { %12570 = vrcp.f32 %v3656_v33 }
0x10de   :  { %12572 = vrcp.f32 %v3663_v37 }
0x10e6   :  { %v12569_v20 = vpop.eup %12568 }
0x10e7   :  { %v12571_v40 = vpop.eup %12570  ;;  %v3670_v5 = vmul.f32 %v12569_v20, %v12567_v38 }
0x10e8   :  { %v3669_v62 = vmul.f32 %v12571_v40, %v3667_v21  ;;  %v3900_v12 = vpop.f32.mrb[40].mxu0  ;;  %v14302_v53 = vpop.f32.mrb[40].mxu1  ;;  %v15647_v21 = vld [vmem:[#allocation23_spill] sm:$0xff] }
0x10e9   :  { %v3902_v63 = vpop.f32.mrb[41].mxu0  ;;  %v14304_v11 = vpop.f32.mrb[41].mxu1  ;;  %v14360_v58 = vadd.f32 %v3900_v12, %v14346_v35  ;;  %v14367_v40 = vrot.slane %v3812_v15, %v15647_v21 }
0x10ea   :  { %v3671_v26 = vadd.f32 %v3670_v5, %v3669_v62  ;;  %v12573_v22 = vpop.eup %12572  ;;  %v14363_v43 = vadd.f32 %v3902_v63, %v14349_v47  ;;  %v15648_v63 = vld [vmem:[#allocation22_spill] sm:$0xff] }
0x10eb   :  { %v14372_v12 = vadd.f32 %v14304_v11, %v14367_v40 }
0x10ec   :  { %12574 = vtanh.f32 %v3671_v26  ;;  %3678 = vst [vmem:[#allocation15 - $0x4] sm:$0xc0] %v3671_v26  ;;  %v14375_v26 = vrot.slane %v3812_v15, %v15648_v63 }
0x10f6   :  { %v12575_v61 = vpop.eup %12574 }
0x10f7   :  { %v3673_v29 = vmul.f32 %v12575_v61, %v12573_v22  ;;  %v14380_v61 = vadd.f32 %v14302_v53, %v14375_v26 }
0x10f9   :  { %3674 = vst [vmem:[#allocation2 + $0x8] sm:$0xc0] %v3673_v29  ;;  %3676 = vst [vmem:[#allocation13 - $0x4] sm:$0xc0] %v3673_v29 }
0x1100   :  { %v3680_v51 = vld [vmem:[#allocation2 + $0x8] sm:$0xff] }
0x1101   :  { %3905 = vmatmul.mubr.f32.gmra.mrb[42].mxu0 %v3680_v51  ;;  %3982 = vmatmul.mubr.f32.gmra.mrb[42].mxu1 %v3680_v51 }
0x1102   :  { %4056 = vmatprep.mubr.f32.mxu0 %v15645_v57  ;;  %4127 = vmatprep.mubr.f32.mxu1 %v15645_v57 }
0x1105   :  { %4057 = vmatmul.mubr.f32.vlgmr.msra.gmra.mrb[44].mxu0 %v9260_v52  ;;  %4128 = vmatmul.mubr.f32.vlgmr.msra.gmra.mrb[44].mxu1 %v9260_v52 }
0x1106   :  { %10675 = vmatpush1.bf16.msra.mxu0 %v14203_v27  ;;  %10707 = vmatpush1.bf16.msra.mxu1 %v14206_v10 }
0x1107   :  { %10677 = vmatprep.subr.bf16.mxu0 %v14211_v41  ;;  %10709 = vmatprep.subr.bf16.mxu1 %v14213_v4 }
0x1108   :  { %4227 = vmatprep.mubr.f32.mxu0 %v15645_v57  ;;  %4298 = vmatprep.mubr.f32.mxu1 %v15645_v57 }
0x110a   :  { %10679 = vmatpush1.bf16.msra.mxu0 %v14215_v23  ;;  %10711 = vmatpush1.bf16.msra.mxu1 %v14218_v59 }
0x110b   :  { %10681 = vmatprep.subr.bf16.mxu0 %v14223_v25  ;;  %10713 = vmatprep.subr.bf16.mxu1 %v14225_v60 }
0x110e   :  { %10683 = vmatpush1.bf16.msra.mxu0 %v14227_v48  ;;  %10715 = vmatpush1.bf16.msra.mxu1 %v14230_v46 }
0x110f   :  { %10685 = vmatprep.subr.bf16.mxu0 %v14235_v34  ;;  %10717 = vmatprep.subr.bf16.mxu1 %v14237_v18 }
0x1112   :  { %10687 = vmatpush1.bf16.msra.mxu0 %v14239_v28  ;;  %10719 = vmatpush1.bf16.msra.mxu1 %v14242_v45 }
0x1113   :  { %10689 = vmatprep.subr.bf16.mxu0 %v14247_v2  ;;  %10721 = vmatprep.subr.bf16.mxu1 %v14249_v13 }
0x1116   :  { %10691 = vmatpush1.bf16.msra.mxu0 %v14251_v24  ;;  %10723 = vmatpush1.bf16.msra.mxu1 %v14254_v54 }
0x1117   :  { %10693 = vmatprep.subr.bf16.mxu0 %v14259_v55  ;;  %10725 = vmatprep.subr.bf16.mxu1 %v14261_v6 }
0x111a   :  { %10695 = vmatpush1.bf16.msra.mxu0 %v14263_v49  ;;  %10727 = vmatpush1.bf16.msra.mxu1 %v14266_v7 }
0x111b   :  { %10697 = vmatprep.subr.bf16.mxu0 %v14270_v44  ;;  %10729 = vmatprep.subr.bf16.mxu1 %v14272_v42 }
0x111e   :  { %10699 = vmatpush1.bf16.msra.mxu0 %v14275_v3  ;;  %10731 = vmatpush1.bf16.msra.mxu1 %v14279_v1 }
0x111f   :  { %10701 = vmatprep.subr.bf16.mxu0 %v14283_v32  ;;  %10733 = vmatprep.subr.bf16.mxu1 %v14285_v31 }
0x1122   :  { %10703 = vmatpush1.bf16.msra.mxu0 %v14287_v50  ;;  %10735 = vmatpush1.bf16.msra.mxu1 %v14290_v36 }
0x1123   :  { %10737 = vmatprep.subr.bf16.mxu0 %v14199_v8  ;;  %10769 = vmatprep.subr.bf16.mxu1 %v14201_v16 }
0x11d4   :  { %v14351_v14 = vpop.f32.mrb[42].mxu0  ;;  %v14353_v19 = vpop.f32.mrb[42].mxu1 }
0x11d5   :  { %v14355_v0 = vpop.f32.mrb[43].mxu0  ;;  %v14357_v17 = vpop.f32.mrb[43].mxu1 }
0x11d8   :  { %v4058_v9 = vpop.f32.mrb[44].mxu0  ;;  %v4129_v33 = vpop.f32.mrb[44].mxu1 }
0x11d9   :  { %v4134_v56 = vadd.f32 %v4058_v9, %v14360_v58  ;;  %v4060_v38 = vpop.f32.mrb[45].mxu0  ;;  %v4131_v20 = vpop.f32.mrb[45].mxu1  ;;  %v4136_v51 = vadd.f32 %v4129_v33, %v14380_v61 }
0x11da   :  { %v4135_v5 = vadd.f32 %v4060_v38, %v14363_v43  ;;  %v4137_v22 = vadd.f32 %v4131_v20, %v14372_v12  ;;  %v9261_v20 = vld [vmem:[%s15625_s2 + $0x4] sm:$0x3] }
0x11db   :  { %v9262_v37 = vmul.f32 -1.442695, %v4134_v56 }
0x11dc   :  { %v9263_v62 = vmul.f32 -1.442695, %v4135_v5  ;;  %v9264_v29 = vmul.f32 -1.442695, %v4137_v22 }
0x11dd   :  { %12576 = vpow2.f32 %v9262_v37 }
0x11de   :  { %12578 = vpow2.f32 %v9263_v62 }
0x11df   :  { %12580 = vpow2.f32 %v9264_v29 }
0x11e0   :  { %12582 = vtanh.f32 %v4136_v51 }
0x11e7   :  { %v12577_v52 = vpop.eup %12576 }
0x11e8   :  { %v12579_v9 = vpop.eup %12578  ;;  %v4141_v56 = vadd.f32 1.0, %v12577_v52 }
0x11e9   :  { %v4147_v11 = vadd.f32 1.0, %v12579_v9  ;;  %v12581_v38 = vpop.eup %12580 }
0x11ea   :  { %12584 = vrcp.f32 %v4141_v56  ;;  %v12583_v15 = vpop.eup %12582  ;;  %v4154_v62 = vadd.f32 1.0, %v12581_v38 }
0x11eb   :  { %12586 = vrcp.f32 %v4147_v11 }
0x11ec   :  { %12588 = vrcp.f32 %v4154_v62 }
0x11f4   :  { %v12585_v5 = vpop.eup %12584 }
0x11f5   :  { %v12587_v53 = vpop.eup %12586  ;;  %v4158_v37 = vmul.f32 %v12585_v5, %v12583_v15 }
0x11f6   :  { %v4157_v22 = vmul.f32 %v12587_v53, %v9261_v20  ;;  %v12589_v29 = vpop.eup %12588 }
0x11f8   :  { %v14386_v33 = vadd.f32 %v4158_v37, %v4157_v22 }
0x11fa   :  { %12590 = vtanh.f32 %v14386_v33 }
0x1204   :  { %v12591_v51 = vpop.eup %12590 }
0x1205   :  { %v4161_v52 = vmul.f32 %v12591_v51, %v12589_v29 }
0x1207   :  { %4162 = vst [vmem:[#allocation2] sm:$0x3] %v4161_v52  ;;  %4228 = vmatmul.mubr.f32.vlgmr.msra.gmra.mrb[46].mxu0 %v4161_v52  ;;  %4299 = vmatmul.mubr.f32.vlgmr.msra.gmra.mrb[46].mxu1 %v4161_v52 }
0x1208   :  { %10739 = vmatpush1.bf16.msra.mxu0 %v14203_v27  ;;  %10771 = vmatpush1.bf16.msra.mxu1 %v14206_v10 }
0x1209   :  { %10741 = vmatprep.subr.bf16.mxu0 %v14211_v41  ;;  %10773 = vmatprep.subr.bf16.mxu1 %v14213_v4 }
0x120a   :  { %4416 = vmatprep.mubr.f32.mxu0 %v15645_v57  ;;  %4487 = vmatprep.mubr.f32.mxu1 %v15645_v57 }
0x120c   :  { %10743 = vmatpush1.bf16.msra.mxu0 %v14215_v23  ;;  %10775 = vmatpush1.bf16.msra.mxu1 %v14218_v59 }
0x120d   :  { %10745 = vmatprep.subr.bf16.mxu0 %v14223_v25  ;;  %10777 = vmatprep.subr.bf16.mxu1 %v14225_v60 }
0x1210   :  { %10747 = vmatpush1.bf16.msra.mxu0 %v14227_v48  ;;  %10779 = vmatpush1.bf16.msra.mxu1 %v14230_v46 }
0x1211   :  { %10749 = vmatprep.subr.bf16.mxu0 %v14235_v34  ;;  %10781 = vmatprep.subr.bf16.mxu1 %v14237_v18 }
0x1214   :  { %10751 = vmatpush1.bf16.msra.mxu0 %v14239_v28  ;;  %10783 = vmatpush1.bf16.msra.mxu1 %v14242_v45 }
0x1215   :  { %10753 = vmatprep.subr.bf16.mxu0 %v14247_v2  ;;  %10785 = vmatprep.subr.bf16.mxu1 %v14249_v13 }
0x1218   :  { %10755 = vmatpush1.bf16.msra.mxu0 %v14251_v24  ;;  %10787 = vmatpush1.bf16.msra.mxu1 %v14254_v54 }
0x1219   :  { %10757 = vmatprep.subr.bf16.mxu0 %v14259_v55  ;;  %10789 = vmatprep.subr.bf16.mxu1 %v14261_v6 }
0x121c   :  { %10759 = vmatpush1.bf16.msra.mxu0 %v14263_v49  ;;  %10791 = vmatpush1.bf16.msra.mxu1 %v14266_v7 }
0x121d   :  { %10761 = vmatprep.subr.bf16.mxu0 %v14270_v44  ;;  %10793 = vmatprep.subr.bf16.mxu1 %v14272_v42 }
0x1220   :  { %10763 = vmatpush1.bf16.msra.mxu0 %v14275_v3  ;;  %10795 = vmatpush1.bf16.msra.mxu1 %v14279_v1 }
0x1221   :  { %10765 = vmatprep.subr.bf16.mxu0 %v14283_v32  ;;  %10797 = vmatprep.subr.bf16.mxu1 %v14285_v31 }
0x1224   :  { %10767 = vmatpush1.bf16.msra.mxu0 %v14287_v50  ;;  %10799 = vmatpush1.bf16.msra.mxu1 %v14290_v36 }
0x1225   :  { %10801 = vmatprep.subr.bf16.mxu0 %v14199_v8  ;;  %10833 = vmatprep.subr.bf16.mxu1 %v14201_v16 }
0x12da   :  { %v4229_v9 = vpop.f32.mrb[46].mxu0  ;;  %v4300_v56 = vpop.f32.mrb[46].mxu1 }
0x12db   :  { %v4309_v11 = vrot.slane %v4229_v9, 6  ;;  %v4231_v38 = vpop.f32.mrb[47].mxu0  ;;  %v4302_v15 = vpop.f32.mrb[47].mxu1  ;;  %v4311_v51 = vrot.slane %v4300_v56, 6 }
0x12dc   :  { %v4310_v20 = vrot.slane %v4231_v38, 6  ;;  %v4312_v22 = vrot.slane %v4302_v15, 6  ;;  %v4341_v15 = vrot.slane %v14386_v33, 6 }
0x12dd   :  { %v4317_v5 = vadd.f32 %v4309_v11, %v14360_v58  ;;  %v4319_v63 = vadd.f32 %v4311_v51, %v14380_v61 }
0x12de   :  { %v4318_v53 = vadd.f32 %v4310_v20, %v14363_v43  ;;  %v4320_v29 = vadd.f32 %v4312_v22, %v14372_v12 }
0x12df   :  { %v9265_v37 = vmul.f32 -1.442695, %v4317_v5 }
0x12e0   :  { %v9266_v62 = vmul.f32 -1.442695, %v4318_v53  ;;  %v9267_v52 = vmul.f32 -1.442695, %v4320_v29 }
0x12e1   :  { %12592 = vpow2.f32 %v9265_v37 }
0x12e2   :  { %12594 = vpow2.f32 %v9266_v62 }
0x12e3   :  { %12596 = vpow2.f32 %v9267_v52 }
0x12e4   :  { %12598 = vtanh.f32 %v4319_v63 }
0x12eb   :  { %v12593_v21 = vpop.eup %12592 }
0x12ec   :  { %v12595_v9 = vpop.eup %12594  ;;  %v4324_v39 = vadd.f32 1.0, %v12593_v21 }
0x12ed   :  { %v4330_v38 = vadd.f32 1.0, %v12595_v9  ;;  %v12597_v11 = vpop.eup %12596 }
0x12ee   :  { %12600 = vrcp.f32 %v4324_v39  ;;  %v12599_v20 = vpop.eup %12598  ;;  %v4337_v62 = vadd.f32 1.0, %v12597_v11 }
0x12ef   :  { %12602 = vrcp.f32 %v4330_v38 }
0x12f0   :  { %12604 = vrcp.f32 %v4337_v62 }
0x12f8   :  { %v12601_v5 = vpop.eup %12600 }
0x12f9   :  { %v12603_v53 = vpop.eup %12602  ;;  %v4344_v37 = vmul.f32 %v12601_v5, %v12599_v20 }
0x12fa   :  { %v4343_v56 = vmul.f32 %v12603_v53, %v4341_v15  ;;  %v12605_v21 = vpop.eup %12604 }
0x12fc   :  { %v14428_v22 = vadd.f32 %v4344_v37, %v4343_v56 }
0x12fe   :  { %12606 = vtanh.f32 %v14428_v22 }
0x1308   :  { %v12607_v29 = vpop.eup %12606 }
0x1309   :  { %v4347_v63 = vmul.f32 %v12607_v29, %v12605_v21 }
0x130b   :  { %4348 = vst [vmem:[#allocation2] sm:$0xc] %v4347_v63  ;;  %v4350_v39 = vrot.slane %v4347_v63, 2 }
0x130d   :  { %4417 = vmatmul.mubr.f32.vlgmr.msra.gmra.mrb[48].mxu0 %v4350_v39  ;;  %4488 = vmatmul.mubr.f32.vlgmr.msra.gmra.mrb[48].mxu1 %v4350_v39 }
0x130e   :  { %10803 = vmatpush1.bf16.msra.mxu0 %v14203_v27  ;;  %10835 = vmatpush1.bf16.msra.mxu1 %v14206_v10 }
0x130f   :  { %10805 = vmatprep.subr.bf16.mxu0 %v14211_v41  ;;  %10837 = vmatprep.subr.bf16.mxu1 %v14213_v4 }
0x1310   :  { %4605 = vmatprep.mubr.f32.mxu0 %v15645_v57  ;;  %4676 = vmatprep.mubr.f32.mxu1 %v15645_v57 }
0x1312   :  { %10807 = vmatpush1.bf16.msra.mxu0 %v14215_v23  ;;  %10839 = vmatpush1.bf16.msra.mxu1 %v14218_v59 }
0x1313   :  { %10809 = vmatprep.subr.bf16.mxu0 %v14223_v25  ;;  %10841 = vmatprep.subr.bf16.mxu1 %v14225_v60 }
0x1316   :  { %10811 = vmatpush1.bf16.msra.mxu0 %v14227_v48  ;;  %10843 = vmatpush1.bf16.msra.mxu1 %v14230_v46 }
0x1317   :  { %10813 = vmatprep.subr.bf16.mxu0 %v14235_v34  ;;  %10845 = vmatprep.subr.bf16.mxu1 %v14237_v18 }
0x131a   :  { %10815 = vmatpush1.bf16.msra.mxu0 %v14239_v28  ;;  %10847 = vmatpush1.bf16.msra.mxu1 %v14242_v45 }
0x131b   :  { %10817 = vmatprep.subr.bf16.mxu0 %v14247_v2  ;;  %10849 = vmatprep.subr.bf16.mxu1 %v14249_v13 }
0x131e   :  { %10819 = vmatpush1.bf16.msra.mxu0 %v14251_v24  ;;  %10851 = vmatpush1.bf16.msra.mxu1 %v14254_v54 }
0x131f   :  { %10821 = vmatprep.subr.bf16.mxu0 %v14259_v55  ;;  %10853 = vmatprep.subr.bf16.mxu1 %v14261_v6 }
0x1322   :  { %10823 = vmatpush1.bf16.msra.mxu0 %v14263_v49  ;;  %10855 = vmatpush1.bf16.msra.mxu1 %v14266_v7 }
0x1323   :  { %10825 = vmatprep.subr.bf16.mxu0 %v14270_v44  ;;  %10857 = vmatprep.subr.bf16.mxu1 %v14272_v42 }
0x1326   :  { %10827 = vmatpush1.bf16.msra.mxu0 %v14275_v3  ;;  %10859 = vmatpush1.bf16.msra.mxu1 %v14279_v1 }
0x1327   :  { %10829 = vmatprep.subr.bf16.mxu0 %v14283_v32  ;;  %10861 = vmatprep.subr.bf16.mxu1 %v14285_v31 }
0x132a   :  { %10831 = vmatpush1.bf16.msra.mxu0 %v14287_v50  ;;  %10863 = vmatpush1.bf16.msra.mxu1 %v14290_v36 }
0x132b   :  { %10865 = vmatprep.subr.bf16.mxu0 %v14199_v8  ;;  %10897 = vmatprep.subr.bf16.mxu1 %v14201_v16 }
0x13e0   :  { %v4418_v33 = vpop.f32.mrb[48].mxu0  ;;  %v4489_v51 = vpop.f32.mrb[48].mxu1 }
0x13e1   :  { %v4498_v52 = vrot.slane %v4418_v33, 4  ;;  %v4420_v9 = vpop.f32.mrb[49].mxu0  ;;  %v4491_v38 = vpop.f32.mrb[49].mxu1  ;;  %v4500_v56 = vrot.slane %v4489_v51, 4 }
0x13e2   :  { %v4499_v11 = vrot.slane %v4420_v9, 4  ;;  %v4501_v37 = vrot.slane %v4491_v38, 4  ;;  %v4530_v38 = vrot.slane %v14428_v22, 6 }
0x13e3   :  { %v4506_v20 = vadd.f32 %v4498_v52, %v14360_v58  ;;  %v4508_v29 = vadd.f32 %v4500_v56, %v14380_v61 }
0x13e4   :  { %v4507_v5 = vadd.f32 %v4499_v11, %v14363_v43  ;;  %v4509_v62 = vadd.f32 %v4501_v37, %v14372_v12 }
0x13e5   :  { %v9268_v15 = vmul.f32 -1.442695, %v4506_v20 }
0x13e6   :  { %v9269_v53 = vmul.f32 -1.442695, %v4507_v5  ;;  %v9270_v21 = vmul.f32 -1.442695, %v4509_v62 }
0x13e7   :  { %12608 = vpow2.f32 %v9268_v15 }
0x13e8   :  { %12610 = vpow2.f32 %v9269_v53 }
0x13e9   :  { %12612 = vpow2.f32 %v9270_v21 }
0x13ea   :  { %12614 = vtanh.f32 %v4508_v29 }
0x13f1   :  { %v12609_v63 = vpop.eup %12608 }
0x13f2   :  { %v12611_v39 = vpop.eup %12610  ;;  %v4513_v33 = vadd.f32 1.0, %v12609_v63 }
0x13f3   :  { %v4519_v9 = vadd.f32 1.0, %v12611_v39  ;;  %v12613_v52 = vpop.eup %12612 }
0x13f4   :  { %12616 = vrcp.f32 %v4513_v33  ;;  %v12615_v11 = vpop.eup %12614  ;;  %v4526_v53 = vadd.f32 1.0, %v12613_v52 }
0x13f5   :  { %12618 = vrcp.f32 %v4519_v9 }
0x13f6   :  { %12620 = vrcp.f32 %v4526_v53 }
0x13fe   :  { %v12617_v20 = vpop.eup %12616 }
0x13ff   :  { %v12619_v5 = vpop.eup %12618  ;;  %v4533_v15 = vmul.f32 %v12617_v20, %v12615_v11 }
0x1400   :  { %v4532_v51 = vmul.f32 %v12619_v5, %v4530_v38  ;;  %v12621_v62 = vpop.eup %12620 }
0x1402   :  { %v14470_v37 = vadd.f32 %v4533_v15, %v4532_v51 }
0x1404   :  { %12622 = vtanh.f32 %v14470_v37 }
0x140e   :  { %v12623_v56 = vpop.eup %12622 }
0x140f   :  { %v4536_v21 = vmul.f32 %v12623_v56, %v12621_v62 }
0x1411   :  { %4537 = vst [vmem:[#allocation2] sm:$0x30] %v4536_v21  ;;  %v4539_v29 = vrot.slane %v4536_v21, 4 }
0x1413   :  { %4606 = vmatmul.mubr.f32.vlgmr.msra.gmra.mrb[50].mxu0 %v4539_v29  ;;  %4677 = vmatmul.mubr.f32.vlgmr.msra.gmra.mrb[50].mxu1 %v4539_v29 }
0x1414   :  { %10867 = vmatpush1.bf16.msra.mxu0 %v14203_v27  ;;  %10899 = vmatpush1.bf16.msra.mxu1 %v14206_v10 }
0x1415   :  { %10869 = vmatprep.subr.bf16.mxu0 %v14211_v41  ;;  %10901 = vmatprep.subr.bf16.mxu1 %v14213_v4 }
0x1416   :  { %4794 = vmatprep.mubr.f32.mxu0 %v15645_v57  ;;  %4865 = vmatprep.mubr.f32.mxu1 %v15645_v57 }
0x1418   :  { %10871 = vmatpush1.bf16.msra.mxu0 %v14215_v23  ;;  %10903 = vmatpush1.bf16.msra.mxu1 %v14218_v59 }
0x1419   :  { %10873 = vmatprep.subr.bf16.mxu0 %v14223_v25  ;;  %10905 = vmatprep.subr.bf16.mxu1 %v14225_v60 }
0x141c   :  { %10875 = vmatpush1.bf16.msra.mxu0 %v14227_v48  ;;  %10907 = vmatpush1.bf16.msra.mxu1 %v14230_v46 }
0x141d   :  { %10877 = vmatprep.subr.bf16.mxu0 %v14235_v34  ;;  %10909 = vmatprep.subr.bf16.mxu1 %v14237_v18 }
0x1420   :  { %10879 = vmatpush1.bf16.msra.mxu0 %v14239_v28  ;;  %10911 = vmatpush1.bf16.msra.mxu1 %v14242_v45 }
0x1421   :  { %10881 = vmatprep.subr.bf16.mxu0 %v14247_v2  ;;  %10913 = vmatprep.subr.bf16.mxu1 %v14249_v13 }
0x1424   :  { %10883 = vmatpush1.bf16.msra.mxu0 %v14251_v24  ;;  %10915 = vmatpush1.bf16.msra.mxu1 %v14254_v54 }
0x1425   :  { %10885 = vmatprep.subr.bf16.mxu0 %v14259_v55  ;;  %10917 = vmatprep.subr.bf16.mxu1 %v14261_v6 }
0x1428   :  { %10887 = vmatpush1.bf16.msra.mxu0 %v14263_v49  ;;  %10919 = vmatpush1.bf16.msra.mxu1 %v14266_v7 }
0x1429   :  { %10889 = vmatprep.subr.bf16.mxu0 %v14270_v44  ;;  %10921 = vmatprep.subr.bf16.mxu1 %v14272_v42 }
0x142c   :  { %10891 = vmatpush1.bf16.msra.mxu0 %v14275_v3  ;;  %10923 = vmatpush1.bf16.msra.mxu1 %v14279_v1 }
0x142d   :  { %10893 = vmatprep.subr.bf16.mxu0 %v14283_v32  ;;  %10925 = vmatprep.subr.bf16.mxu1 %v14285_v31 }
0x1430   :  { %10895 = vmatpush1.bf16.msra.mxu0 %v14287_v50  ;;  %10927 = vmatpush1.bf16.msra.mxu1 %v14290_v36 }
0x1431   :  { %10929 = vmatprep.subr.bf16.mxu0 %v14199_v8  ;;  %10961 = vmatprep.subr.bf16.mxu1 %v14201_v16 }
0x14e6   :  { %v4607_v22 = vpop.f32.mrb[50].mxu0  ;;  %v4678_v63 = vpop.f32.mrb[50].mxu1 }
0x14e7   :  { %v4687_v39 = vrot.slane %v4607_v22, 2  ;;  %v4609_v33 = vpop.f32.mrb[51].mxu0  ;;  %v4680_v9 = vpop.f32.mrb[51].mxu1  ;;  %v4689_v51 = vrot.slane %v4678_v63, 2 }
0x14e8   :  { %v4688_v52 = vrot.slane %v4609_v33, 2  ;;  %v4690_v15 = vrot.slane %v4680_v9, 2  ;;  %v4719_v9 = vrot.slane %v14470_v37, 6  ;;  %v14551_v37 = vadd.f32 %v14351_v14, %v14346_v35 }
0x14e9   :  { %v4695_v11 = vadd.f32 %v4687_v39, %v14360_v58  ;;  %v4697_v56 = vadd.f32 %v4689_v51, %v14380_v61 }
0x14ea   :  { %v4696_v20 = vadd.f32 %v4688_v52, %v14363_v43  ;;  %v4698_v53 = vadd.f32 %v4690_v15, %v14372_v12 }
0x14eb   :  { %v9271_v38 = vmul.f32 -1.442695, %v4695_v11 }
0x14ec   :  { %v9272_v5 = vmul.f32 -1.442695, %v4696_v20  ;;  %v9273_v62 = vmul.f32 -1.442695, %v4698_v53  ;;  %v14555_v53 = vadd.f32 %v14355_v0, %v14349_v47  ;;  %v14566_v47 = vadd.f32 %v14353_v19, %v14375_v26 }
0x14ed   :  { %12624 = vpow2.f32 %v9271_v38 }
0x14ee   :  { %12626 = vpow2.f32 %v9272_v5 }
0x14ef   :  { %12628 = vpow2.f32 %v9273_v62 }
0x14f0   :  { %12630 = vtanh.f32 %v4697_v56 }
0x14f7   :  { %v12625_v21 = vpop.eup %12624 }
0x14f8   :  { %v12627_v29 = vpop.eup %12626  ;;  %v4702_v22 = vadd.f32 1.0, %v12625_v21 }
0x14f9   :  { %v4708_v33 = vadd.f32 1.0, %v12627_v29  ;;  %v12629_v58 = vpop.eup %12628 }
0x14fa   :  { %12632 = vrcp.f32 %v4702_v22  ;;  %v12631_v43 = vpop.eup %12630  ;;  %v4715_v12 = vadd.f32 1.0, %v12629_v58 }
0x14fb   :  { %12634 = vrcp.f32 %v4708_v33 }
0x14fc   :  { %12636 = vrcp.f32 %v4715_v12 }
0x1504   :  { %v12633_v39 = vpop.eup %12632 }
0x1505   :  { %v12635_v52 = vpop.eup %12634  ;;  %v4722_v11 = vmul.f32 %v12633_v39, %v12631_v43  ;;  %v14561_v43 = vadd.f32 %v14357_v17, %v14367_v40 }
0x1506   :  { %v4721_v63 = vmul.f32 %v12635_v52, %v4719_v9  ;;  %v12637_v61 = vpop.eup %12636 }
0x1508   :  { %v14512_v20 = vadd.f32 %v4722_v11, %v4721_v63 }
0x150a   :  { %12638 = vtanh.f32 %v14512_v20  ;;  %v4896_v63 = vrot.slane %v14512_v20, 6 }
0x1514   :  { %v12639_v38 = vpop.eup %12638 }
0x1515   :  { %v4725_v5 = vmul.f32 %v12639_v38, %v12637_v61 }
0x1517   :  { %4726 = vst [vmem:[#allocation2] sm:$0xc0] %v4725_v5  ;;  %v4728_v15 = vrot.slane %v4725_v5, 6 }
0x1519   :  { %4795 = vmatmul.mubr.f32.vlgmr.msra.gmra.mrb[52].mxu0 %v4728_v15  ;;  %4866 = vmatmul.mubr.f32.vlgmr.msra.gmra.mrb[52].mxu1 %v4728_v15 }
0x151a   :  { %10931 = vmatpush1.bf16.msra.mxu0 %v14203_v27  ;;  %10963 = vmatpush1.bf16.msra.mxu1 %v14206_v10 }
0x151b   :  { %10933 = vmatprep.subr.bf16.mxu0 %v14211_v41  ;;  %10965 = vmatprep.subr.bf16.mxu1 %v14213_v4 }
0x151c   :  { %4968 = vmatprep.mubr.f32.mxu0 %v15645_v57  ;;  %5039 = vmatprep.mubr.f32.mxu1 %v15645_v57 }
0x151e   :  { %10935 = vmatpush1.bf16.msra.mxu0 %v14215_v23  ;;  %10967 = vmatpush1.bf16.msra.mxu1 %v14218_v59 }
0x151f   :  { %10937 = vmatprep.subr.bf16.mxu0 %v14223_v25  ;;  %10969 = vmatprep.subr.bf16.mxu1 %v14225_v60 }
0x1522   :  { %10939 = vmatpush1.bf16.msra.mxu0 %v14227_v48  ;;  %10971 = vmatpush1.bf16.msra.mxu1 %v14230_v46 }
0x1523   :  { %10941 = vmatprep.subr.bf16.mxu0 %v14235_v34  ;;  %10973 = vmatprep.subr.bf16.mxu1 %v14237_v18 }
0x1526   :  { %10943 = vmatpush1.bf16.msra.mxu0 %v14239_v28  ;;  %10975 = vmatpush1.bf16.msra.mxu1 %v14242_v45 }
0x1527   :  { %10945 = vmatprep.subr.bf16.mxu0 %v14247_v2  ;;  %10977 = vmatprep.subr.bf16.mxu1 %v14249_v13 }
0x152a   :  { %10947 = vmatpush1.bf16.msra.mxu0 %v14251_v24  ;;  %10979 = vmatpush1.bf16.msra.mxu1 %v14254_v54 }
0x152b   :  { %10949 = vmatprep.subr.bf16.mxu0 %v14259_v55  ;;  %10981 = vmatprep.subr.bf16.mxu1 %v14261_v6 }
0x152e   :  { %10951 = vmatpush1.bf16.msra.mxu0 %v14263_v49  ;;  %10983 = vmatpush1.bf16.msra.mxu1 %v14266_v7 }
0x152f   :  { %10953 = vmatprep.subr.bf16.mxu0 %v14270_v44  ;;  %10985 = vmatprep.subr.bf16.mxu1 %v14272_v42 }
0x1532   :  { %10955 = vmatpush1.bf16.msra.mxu0 %v14275_v3  ;;  %10987 = vmatpush1.bf16.msra.mxu1 %v14279_v1 }
0x1533   :  { %10957 = vmatprep.subr.bf16.mxu0 %v14283_v32  ;;  %10989 = vmatprep.subr.bf16.mxu1 %v14285_v31 }
0x1536   :  { %10959 = vmatpush1.bf16.msra.mxu0 %v14287_v50  ;;  %10991 = vmatpush1.bf16.msra.mxu1 %v14290_v36 }
0x1537   :  { %10993 = vmatprep.subr.bf16.mxu0 %v14199_v8  ;;  %11025 = vmatprep.subr.bf16.mxu1 %v14201_v16 }
0x15ec   :  { %v4796_v51 = vpop.f32.mrb[52].mxu0  ;;  %v4867_v62 = vpop.f32.mrb[52].mxu1 }
0x15ed   :  { %v4872_v56 = vadd.f32 %v4796_v51, %v14551_v37  ;;  %v4798_v21 = vpop.f32.mrb[53].mxu0  ;;  %v4869_v29 = vpop.f32.mrb[53].mxu1  ;;  %v4874_v0 = vadd.f32 %v4867_v62, %v14566_v47 }
0x15ee   :  { %v4873_v22 = vadd.f32 %v4798_v21, %v14555_v53  ;;  %v4875_v35 = vadd.f32 %v4869_v29, %v14561_v43 }
0x15ef   :  { %v9274_v33 = vmul.f32 -1.442695, %v4872_v56 }
0x15f0   :  { %v9275_v58 = vmul.f32 -1.442695, %v4873_v22  ;;  %v9276_v14 = vmul.f32 -1.442695, %v4875_v35 }
0x15f1   :  { %12640 = vpow2.f32 %v9274_v33 }
0x15f2   :  { %12642 = vpow2.f32 %v9275_v58 }
0x15f3   :  { %12644 = vpow2.f32 %v9276_v14 }
0x15f4   :  { %12646 = vtanh.f32 %v4874_v0 }
0x15fb   :  { %v12641_v39 = vpop.eup %12640 }
0x15fc   :  { %v12643_v9 = vpop.eup %12642  ;;  %v4879_v52 = vadd.f32 1.0, %v12641_v39 }
0x15fd   :  { %v4885_v11 = vadd.f32 1.0, %v12643_v9  ;;  %v12645_v17 = vpop.eup %12644 }
0x15fe   :  { %12648 = vrcp.f32 %v4879_v52  ;;  %v12647_v40 = vpop.eup %12646  ;;  %v4892_v19 = vadd.f32 1.0, %v12645_v17 }
0x15ff   :  { %12650 = vrcp.f32 %v4885_v11 }
0x1600   :  { %12652 = vrcp.f32 %v4892_v19 }
0x1608   :  { %v12649_v12 = vpop.eup %12648 }
0x1609   :  { %v12651_v61 = vpop.eup %12650  ;;  %v4899_v38 = vmul.f32 %v12649_v12, %v12647_v40 }
0x160a   :  { %v4898_v26 = vmul.f32 %v12651_v61, %v4896_v63  ;;  %v12653_v15 = vpop.eup %12652 }
0x160c   :  { %v14570_v5 = vadd.f32 %v4899_v38, %v4898_v26 }
0x160e   :  { %12654 = vtanh.f32 %v14570_v5  ;;  %v5082_v19 = vrot.slane %v14570_v5, 6 }
0x1618   :  { %v12655_v51 = vpop.eup %12654 }
0x1619   :  { %v4902_v62 = vmul.f32 %v12655_v51, %v12653_v15 }
0x161b   :  { %4903 = vst [vmem:[#allocation2 + $0x8] sm:$0x3] %v4902_v62  ;;  %4969 = vmatmul.mubr.f32.vlgmr.msra.gmra.mrb[54].mxu0 %v4902_v62  ;;  %5040 = vmatmul.mubr.f32.vlgmr.msra.gmra.mrb[54].mxu1 %v4902_v62 }
0x161c   :  { %10995 = vmatpush1.bf16.msra.mxu0 %v14203_v27  ;;  %11027 = vmatpush1.bf16.msra.mxu1 %v14206_v10 }
0x161d   :  { %10997 = vmatprep.subr.bf16.mxu0 %v14211_v41  ;;  %11029 = vmatprep.subr.bf16.mxu1 %v14213_v4 }
0x161e   :  { %5157 = vmatprep.mubr.f32.mxu0 %v15645_v57  ;;  %5228 = vmatprep.mubr.f32.mxu1 %v15645_v57 }
0x1620   :  { %10999 = vmatpush1.bf16.msra.mxu0 %v14215_v23  ;;  %11031 = vmatpush1.bf16.msra.mxu1 %v14218_v59 }
0x1621   :  { %11001 = vmatprep.subr.bf16.mxu0 %v14223_v25  ;;  %11033 = vmatprep.subr.bf16.mxu1 %v14225_v60 }
0x1624   :  { %11003 = vmatpush1.bf16.msra.mxu0 %v14227_v48  ;;  %11035 = vmatpush1.bf16.msra.mxu1 %v14230_v46 }
0x1625   :  { %11005 = vmatprep.subr.bf16.mxu0 %v14235_v34  ;;  %11037 = vmatprep.subr.bf16.mxu1 %v14237_v18 }
0x1628   :  { %11007 = vmatpush1.bf16.msra.mxu0 %v14239_v28  ;;  %11039 = vmatpush1.bf16.msra.mxu1 %v14242_v45 }
0x1629   :  { %11009 = vmatprep.subr.bf16.mxu0 %v14247_v2  ;;  %11041 = vmatprep.subr.bf16.mxu1 %v14249_v13 }
0x162c   :  { %11011 = vmatpush1.bf16.msra.mxu0 %v14251_v24  ;;  %11043 = vmatpush1.bf16.msra.mxu1 %v14254_v54 }
0x162d   :  { %11013 = vmatprep.subr.bf16.mxu0 %v14259_v55  ;;  %11045 = vmatprep.subr.bf16.mxu1 %v14261_v6 }
0x1630   :  { %11015 = vmatpush1.bf16.msra.mxu0 %v14263_v49  ;;  %11047 = vmatpush1.bf16.msra.mxu1 %v14266_v7 }
0x1631   :  { %11017 = vmatprep.subr.bf16.mxu0 %v14270_v44  ;;  %11049 = vmatprep.subr.bf16.mxu1 %v14272_v42 }
0x1634   :  { %11019 = vmatpush1.bf16.msra.mxu0 %v14275_v3  ;;  %11051 = vmatpush1.bf16.msra.mxu1 %v14279_v1 }
0x1635   :  { %11021 = vmatprep.subr.bf16.mxu0 %v14283_v32  ;;  %11053 = vmatprep.subr.bf16.mxu1 %v14285_v31 }
0x1638   :  { %11023 = vmatpush1.bf16.msra.mxu0 %v14287_v50  ;;  %11055 = vmatpush1.bf16.msra.mxu1 %v14290_v36 }
0x1639   :  { %11057 = vmatprep.subr.bf16.mxu0 %v14199_v8  ;;  %11089 = vmatprep.subr.bf16.mxu1 %v14201_v16 }
0x16ee   :  { %v4970_v20 = vpop.f32.mrb[54].mxu0  ;;  %v5041_v56 = vpop.f32.mrb[54].mxu1 }
0x16ef   :  { %v5050_v21 = vrot.slane %v4970_v20, 6  ;;  %v4972_v29 = vpop.f32.mrb[55].mxu0  ;;  %v5043_v22 = vpop.f32.mrb[55].mxu1  ;;  %v5052_v8 = vrot.slane %v5041_v56, 6 }
0x16f0   :  { %v5051_v33 = vrot.slane %v4972_v29, 6  ;;  %v5053_v39 = vrot.slane %v5043_v22, 6 }
0x16f1   :  { %v5058_v58 = vadd.f32 %v5050_v21, %v14551_v37  ;;  %v5060_v16 = vadd.f32 %v5052_v8, %v14566_v47  ;;  %v5481_v8 = vld [vmem:[#allocation3 + $0x630] sm:$0xff] }
0x16f2   :  { %v5059_v35 = vadd.f32 %v5051_v33, %v14555_v53  ;;  %v5061_v9 = vadd.f32 %v5053_v39, %v14561_v43 }
0x16f3   :  { %v9277_v14 = vmul.f32 -1.442695, %v5058_v58 }
0x16f4   :  { %v9278_v0 = vmul.f32 -1.442695, %v5059_v35  ;;  %v9279_v52 = vmul.f32 -1.442695, %v5061_v9  ;;  %v5477_v9 = vld [vmem:[#allocation3 + $0x610] sm:$0xff] }
0x16f5   :  { %12656 = vpow2.f32 %v9277_v14  ;;  %v5475_v14 = vld [vmem:[#allocation3 + $0x600] sm:$0xff] }
0x16f6   :  { %12658 = vpow2.f32 %v9278_v0  ;;  %v5479_v0 = vld [vmem:[#allocation3 + $0x620] sm:$0xff] }
0x16f7   :  { %12660 = vpow2.f32 %v9279_v52  ;;  %v5484_v52 = vld [vmem:[#allocation3 + $0x648] sm:$0xff] }
0x16f8   :  { %12662 = vtanh.f32 %v5060_v16 }
0x16ff   :  { %v12657_v11 = vpop.eup %12656 }
0x1700   :  { %v12659_v17 = vpop.eup %12658  ;;  %v5065_v40 = vadd.f32 1.0, %v12657_v11  ;;  %v5488_v11 = vld [vmem:[#allocation3 + $0x668] sm:$0xff] }
0x1701   :  { %v5071_v12 = vadd.f32 1.0, %v12659_v17  ;;  %v12661_v63 = vpop.eup %12660  ;;  %v5486_v17 = vld [vmem:[#allocation3 + $0x658] sm:$0xff] }
0x1702   :  { %12664 = vrcp.f32 %v5065_v40  ;;  %v12663_v61 = vpop.eup %12662  ;;  %v5078_v51 = vadd.f32 1.0, %v12661_v63  ;;  %v5490_v40 = vld [vmem:[#allocation3 + $0x678] sm:$0xff]  ;;  %v11122_v63 = vpack.c.bf16 %v5479_v0, %v5475_v14  ;;  %v5520_v14 = vld [vmem:[#allocation3 + $0x768] sm:$0xff] }
0x1703   :  { %12666 = vrcp.f32 %v5071_v12  ;;  %v5518_v0 = vld [vmem:[#allocation3 + $0x758] sm:$0xff] }
0x1704   :  { %12668 = vrcp.f32 %v5078_v51  ;;  %v11156_v51 = vpack.c.bf16 %v5490_v40, %v5486_v17  ;;  %v5517_v40 = vld [vmem:[#allocation3 + $0x750] sm:$0xff] }
0x170c   :  { %v12665_v38 = vpop.eup %12664 }
0x170d   :  { %v12667_v26 = vpop.eup %12666  ;;  %v5085_v15 = vmul.f32 %v12665_v38, %v12663_v61  ;;  %v11154_v61 = vpack.c.bf16 %v5481_v8, %v5477_v9  ;;  %v5483_v38 = vld [vmem:[#allocation3 + $0x640] sm:$0xff] }
0x170e   :  { %v5084_v62 = vmul.f32 %v12667_v26, %v5082_v19  ;;  %v12669_v56 = vpop.eup %12668  ;;  %v5487_v19 = vld [vmem:[#allocation3 + $0x660] sm:$0xff] }
0x1710   :  { %v14612_v20 = vadd.f32 %v5085_v15, %v5084_v62  ;;  %v11124_v15 = vpack.c.bf16 %v5488_v11, %v5484_v52  ;;  %v5485_v62 = vld [vmem:[#allocation3 + $0x650] sm:$0xff]  ;;  %v5515_v52 = vld [vmem:[#allocation3 + $0x740] sm:$0xff] }
0x1712   :  { %12670 = vtanh.f32 %v14612_v20 }
0x171c   :  { %v12671_v21 = vpop.eup %12670 }
0x171d   :  { %v5088_v29 = vmul.f32 %v12671_v21, %v12669_v56  ;;  %v5492_v56 = vld [vmem:[#allocation3 + $0x688] sm:$0xff] }
0x171e   :  { %v5496_v21 = vld [vmem:[#allocation3 + $0x6a8] sm:$0xff] }
0x171f   :  { %5089 = vst [vmem:[#allocation2 + $0x8] sm:$0xc] %v5088_v29  ;;  %v5091_v22 = vrot.slane %v5088_v29, 2  ;;  %v5494_v29 = vld [vmem:[#allocation3 + $0x698] sm:$0xff] }
0x1721   :  { %5158 = vmatmul.mubr.f32.vlgmr.msra.gmra.mrb[56].mxu0 %v5091_v22  ;;  %5229 = vmatmul.mubr.f32.vlgmr.msra.gmra.mrb[56].mxu1 %v5091_v22  ;;  %v5498_v22 = vld [vmem:[#allocation3 + $0x6b8] sm:$0xff] }
0x1722   :  { %11059 = vmatpush1.bf16.msra.mxu0 %v14203_v27  ;;  %11091 = vmatpush1.bf16.msra.mxu1 %v14206_v10  ;;  %v5476_v27 = vld [vmem:[#allocation3 + $0x608] sm:$0xff] }
0x1723   :  { %11061 = vmatprep.subr.bf16.mxu0 %v14211_v41  ;;  %11093 = vmatprep.subr.bf16.mxu1 %v14213_v4  ;;  %v5480_v10 = vld [vmem:[#allocation3 + $0x628] sm:$0xff]  ;;  %v5478_v41 = vld [vmem:[#allocation3 + $0x618] sm:$0xff] }
0x1724   :  { %5346 = vmatprep.mubr.f32.mxu0 %v15645_v57  ;;  %5417 = vmatprep.mubr.f32.mxu1 %v15645_v57  ;;  %v11120_v4 = vpack.c.bf16 %v5480_v10, %v5476_v27  ;;  %v11126_v27 = vpack.c.bf16 %v5487_v19, %v5483_v38  ;;  %v5526_v38 = vld [vmem:[#allocation3 + $0x798] sm:$0xff] }
0x1725   :  { %v5530_v19 = vld [vmem:[#allocation3 + $0x7b8] sm:$0xff] }
0x1726   :  { %11063 = vmatpush1.bf16.msra.mxu0 %v14215_v23  ;;  %11095 = vmatpush1.bf16.msra.mxu1 %v14218_v59  ;;  %v5482_v23 = vld [vmem:[#allocation3 + $0x638] sm:$0xff] }
0x1727   :  { %11065 = vmatprep.subr.bf16.mxu0 %v14223_v25  ;;  %11097 = vmatprep.subr.bf16.mxu1 %v14225_v60  ;;  %v11152_v59 = vpack.c.bf16 %v5482_v23, %v5478_v41  ;;  %v5491_v41 = vld [vmem:[#allocation3 + $0x680] sm:$0xff]  ;;  %v11128_v23 = vpack.c.bf16 %v5496_v21, %v5492_v56  ;;  %v11176_v56 = vpack.c.bf16 %v5530_v19, %v5526_v38  ;;  %v5525_v21 = vld [vmem:[#allocation3 + $0x790] sm:$0xff] }
0x1728   :  { %v5558_v19 = vld [vmem:[#allocation6 + $0x690] sm:$0xff] }
0x172a   :  { %11067 = vmatpush1.bf16.msra.mxu0 %v14227_v48  ;;  %11099 = vmatpush1.bf16.msra.mxu1 %v14230_v46 }
0x172b   :  { %11069 = vmatprep.subr.bf16.mxu0 %v14235_v34  ;;  %11101 = vmatprep.subr.bf16.mxu1 %v14237_v18 }
0x172e   :  { %11071 = vmatpush1.bf16.msra.mxu0 %v14239_v28  ;;  %11103 = vmatpush1.bf16.msra.mxu1 %v14242_v45 }
0x172f   :  { %11073 = vmatprep.subr.bf16.mxu0 %v14247_v2  ;;  %11105 = vmatprep.subr.bf16.mxu1 %v14249_v13 }
0x1732   :  { %11075 = vmatpush1.bf16.msra.mxu0 %v14251_v24  ;;  %11107 = vmatpush1.bf16.msra.mxu1 %v14254_v54 }
0x1733   :  { %11077 = vmatprep.subr.bf16.mxu0 %v14259_v55  ;;  %11109 = vmatprep.subr.bf16.mxu1 %v14261_v6 }
0x1736   :  { %11079 = vmatpush1.bf16.msra.mxu0 %v14263_v49  ;;  %11111 = vmatpush1.bf16.msra.mxu1 %v14266_v7 }
0x1737   :  { %11081 = vmatprep.subr.bf16.mxu0 %v14270_v44  ;;  %11113 = vmatprep.subr.bf16.mxu1 %v14272_v42 }
0x173a   :  { %11083 = vmatpush1.bf16.msra.mxu0 %v14275_v3  ;;  %11115 = vmatpush1.bf16.msra.mxu1 %v14279_v1 }
0x173b   :  { %11085 = vmatprep.subr.bf16.mxu0 %v14283_v32  ;;  %11117 = vmatprep.subr.bf16.mxu1 %v14285_v31 }
0x173e   :  { %11087 = vmatpush1.bf16.msra.mxu0 %v14287_v50  ;;  %11119 = vmatpush1.bf16.msra.mxu1 %v14290_v36  ;;  %v5271_v50 = vrot.slane %v14612_v20, 6  ;;  %v5489_v20 = vld [vmem:[#allocation3 + $0x670] sm:$0xff] }
0x173f   :  { %11121 = vmatprep.subr.bf16.mxu0 %v11120_v4  ;;  %11153 = vmatprep.subr.bf16.mxu1 %v11152_v59  ;;  %v11158_v10 = vpack.c.bf16 %v5489_v20, %v5485_v62  ;;  %v5495_v4 = vld [vmem:[#allocation3 + $0x6a0] sm:$0xff]  ;;  %v11160_v59 = vpack.c.bf16 %v5498_v22, %v5494_v29  ;;  %v5529_v29 = vld [vmem:[#allocation3 + $0x7b0] sm:$0xff]  ;;  %v5532_v22 = vld [vmem:[#allocation3 + $0x7c8] sm:$0xff] }
0x1740   :  { %v5527_v62 = vld [vmem:[#allocation3 + $0x7a0] sm:$0xff] }
0x17f4   :  { %v5159_v25 = vpop.f32.mrb[56].mxu0  ;;  %v5230_v60 = vpop.f32.mrb[56].mxu1 }
0x17f5   :  { %v5239_v48 = vrot.slane %v5159_v25, 4  ;;  %v5161_v46 = vpop.f32.mrb[57].mxu0  ;;  %v5232_v34 = vpop.f32.mrb[57].mxu1  ;;  %v5241_v55 = vrot.slane %v5230_v60, 4  ;;  %v5493_v25 = vld [vmem:[#allocation3 + $0x690] sm:$0xff] }
0x17f6   :  { %v5240_v18 = vrot.slane %v5161_v46, 4  ;;  %v5242_v24 = vrot.slane %v5232_v34, 4  ;;  %v5497_v60 = vld [vmem:[#allocation3 + $0x6b0] sm:$0xff]  ;;  %v5504_v46 = vld [vmem:[#allocation3 + $0x6e8] sm:$0xff]  ;;  %v5502_v34 = vld [vmem:[#allocation3 + $0x6d8] sm:$0xff] }
0x17f7   :  { %v5247_v28 = vadd.f32 %v5239_v48, %v14551_v37  ;;  %v5249_v49 = vadd.f32 %v5241_v55, %v14566_v47  ;;  %v5500_v48 = vld [vmem:[#allocation3 + $0x6c8] sm:$0xff]  ;;  %v5501_v55 = vld [vmem:[#allocation3 + $0x6d0] sm:$0xff] }
0x17f8   :  { %v5248_v45 = vadd.f32 %v5240_v18, %v14555_v53  ;;  %v5250_v54 = vadd.f32 %v5242_v24, %v14561_v43  ;;  %v5506_v18 = vld [vmem:[#allocation3 + $0x6f8] sm:$0xff]  ;;  %v11132_v24 = vpack.c.bf16 %v5504_v46, %v5500_v48  ;;  %v5535_v48 = vld [vmem:[#allocation3 + $0x7e0] sm:$0xff]  ;;  %v5533_v46 = vld [vmem:[#allocation3 + $0x7d0] sm:$0xff] }
0x17f9   :  { %v9280_v2 = vmul.f32 -1.442695, %v5247_v28  ;;  %v11130_v28 = vpack.c.bf16 %v5495_v4, %v5491_v41  ;;  %v5538_v41 = vld [vmem:[#allocation3 + $0x7f8] sm:$0xff] }
0x17fa   :  { %v9281_v13 = vmul.f32 -1.442695, %v5248_v45  ;;  %v9282_v6 = vmul.f32 -1.442695, %v5250_v54  ;;  %v11162_v45 = vpack.c.bf16 %v5497_v60, %v5493_v25  ;;  %v11164_v54 = vpack.c.bf16 %v5506_v18, %v5502_v34  ;;  %v5537_v34 = vld [vmem:[#allocation3 + $0x7f0] sm:$0xff] }
0x17fb   :  { %12672 = vpow2.f32 %v9280_v2  ;;  %v5499_v2 = vld [vmem:[#allocation3 + $0x6c0] sm:$0xff] }
0x17fc   :  { %12674 = vpow2.f32 %v9281_v13  ;;  %v5503_v13 = vld [vmem:[#allocation3 + $0x6e0] sm:$0xff] }
0x17fd   :  { %12676 = vpow2.f32 %v9282_v6  ;;  %v5505_v6 = vld [vmem:[#allocation3 + $0x6f0] sm:$0xff] }
0x17fe   :  { %12678 = vtanh.f32 %v5249_v49  ;;  %v5508_v49 = vld [vmem:[#allocation3 + $0x708] sm:$0xff] }
0x1805   :  { %v12673_v7 = vpop.eup %12672 }
0x1806   :  { %v12675_v44 = vpop.eup %12674  ;;  %v5254_v42 = vadd.f32 1.0, %v12673_v7  ;;  %v5512_v7 = vld [vmem:[#allocation3 + $0x728] sm:$0xff] }
0x1807   :  { %v5260_v3 = vadd.f32 1.0, %v12675_v44  ;;  %v12677_v1 = vpop.eup %12676  ;;  %v5510_v44 = vld [vmem:[#allocation3 + $0x718] sm:$0xff] }
0x1808   :  { %12680 = vrcp.f32 %v5254_v42  ;;  %v12679_v32 = vpop.eup %12678  ;;  %v5267_v33 = vadd.f32 1.0, %v12677_v1  ;;  %v5514_v42 = vld [vmem:[#allocation3 + $0x738] sm:$0xff]  ;;  %v11166_v1 = vpack.c.bf16 %v5505_v6, %v5501_v55  ;;  %v5540_v6 = vld [vmem:[#allocation6 + $0x600] sm:$0xff] }
0x1809   :  { %12682 = vrcp.f32 %v5260_v3  ;;  %v11134_v3 = vpack.c.bf16 %v5503_v13, %v5499_v2  ;;  %v5541_v2 = vld [vmem:[#allocation6 + $0x608] sm:$0xff]  ;;  %v5547_v55 = vld [vmem:[#allocation6 + $0x638] sm:$0xff] }
0x180a   :  { %12684 = vrcp.f32 %v5267_v33  ;;  %v5513_v33 = vld [vmem:[#allocation3 + $0x730] sm:$0xff]  ;;  %v5545_v13 = vld [vmem:[#allocation6 + $0x628] sm:$0xff] }
0x1812   :  { %v12681_v31 = vpop.eup %12680 }
0x1813   :  { %v12683_v36 = vpop.eup %12682  ;;  %v5274_v5 = vmul.f32 %v12681_v31, %v12679_v32  ;;  %v5507_v32 = vld [vmem:[#allocation3 + $0x700] sm:$0xff] }
0x1814   :  { %v5273_v58 = vmul.f32 %v12683_v36, %v5271_v50  ;;  %v12685_v39 = vpop.eup %12684  ;;  %v5511_v31 = vld [vmem:[#allocation3 + $0x720] sm:$0xff]  ;;  %v11136_v50 = vpack.c.bf16 %v5512_v7, %v5508_v49  ;;  %v11168_v36 = vpack.c.bf16 %v5514_v42, %v5510_v44  ;;  %v5542_v42 = vld [vmem:[#allocation6 + $0x610] sm:$0xff] }
0x1815   :  { %v11138_v9 = vpack.c.bf16 %v5511_v31, %v5507_v32  ;;  %v5544_v49 = vld [vmem:[#allocation6 + $0x620] sm:$0xff]  ;;  %v5549_v32 = vld [vmem:[#allocation6 + $0x648] sm:$0xff] }
0x1816   :  { %v14652_v35 = vadd.f32 %v5274_v5, %v5273_v58  ;;  %v5509_v5 = vld [vmem:[#allocation3 + $0x710] sm:$0xff]  ;;  %v5516_v58 = vld [vmem:[#allocation3 + $0x748] sm:$0xff]  ;;  %v14663_v44 = vpack.c.bf16 %v5544_v49, %v5540_v6  ;;  %v5583_v49 = vld [vmem:[#allocation6 + $0x758] sm:$0xff] }
0x1817   :  { %v11170_v8 = vpack.c.bf16 %v5513_v33, %v5509_v5  ;;  %v11140_v11 = vpack.c.bf16 %v5520_v14, %v5516_v58  ;;  %v5553_v31 = vld [vmem:[#allocation6 + $0x668] sm:$0xff]  ;;  %v5555_v5 = vld [vmem:[#allocation6 + $0x678] sm:$0xff]  ;;  %v5548_v33 = vld [vmem:[#allocation6 + $0x640] sm:$0xff] }
0x1818   :  { %12686 = vtanh.f32 %v14652_v35  ;;  %v5552_v58 = vld [vmem:[#allocation6 + $0x660] sm:$0xff]  ;;  %v5585_v6 = vld [vmem:[#allocation6 + $0x768] sm:$0xff] }
0x1822   :  { %v12687_v16 = vpop.eup %12686 }
0x1823   :  { %v5277_v12 = vmul.f32 %v12687_v16, %v12685_v39  ;;  %v5522_v39 = vld [vmem:[#allocation3 + $0x778] sm:$0xff]  ;;  %v5519_v16 = vld [vmem:[#allocation3 + $0x760] sm:$0xff] }
0x1824   :  { %v11172_v17 = vpack.c.bf16 %v5522_v39, %v5518_v0  ;;  %v14675_v0 = vpack.c.bf16 %v5552_v58, %v5548_v33  ;;  %v5550_v39 = vld [vmem:[#allocation6 + $0x650] sm:$0xff] }
0x1825   :  { %5278 = vst [vmem:[#allocation2 + $0x8] sm:$0x30] %v5277_v12  ;;  %v5280_v26 = vrot.slane %v5277_v12, 4  ;;  %v5521_v12 = vld [vmem:[#allocation3 + $0x770] sm:$0xff] }
0x1826   :  { %v5582_v33 = vld [vmem:[#allocation6 + $0x750] sm:$0xff] }
0x1827   :  { %5347 = vmatmul.mubr.f32.vlgmr.msra.gmra.mrb[58].mxu0 %v5280_v26  ;;  %5418 = vmatmul.mubr.f32.vlgmr.msra.gmra.mrb[58].mxu1 %v5280_v26  ;;  %v11142_v26 = vpack.c.bf16 %v5519_v16, %v5515_v52  ;;  %v5557_v52 = vld [vmem:[#allocation6 + $0x688] sm:$0xff]  ;;  %v5586_v58 = vld [vmem:[#allocation6 + $0x770] sm:$0xff] }
0x1828   :  { %11123 = vmatpush1.bf16.msra.mxu0 %v11122_v63  ;;  %11155 = vmatpush1.bf16.msra.mxu1 %v11154_v61  ;;  %v5524_v63 = vld [vmem:[#allocation3 + $0x788] sm:$0xff] }
0x1829   :  { %11125 = vmatprep.subr.bf16.mxu0 %v11124_v15  ;;  %11157 = vmatprep.subr.bf16.mxu1 %v11156_v51  ;;  %v5528_v61 = vld [vmem:[#allocation3 + $0x7a8] sm:$0xff]  ;;  %v11174_v15 = vpack.c.bf16 %v5521_v12, %v5517_v40  ;;  %v5523_v51 = vld [vmem:[#allocation3 + $0x780] sm:$0xff]  ;;  %v5563_v40 = vld [vmem:[#allocation6 + $0x6b8] sm:$0xff] }
0x182a   :  { %5691 = vmatprep.mubr.f32.mxu0 %v15645_v57  ;;  %5768 = vmatprep.mubr.f32.mxu1 %v15645_v57  ;;  %v11144_v20 = vpack.c.bf16 %v5528_v61, %v5524_v63  ;;  %v11146_v4 = vpack.c.bf16 %v5527_v62, %v5523_v51  ;;  %v5561_v16 = vld [vmem:[#allocation6 + $0x6a8] sm:$0xff]  ;;  %v5556_v12 = vld [vmem:[#allocation6 + $0x680] sm:$0xff] }
0x182b   :  { %v5560_v63 = vld [vmem:[#allocation6 + $0x6a0] sm:$0xff]  ;;  %v5565_v51 = vld [vmem:[#allocation6 + $0x6c8] sm:$0xff] }
0x182c   :  { %11127 = vmatpush1.bf16.msra.mxu0 %v11126_v27  ;;  %11159 = vmatpush1.bf16.msra.mxu1 %v11158_v10  ;;  %v5536_v27 = vld [vmem:[#allocation3 + $0x7e8] sm:$0xff]  ;;  %v5534_v10 = vld [vmem:[#allocation3 + $0x7d8] sm:$0xff]  ;;  %v14687_v38 = vpack.c.bf16 %v5560_v63, %v5556_v12  ;;  %v5588_v63 = vld [vmem:[#allocation6 + $0x780] sm:$0xff] }
0x182d   :  { %11129 = vmatprep.subr.bf16.mxu0 %v11128_v23  ;;  %11161 = vmatprep.subr.bf16.mxu1 %v11160_v59  ;;  %v11178_v23 = vpack.c.bf16 %v5529_v29, %v5525_v21  ;;  %v5531_v59 = vld [vmem:[#allocation3 + $0x7c0] sm:$0xff]  ;;  %v11148_v25 = vpack.c.bf16 %v5536_v27, %v5532_v22  ;;  %v11180_v60 = vpack.c.bf16 %v5538_v41, %v5534_v10  ;;  %v5569_v62 = vld [vmem:[#allocation6 + $0x6e8] sm:$0xff]  ;;  %v5571_v21 = vld [vmem:[#allocation6 + $0x6f8] sm:$0xff] }
0x182e   :  { %v11150_v18 = vpack.c.bf16 %v5535_v48, %v5531_v59  ;;  %v5564_v29 = vld [vmem:[#allocation6 + $0x6c0] sm:$0xff]  ;;  %v5566_v41 = vld [vmem:[#allocation6 + $0x6d0] sm:$0xff]  ;;  %v5573_v59 = vld [vmem:[#allocation6 + $0x708] sm:$0xff] }
0x182f   :  { %v5568_v22 = vld [vmem:[#allocation6 + $0x6e0] sm:$0xff] }
0x1830   :  { %11131 = vmatpush1.bf16.msra.mxu0 %v11130_v28  ;;  %11163 = vmatpush1.bf16.msra.mxu1 %v11162_v45  ;;  %v11182_v28 = vpack.c.bf16 %v5537_v34, %v5533_v46  ;;  %v5472_v45 = vld [vmem:[#allocation2] sm:$0xff]  ;;  %v14699_v10 = vpack.c.bf16 %v5568_v22, %v5564_v29  ;;  %v5579_v46 = vld [vmem:[#allocation6 + $0x738] sm:$0xff]  ;;  %v5572_v34 = vld [vmem:[#allocation6 + $0x700] sm:$0xff] }
0x1831   :  { %11133 = vmatprep.subr.bf16.mxu0 %v11132_v24  ;;  %11165 = vmatprep.subr.bf16.mxu1 %v11164_v54  ;;  %v5543_v24 = vld [vmem:[#allocation6 + $0x618] sm:$0xff]  ;;  %v14659_v54 = vpack.c.bf16 %v5545_v13, %v5541_v2  ;;  %v5574_v2 = vld [vmem:[#allocation6 + $0x710] sm:$0xff]  ;;  %v5601_v29 = vld [vmem:[#allocation6 + $0x7e8] sm:$0xff] }
0x1832   :  { %v14661_v7 = vpack.c.bf16 %v5547_v55, %v5543_v24  ;;  %v5578_v13 = vld [vmem:[#allocation6 + $0x730] sm:$0xff]  ;;  %v5581_v55 = vld [vmem:[#allocation6 + $0x748] sm:$0xff]  ;;  %v5599_v22 = vld [vmem:[#allocation6 + $0x7d8] sm:$0xff] }
0x1833   :  { %v14714_v24 = vpack.c.bf16 %v5578_v13, %v5574_v2 }
0x1834   :  { %11135 = vmatpush1.bf16.msra.mxu0 %v11134_v3  ;;  %11167 = vmatpush1.bf16.msra.mxu1 %v11166_v1  ;;  %v5546_v3 = vld [vmem:[#allocation6 + $0x630] sm:$0xff] }
0x1835   :  { %11137 = vmatprep.subr.bf16.mxu0 %v11136_v50  ;;  %11169 = vmatprep.subr.bf16.mxu1 %v11168_v36  ;;  %v14666_v1 = vpack.c.bf16 %v5546_v3, %v5542_v42  ;;  %v5551_v50 = vld [vmem:[#allocation6 + $0x658] sm:$0xff]  ;;  %v14671_v36 = vpack.c.bf16 %v5553_v31, %v5549_v32  ;;  %v14719_v42 = vpack.c.bf16 %v5585_v6, %v5581_v55  ;;  %v5580_v32 = vld [vmem:[#allocation6 + $0x740] sm:$0xff] }
0x1836   :  { %v14673_v14 = vpack.c.bf16 %v5555_v5, %v5551_v50  ;;  %v5587_v3 = vld [vmem:[#allocation6 + $0x778] sm:$0xff]  ;;  %v5584_v31 = vld [vmem:[#allocation6 + $0x760] sm:$0xff] }
0x1837   :  { %v14721_v50 = vpack.c.bf16 %v5587_v3, %v5583_v49  ;;  %v14723_v5 = vpack.c.bf16 %v5584_v31, %v5580_v32 }
0x1838   :  { %11139 = vmatpush1.bf16.msra.mxu0 %v11138_v9  ;;  %11171 = vmatpush1.bf16.msra.mxu1 %v11170_v8  ;;  %v5554_v9 = vld [vmem:[#allocation6 + $0x670] sm:$0xff] }
0x1839   :  { %11141 = vmatprep.subr.bf16.mxu0 %v11140_v11  ;;  %11173 = vmatprep.subr.bf16.mxu1 %v11172_v17  ;;  %v14678_v8 = vpack.c.bf16 %v5554_v9, %v5550_v39  ;;  %v5559_v11 = vld [vmem:[#allocation6 + $0x698] sm:$0xff]  ;;  %v14683_v17 = vpack.c.bf16 %v5561_v16, %v5557_v52  ;;  %v5589_v39 = vld [vmem:[#allocation6 + $0x788] sm:$0xff]  ;;  %v14726_v9 = vpack.c.bf16 %v5586_v58, %v5582_v33 }
0x183a   :  { %v14685_v61 = vpack.c.bf16 %v5563_v40, %v5559_v11  ;;  %v5593_v52 = vld [vmem:[#allocation6 + $0x7a8] sm:$0xff]  ;;  %v5591_v16 = vld [vmem:[#allocation6 + $0x798] sm:$0xff] }
0x183b   :  { %v5595_v11 = vld [vmem:[#allocation6 + $0x7b8] sm:$0xff]  ;;  %v14730_v40 = vpack.c.bf16 %v5593_v52, %v5589_v39 }
0x183c   :  { %11143 = vmatpush1.bf16.msra.mxu0 %v11142_v26  ;;  %11175 = vmatpush1.bf16.msra.mxu1 %v11174_v15  ;;  %v5562_v26 = vld [vmem:[#allocation6 + $0x6b0] sm:$0xff]  ;;  %v14732_v12 = vpack.c.bf16 %v5595_v11, %v5591_v16 }
0x183d   :  { %11145 = vmatprep.subr.bf16.mxu0 %v11144_v20  ;;  %11177 = vmatprep.subr.bf16.mxu1 %v11176_v56  ;;  %v14690_v15 = vpack.c.bf16 %v5562_v26, %v5558_v19  ;;  %v5567_v20 = vld [vmem:[#allocation6 + $0x6d8] sm:$0xff]  ;;  %v14695_v56 = vpack.c.bf16 %v5569_v62, %v5565_v51  ;;  %v5592_v19 = vld [vmem:[#allocation6 + $0x7a0] sm:$0xff]  ;;  %v5590_v26 = vld [vmem:[#allocation6 + $0x790] sm:$0xff] }
0x183e   :  { %v14697_v27 = vpack.c.bf16 %v5571_v21, %v5567_v20  ;;  %v14735_v51 = vpack.c.bf16 %v5592_v19, %v5588_v63  ;;  %v5594_v62 = vld [vmem:[#allocation6 + $0x7b0] sm:$0xff]  ;;  %v5597_v21 = vld [vmem:[#allocation6 + $0x7c8] sm:$0xff] }
0x183f   :  { %v14739_v20 = vpack.c.bf16 %v5594_v62, %v5590_v26 }
0x1840   :  { %11147 = vmatpush1.bf16.msra.mxu0 %v11146_v4  ;;  %11179 = vmatpush1.bf16.msra.mxu1 %v11178_v23  ;;  %v5570_v4 = vld [vmem:[#allocation6 + $0x6f0] sm:$0xff] }
0x1841   :  { %11149 = vmatprep.subr.bf16.mxu0 %v11148_v25  ;;  %11181 = vmatprep.subr.bf16.mxu1 %v11180_v60  ;;  %v14702_v23 = vpack.c.bf16 %v5570_v4, %v5566_v41  ;;  %v5577_v25 = vld [vmem:[#allocation6 + $0x728] sm:$0xff]  ;;  %v5575_v60 = vld [vmem:[#allocation6 + $0x718] sm:$0xff]  ;;  %v14743_v41 = vpack.c.bf16 %v5601_v29, %v5597_v21 }
0x1842   :  { %v14707_v48 = vpack.c.bf16 %v5577_v25, %v5573_v59  ;;  %v5603_v4 = vld [vmem:[#allocation6 + $0x7f8] sm:$0xff]  ;;  %v5596_v59 = vld [vmem:[#allocation6 + $0x7c0] sm:$0xff] }
0x1843   :  { %v5600_v25 = vld [vmem:[#allocation6 + $0x7e0] sm:$0xff] }
0x1844   :  { %11151 = vmatpush1.bf16.msra.mxu0 %v11150_v18  ;;  %11183 = vmatpush1.bf16.msra.mxu1 %v11182_v28  ;;  %v5576_v18 = vld [vmem:[#allocation6 + $0x720] sm:$0xff]  ;;  %v14709_v28 = vpack.c.bf16 %v5579_v46, %v5575_v60  ;;  %v14745_v60 = vpack.c.bf16 %v5603_v4, %v5599_v22  ;;  %v14747_v46 = vpack.c.bf16 %v5600_v25, %v5596_v59  ;;  %v5460_v4 = vrot.slane %v14652_v35, 6 }
0x1845   :  { %11185 = vmatprep.subr.bf16.mxu0 %v14659_v54  ;;  %11217 = vmatprep.subr.bf16.mxu1 %v14661_v7 }
0x1847   :  { %5692 = vmatmul.mubr.f32.vlgmr.msra.gmra.mrb[60].mxu0 %v5472_v45  ;;  %5769 = vmatmul.mubr.f32.vlgmr.msra.gmra.mrb[60].mxu1 %v5472_v45  ;;  %v14711_v45 = vpack.c.bf16 %v5576_v18, %v5572_v34  ;;  %v5598_v34 = vld [vmem:[#allocation6 + $0x7d0] sm:$0xff] }
0x1848   :  { %5697 = vmatprep.mubr.f32.mxu0 %v15645_v57  ;;  %5774 = vmatprep.mubr.f32.mxu1 %v15645_v57  ;;  %v5602_v18 = vld [vmem:[#allocation6 + $0x7f0] sm:$0xff] }
0x1849   :  { %11187 = vmatpush1.bf16.msra.mxu0 %v14663_v44  ;;  %11219 = vmatpush1.bf16.msra.mxu1 %v14666_v1  ;;  %v14750_v2 = vpack.c.bf16 %v5602_v18, %v5598_v34 }
0x184a   :  { %11189 = vmatprep.subr.bf16.mxu0 %v14671_v36  ;;  %11221 = vmatprep.subr.bf16.mxu1 %v14673_v14 }
0x184d   :  { %11191 = vmatpush1.bf16.msra.mxu0 %v14675_v0  ;;  %11223 = vmatpush1.bf16.msra.mxu1 %v14678_v8 }
0x184e   :  { %11193 = vmatprep.subr.bf16.mxu0 %v14683_v17  ;;  %11225 = vmatprep.subr.bf16.mxu1 %v14685_v61 }
0x1851   :  { %11195 = vmatpush1.bf16.msra.mxu0 %v14687_v38  ;;  %11227 = vmatpush1.bf16.msra.mxu1 %v14690_v15 }
0x1852   :  { %11197 = vmatprep.subr.bf16.mxu0 %v14695_v56  ;;  %11229 = vmatprep.subr.bf16.mxu1 %v14697_v27 }
0x1855   :  { %11199 = vmatpush1.bf16.msra.mxu0 %v14699_v10  ;;  %11231 = vmatpush1.bf16.msra.mxu1 %v14702_v23 }
0x1856   :  { %11201 = vmatprep.subr.bf16.mxu0 %v14707_v48  ;;  %11233 = vmatprep.subr.bf16.mxu1 %v14709_v28 }
0x1859   :  { %11203 = vmatpush1.bf16.msra.mxu0 %v14711_v45  ;;  %11235 = vmatpush1.bf16.msra.mxu1 %v14714_v24 }
0x185a   :  { %11205 = vmatprep.subr.bf16.mxu0 %v14719_v42  ;;  %11237 = vmatprep.subr.bf16.mxu1 %v14721_v50 }
0x185d   :  { %11207 = vmatpush1.bf16.msra.mxu0 %v14723_v5  ;;  %11239 = vmatpush1.bf16.msra.mxu1 %v14726_v9 }
0x185e   :  { %11209 = vmatprep.subr.bf16.mxu0 %v14730_v40  ;;  %11241 = vmatprep.subr.bf16.mxu1 %v14732_v12 }
0x1861   :  { %11211 = vmatpush1.bf16.msra.mxu0 %v14735_v51  ;;  %11243 = vmatpush1.bf16.msra.mxu1 %v14739_v20 }
0x1862   :  { %11213 = vmatprep.subr.bf16.mxu0 %v14743_v41  ;;  %11245 = vmatprep.subr.bf16.mxu1 %v14745_v60 }
0x1865   :  { %11215 = vmatpush1.bf16.msra.mxu0 %v14747_v46  ;;  %11247 = vmatpush1.bf16.msra.mxu1 %v14750_v2 }
0x1866   :  { %11249 = vmatprep.subr.bf16.mxu0 %v14659_v54  ;;  %11281 = vmatprep.subr.bf16.mxu1 %v14661_v7 }
0x18fa   :  { %v5348_v13 = vpop.f32.mrb[58].mxu0  ;;  %v5419_v55 = vpop.f32.mrb[58].mxu1 }
0x18fb   :  { %v5428_v6 = vrot.slane %v5348_v13, 2  ;;  %v5350_v49 = vpop.f32.mrb[59].mxu0  ;;  %v5421_v3 = vpop.f32.mrb[59].mxu1  ;;  %v5430_v11 = vrot.slane %v5419_v55, 2 }
0x18fc   :  { %v5429_v32 = vrot.slane %v5350_v49, 2  ;;  %v5431_v52 = vrot.slane %v5421_v3, 2 }
0x18fd   :  { %v5436_v31 = vadd.f32 %v5428_v6, %v14551_v37  ;;  %v5438_v19 = vadd.f32 %v5430_v11, %v14566_v47 }
0x18fe   :  { %v5437_v33 = vadd.f32 %v5429_v32, %v14555_v53  ;;  %v5439_v16 = vadd.f32 %v5431_v52, %v14561_v43 }
0x18ff   :  { %v9283_v58 = vmul.f32 -1.442695, %v5436_v31  ;;  %v9286_v31 = vld [vmem:[%s15624_s1 + $0x6] sm:$0x3] }
0x1900   :  { %v9284_v39 = vmul.f32 -1.442695, %v5437_v33  ;;  %v9285_v63 = vmul.f32 -1.442695, %v5439_v16  ;;  %v5605_v33 = vld [vmem:[#allocation8 + $0xc] sm:$0xf] }
0x1901   :  { %12688 = vpow2.f32 %v9283_v58  ;;  %v14806_v58 = vrot.slane %v5605_v33, %v13447_v30 }
0x1902   :  { %12690 = vpow2.f32 %v9284_v39  ;;  %v15649_v39 = vld [vmem:[#allocation21_spill] sm:$0xff] }
0x1903   :  { %12692 = vpow2.f32 %v9285_v63  ;;  %v14809_v52 = vrot.slane %v5605_v33, %v15649_v39 }
0x1904   :  { %12694 = vtanh.f32 %v5438_v19 }
0x190b   :  { %v12689_v26 = vpop.eup %12688 }
0x190c   :  { %v12691_v62 = vpop.eup %12690  ;;  %v5443_v21 = vadd.f32 1.0, %v12689_v26 }
0x190d   :  { %v5449_v29 = vadd.f32 1.0, %v12691_v62  ;;  %v12693_v37 = vpop.eup %12692 }
0x190e   :  { %12696 = vrcp.f32 %v5443_v21  ;;  %v12695_v53 = vpop.eup %12694  ;;  %v5456_v43 = vadd.f32 1.0, %v12693_v37 }
0x190f   :  { %12698 = vrcp.f32 %v5449_v29 }
0x1910   :  { %12700 = vrcp.f32 %v5456_v43 }
0x1918   :  { %v12697_v22 = vpop.eup %12696 }
0x1919   :  { %v12699_v59 = vpop.eup %12698  ;;  %v5463_v25 = vmul.f32 %v12697_v22, %v12695_v53 }
0x191a   :  { %v5462_v34 = vmul.f32 %v12699_v59, %v5460_v4  ;;  %v5693_v18 = vpop.f32.mrb[60].mxu0  ;;  %v14762_v13 = vpop.f32.mrb[60].mxu1  ;;  %v15650_v4 = vld [vmem:[#allocation23_spill] sm:$0xff] }
0x191b   :  { %v5695_v47 = vpop.f32.mrb[61].mxu0  ;;  %v14764_v55 = vpop.f32.mrb[61].mxu1  ;;  %v14820_v26 = vadd.f32 %v5693_v18, %v14806_v58  ;;  %v14827_v59 = vrot.slane %v5605_v33, %v15650_v4 }
0x191c   :  { %v5464_v6 = vadd.f32 %v5463_v25, %v5462_v34  ;;  %v12701_v49 = vpop.eup %12700  ;;  %v14823_v62 = vadd.f32 %v5695_v47, %v14809_v52  ;;  %v15651_v47 = vld [vmem:[#allocation22_spill] sm:$0xff] }
0x191d   :  { %v14832_v18 = vadd.f32 %v14764_v55, %v14827_v59 }
0x191e   :  { %12702 = vtanh.f32 %v5464_v6  ;;  %5471 = vst [vmem:[#allocation15 - $0x2] sm:$0xc0] %v5464_v6  ;;  %v14835_v6 = vrot.slane %v5605_v33, %v15651_v47 }
0x1928   :  { %v12703_v3 = vpop.eup %12702 }
0x1929   :  { %v5466_v32 = vmul.f32 %v12703_v3, %v12701_v49  ;;  %v14840_v3 = vadd.f32 %v14762_v13, %v14835_v6 }
0x192b   :  { %5467 = vst [vmem:[#allocation2 + $0x8] sm:$0xc0] %v5466_v32  ;;  %5469 = vst [vmem:[#allocation13 - $0x2] sm:$0xc0] %v5466_v32 }
0x1932   :  { %v5473_v35 = vld [vmem:[#allocation2 + $0x8] sm:$0xff] }
0x1933   :  { %5698 = vmatmul.mubr.f32.gmra.mrb[62].mxu0 %v5473_v35  ;;  %5775 = vmatmul.mubr.f32.gmra.mrb[62].mxu1 %v5473_v35 }
0x1934   :  { %5849 = vmatprep.mubr.f32.mxu0 %v15645_v57  ;;  %5920 = vmatprep.mubr.f32.mxu1 %v15645_v57 }
0x1937   :  { %5850 = vmatmul.mubr.f32.vlgmr.msra.gmra.mrb[64].mxu0 %v9286_v31  ;;  %5921 = vmatmul.mubr.f32.vlgmr.msra.gmra.mrb[64].mxu1 %v9286_v31 }
0x1938   :  { %11251 = vmatpush1.bf16.msra.mxu0 %v14663_v44  ;;  %11283 = vmatpush1.bf16.msra.mxu1 %v14666_v1 }
0x1939   :  { %11253 = vmatprep.subr.bf16.mxu0 %v14671_v36  ;;  %11285 = vmatprep.subr.bf16.mxu1 %v14673_v14 }
0x193a   :  { %6020 = vmatprep.mubr.f32.mxu0 %v15645_v57  ;;  %6091 = vmatprep.mubr.f32.mxu1 %v15645_v57 }
0x193c   :  { %11255 = vmatpush1.bf16.msra.mxu0 %v14675_v0  ;;  %11287 = vmatpush1.bf16.msra.mxu1 %v14678_v8 }
0x193d   :  { %11257 = vmatprep.subr.bf16.mxu0 %v14683_v17  ;;  %11289 = vmatprep.subr.bf16.mxu1 %v14685_v61 }
0x1940   :  { %11259 = vmatpush1.bf16.msra.mxu0 %v14687_v38  ;;  %11291 = vmatpush1.bf16.msra.mxu1 %v14690_v15 }
0x1941   :  { %11261 = vmatprep.subr.bf16.mxu0 %v14695_v56  ;;  %11293 = vmatprep.subr.bf16.mxu1 %v14697_v27 }
0x1944   :  { %11263 = vmatpush1.bf16.msra.mxu0 %v14699_v10  ;;  %11295 = vmatpush1.bf16.msra.mxu1 %v14702_v23 }
0x1945   :  { %11265 = vmatprep.subr.bf16.mxu0 %v14707_v48  ;;  %11297 = vmatprep.subr.bf16.mxu1 %v14709_v28 }
0x1948   :  { %11267 = vmatpush1.bf16.msra.mxu0 %v14711_v45  ;;  %11299 = vmatpush1.bf16.msra.mxu1 %v14714_v24 }
0x1949   :  { %11269 = vmatprep.subr.bf16.mxu0 %v14719_v42  ;;  %11301 = vmatprep.subr.bf16.mxu1 %v14721_v50 }
0x194c   :  { %11271 = vmatpush1.bf16.msra.mxu0 %v14723_v5  ;;  %11303 = vmatpush1.bf16.msra.mxu1 %v14726_v9 }
0x194d   :  { %11273 = vmatprep.subr.bf16.mxu0 %v14730_v40  ;;  %11305 = vmatprep.subr.bf16.mxu1 %v14732_v12 }
0x1950   :  { %11275 = vmatpush1.bf16.msra.mxu0 %v14735_v51  ;;  %11307 = vmatpush1.bf16.msra.mxu1 %v14739_v20 }
0x1951   :  { %11277 = vmatprep.subr.bf16.mxu0 %v14743_v41  ;;  %11309 = vmatprep.subr.bf16.mxu1 %v14745_v60 }
0x1954   :  { %11279 = vmatpush1.bf16.msra.mxu0 %v14747_v46  ;;  %11311 = vmatpush1.bf16.msra.mxu1 %v14750_v2 }
0x1955   :  { %11313 = vmatprep.subr.bf16.mxu0 %v14659_v54  ;;  %11345 = vmatprep.subr.bf16.mxu1 %v14661_v7 }
0x1a06   :  { %v14811_v16 = vpop.f32.mrb[62].mxu0  ;;  %v14813_v11 = vpop.f32.mrb[62].mxu1 }
0x1a07   :  { %v14815_v63 = vpop.f32.mrb[63].mxu0  ;;  %v14817_v19 = vpop.f32.mrb[63].mxu1 }
0x1a0a   :  { %v5851_v21 = vpop.f32.mrb[64].mxu0  ;;  %v5922_v29 = vpop.f32.mrb[64].mxu1 }
0x1a0b   :  { %v5927_v37 = vadd.f32 %v5851_v21, %v14820_v26  ;;  %v5853_v53 = vpop.f32.mrb[65].mxu0  ;;  %v5924_v22 = vpop.f32.mrb[65].mxu1  ;;  %v5929_v35 = vadd.f32 %v5922_v29, %v14840_v3 }
0x1a0c   :  { %v5928_v25 = vadd.f32 %v5853_v53, %v14823_v62  ;;  %v5930_v49 = vadd.f32 %v5924_v22, %v14832_v18  ;;  %v9287_v22 = vld [vmem:[%s15625_s2 + $0x6] sm:$0x3] }
0x1a0d   :  { %v9288_v43 = vmul.f32 -1.442695, %v5927_v37 }
0x1a0e   :  { %v9289_v34 = vmul.f32 -1.442695, %v5928_v25  ;;  %v9290_v32 = vmul.f32 -1.442695, %v5930_v49 }
0x1a0f   :  { %12704 = vpow2.f32 %v9288_v43 }
0x1a10   :  { %12706 = vpow2.f32 %v9289_v34 }
0x1a11   :  { %12708 = vpow2.f32 %v9290_v32 }
0x1a12   :  { %12710 = vtanh.f32 %v5929_v35 }
0x1a19   :  { %v12705_v31 = vpop.eup %12704 }
0x1a1a   :  { %v12707_v21 = vpop.eup %12706  ;;  %v5934_v37 = vadd.f32 1.0, %v12705_v31 }
0x1a1b   :  { %v5940_v55 = vadd.f32 1.0, %v12707_v21  ;;  %v12709_v53 = vpop.eup %12708 }
0x1a1c   :  { %12712 = vrcp.f32 %v5934_v37  ;;  %v12711_v33 = vpop.eup %12710  ;;  %v5947_v34 = vadd.f32 1.0, %v12709_v53 }
0x1a1d   :  { %12714 = vrcp.f32 %v5940_v55 }
0x1a1e   :  { %12716 = vrcp.f32 %v5947_v34 }
0x1a26   :  { %v12713_v25 = vpop.eup %12712 }
0x1a27   :  { %v12715_v13 = vpop.eup %12714  ;;  %v5951_v43 = vmul.f32 %v12713_v25, %v12711_v33 }
0x1a28   :  { %v5950_v49 = vmul.f32 %v12715_v13, %v9287_v22  ;;  %v12717_v32 = vpop.eup %12716 }
0x1a2a   :  { %v14846_v29 = vadd.f32 %v5951_v43, %v5950_v49 }
0x1a2c   :  { %12718 = vtanh.f32 %v14846_v29 }
0x1a36   :  { %v12719_v35 = vpop.eup %12718 }
0x1a37   :  { %v5954_v31 = vmul.f32 %v12719_v35, %v12717_v32 }
0x1a39   :  { %5955 = vst [vmem:[#allocation2] sm:$0x3] %v5954_v31  ;;  %6021 = vmatmul.mubr.f32.vlgmr.msra.gmra.mrb[66].mxu0 %v5954_v31  ;;  %6092 = vmatmul.mubr.f32.vlgmr.msra.gmra.mrb[66].mxu1 %v5954_v31 }
0x1a3a   :  { %11315 = vmatpush1.bf16.msra.mxu0 %v14663_v44  ;;  %11347 = vmatpush1.bf16.msra.mxu1 %v14666_v1 }
0x1a3b   :  { %11317 = vmatprep.subr.bf16.mxu0 %v14671_v36  ;;  %11349 = vmatprep.subr.bf16.mxu1 %v14673_v14 }
0x1a3c   :  { %6209 = vmatprep.mubr.f32.mxu0 %v15645_v57  ;;  %6280 = vmatprep.mubr.f32.mxu1 %v15645_v57 }
0x1a3e   :  { %11319 = vmatpush1.bf16.msra.mxu0 %v14675_v0  ;;  %11351 = vmatpush1.bf16.msra.mxu1 %v14678_v8 }
0x1a3f   :  { %11321 = vmatprep.subr.bf16.mxu0 %v14683_v17  ;;  %11353 = vmatprep.subr.bf16.mxu1 %v14685_v61 }
0x1a42   :  { %11323 = vmatpush1.bf16.msra.mxu0 %v14687_v38  ;;  %11355 = vmatpush1.bf16.msra.mxu1 %v14690_v15 }
0x1a43   :  { %11325 = vmatprep.subr.bf16.mxu0 %v14695_v56  ;;  %11357 = vmatprep.subr.bf16.mxu1 %v14697_v27 }
0x1a46   :  { %11327 = vmatpush1.bf16.msra.mxu0 %v14699_v10  ;;  %11359 = vmatpush1.bf16.msra.mxu1 %v14702_v23 }
0x1a47   :  { %11329 = vmatprep.subr.bf16.mxu0 %v14707_v48  ;;  %11361 = vmatprep.subr.bf16.mxu1 %v14709_v28 }
0x1a4a   :  { %11331 = vmatpush1.bf16.msra.mxu0 %v14711_v45  ;;  %11363 = vmatpush1.bf16.msra.mxu1 %v14714_v24 }
0x1a4b   :  { %11333 = vmatprep.subr.bf16.mxu0 %v14719_v42  ;;  %11365 = vmatprep.subr.bf16.mxu1 %v14721_v50 }
0x1a4e   :  { %11335 = vmatpush1.bf16.msra.mxu0 %v14723_v5  ;;  %11367 = vmatpush1.bf16.msra.mxu1 %v14726_v9 }
0x1a4f   :  { %11337 = vmatprep.subr.bf16.mxu0 %v14730_v40  ;;  %11369 = vmatprep.subr.bf16.mxu1 %v14732_v12 }
0x1a52   :  { %11339 = vmatpush1.bf16.msra.mxu0 %v14735_v51  ;;  %11371 = vmatpush1.bf16.msra.mxu1 %v14739_v20 }
0x1a53   :  { %11341 = vmatprep.subr.bf16.mxu0 %v14743_v41  ;;  %11373 = vmatprep.subr.bf16.mxu1 %v14745_v60 }
0x1a56   :  { %11343 = vmatpush1.bf16.msra.mxu0 %v14747_v46  ;;  %11375 = vmatpush1.bf16.msra.mxu1 %v14750_v2 }
0x1a57   :  { %11377 = vmatprep.subr.bf16.mxu0 %v14659_v54  ;;  %11409 = vmatprep.subr.bf16.mxu1 %v14661_v7 }
0x1b0c   :  { %v6022_v21 = vpop.f32.mrb[66].mxu0  ;;  %v6093_v37 = vpop.f32.mrb[66].mxu1 }
0x1b0d   :  { %v6102_v55 = vrot.slane %v6022_v21, 6  ;;  %v6024_v53 = vpop.f32.mrb[67].mxu0  ;;  %v6095_v33 = vpop.f32.mrb[67].mxu1  ;;  %v6104_v35 = vrot.slane %v6093_v37, 6 }
0x1b0e   :  { %v6103_v22 = vrot.slane %v6024_v53, 6  ;;  %v6105_v49 = vrot.slane %v6095_v33, 6  ;;  %v6134_v33 = vrot.slane %v14846_v29, 6 }
0x1b0f   :  { %v6110_v25 = vadd.f32 %v6102_v55, %v14820_v26  ;;  %v6112_v47 = vadd.f32 %v6104_v35, %v14840_v3 }
0x1b10   :  { %v6111_v13 = vadd.f32 %v6103_v22, %v14823_v62  ;;  %v6113_v32 = vadd.f32 %v6105_v49, %v14832_v18 }
0x1b11   :  { %v9291_v43 = vmul.f32 -1.442695, %v6110_v25 }
0x1b12   :  { %v9292_v34 = vmul.f32 -1.442695, %v6111_v13  ;;  %v9293_v31 = vmul.f32 -1.442695, %v6113_v32 }
0x1b13   :  { %12720 = vpow2.f32 %v9291_v43 }
0x1b14   :  { %12722 = vpow2.f32 %v9292_v34 }
0x1b15   :  { %12724 = vpow2.f32 %v9293_v31 }
0x1b16   :  { %12726 = vtanh.f32 %v6112_v47 }
0x1b1d   :  { %v12721_v4 = vpop.eup %12720 }
0x1b1e   :  { %v12723_v21 = vpop.eup %12722  ;;  %v6117_v39 = vadd.f32 1.0, %v12721_v4 }
0x1b1f   :  { %v6123_v53 = vadd.f32 1.0, %v12723_v21  ;;  %v12725_v55 = vpop.eup %12724 }
0x1b20   :  { %12728 = vrcp.f32 %v6117_v39  ;;  %v12727_v22 = vpop.eup %12726  ;;  %v6130_v34 = vadd.f32 1.0, %v12725_v55 }
0x1b21   :  { %12730 = vrcp.f32 %v6123_v53 }
0x1b22   :  { %12732 = vrcp.f32 %v6130_v34 }
0x1b2a   :  { %v12729_v25 = vpop.eup %12728 }
0x1b2b   :  { %v12731_v13 = vpop.eup %12730  ;;  %v6137_v43 = vmul.f32 %v12729_v25, %v12727_v22 }
0x1b2c   :  { %v6136_v37 = vmul.f32 %v12731_v13, %v6134_v33  ;;  %v12733_v4 = vpop.eup %12732 }
0x1b2e   :  { %v14888_v49 = vadd.f32 %v6137_v43, %v6136_v37 }
0x1b30   :  { %12734 = vtanh.f32 %v14888_v49 }
0x1b3a   :  { %v12735_v32 = vpop.eup %12734 }
0x1b3b   :  { %v6140_v47 = vmul.f32 %v12735_v32, %v12733_v4 }
0x1b3d   :  { %6141 = vst [vmem:[#allocation2] sm:$0xc] %v6140_v47  ;;  %v6143_v39 = vrot.slane %v6140_v47, 2 }
0x1b3f   :  { %6210 = vmatmul.mubr.f32.vlgmr.msra.gmra.mrb[68].mxu0 %v6143_v39  ;;  %6281 = vmatmul.mubr.f32.vlgmr.msra.gmra.mrb[68].mxu1 %v6143_v39 }
0x1b40   :  { %11379 = vmatpush1.bf16.msra.mxu0 %v14663_v44  ;;  %11411 = vmatpush1.bf16.msra.mxu1 %v14666_v1 }
0x1b41   :  { %11381 = vmatprep.subr.bf16.mxu0 %v14671_v36  ;;  %11413 = vmatprep.subr.bf16.mxu1 %v14673_v14 }
0x1b42   :  { %6398 = vmatprep.mubr.f32.mxu0 %v15645_v57  ;;  %6469 = vmatprep.mubr.f32.mxu1 %v15645_v57 }
0x1b44   :  { %11383 = vmatpush1.bf16.msra.mxu0 %v14675_v0  ;;  %11415 = vmatpush1.bf16.msra.mxu1 %v14678_v8 }
0x1b45   :  { %11385 = vmatprep.subr.bf16.mxu0 %v14683_v17  ;;  %11417 = vmatprep.subr.bf16.mxu1 %v14685_v61 }
0x1b48   :  { %11387 = vmatpush1.bf16.msra.mxu0 %v14687_v38  ;;  %11419 = vmatpush1.bf16.msra.mxu1 %v14690_v15 }
0x1b49   :  { %11389 = vmatprep.subr.bf16.mxu0 %v14695_v56  ;;  %11421 = vmatprep.subr.bf16.mxu1 %v14697_v27 }
0x1b4c   :  { %11391 = vmatpush1.bf16.msra.mxu0 %v14699_v10  ;;  %11423 = vmatpush1.bf16.msra.mxu1 %v14702_v23 }
0x1b4d   :  { %11393 = vmatprep.subr.bf16.mxu0 %v14707_v48  ;;  %11425 = vmatprep.subr.bf16.mxu1 %v14709_v28 }
0x1b50   :  { %11395 = vmatpush1.bf16.msra.mxu0 %v14711_v45  ;;  %11427 = vmatpush1.bf16.msra.mxu1 %v14714_v24 }
0x1b51   :  { %11397 = vmatprep.subr.bf16.mxu0 %v14719_v42  ;;  %11429 = vmatprep.subr.bf16.mxu1 %v14721_v50 }
0x1b54   :  { %11399 = vmatpush1.bf16.msra.mxu0 %v14723_v5  ;;  %11431 = vmatpush1.bf16.msra.mxu1 %v14726_v9 }
0x1b55   :  { %11401 = vmatprep.subr.bf16.mxu0 %v14730_v40  ;;  %11433 = vmatprep.subr.bf16.mxu1 %v14732_v12 }
0x1b58   :  { %11403 = vmatpush1.bf16.msra.mxu0 %v14735_v51  ;;  %11435 = vmatpush1.bf16.msra.mxu1 %v14739_v20 }
0x1b59   :  { %11405 = vmatprep.subr.bf16.mxu0 %v14743_v41  ;;  %11437 = vmatprep.subr.bf16.mxu1 %v14745_v60 }
0x1b5c   :  { %11407 = vmatpush1.bf16.msra.mxu0 %v14747_v46  ;;  %11439 = vmatpush1.bf16.msra.mxu1 %v14750_v2 }
0x1b5d   :  { %11441 = vmatprep.subr.bf16.mxu0 %v14659_v54  ;;  %11473 = vmatprep.subr.bf16.mxu1 %v14661_v7 }
0x1c12   :  { %v6211_v29 = vpop.f32.mrb[68].mxu0  ;;  %v6282_v35 = vpop.f32.mrb[68].mxu1 }
0x1c13   :  { %v6291_v31 = vrot.slane %v6211_v29, 4  ;;  %v6213_v21 = vpop.f32.mrb[69].mxu0  ;;  %v6284_v53 = vpop.f32.mrb[69].mxu1  ;;  %v6293_v37 = vrot.slane %v6282_v35, 4 }
0x1c14   :  { %v6292_v55 = vrot.slane %v6213_v21, 4  ;;  %v6294_v43 = vrot.slane %v6284_v53, 4  ;;  %v6323_v53 = vrot.slane %v14888_v49, 6 }
0x1c15   :  { %v6299_v22 = vadd.f32 %v6291_v31, %v14820_v26  ;;  %v6301_v32 = vadd.f32 %v6293_v37, %v14840_v3 }
0x1c16   :  { %v6300_v25 = vadd.f32 %v6292_v55, %v14823_v62  ;;  %v6302_v34 = vadd.f32 %v6294_v43, %v14832_v18 }
0x1c17   :  { %v9294_v33 = vmul.f32 -1.442695, %v6299_v22 }
0x1c18   :  { %v9295_v13 = vmul.f32 -1.442695, %v6300_v25  ;;  %v9296_v4 = vmul.f32 -1.442695, %v6302_v34 }
0x1c19   :  { %12736 = vpow2.f32 %v9294_v33 }
0x1c1a   :  { %12738 = vpow2.f32 %v9295_v13 }
0x1c1b   :  { %12740 = vpow2.f32 %v9296_v4 }
0x1c1c   :  { %12742 = vtanh.f32 %v6301_v32 }
0x1c23   :  { %v12737_v47 = vpop.eup %12736 }
0x1c24   :  { %v12739_v39 = vpop.eup %12738  ;;  %v6306_v29 = vadd.f32 1.0, %v12737_v47 }
0x1c25   :  { %v6312_v21 = vadd.f32 1.0, %v12739_v39  ;;  %v12741_v31 = vpop.eup %12740 }
0x1c26   :  { %12744 = vrcp.f32 %v6306_v29  ;;  %v12743_v55 = vpop.eup %12742  ;;  %v6319_v13 = vadd.f32 1.0, %v12741_v31 }
0x1c27   :  { %12746 = vrcp.f32 %v6312_v21 }
0x1c28   :  { %12748 = vrcp.f32 %v6319_v13 }
0x1c30   :  { %v12745_v22 = vpop.eup %12744 }
0x1c31   :  { %v12747_v25 = vpop.eup %12746  ;;  %v6326_v33 = vmul.f32 %v12745_v22, %v12743_v55 }
0x1c32   :  { %v6325_v35 = vmul.f32 %v12747_v25, %v6323_v53  ;;  %v12749_v34 = vpop.eup %12748 }
0x1c34   :  { %v14930_v43 = vadd.f32 %v6326_v33, %v6325_v35 }
0x1c36   :  { %12750 = vtanh.f32 %v14930_v43 }
0x1c40   :  { %v12751_v37 = vpop.eup %12750 }
0x1c41   :  { %v6329_v4 = vmul.f32 %v12751_v37, %v12749_v34 }
0x1c43   :  { %6330 = vst [vmem:[#allocation2] sm:$0x30] %v6329_v4  ;;  %v6332_v32 = vrot.slane %v6329_v4, 4 }
0x1c45   :  { %6399 = vmatmul.mubr.f32.vlgmr.msra.gmra.mrb[70].mxu0 %v6332_v32  ;;  %6470 = vmatmul.mubr.f32.vlgmr.msra.gmra.mrb[70].mxu1 %v6332_v32 }
0x1c46   :  { %11443 = vmatpush1.bf16.msra.mxu0 %v14663_v44  ;;  %11475 = vmatpush1.bf16.msra.mxu1 %v14666_v1 }
0x1c47   :  { %11445 = vmatprep.subr.bf16.mxu0 %v14671_v36  ;;  %11477 = vmatprep.subr.bf16.mxu1 %v14673_v14 }
0x1c48   :  { %6587 = vmatprep.mubr.f32.mxu0 %v15645_v57  ;;  %6658 = vmatprep.mubr.f32.mxu1 %v15645_v57 }
0x1c4a   :  { %11447 = vmatpush1.bf16.msra.mxu0 %v14675_v0  ;;  %11479 = vmatpush1.bf16.msra.mxu1 %v14678_v8 }
0x1c4b   :  { %11449 = vmatprep.subr.bf16.mxu0 %v14683_v17  ;;  %11481 = vmatprep.subr.bf16.mxu1 %v14685_v61 }
0x1c4e   :  { %11451 = vmatpush1.bf16.msra.mxu0 %v14687_v38  ;;  %11483 = vmatpush1.bf16.msra.mxu1 %v14690_v15 }
0x1c4f   :  { %11453 = vmatprep.subr.bf16.mxu0 %v14695_v56  ;;  %11485 = vmatprep.subr.bf16.mxu1 %v14697_v27 }
0x1c52   :  { %11455 = vmatpush1.bf16.msra.mxu0 %v14699_v10  ;;  %11487 = vmatpush1.bf16.msra.mxu1 %v14702_v23 }
0x1c53   :  { %11457 = vmatprep.subr.bf16.mxu0 %v14707_v48  ;;  %11489 = vmatprep.subr.bf16.mxu1 %v14709_v28 }
0x1c56   :  { %11459 = vmatpush1.bf16.msra.mxu0 %v14711_v45  ;;  %11491 = vmatpush1.bf16.msra.mxu1 %v14714_v24 }
0x1c57   :  { %11461 = vmatprep.subr.bf16.mxu0 %v14719_v42  ;;  %11493 = vmatprep.subr.bf16.mxu1 %v14721_v50 }
0x1c5a   :  { %11463 = vmatpush1.bf16.msra.mxu0 %v14723_v5  ;;  %11495 = vmatpush1.bf16.msra.mxu1 %v14726_v9 }
0x1c5b   :  { %11465 = vmatprep.subr.bf16.mxu0 %v14730_v40  ;;  %11497 = vmatprep.subr.bf16.mxu1 %v14732_v12 }
0x1c5e   :  { %11467 = vmatpush1.bf16.msra.mxu0 %v14735_v51  ;;  %11499 = vmatpush1.bf16.msra.mxu1 %v14739_v20 }
0x1c5f   :  { %11469 = vmatprep.subr.bf16.mxu0 %v14743_v41  ;;  %11501 = vmatprep.subr.bf16.mxu1 %v14745_v60 }
0x1c62   :  { %11471 = vmatpush1.bf16.msra.mxu0 %v14747_v46  ;;  %11503 = vmatpush1.bf16.msra.mxu1 %v14750_v2 }
0x1c63   :  { %11505 = vmatprep.subr.bf16.mxu0 %v14659_v54  ;;  %11537 = vmatprep.subr.bf16.mxu1 %v14661_v7 }
0x1d18   :  { %v6400_v49 = vpop.f32.mrb[70].mxu0  ;;  %v6471_v47 = vpop.f32.mrb[70].mxu1 }
0x1d19   :  { %v6480_v39 = vrot.slane %v6400_v49, 2  ;;  %v6402_v29 = vpop.f32.mrb[71].mxu0  ;;  %v6473_v21 = vpop.f32.mrb[71].mxu1  ;;  %v6482_v35 = vrot.slane %v6471_v47, 2 }
0x1d1a   :  { %v6481_v31 = vrot.slane %v6402_v29, 2  ;;  %v6483_v33 = vrot.slane %v6473_v21, 2  ;;  %v6512_v21 = vrot.slane %v14930_v43, 6  ;;  %v15011_v43 = vadd.f32 %v14811_v16, %v14806_v58 }
0x1d1b   :  { %v6488_v55 = vadd.f32 %v6480_v39, %v14820_v26  ;;  %v6490_v37 = vadd.f32 %v6482_v35, %v14840_v3 }
0x1d1c   :  { %v6489_v22 = vadd.f32 %v6481_v31, %v14823_v62  ;;  %v6491_v13 = vadd.f32 %v6483_v33, %v14832_v18 }
0x1d1d   :  { %v9297_v53 = vmul.f32 -1.442695, %v6488_v55 }
0x1d1e   :  { %v9298_v25 = vmul.f32 -1.442695, %v6489_v22  ;;  %v9299_v34 = vmul.f32 -1.442695, %v6491_v13  ;;  %v15015_v13 = vadd.f32 %v14815_v63, %v14809_v52  ;;  %v15026_v52 = vadd.f32 %v14813_v11, %v14835_v6 }
0x1d1f   :  { %12752 = vpow2.f32 %v9297_v53 }
0x1d20   :  { %12754 = vpow2.f32 %v9298_v25 }
0x1d21   :  { %12756 = vpow2.f32 %v9299_v34 }
0x1d22   :  { %12758 = vtanh.f32 %v6490_v37 }
0x1d29   :  { %v12753_v4 = vpop.eup %12752 }
0x1d2a   :  { %v12755_v32 = vpop.eup %12754  ;;  %v6495_v49 = vadd.f32 1.0, %v12753_v4 }
0x1d2b   :  { %v6501_v29 = vadd.f32 1.0, %v12755_v32  ;;  %v12757_v26 = vpop.eup %12756 }
0x1d2c   :  { %12760 = vrcp.f32 %v6495_v49  ;;  %v12759_v62 = vpop.eup %12758  ;;  %v6508_v18 = vadd.f32 1.0, %v12757_v26 }
0x1d2d   :  { %12762 = vrcp.f32 %v6501_v29 }
0x1d2e   :  { %12764 = vrcp.f32 %v6508_v18 }
0x1d36   :  { %v12761_v39 = vpop.eup %12760 }
0x1d37   :  { %v12763_v31 = vpop.eup %12762  ;;  %v6515_v55 = vmul.f32 %v12761_v39, %v12759_v62  ;;  %v15021_v62 = vadd.f32 %v14817_v19, %v14827_v59 }
0x1d38   :  { %v6514_v47 = vmul.f32 %v12763_v31, %v6512_v21  ;;  %v12765_v3 = vpop.eup %12764 }
0x1d3a   :  { %v14972_v22 = vadd.f32 %v6515_v55, %v6514_v47 }
0x1d3c   :  { %12766 = vtanh.f32 %v14972_v22  ;;  %v6689_v47 = vrot.slane %v14972_v22, 6 }
0x1d46   :  { %v12767_v53 = vpop.eup %12766 }
0x1d47   :  { %v6518_v25 = vmul.f32 %v12767_v53, %v12765_v3 }
0x1d49   :  { %6519 = vst [vmem:[#allocation2] sm:$0xc0] %v6518_v25  ;;  %v6521_v33 = vrot.slane %v6518_v25, 6 }
0x1d4b   :  { %6588 = vmatmul.mubr.f32.vlgmr.msra.gmra.mrb[72].mxu0 %v6521_v33  ;;  %6659 = vmatmul.mubr.f32.vlgmr.msra.gmra.mrb[72].mxu1 %v6521_v33 }
0x1d4c   :  { %11507 = vmatpush1.bf16.msra.mxu0 %v14663_v44  ;;  %11539 = vmatpush1.bf16.msra.mxu1 %v14666_v1 }
0x1d4d   :  { %11509 = vmatprep.subr.bf16.mxu0 %v14671_v36  ;;  %11541 = vmatprep.subr.bf16.mxu1 %v14673_v14 }
0x1d4e   :  { %6761 = vmatprep.mubr.f32.mxu0 %v15645_v57  ;;  %6832 = vmatprep.mubr.f32.mxu1 %v15645_v57 }
0x1d50   :  { %11511 = vmatpush1.bf16.msra.mxu0 %v14675_v0  ;;  %11543 = vmatpush1.bf16.msra.mxu1 %v14678_v8 }
0x1d51   :  { %11513 = vmatprep.subr.bf16.mxu0 %v14683_v17  ;;  %11545 = vmatprep.subr.bf16.mxu1 %v14685_v61 }
0x1d54   :  { %11515 = vmatpush1.bf16.msra.mxu0 %v14687_v38  ;;  %11547 = vmatpush1.bf16.msra.mxu1 %v14690_v15 }
0x1d55   :  { %11517 = vmatprep.subr.bf16.mxu0 %v14695_v56  ;;  %11549 = vmatprep.subr.bf16.mxu1 %v14697_v27 }
0x1d58   :  { %11519 = vmatpush1.bf16.msra.mxu0 %v14699_v10  ;;  %11551 = vmatpush1.bf16.msra.mxu1 %v14702_v23 }
0x1d59   :  { %11521 = vmatprep.subr.bf16.mxu0 %v14707_v48  ;;  %11553 = vmatprep.subr.bf16.mxu1 %v14709_v28 }
0x1d5c   :  { %11523 = vmatpush1.bf16.msra.mxu0 %v14711_v45  ;;  %11555 = vmatpush1.bf16.msra.mxu1 %v14714_v24 }
0x1d5d   :  { %11525 = vmatprep.subr.bf16.mxu0 %v14719_v42  ;;  %11557 = vmatprep.subr.bf16.mxu1 %v14721_v50 }
0x1d60   :  { %11527 = vmatpush1.bf16.msra.mxu0 %v14723_v5  ;;  %11559 = vmatpush1.bf16.msra.mxu1 %v14726_v9 }
0x1d61   :  { %11529 = vmatprep.subr.bf16.mxu0 %v14730_v40  ;;  %11561 = vmatprep.subr.bf16.mxu1 %v14732_v12 }
0x1d64   :  { %11531 = vmatpush1.bf16.msra.mxu0 %v14735_v51  ;;  %11563 = vmatpush1.bf16.msra.mxu1 %v14739_v20 }
0x1d65   :  { %11533 = vmatprep.subr.bf16.mxu0 %v14743_v41  ;;  %11565 = vmatprep.subr.bf16.mxu1 %v14745_v60 }
0x1d68   :  { %11535 = vmatpush1.bf16.msra.mxu0 %v14747_v46  ;;  %11567 = vmatpush1.bf16.msra.mxu1 %v14750_v2 }
0x1d69   :  { %11569 = vmatprep.subr.bf16.mxu0 %v14659_v54  ;;  %11601 = vmatprep.subr.bf16.mxu1 %v14661_v7 }
0x1e1e   :  { %v6589_v35 = vpop.f32.mrb[72].mxu0  ;;  %v6660_v34 = vpop.f32.mrb[72].mxu1 }
0x1e1f   :  { %v6665_v37 = vadd.f32 %v6589_v35, %v15011_v43  ;;  %v6591_v4 = vpop.f32.mrb[73].mxu0  ;;  %v6662_v32 = vpop.f32.mrb[73].mxu1  ;;  %v6667_v63 = vadd.f32 %v6660_v34, %v15026_v52 }
0x1e20   :  { %v6666_v49 = vadd.f32 %v6591_v4, %v15015_v13  ;;  %v6668_v58 = vadd.f32 %v6662_v32, %v15021_v62 }
0x1e21   :  { %v9300_v29 = vmul.f32 -1.442695, %v6665_v37 }
0x1e22   :  { %v9301_v26 = vmul.f32 -1.442695, %v6666_v49  ;;  %v9302_v16 = vmul.f32 -1.442695, %v6668_v58 }
0x1e23   :  { %12768 = vpow2.f32 %v9300_v29 }
0x1e24   :  { %12770 = vpow2.f32 %v9301_v26 }
0x1e25   :  { %12772 = vpow2.f32 %v9302_v16 }
0x1e26   :  { %12774 = vtanh.f32 %v6667_v63 }
0x1e2d   :  { %v12769_v39 = vpop.eup %12768 }
0x1e2e   :  { %v12771_v21 = vpop.eup %12770  ;;  %v6672_v31 = vadd.f32 1.0, %v12769_v39 }
0x1e2f   :  { %v6678_v55 = vadd.f32 1.0, %v12771_v21  ;;  %v12773_v19 = vpop.eup %12772 }
0x1e30   :  { %12776 = vrcp.f32 %v6672_v31  ;;  %v12775_v59 = vpop.eup %12774  ;;  %v6685_v11 = vadd.f32 1.0, %v12773_v19 }
0x1e31   :  { %12778 = vrcp.f32 %v6678_v55 }
0x1e32   :  { %12780 = vrcp.f32 %v6685_v11 }
0x1e3a   :  { %v12777_v18 = vpop.eup %12776 }
0x1e3b   :  { %v12779_v3 = vpop.eup %12778  ;;  %v6692_v53 = vmul.f32 %v12777_v18, %v12775_v59 }
0x1e3c   :  { %v6691_v6 = vmul.f32 %v12779_v3, %v6689_v47  ;;  %v12781_v33 = vpop.eup %12780 }
0x1e3e   :  { %v15030_v25 = vadd.f32 %v6692_v53, %v6691_v6 }
0x1e40   :  { %12782 = vtanh.f32 %v15030_v25  ;;  %v6875_v11 = vrot.slane %v15030_v25, 6 }
0x1e4a   :  { %v12783_v35 = vpop.eup %12782 }
0x1e4b   :  { %v6695_v34 = vmul.f32 %v12783_v35, %v12781_v33 }
0x1e4d   :  { %6696 = vst [vmem:[#allocation2 + $0x8] sm:$0x3] %v6695_v34  ;;  %6762 = vmatmul.mubr.f32.vlgmr.msra.gmra.mrb[74].mxu0 %v6695_v34  ;;  %6833 = vmatmul.mubr.f32.vlgmr.msra.gmra.mrb[74].mxu1 %v6695_v34 }
0x1e4e   :  { %11571 = vmatpush1.bf16.msra.mxu0 %v14663_v44  ;;  %11603 = vmatpush1.bf16.msra.mxu1 %v14666_v1 }
0x1e4f   :  { %11573 = vmatprep.subr.bf16.mxu0 %v14671_v36  ;;  %11605 = vmatprep.subr.bf16.mxu1 %v14673_v14 }
0x1e50   :  { %6950 = vmatprep.mubr.f32.mxu0 %v15645_v57  ;;  %7021 = vmatprep.mubr.f32.mxu1 %v15645_v57 }
0x1e52   :  { %11575 = vmatpush1.bf16.msra.mxu0 %v14675_v0  ;;  %11607 = vmatpush1.bf16.msra.mxu1 %v14678_v8 }
0x1e53   :  { %11577 = vmatprep.subr.bf16.mxu0 %v14683_v17  ;;  %11609 = vmatprep.subr.bf16.mxu1 %v14685_v61 }
0x1e56   :  { %11579 = vmatpush1.bf16.msra.mxu0 %v14687_v38  ;;  %11611 = vmatpush1.bf16.msra.mxu1 %v14690_v15 }
0x1e57   :  { %11581 = vmatprep.subr.bf16.mxu0 %v14695_v56  ;;  %11613 = vmatprep.subr.bf16.mxu1 %v14697_v27 }
0x1e5a   :  { %11583 = vmatpush1.bf16.msra.mxu0 %v14699_v10  ;;  %11615 = vmatpush1.bf16.msra.mxu1 %v14702_v23 }
0x1e5b   :  { %11585 = vmatprep.subr.bf16.mxu0 %v14707_v48  ;;  %11617 = vmatprep.subr.bf16.mxu1 %v14709_v28 }
0x1e5e   :  { %11587 = vmatpush1.bf16.msra.mxu0 %v14711_v45  ;;  %11619 = vmatpush1.bf16.msra.mxu1 %v14714_v24 }
0x1e5f   :  { %11589 = vmatprep.subr.bf16.mxu0 %v14719_v42  ;;  %11621 = vmatprep.subr.bf16.mxu1 %v14721_v50 }
0x1e62   :  { %11591 = vmatpush1.bf16.msra.mxu0 %v14723_v5  ;;  %11623 = vmatpush1.bf16.msra.mxu1 %v14726_v9 }
0x1e63   :  { %11593 = vmatprep.subr.bf16.mxu0 %v14730_v40  ;;  %11625 = vmatprep.subr.bf16.mxu1 %v14732_v12 }
0x1e66   :  { %11595 = vmatpush1.bf16.msra.mxu0 %v14735_v51  ;;  %11627 = vmatpush1.bf16.msra.mxu1 %v14739_v20 }
0x1e67   :  { %11597 = vmatprep.subr.bf16.mxu0 %v14743_v41  ;;  %11629 = vmatprep.subr.bf16.mxu1 %v14745_v60 }
0x1e6a   :  { %11599 = vmatpush1.bf16.msra.mxu0 %v14747_v46  ;;  %11631 = vmatpush1.bf16.msra.mxu1 %v14750_v2 }
0x1e6b   :  { %11633 = vmatprep.subr.bf16.mxu0 %v14659_v54  ;;  %11665 = vmatprep.subr.bf16.mxu1 %v14661_v7 }
0x1f20   :  { %v6763_v22 = vpop.f32.mrb[74].mxu0  ;;  %v6834_v37 = vpop.f32.mrb[74].mxu1 }
0x1f21   :  { %v6843_v4 = vrot.slane %v6763_v22, 6  ;;  %v6765_v32 = vpop.f32.mrb[75].mxu0  ;;  %v6836_v49 = vpop.f32.mrb[75].mxu1  ;;  %v6845_v54 = vrot.slane %v6834_v37, 6 }
0x1f22   :  { %v6844_v29 = vrot.slane %v6765_v32, 6  ;;  %v6846_v39 = vrot.slane %v6836_v49, 6 }
0x1f23   :  { %v6851_v26 = vadd.f32 %v6843_v4, %v15011_v43  ;;  %v6853_v7 = vadd.f32 %v6845_v54, %v15026_v52  ;;  %v7274_v54 = vld [vmem:[#allocation3 + $0x830] sm:$0xff] }
0x1f24   :  { %v6852_v58 = vadd.f32 %v6844_v29, %v15015_v13  ;;  %v6854_v21 = vadd.f32 %v6846_v39, %v15021_v62 }
0x1f25   :  { %v9303_v16 = vmul.f32 -1.442695, %v6851_v26 }
0x1f26   :  { %v9304_v63 = vmul.f32 -1.442695, %v6852_v58  ;;  %v9305_v31 = vmul.f32 -1.442695, %v6854_v21  ;;  %v7270_v21 = vld [vmem:[#allocation3 + $0x810] sm:$0xff] }
0x1f27   :  { %12784 = vpow2.f32 %v9303_v16  ;;  %v7268_v16 = vld [vmem:[#allocation3 + $0x800] sm:$0xff] }
0x1f28   :  { %12786 = vpow2.f32 %v9304_v63  ;;  %v7272_v63 = vld [vmem:[#allocation3 + $0x820] sm:$0xff] }
0x1f29   :  { %12788 = vpow2.f32 %v9305_v31  ;;  %v7277_v31 = vld [vmem:[#allocation3 + $0x848] sm:$0xff] }
0x1f2a   :  { %12790 = vtanh.f32 %v6853_v7 }
0x1f31   :  { %v12785_v55 = vpop.eup %12784 }
0x1f32   :  { %v12787_v19 = vpop.eup %12786  ;;  %v6858_v59 = vadd.f32 1.0, %v12785_v55  ;;  %v7281_v55 = vld [vmem:[#allocation3 + $0x868] sm:$0xff] }
0x1f33   :  { %v6864_v18 = vadd.f32 1.0, %v12787_v19  ;;  %v12789_v47 = vpop.eup %12788  ;;  %v7279_v19 = vld [vmem:[#allocation3 + $0x858] sm:$0xff] }
0x1f34   :  { %12792 = vrcp.f32 %v6858_v59  ;;  %v12791_v3 = vpop.eup %12790  ;;  %v6871_v35 = vadd.f32 1.0, %v12789_v47  ;;  %v7283_v59 = vld [vmem:[#allocation3 + $0x878] sm:$0xff]  ;;  %v11698_v47 = vpack.c.bf16 %v7272_v63, %v7268_v16  ;;  %v7313_v16 = vld [vmem:[#allocation3 + $0x968] sm:$0xff] }
0x1f35   :  { %12794 = vrcp.f32 %v6864_v18  ;;  %v7311_v63 = vld [vmem:[#allocation3 + $0x958] sm:$0xff] }
0x1f36   :  { %12796 = vrcp.f32 %v6871_v35  ;;  %v11732_v35 = vpack.c.bf16 %v7283_v59, %v7279_v19  ;;  %v7310_v59 = vld [vmem:[#allocation3 + $0x950] sm:$0xff] }
0x1f3e   :  { %v12793_v53 = vpop.eup %12792 }
0x1f3f   :  { %v12795_v6 = vpop.eup %12794  ;;  %v6878_v33 = vmul.f32 %v12793_v53, %v12791_v3  ;;  %v11730_v3 = vpack.c.bf16 %v7274_v54, %v7270_v21  ;;  %v7276_v53 = vld [vmem:[#allocation3 + $0x840] sm:$0xff] }
0x1f40   :  { %v6877_v34 = vmul.f32 %v12795_v6, %v6875_v11  ;;  %v12797_v37 = vpop.eup %12796  ;;  %v7280_v11 = vld [vmem:[#allocation3 + $0x860] sm:$0xff] }
0x1f42   :  { %v15072_v22 = vadd.f32 %v6878_v33, %v6877_v34  ;;  %v11700_v33 = vpack.c.bf16 %v7281_v55, %v7277_v31  ;;  %v7278_v34 = vld [vmem:[#allocation3 + $0x850] sm:$0xff]  ;;  %v7308_v31 = vld [vmem:[#allocation3 + $0x940] sm:$0xff] }
0x1f44   :  { %12798 = vtanh.f32 %v15072_v22 }
0x1f4e   :  { %v12799_v4 = vpop.eup %12798 }
0x1f4f   :  { %v6881_v32 = vmul.f32 %v12799_v4, %v12797_v37  ;;  %v7285_v37 = vld [vmem:[#allocation3 + $0x888] sm:$0xff] }
0x1f50   :  { %v7289_v4 = vld [vmem:[#allocation3 + $0x8a8] sm:$0xff] }
0x1f51   :  { %6882 = vst [vmem:[#allocation2 + $0x8] sm:$0xc] %v6881_v32  ;;  %v6884_v49 = vrot.slane %v6881_v32, 2  ;;  %v7287_v32 = vld [vmem:[#allocation3 + $0x898] sm:$0xff] }
0x1f53   :  { %6951 = vmatmul.mubr.f32.vlgmr.msra.gmra.mrb[76].mxu0 %v6884_v49  ;;  %7022 = vmatmul.mubr.f32.vlgmr.msra.gmra.mrb[76].mxu1 %v6884_v49  ;;  %v7291_v49 = vld [vmem:[#allocation3 + $0x8b8] sm:$0xff] }
0x1f54   :  { %11635 = vmatpush1.bf16.msra.mxu0 %v14663_v44  ;;  %11667 = vmatpush1.bf16.msra.mxu1 %v14666_v1  ;;  %v7269_v44 = vld [vmem:[#allocation3 + $0x808] sm:$0xff] }
0x1f55   :  { %11637 = vmatprep.subr.bf16.mxu0 %v14671_v36  ;;  %11669 = vmatprep.subr.bf16.mxu1 %v14673_v14  ;;  %v7273_v1 = vld [vmem:[#allocation3 + $0x828] sm:$0xff]  ;;  %v7271_v36 = vld [vmem:[#allocation3 + $0x818] sm:$0xff] }
0x1f56   :  { %7139 = vmatprep.mubr.f32.mxu0 %v15645_v57  ;;  %7210 = vmatprep.mubr.f32.mxu1 %v15645_v57  ;;  %v11696_v14 = vpack.c.bf16 %v7273_v1, %v7269_v44  ;;  %v11702_v44 = vpack.c.bf16 %v7280_v11, %v7276_v53  ;;  %v7319_v53 = vld [vmem:[#allocation3 + $0x998] sm:$0xff] }
0x1f57   :  { %v7323_v11 = vld [vmem:[#allocation3 + $0x9b8] sm:$0xff] }
0x1f58   :  { %11639 = vmatpush1.bf16.msra.mxu0 %v14675_v0  ;;  %11671 = vmatpush1.bf16.msra.mxu1 %v14678_v8  ;;  %v7275_v0 = vld [vmem:[#allocation3 + $0x838] sm:$0xff] }
0x1f59   :  { %11641 = vmatprep.subr.bf16.mxu0 %v14683_v17  ;;  %11673 = vmatprep.subr.bf16.mxu1 %v14685_v61  ;;  %v11728_v8 = vpack.c.bf16 %v7275_v0, %v7271_v36  ;;  %v7284_v36 = vld [vmem:[#allocation3 + $0x880] sm:$0xff]  ;;  %v11704_v0 = vpack.c.bf16 %v7289_v4, %v7285_v37  ;;  %v11752_v37 = vpack.c.bf16 %v7323_v11, %v7319_v53  ;;  %v7318_v4 = vld [vmem:[#allocation3 + $0x990] sm:$0xff] }
0x1f5a   :  { %v7351_v11 = vld [vmem:[#allocation6 + $0x890] sm:$0xff] }
0x1f5c   :  { %11643 = vmatpush1.bf16.msra.mxu0 %v14687_v38  ;;  %11675 = vmatpush1.bf16.msra.mxu1 %v14690_v15 }
0x1f5d   :  { %11645 = vmatprep.subr.bf16.mxu0 %v14695_v56  ;;  %11677 = vmatprep.subr.bf16.mxu1 %v14697_v27 }
0x1f60   :  { %11647 = vmatpush1.bf16.msra.mxu0 %v14699_v10  ;;  %11679 = vmatpush1.bf16.msra.mxu1 %v14702_v23 }
0x1f61   :  { %11649 = vmatprep.subr.bf16.mxu0 %v14707_v48  ;;  %11681 = vmatprep.subr.bf16.mxu1 %v14709_v28 }
0x1f64   :  { %11651 = vmatpush1.bf16.msra.mxu0 %v14711_v45  ;;  %11683 = vmatpush1.bf16.msra.mxu1 %v14714_v24 }
0x1f65   :  { %11653 = vmatprep.subr.bf16.mxu0 %v14719_v42  ;;  %11685 = vmatprep.subr.bf16.mxu1 %v14721_v50 }
0x1f68   :  { %11655 = vmatpush1.bf16.msra.mxu0 %v14723_v5  ;;  %11687 = vmatpush1.bf16.msra.mxu1 %v14726_v9 }
0x1f69   :  { %11657 = vmatprep.subr.bf16.mxu0 %v14730_v40  ;;  %11689 = vmatprep.subr.bf16.mxu1 %v14732_v12 }
0x1f6c   :  { %11659 = vmatpush1.bf16.msra.mxu0 %v14735_v51  ;;  %11691 = vmatpush1.bf16.msra.mxu1 %v14739_v20 }
0x1f6d   :  { %11661 = vmatprep.subr.bf16.mxu0 %v14743_v41  ;;  %11693 = vmatprep.subr.bf16.mxu1 %v14745_v60 }
0x1f70   :  { %11663 = vmatpush1.bf16.msra.mxu0 %v14747_v46  ;;  %11695 = vmatpush1.bf16.msra.mxu1 %v14750_v2  ;;  %v7064_v46 = vrot.slane %v15072_v22, 6  ;;  %v7282_v22 = vld [vmem:[#allocation3 + $0x870] sm:$0xff] }
0x1f71   :  { %11697 = vmatprep.subr.bf16.mxu0 %v11696_v14  ;;  %11729 = vmatprep.subr.bf16.mxu1 %v11728_v8  ;;  %v11734_v1 = vpack.c.bf16 %v7282_v22, %v7278_v34  ;;  %v7288_v14 = vld [vmem:[#allocation3 + $0x8a0] sm:$0xff]  ;;  %v11736_v8 = vpack.c.bf16 %v7291_v49, %v7287_v32  ;;  %v7322_v32 = vld [vmem:[#allocation3 + $0x9b0] sm:$0xff]  ;;  %v7325_v49 = vld [vmem:[#allocation3 + $0x9c8] sm:$0xff] }
0x1f72   :  { %v7320_v34 = vld [vmem:[#allocation3 + $0x9a0] sm:$0xff] }
0x2026   :  { %v6952_v17 = vpop.f32.mrb[76].mxu0  ;;  %v7023_v61 = vpop.f32.mrb[76].mxu1 }
0x2027   :  { %v7032_v38 = vrot.slane %v6952_v17, 4  ;;  %v6954_v15 = vpop.f32.mrb[77].mxu0  ;;  %v7025_v56 = vpop.f32.mrb[77].mxu1  ;;  %v7034_v42 = vrot.slane %v7023_v61, 4  ;;  %v7286_v17 = vld [vmem:[#allocation3 + $0x890] sm:$0xff] }
0x2028   :  { %v7033_v27 = vrot.slane %v6954_v15, 4  ;;  %v7035_v45 = vrot.slane %v7025_v56, 4  ;;  %v7290_v61 = vld [vmem:[#allocation3 + $0x8b0] sm:$0xff]  ;;  %v7297_v15 = vld [vmem:[#allocation3 + $0x8e8] sm:$0xff]  ;;  %v7295_v56 = vld [vmem:[#allocation3 + $0x8d8] sm:$0xff] }
0x2029   :  { %v7040_v10 = vadd.f32 %v7032_v38, %v15011_v43  ;;  %v7042_v5 = vadd.f32 %v7034_v42, %v15026_v52  ;;  %v7293_v38 = vld [vmem:[#allocation3 + $0x8c8] sm:$0xff]  ;;  %v7294_v42 = vld [vmem:[#allocation3 + $0x8d0] sm:$0xff] }
0x202a   :  { %v7041_v23 = vadd.f32 %v7033_v27, %v15015_v13  ;;  %v7043_v24 = vadd.f32 %v7035_v45, %v15021_v62  ;;  %v7299_v27 = vld [vmem:[#allocation3 + $0x8f8] sm:$0xff]  ;;  %v11708_v45 = vpack.c.bf16 %v7297_v15, %v7293_v38  ;;  %v7328_v38 = vld [vmem:[#allocation3 + $0x9e0] sm:$0xff]  ;;  %v7326_v15 = vld [vmem:[#allocation3 + $0x9d0] sm:$0xff] }
0x202b   :  { %v9306_v48 = vmul.f32 -1.442695, %v7040_v10  ;;  %v11706_v10 = vpack.c.bf16 %v7288_v14, %v7284_v36  ;;  %v7331_v36 = vld [vmem:[#allocation3 + $0x9f8] sm:$0xff] }
0x202c   :  { %v9307_v28 = vmul.f32 -1.442695, %v7041_v23  ;;  %v9308_v50 = vmul.f32 -1.442695, %v7043_v24  ;;  %v11738_v23 = vpack.c.bf16 %v7290_v61, %v7286_v17  ;;  %v11740_v24 = vpack.c.bf16 %v7299_v27, %v7295_v56  ;;  %v7330_v56 = vld [vmem:[#allocation3 + $0x9f0] sm:$0xff] }
0x202d   :  { %12800 = vpow2.f32 %v9306_v48  ;;  %v7292_v48 = vld [vmem:[#allocation3 + $0x8c0] sm:$0xff] }
0x202e   :  { %12802 = vpow2.f32 %v9307_v28  ;;  %v7296_v28 = vld [vmem:[#allocation3 + $0x8e0] sm:$0xff] }
0x202f   :  { %12804 = vpow2.f32 %v9308_v50  ;;  %v7298_v50 = vld [vmem:[#allocation3 + $0x8f0] sm:$0xff] }
0x2030   :  { %12806 = vtanh.f32 %v7042_v5  ;;  %v7301_v5 = vld [vmem:[#allocation3 + $0x908] sm:$0xff] }
0x2037   :  { %v12801_v9 = vpop.eup %12800 }
0x2038   :  { %v12803_v40 = vpop.eup %12802  ;;  %v7047_v12 = vadd.f32 1.0, %v12801_v9  ;;  %v7305_v9 = vld [vmem:[#allocation3 + $0x928] sm:$0xff] }
0x2039   :  { %v7053_v51 = vadd.f32 1.0, %v12803_v40  ;;  %v12805_v20 = vpop.eup %12804  ;;  %v7303_v40 = vld [vmem:[#allocation3 + $0x918] sm:$0xff] }
0x203a   :  { %12808 = vrcp.f32 %v7047_v12  ;;  %v12807_v41 = vpop.eup %12806  ;;  %v7060_v29 = vadd.f32 1.0, %v12805_v20  ;;  %v7307_v12 = vld [vmem:[#allocation3 + $0x938] sm:$0xff]  ;;  %v11742_v20 = vpack.c.bf16 %v7298_v50, %v7294_v42  ;;  %v7333_v50 = vld [vmem:[#allocation6 + $0x800] sm:$0xff] }
0x203b   :  { %12810 = vrcp.f32 %v7053_v51  ;;  %v11710_v51 = vpack.c.bf16 %v7296_v28, %v7292_v48  ;;  %v7334_v48 = vld [vmem:[#allocation6 + $0x808] sm:$0xff]  ;;  %v7340_v42 = vld [vmem:[#allocation6 + $0x838] sm:$0xff] }
0x203c   :  { %12812 = vrcp.f32 %v7060_v29  ;;  %v7306_v29 = vld [vmem:[#allocation3 + $0x930] sm:$0xff]  ;;  %v7338_v28 = vld [vmem:[#allocation6 + $0x828] sm:$0xff] }
0x2044   :  { %v12809_v60 = vpop.eup %12808 }
0x2045   :  { %v12811_v2 = vpop.eup %12810  ;;  %v7067_v25 = vmul.f32 %v12809_v60, %v12807_v41  ;;  %v7300_v41 = vld [vmem:[#allocation3 + $0x900] sm:$0xff] }
0x2046   :  { %v7066_v26 = vmul.f32 %v12811_v2, %v7064_v46  ;;  %v12813_v39 = vpop.eup %12812  ;;  %v7304_v60 = vld [vmem:[#allocation3 + $0x920] sm:$0xff]  ;;  %v11712_v46 = vpack.c.bf16 %v7305_v9, %v7301_v5  ;;  %v11744_v2 = vpack.c.bf16 %v7307_v12, %v7303_v40  ;;  %v7335_v12 = vld [vmem:[#allocation6 + $0x810] sm:$0xff] }
0x2047   :  { %v11714_v21 = vpack.c.bf16 %v7304_v60, %v7300_v41  ;;  %v7337_v5 = vld [vmem:[#allocation6 + $0x820] sm:$0xff]  ;;  %v7342_v41 = vld [vmem:[#allocation6 + $0x848] sm:$0xff] }
0x2048   :  { %v15112_v58 = vadd.f32 %v7067_v25, %v7066_v26  ;;  %v7302_v25 = vld [vmem:[#allocation3 + $0x910] sm:$0xff]  ;;  %v7309_v26 = vld [vmem:[#allocation3 + $0x948] sm:$0xff]  ;;  %v15123_v40 = vpack.c.bf16 %v7337_v5, %v7333_v50  ;;  %v7376_v5 = vld [vmem:[#allocation6 + $0x958] sm:$0xff] }
0x2049   :  { %v11746_v54 = vpack.c.bf16 %v7306_v29, %v7302_v25  ;;  %v11716_v55 = vpack.c.bf16 %v7313_v16, %v7309_v26  ;;  %v7346_v60 = vld [vmem:[#allocation6 + $0x868] sm:$0xff]  ;;  %v7348_v25 = vld [vmem:[#allocation6 + $0x878] sm:$0xff]  ;;  %v7341_v29 = vld [vmem:[#allocation6 + $0x840] sm:$0xff] }
0x204a   :  { %12814 = vtanh.f32 %v15112_v58  ;;  %v7345_v26 = vld [vmem:[#allocation6 + $0x860] sm:$0xff]  ;;  %v7378_v50 = vld [vmem:[#allocation6 + $0x968] sm:$0xff] }
0x2054   :  { %v12815_v7 = vpop.eup %12814 }
0x2055   :  { %v7070_v18 = vmul.f32 %v12815_v7, %v12813_v39  ;;  %v7315_v39 = vld [vmem:[#allocation3 + $0x978] sm:$0xff]  ;;  %v7312_v7 = vld [vmem:[#allocation3 + $0x960] sm:$0xff] }
0x2056   :  { %v11748_v19 = vpack.c.bf16 %v7315_v39, %v7311_v63  ;;  %v15135_v63 = vpack.c.bf16 %v7345_v26, %v7341_v29  ;;  %v7343_v39 = vld [vmem:[#allocation6 + $0x850] sm:$0xff] }
0x2057   :  { %7071 = vst [vmem:[#allocation2 + $0x8] sm:$0x30] %v7070_v18  ;;  %v7073_v6 = vrot.slane %v7070_v18, 4  ;;  %v7314_v18 = vld [vmem:[#allocation3 + $0x970] sm:$0xff] }
0x2058   :  { %v7375_v29 = vld [vmem:[#allocation6 + $0x950] sm:$0xff] }
0x2059   :  { %7140 = vmatmul.mubr.f32.vlgmr.msra.gmra.mrb[78].mxu0 %v7073_v6  ;;  %7211 = vmatmul.mubr.f32.vlgmr.msra.gmra.mrb[78].mxu1 %v7073_v6  ;;  %v11718_v6 = vpack.c.bf16 %v7312_v7, %v7308_v31  ;;  %v7350_v31 = vld [vmem:[#allocation6 + $0x888] sm:$0xff]  ;;  %v7379_v26 = vld [vmem:[#allocation6 + $0x970] sm:$0xff] }
0x205a   :  { %11699 = vmatpush1.bf16.msra.mxu0 %v11698_v47  ;;  %11731 = vmatpush1.bf16.msra.mxu1 %v11730_v3  ;;  %v7317_v47 = vld [vmem:[#allocation3 + $0x988] sm:$0xff] }
0x205b   :  { %11701 = vmatprep.subr.bf16.mxu0 %v11700_v33  ;;  %11733 = vmatprep.subr.bf16.mxu1 %v11732_v35  ;;  %v7321_v3 = vld [vmem:[#allocation3 + $0x9a8] sm:$0xff]  ;;  %v11750_v33 = vpack.c.bf16 %v7314_v18, %v7310_v59  ;;  %v7316_v35 = vld [vmem:[#allocation3 + $0x980] sm:$0xff]  ;;  %v7356_v59 = vld [vmem:[#allocation6 + $0x8b8] sm:$0xff] }
0x205c   :  { %7484 = vmatprep.mubr.f32.mxu0 %v15645_v57  ;;  %7561 = vmatprep.mubr.f32.mxu1 %v15645_v57  ;;  %v11720_v22 = vpack.c.bf16 %v7321_v3, %v7317_v47  ;;  %v11722_v14 = vpack.c.bf16 %v7320_v34, %v7316_v35  ;;  %v7354_v7 = vld [vmem:[#allocation6 + $0x8a8] sm:$0xff]  ;;  %v7349_v18 = vld [vmem:[#allocation6 + $0x880] sm:$0xff] }
0x205d   :  { %v7353_v47 = vld [vmem:[#allocation6 + $0x8a0] sm:$0xff]  ;;  %v7358_v35 = vld [vmem:[#allocation6 + $0x8c8] sm:$0xff] }
0x205e   :  { %11703 = vmatpush1.bf16.msra.mxu0 %v11702_v44  ;;  %11735 = vmatpush1.bf16.msra.mxu1 %v11734_v1  ;;  %v7329_v44 = vld [vmem:[#allocation3 + $0x9e8] sm:$0xff]  ;;  %v7327_v1 = vld [vmem:[#allocation3 + $0x9d8] sm:$0xff]  ;;  %v15147_v53 = vpack.c.bf16 %v7353_v47, %v7349_v18  ;;  %v7381_v47 = vld [vmem:[#allocation6 + $0x980] sm:$0xff] }
0x205f   :  { %11705 = vmatprep.subr.bf16.mxu0 %v11704_v0  ;;  %11737 = vmatprep.subr.bf16.mxu1 %v11736_v8  ;;  %v11754_v0 = vpack.c.bf16 %v7322_v32, %v7318_v4  ;;  %v7324_v8 = vld [vmem:[#allocation3 + $0x9c0] sm:$0xff]  ;;  %v11724_v17 = vpack.c.bf16 %v7329_v44, %v7325_v49  ;;  %v11756_v61 = vpack.c.bf16 %v7331_v36, %v7327_v1  ;;  %v7362_v34 = vld [vmem:[#allocation6 + $0x8e8] sm:$0xff]  ;;  %v7364_v4 = vld [vmem:[#allocation6 + $0x8f8] sm:$0xff] }
0x2060   :  { %v11726_v27 = vpack.c.bf16 %v7328_v38, %v7324_v8  ;;  %v7357_v32 = vld [vmem:[#allocation6 + $0x8c0] sm:$0xff]  ;;  %v7359_v36 = vld [vmem:[#allocation6 + $0x8d0] sm:$0xff]  ;;  %v7366_v8 = vld [vmem:[#allocation6 + $0x908] sm:$0xff] }
0x2061   :  { %v7361_v49 = vld [vmem:[#allocation6 + $0x8e0] sm:$0xff] }
0x2062   :  { %11707 = vmatpush1.bf16.msra.mxu0 %v11706_v10  ;;  %11739 = vmatpush1.bf16.msra.mxu1 %v11738_v23  ;;  %v11758_v10 = vpack.c.bf16 %v7330_v56, %v7326_v15  ;;  %v7265_v23 = vld [vmem:[#allocation2] sm:$0xff]  ;;  %v15159_v1 = vpack.c.bf16 %v7361_v49, %v7357_v32  ;;  %v7372_v15 = vld [vmem:[#allocation6 + $0x938] sm:$0xff]  ;;  %v7365_v56 = vld [vmem:[#allocation6 + $0x900] sm:$0xff] }
0x2063   :  { %11709 = vmatprep.subr.bf16.mxu0 %v11708_v45  ;;  %11741 = vmatprep.subr.bf16.mxu1 %v11740_v24  ;;  %v7336_v45 = vld [vmem:[#allocation6 + $0x818] sm:$0xff]  ;;  %v15119_v24 = vpack.c.bf16 %v7338_v28, %v7334_v48  ;;  %v7367_v48 = vld [vmem:[#allocation6 + $0x910] sm:$0xff]  ;;  %v7394_v32 = vld [vmem:[#allocation6 + $0x9e8] sm:$0xff] }
0x2064   :  { %v15121_v9 = vpack.c.bf16 %v7340_v42, %v7336_v45  ;;  %v7371_v28 = vld [vmem:[#allocation6 + $0x930] sm:$0xff]  ;;  %v7374_v42 = vld [vmem:[#allocation6 + $0x948] sm:$0xff]  ;;  %v7392_v49 = vld [vmem:[#allocation6 + $0x9d8] sm:$0xff] }
0x2065   :  { %v15174_v45 = vpack.c.bf16 %v7371_v28, %v7367_v48 }
0x2066   :  { %11711 = vmatpush1.bf16.msra.mxu0 %v11710_v51  ;;  %11743 = vmatpush1.bf16.msra.mxu1 %v11742_v20  ;;  %v7339_v51 = vld [vmem:[#allocation6 + $0x830] sm:$0xff] }
0x2067   :  { %11713 = vmatprep.subr.bf16.mxu0 %v11712_v46  ;;  %11745 = vmatprep.subr.bf16.mxu1 %v11744_v2  ;;  %v15126_v20 = vpack.c.bf16 %v7339_v51, %v7335_v12  ;;  %v7344_v46 = vld [vmem:[#allocation6 + $0x858] sm:$0xff]  ;;  %v15131_v2 = vpack.c.bf16 %v7346_v60, %v7342_v41  ;;  %v15179_v12 = vpack.c.bf16 %v7378_v50, %v7374_v42  ;;  %v7373_v41 = vld [vmem:[#allocation6 + $0x940] sm:$0xff] }
0x2068   :  { %v15133_v16 = vpack.c.bf16 %v7348_v25, %v7344_v46  ;;  %v7380_v51 = vld [vmem:[#allocation6 + $0x978] sm:$0xff]  ;;  %v7377_v60 = vld [vmem:[#allocation6 + $0x960] sm:$0xff] }
0x2069   :  { %v15181_v46 = vpack.c.bf16 %v7380_v51, %v7376_v5  ;;  %v15183_v25 = vpack.c.bf16 %v7377_v60, %v7373_v41 }
0x206a   :  { %11715 = vmatpush1.bf16.msra.mxu0 %v11714_v21  ;;  %11747 = vmatpush1.bf16.msra.mxu1 %v11746_v54  ;;  %v7347_v21 = vld [vmem:[#allocation6 + $0x870] sm:$0xff] }
0x206b   :  { %11717 = vmatprep.subr.bf16.mxu0 %v11716_v55  ;;  %11749 = vmatprep.subr.bf16.mxu1 %v11748_v19  ;;  %v15138_v54 = vpack.c.bf16 %v7347_v21, %v7343_v39  ;;  %v7352_v55 = vld [vmem:[#allocation6 + $0x898] sm:$0xff]  ;;  %v15143_v19 = vpack.c.bf16 %v7354_v7, %v7350_v31  ;;  %v7382_v39 = vld [vmem:[#allocation6 + $0x988] sm:$0xff]  ;;  %v15186_v21 = vpack.c.bf16 %v7379_v26, %v7375_v29 }
0x206c   :  { %v15145_v3 = vpack.c.bf16 %v7356_v59, %v7352_v55  ;;  %v7386_v31 = vld [vmem:[#allocation6 + $0x9a8] sm:$0xff]  ;;  %v7384_v7 = vld [vmem:[#allocation6 + $0x998] sm:$0xff] }
0x206d   :  { %v7388_v55 = vld [vmem:[#allocation6 + $0x9b8] sm:$0xff]  ;;  %v15190_v59 = vpack.c.bf16 %v7386_v31, %v7382_v39 }
0x206e   :  { %11719 = vmatpush1.bf16.msra.mxu0 %v11718_v6  ;;  %11751 = vmatpush1.bf16.msra.mxu1 %v11750_v33  ;;  %v7355_v6 = vld [vmem:[#allocation6 + $0x8b0] sm:$0xff]  ;;  %v15192_v18 = vpack.c.bf16 %v7388_v55, %v7384_v7 }
0x206f   :  { %11721 = vmatprep.subr.bf16.mxu0 %v11720_v22  ;;  %11753 = vmatprep.subr.bf16.mxu1 %v11752_v37  ;;  %v15150_v33 = vpack.c.bf16 %v7355_v6, %v7351_v11  ;;  %v7360_v22 = vld [vmem:[#allocation6 + $0x8d8] sm:$0xff]  ;;  %v15155_v37 = vpack.c.bf16 %v7362_v34, %v7358_v35  ;;  %v7385_v11 = vld [vmem:[#allocation6 + $0x9a0] sm:$0xff]  ;;  %v7383_v6 = vld [vmem:[#allocation6 + $0x990] sm:$0xff] }
0x2070   :  { %v15157_v44 = vpack.c.bf16 %v7364_v4, %v7360_v22  ;;  %v15195_v35 = vpack.c.bf16 %v7385_v11, %v7381_v47  ;;  %v7387_v34 = vld [vmem:[#allocation6 + $0x9b0] sm:$0xff]  ;;  %v7390_v4 = vld [vmem:[#allocation6 + $0x9c8] sm:$0xff] }
0x2071   :  { %v15199_v22 = vpack.c.bf16 %v7387_v34, %v7383_v6 }
0x2072   :  { %11723 = vmatpush1.bf16.msra.mxu0 %v11722_v14  ;;  %11755 = vmatpush1.bf16.msra.mxu1 %v11754_v0  ;;  %v7363_v14 = vld [vmem:[#allocation6 + $0x8f0] sm:$0xff] }
0x2073   :  { %11725 = vmatprep.subr.bf16.mxu0 %v11724_v17  ;;  %11757 = vmatprep.subr.bf16.mxu1 %v11756_v61  ;;  %v15162_v0 = vpack.c.bf16 %v7363_v14, %v7359_v36  ;;  %v7370_v17 = vld [vmem:[#allocation6 + $0x928] sm:$0xff]  ;;  %v7368_v61 = vld [vmem:[#allocation6 + $0x918] sm:$0xff]  ;;  %v15203_v36 = vpack.c.bf16 %v7394_v32, %v7390_v4 }
0x2074   :  { %v15167_v38 = vpack.c.bf16 %v7370_v17, %v7366_v8  ;;  %v7396_v14 = vld [vmem:[#allocation6 + $0x9f8] sm:$0xff]  ;;  %v7389_v8 = vld [vmem:[#allocation6 + $0x9c0] sm:$0xff] }
0x2075   :  { %v7393_v17 = vld [vmem:[#allocation6 + $0x9e0] sm:$0xff] }
0x2076   :  { %11727 = vmatpush1.bf16.msra.mxu0 %v11726_v27  ;;  %11759 = vmatpush1.bf16.msra.mxu1 %v11758_v10  ;;  %v7369_v27 = vld [vmem:[#allocation6 + $0x920] sm:$0xff]  ;;  %v15169_v10 = vpack.c.bf16 %v7372_v15, %v7368_v61  ;;  %v15205_v61 = vpack.c.bf16 %v7396_v14, %v7392_v49  ;;  %v15207_v15 = vpack.c.bf16 %v7393_v17, %v7389_v8  ;;  %v7253_v14 = vrot.slane %v15112_v58, 6 }
0x2077   :  { %11761 = vmatprep.subr.bf16.mxu0 %v15119_v24  ;;  %11793 = vmatprep.subr.bf16.mxu1 %v15121_v9 }
0x2079   :  { %7485 = vmatmul.mubr.f32.vlgmr.msra.gmra.mrb[80].mxu0 %v7265_v23  ;;  %7562 = vmatmul.mubr.f32.vlgmr.msra.gmra.mrb[80].mxu1 %v7265_v23  ;;  %v15171_v23 = vpack.c.bf16 %v7369_v27, %v7365_v56  ;;  %v7391_v56 = vld [vmem:[#allocation6 + $0x9d0] sm:$0xff] }
0x207a   :  { %7490 = vmatprep.mubr.f32.mxu0 %v15645_v57  ;;  %7567 = vmatprep.mubr.f32.mxu1 %v15645_v57  ;;  %v7395_v27 = vld [vmem:[#allocation6 + $0x9f0] sm:$0xff] }
0x207b   :  { %11763 = vmatpush1.bf16.msra.mxu0 %v15123_v40  ;;  %11795 = vmatpush1.bf16.msra.mxu1 %v15126_v20  ;;  %v15210_v48 = vpack.c.bf16 %v7395_v27, %v7391_v56 }
0x207c   :  { %11765 = vmatprep.subr.bf16.mxu0 %v15131_v2  ;;  %11797 = vmatprep.subr.bf16.mxu1 %v15133_v16 }
0x207f   :  { %11767 = vmatpush1.bf16.msra.mxu0 %v15135_v63  ;;  %11799 = vmatpush1.bf16.msra.mxu1 %v15138_v54 }
0x2080   :  { %11769 = vmatprep.subr.bf16.mxu0 %v15143_v19  ;;  %11801 = vmatprep.subr.bf16.mxu1 %v15145_v3 }
0x2083   :  { %11771 = vmatpush1.bf16.msra.mxu0 %v15147_v53  ;;  %11803 = vmatpush1.bf16.msra.mxu1 %v15150_v33 }
0x2084   :  { %11773 = vmatprep.subr.bf16.mxu0 %v15155_v37  ;;  %11805 = vmatprep.subr.bf16.mxu1 %v15157_v44 }
0x2087   :  { %11775 = vmatpush1.bf16.msra.mxu0 %v15159_v1  ;;  %11807 = vmatpush1.bf16.msra.mxu1 %v15162_v0 }
0x2088   :  { %11777 = vmatprep.subr.bf16.mxu0 %v15167_v38  ;;  %11809 = vmatprep.subr.bf16.mxu1 %v15169_v10 }
0x208b   :  { %11779 = vmatpush1.bf16.msra.mxu0 %v15171_v23  ;;  %11811 = vmatpush1.bf16.msra.mxu1 %v15174_v45 }
0x208c   :  { %11781 = vmatprep.subr.bf16.mxu0 %v15179_v12  ;;  %11813 = vmatprep.subr.bf16.mxu1 %v15181_v46 }
0x208f   :  { %11783 = vmatpush1.bf16.msra.mxu0 %v15183_v25  ;;  %11815 = vmatpush1.bf16.msra.mxu1 %v15186_v21 }
0x2090   :  { %11785 = vmatprep.subr.bf16.mxu0 %v15190_v59  ;;  %11817 = vmatprep.subr.bf16.mxu1 %v15192_v18 }
0x2093   :  { %11787 = vmatpush1.bf16.msra.mxu0 %v15195_v35  ;;  %11819 = vmatpush1.bf16.msra.mxu1 %v15199_v22 }
0x2094   :  { %11789 = vmatprep.subr.bf16.mxu0 %v15203_v36  ;;  %11821 = vmatprep.subr.bf16.mxu1 %v15205_v61 }
0x2097   :  { %11791 = vmatpush1.bf16.msra.mxu0 %v15207_v15  ;;  %11823 = vmatpush1.bf16.msra.mxu1 %v15210_v48 }
0x2098   :  { %11825 = vmatprep.subr.bf16.mxu0 %v15119_v24  ;;  %11857 = vmatprep.subr.bf16.mxu1 %v15121_v9 }
0x212c   :  { %v7141_v28 = vpop.f32.mrb[78].mxu0  ;;  %v7212_v42 = vpop.f32.mrb[78].mxu1 }
0x212d   :  { %v7221_v50 = vrot.slane %v7141_v28, 2  ;;  %v7143_v5 = vpop.f32.mrb[79].mxu0  ;;  %v7214_v51 = vpop.f32.mrb[79].mxu1  ;;  %v7223_v55 = vrot.slane %v7212_v42, 2 }
0x212e   :  { %v7222_v41 = vrot.slane %v7143_v5, 2  ;;  %v7224_v31 = vrot.slane %v7214_v51, 2 }
0x212f   :  { %v7229_v60 = vadd.f32 %v7221_v50, %v15011_v43  ;;  %v7231_v11 = vadd.f32 %v7223_v55, %v15026_v52 }
0x2130   :  { %v7230_v29 = vadd.f32 %v7222_v41, %v15015_v13  ;;  %v7232_v7 = vadd.f32 %v7224_v31, %v15021_v62 }
0x2131   :  { %v9309_v26 = vmul.f32 -1.442695, %v7229_v60  ;;  %v9312_v60 = vld [vmem:[%s15624_s1 + $0x8] sm:$0x3] }
0x2132   :  { %v9310_v39 = vmul.f32 -1.442695, %v7230_v29  ;;  %v9311_v47 = vmul.f32 -1.442695, %v7232_v7  ;;  %v7398_v29 = vld [vmem:[#allocation8 + $0x10] sm:$0xf] }
0x2133   :  { %12816 = vpow2.f32 %v9309_v26  ;;  %v15266_v26 = vrot.slane %v7398_v29, %v13447_v30 }
0x2134   :  { %12818 = vpow2.f32 %v9310_v39  ;;  %v15652_v39 = vld [vmem:[#allocation21_spill] sm:$0xff] }
0x2135   :  { %12820 = vpow2.f32 %v9311_v47  ;;  %v15269_v31 = vrot.slane %v7398_v29, %v15652_v39 }
0x2136   :  { %12822 = vtanh.f32 %v7231_v11 }
0x213d   :  { %v12817_v6 = vpop.eup %12816 }
0x213e   :  { %v12819_v34 = vpop.eup %12818  ;;  %v7236_v4 = vadd.f32 1.0, %v12817_v6 }
0x213f   :  { %v7242_v32 = vadd.f32 1.0, %v12819_v34  ;;  %v12821_v43 = vpop.eup %12820 }
0x2140   :  { %12824 = vrcp.f32 %v7236_v4  ;;  %v12823_v13 = vpop.eup %12822  ;;  %v7249_v62 = vadd.f32 1.0, %v12821_v43 }
0x2141   :  { %12826 = vrcp.f32 %v7242_v32 }
0x2142   :  { %12828 = vrcp.f32 %v7249_v62 }
0x214a   :  { %v12825_v49 = vpop.eup %12824 }
0x214b   :  { %v12827_v8 = vpop.eup %12826  ;;  %v7256_v17 = vmul.f32 %v12825_v49, %v12823_v13  ;;  %v15653_v49 = vld [vmem:[#allocation23_spill] sm:$0xff] }
0x214c   :  { %v7255_v56 = vmul.f32 %v12827_v8, %v7253_v14  ;;  %v7486_v27 = vpop.f32.mrb[80].mxu0  ;;  %v15222_v28 = vpop.f32.mrb[80].mxu1  ;;  %v15287_v14 = vrot.slane %v7398_v29, %v15653_v49 }
0x214d   :  { %v7488_v52 = vpop.f32.mrb[81].mxu0  ;;  %v15224_v42 = vpop.f32.mrb[81].mxu1  ;;  %v15280_v6 = vadd.f32 %v7486_v27, %v15266_v26  ;;  %v15654_v27 = vld [vmem:[#allocation22_spill] sm:$0xff] }
0x214e   :  { %v7257_v50 = vadd.f32 %v7256_v17, %v7255_v56  ;;  %v12829_v5 = vpop.eup %12828  ;;  %v15283_v34 = vadd.f32 %v7488_v52, %v15269_v31  ;;  %v15292_v56 = vadd.f32 %v15224_v42, %v15287_v14  ;;  %v15295_v52 = vrot.slane %v7398_v29, %v15654_v27 }
0x2150   :  { %12830 = vtanh.f32 %v7257_v50  ;;  %7264 = vst [vmem:[#allocation15] sm:$0xc0] %v7257_v50 }
0x215a   :  { %v12831_v51 = vpop.eup %12830 }
0x215b   :  { %v7259_v41 = vmul.f32 %v12831_v51, %v12829_v5  ;;  %v15300_v5 = vadd.f32 %v15222_v28, %v15295_v52 }
0x215d   :  { %7260 = vst [vmem:[#allocation2 + $0x8] sm:$0xc0] %v7259_v41  ;;  %7262 = vst [vmem:[#allocation13] sm:$0xc0] %v7259_v41 }
0x2164   :  { %v7266_v58 = vld [vmem:[#allocation2 + $0x8] sm:$0xff] }
0x2165   :  { %7491 = vmatmul.mubr.f32.gmra.mrb[82].mxu0 %v7266_v58  ;;  %7568 = vmatmul.mubr.f32.gmra.mrb[82].mxu1 %v7266_v58 }
0x2166   :  { %7642 = vmatprep.mubr.f32.mxu0 %v15645_v57  ;;  %7713 = vmatprep.mubr.f32.mxu1 %v15645_v57 }
0x2169   :  { %7643 = vmatmul.mubr.f32.vlgmr.msra.gmra.mrb[84].mxu0 %v9312_v60  ;;  %7714 = vmatmul.mubr.f32.vlgmr.msra.gmra.mrb[84].mxu1 %v9312_v60 }
0x216a   :  { %11827 = vmatpush1.bf16.msra.mxu0 %v15123_v40  ;;  %11859 = vmatpush1.bf16.msra.mxu1 %v15126_v20 }
0x216b   :  { %11829 = vmatprep.subr.bf16.mxu0 %v15131_v2  ;;  %11861 = vmatprep.subr.bf16.mxu1 %v15133_v16 }
0x216c   :  { %7813 = vmatprep.mubr.f32.mxu0 %v15645_v57  ;;  %7884 = vmatprep.mubr.f32.mxu1 %v15645_v57 }
0x216e   :  { %11831 = vmatpush1.bf16.msra.mxu0 %v15135_v63  ;;  %11863 = vmatpush1.bf16.msra.mxu1 %v15138_v54 }
0x216f   :  { %11833 = vmatprep.subr.bf16.mxu0 %v15143_v19  ;;  %11865 = vmatprep.subr.bf16.mxu1 %v15145_v3 }
0x2172   :  { %11835 = vmatpush1.bf16.msra.mxu0 %v15147_v53  ;;  %11867 = vmatpush1.bf16.msra.mxu1 %v15150_v33 }
0x2173   :  { %11837 = vmatprep.subr.bf16.mxu0 %v15155_v37  ;;  %11869 = vmatprep.subr.bf16.mxu1 %v15157_v44 }
0x2176   :  { %11839 = vmatpush1.bf16.msra.mxu0 %v15159_v1  ;;  %11871 = vmatpush1.bf16.msra.mxu1 %v15162_v0 }
0x2177   :  { %11841 = vmatprep.subr.bf16.mxu0 %v15167_v38  ;;  %11873 = vmatprep.subr.bf16.mxu1 %v15169_v10 }
0x217a   :  { %11843 = vmatpush1.bf16.msra.mxu0 %v15171_v23  ;;  %11875 = vmatpush1.bf16.msra.mxu1 %v15174_v45 }
0x217b   :  { %11845 = vmatprep.subr.bf16.mxu0 %v15179_v12  ;;  %11877 = vmatprep.subr.bf16.mxu1 %v15181_v46 }
0x217e   :  { %11847 = vmatpush1.bf16.msra.mxu0 %v15183_v25  ;;  %11879 = vmatpush1.bf16.msra.mxu1 %v15186_v21 }
0x217f   :  { %11849 = vmatprep.subr.bf16.mxu0 %v15190_v59  ;;  %11881 = vmatprep.subr.bf16.mxu1 %v15192_v18 }
0x2182   :  { %11851 = vmatpush1.bf16.msra.mxu0 %v15195_v35  ;;  %11883 = vmatpush1.bf16.msra.mxu1 %v15199_v22 }
0x2183   :  { %11853 = vmatprep.subr.bf16.mxu0 %v15203_v36  ;;  %11885 = vmatprep.subr.bf16.mxu1 %v15205_v61 }
0x2186   :  { %11855 = vmatpush1.bf16.msra.mxu0 %v15207_v15  ;;  %11887 = vmatpush1.bf16.msra.mxu1 %v15210_v48 }
0x2187   :  { %11889 = vmatprep.subr.bf16.mxu0 %v15119_v24  ;;  %11921 = vmatprep.subr.bf16.mxu1 %v15121_v9 }
0x2238   :  { %v15271_v7 = vpop.f32.mrb[82].mxu0  ;;  %v15273_v55 = vpop.f32.mrb[82].mxu1 }
0x2239   :  { %v15275_v47 = vpop.f32.mrb[83].mxu0  ;;  %v15277_v11 = vpop.f32.mrb[83].mxu1 }
0x223c   :  { %v7644_v4 = vpop.f32.mrb[84].mxu0  ;;  %v7715_v30 = vpop.f32.mrb[84].mxu1 }
0x223d   :  { %v7720_v32 = vadd.f32 %v7644_v4, %v15280_v6  ;;  %v7646_v43 = vpop.f32.mrb[85].mxu0  ;;  %v7717_v13 = vpop.f32.mrb[85].mxu1  ;;  %v7722_v41 = vadd.f32 %v7715_v30, %v15300_v5 }
0x223e   :  { %v7721_v8 = vadd.f32 %v7646_v43, %v15283_v34  ;;  %v7723_v50 = vadd.f32 %v7717_v13, %v15292_v56 }
0x223f   :  { %v9314_v17 = vmul.f32 -1.442695, %v7720_v32  ;;  %v9313_v32 = vld [vmem:[%s15625_s2 + $0x8] sm:$0x3]  ;;  %s13158_s2 = smov [#allocation13]  }
0x2240   :  { %v9315_v62 = vmul.f32 -1.442695, %v7721_v8  ;;  %v9316_v51 = vmul.f32 -1.442695, %v7723_v50  ;;  %s9177_s7 = sshll.u32 %s13158_s2, 4  ;;  %s9178_s7 = int_to_ptr.vmem [resolvable:$true] %s9177_s7 }
0x2241   :  { %12832 = vpow2.f32 %v9314_v17  ;;  %s13070_s21 = scalar_lea.vmem %s9178_s7, 160  ;;  %p13075_p13 = scmp.lt.s32.totalorder %s9178_s7, %s9178_s7 }
0x2242   :  { %12834 = vpow2.f32 %v9315_v62  ;;  %p13071_p12 = scmp.ne.s32.totalorder %s9178_s7, %s13070_s21  ;;  %p13076_p0 = scmp.lt.s32.totalorder %s13070_s21, %s13070_s21 }
0x2243   :  { %12836 = vpow2.f32 %v9316_v51 }
0x2244   :  { %12838 = vtanh.f32 %v7722_v41  ;;  %p13077_p1 = por %p13076_p0, %p13075_p13 }
0x2246   :  { %p13078_p2 = pnand %p13077_p1, %p13071_p12 }
0x224b   :  { %v12833_v58 = vpop.eup %12832 }
0x224c   :  { %v12835_v60 = vpop.eup %12834  ;;  %v7727_v39 = vadd.f32 1.0, %v12833_v58 }
0x224d   :  { %v7733_v42 = vadd.f32 1.0, %v12835_v60  ;;  %v12837_v4 = vpop.eup %12836 }
0x224e   :  { %12840 = vrcp.f32 %v7727_v39  ;;  %v12839_v29 = vpop.eup %12838  ;;  %v7740_v49 = vadd.f32 1.0, %v12837_v4 }
0x224f   :  { %12842 = vrcp.f32 %v7733_v42 }
0x2250   :  { %12844 = vrcp.f32 %v7740_v49 }
0x2258   :  { %v12841_v43 = vpop.eup %12840 }
0x2259   :  { %v12843_v28 = vpop.eup %12842  ;;  %v7744_v13 = vmul.f32 %v12841_v43, %v12839_v29 }
0x225a   :  { %v7743_v8 = vmul.f32 %v12843_v28, %v9313_v32  ;;  %v12845_v17 = vpop.eup %12844 }
0x225c   :  { %v15306_v30 = vadd.f32 %v7744_v13, %v7743_v8 }
0x225e   :  { %12846 = vtanh.f32 %v15306_v30 }
0x2268   :  { %v12847_v62 = vpop.eup %12846 }
0x2269   :  { %v7747_v27 = vmul.f32 %v12847_v62, %v12845_v17 }
0x226b   :  { %7748 = vst [vmem:[#allocation2] sm:$0x3] %v7747_v27  ;;  %7814 = vmatmul.mubr.f32.vlgmr.msra.gmra.mrb[86].mxu0 %v7747_v27  ;;  %7885 = vmatmul.mubr.f32.vlgmr.msra.gmra.mrb[86].mxu1 %v7747_v27 }
0x226c   :  { %11891 = vmatpush1.bf16.msra.mxu0 %v15123_v40  ;;  %11923 = vmatpush1.bf16.msra.mxu1 %v15126_v20 }
0x226d   :  { %11893 = vmatprep.subr.bf16.mxu0 %v15131_v2  ;;  %11925 = vmatprep.subr.bf16.mxu1 %v15133_v16 }
0x226e   :  { %8002 = vmatprep.mubr.f32.mxu0 %v15645_v57  ;;  %8073 = vmatprep.mubr.f32.mxu1 %v15645_v57 }
0x2270   :  { %11895 = vmatpush1.bf16.msra.mxu0 %v15135_v63  ;;  %11927 = vmatpush1.bf16.msra.mxu1 %v15138_v54 }
0x2271   :  { %11897 = vmatprep.subr.bf16.mxu0 %v15143_v19  ;;  %11929 = vmatprep.subr.bf16.mxu1 %v15145_v3 }
0x2274   :  { %11899 = vmatpush1.bf16.msra.mxu0 %v15147_v53  ;;  %11931 = vmatpush1.bf16.msra.mxu1 %v15150_v33 }
0x2275   :  { %11901 = vmatprep.subr.bf16.mxu0 %v15155_v37  ;;  %11933 = vmatprep.subr.bf16.mxu1 %v15157_v44 }
0x2278   :  { %11903 = vmatpush1.bf16.msra.mxu0 %v15159_v1  ;;  %11935 = vmatpush1.bf16.msra.mxu1 %v15162_v0 }
0x2279   :  { %11905 = vmatprep.subr.bf16.mxu0 %v15167_v38  ;;  %11937 = vmatprep.subr.bf16.mxu1 %v15169_v10 }
0x227c   :  { %11907 = vmatpush1.bf16.msra.mxu0 %v15171_v23  ;;  %11939 = vmatpush1.bf16.msra.mxu1 %v15174_v45 }
0x227d   :  { %11909 = vmatprep.subr.bf16.mxu0 %v15179_v12  ;;  %11941 = vmatprep.subr.bf16.mxu1 %v15181_v46 }
0x2280   :  { %11911 = vmatpush1.bf16.msra.mxu0 %v15183_v25  ;;  %11943 = vmatpush1.bf16.msra.mxu1 %v15186_v21 }
0x2281   :  { %11913 = vmatprep.subr.bf16.mxu0 %v15190_v59  ;;  %11945 = vmatprep.subr.bf16.mxu1 %v15192_v18 }
0x2284   :  { %11915 = vmatpush1.bf16.msra.mxu0 %v15195_v35  ;;  %11947 = vmatpush1.bf16.msra.mxu1 %v15199_v22 }
0x2285   :  { %11917 = vmatprep.subr.bf16.mxu0 %v15203_v36  ;;  %11949 = vmatprep.subr.bf16.mxu1 %v15205_v61 }
0x2288   :  { %11919 = vmatpush1.bf16.msra.mxu0 %v15207_v15  ;;  %11951 = vmatpush1.bf16.msra.mxu1 %v15210_v48 }
0x2289   :  { %11953 = vmatprep.subr.bf16.mxu0 %v15119_v24  ;;  %11985 = vmatprep.subr.bf16.mxu1 %v15121_v9 }
0x233e   :  { %v7815_v50 = vpop.f32.mrb[86].mxu0  ;;  %v7886_v51 = vpop.f32.mrb[86].mxu1 }
0x233f   :  { %v7895_v41 = vrot.slane %v7815_v50, 6  ;;  %v7817_v58 = vpop.f32.mrb[87].mxu0  ;;  %v7888_v60 = vpop.f32.mrb[87].mxu1  ;;  %v7897_v13 = vrot.slane %v7886_v51, 6 }
0x2340   :  { %v7896_v39 = vrot.slane %v7817_v58, 6  ;;  %v7898_v43 = vrot.slane %v7888_v60, 6  ;;  %v7927_v60 = vrot.slane %v15306_v30, 6 }
0x2341   :  { %v7903_v42 = vadd.f32 %v7895_v41, %v15280_v6  ;;  %v7905_v8 = vadd.f32 %v7897_v13, %v15300_v5 }
0x2342   :  { %v7904_v4 = vadd.f32 %v7896_v39, %v15283_v34  ;;  %v7906_v28 = vadd.f32 %v7898_v43, %v15292_v56 }
0x2343   :  { %v9317_v29 = vmul.f32 -1.442695, %v7903_v42 }
0x2344   :  { %v9318_v32 = vmul.f32 -1.442695, %v7904_v4  ;;  %v9319_v49 = vmul.f32 -1.442695, %v7906_v28 }
0x2345   :  { %12848 = vpow2.f32 %v9317_v29 }
0x2346   :  { %12850 = vpow2.f32 %v9318_v32 }
0x2347   :  { %12852 = vpow2.f32 %v9319_v49 }
0x2348   :  { %12854 = vtanh.f32 %v7905_v8 }
0x234f   :  { %v12849_v17 = vpop.eup %12848 }
0x2350   :  { %v12851_v62 = vpop.eup %12850  ;;  %v7910_v27 = vadd.f32 1.0, %v12849_v17 }
0x2351   :  { %v7916_v50 = vadd.f32 1.0, %v12851_v62  ;;  %v12853_v41 = vpop.eup %12852 }
0x2352   :  { %12856 = vrcp.f32 %v7910_v27  ;;  %v12855_v58 = vpop.eup %12854  ;;  %v7923_v29 = vadd.f32 1.0, %v12853_v41 }
0x2353   :  { %12858 = vrcp.f32 %v7916_v50 }
0x2354   :  { %12860 = vrcp.f32 %v7923_v29 }
0x235c   :  { %v12857_v39 = vpop.eup %12856 }
0x235d   :  { %v12859_v42 = vpop.eup %12858  ;;  %v7930_v4 = vmul.f32 %v12857_v39, %v12855_v58 }
0x235e   :  { %v7929_v51 = vmul.f32 %v12859_v42, %v7927_v60  ;;  %v12861_v43 = vpop.eup %12860 }
0x2360   :  { %v15348_v32 = vadd.f32 %v7930_v4, %v7929_v51 }
0x2362   :  { %12862 = vtanh.f32 %v15348_v32 }
0x236c   :  { %v12863_v28 = vpop.eup %12862 }
0x236d   :  { %v7933_v13 = vmul.f32 %v12863_v28, %v12861_v43 }
0x236f   :  { %v7936_v49 = vrot.slane %v7933_v13, 2  ;;  %7934 = vst [vmem:[#allocation2] sm:$0xc] %v7933_v13 }
0x2371   :  { %8003 = vmatmul.mubr.f32.vlgmr.msra.gmra.mrb[88].mxu0 %v7936_v49  ;;  %8074 = vmatmul.mubr.f32.vlgmr.msra.gmra.mrb[88].mxu1 %v7936_v49 }
0x2372   :  { %11955 = vmatpush1.bf16.msra.mxu0 %v15123_v40  ;;  %11987 = vmatpush1.bf16.msra.mxu1 %v15126_v20 }
0x2373   :  { %11957 = vmatprep.subr.bf16.mxu0 %v15131_v2  ;;  %11989 = vmatprep.subr.bf16.mxu1 %v15133_v16 }
0x2374   :  { %8191 = vmatprep.mubr.f32.mxu0 %v15645_v57  ;;  %8262 = vmatprep.mubr.f32.mxu1 %v15645_v57 }
0x2376   :  { %11959 = vmatpush1.bf16.msra.mxu0 %v15135_v63  ;;  %11991 = vmatpush1.bf16.msra.mxu1 %v15138_v54 }
0x2377   :  { %11961 = vmatprep.subr.bf16.mxu0 %v15143_v19  ;;  %11993 = vmatprep.subr.bf16.mxu1 %v15145_v3 }
0x237a   :  { %11963 = vmatpush1.bf16.msra.mxu0 %v15147_v53  ;;  %11995 = vmatpush1.bf16.msra.mxu1 %v15150_v33 }
0x237b   :  { %11965 = vmatprep.subr.bf16.mxu0 %v15155_v37  ;;  %11997 = vmatprep.subr.bf16.mxu1 %v15157_v44 }
0x237e   :  { %11967 = vmatpush1.bf16.msra.mxu0 %v15159_v1  ;;  %11999 = vmatpush1.bf16.msra.mxu1 %v15162_v0 }
0x237f   :  { %11969 = vmatprep.subr.bf16.mxu0 %v15167_v38  ;;  %12001 = vmatprep.subr.bf16.mxu1 %v15169_v10 }
0x2382   :  { %11971 = vmatpush1.bf16.msra.mxu0 %v15171_v23  ;;  %12003 = vmatpush1.bf16.msra.mxu1 %v15174_v45 }
0x2383   :  { %11973 = vmatprep.subr.bf16.mxu0 %v15179_v12  ;;  %12005 = vmatprep.subr.bf16.mxu1 %v15181_v46 }
0x2386   :  { %11975 = vmatpush1.bf16.msra.mxu0 %v15183_v25  ;;  %12007 = vmatpush1.bf16.msra.mxu1 %v15186_v21 }
0x2387   :  { %11977 = vmatprep.subr.bf16.mxu0 %v15190_v59  ;;  %12009 = vmatprep.subr.bf16.mxu1 %v15192_v18 }
0x238a   :  { %11979 = vmatpush1.bf16.msra.mxu0 %v15195_v35  ;;  %12011 = vmatpush1.bf16.msra.mxu1 %v15199_v22 }
0x238b   :  { %11981 = vmatprep.subr.bf16.mxu0 %v15203_v36  ;;  %12013 = vmatprep.subr.bf16.mxu1 %v15205_v61 }
0x238e   :  { %11983 = vmatpush1.bf16.msra.mxu0 %v15207_v15  ;;  %12015 = vmatpush1.bf16.msra.mxu1 %v15210_v48 }
0x238f   :  { %12017 = vmatprep.subr.bf16.mxu0 %v15119_v24  ;;  %12049 = vmatprep.subr.bf16.mxu1 %v15121_v9 }
0x2444   :  { %v8004_v30 = vpop.f32.mrb[88].mxu0  ;;  %v8075_v8 = vpop.f32.mrb[88].mxu1 }
0x2445   :  { %v8084_v17 = vrot.slane %v8004_v30, 4  ;;  %v8006_v62 = vpop.f32.mrb[89].mxu0  ;;  %v8077_v27 = vpop.f32.mrb[89].mxu1  ;;  %v8086_v29 = vrot.slane %v8075_v8, 4 }
0x2446   :  { %v8085_v50 = vrot.slane %v8006_v62, 4  ;;  %v8087_v42 = vrot.slane %v8077_v27, 4  ;;  %v8116_v27 = vrot.slane %v15348_v32, 6 }
0x2447   :  { %v8092_v41 = vadd.f32 %v8084_v17, %v15280_v6  ;;  %v8094_v43 = vadd.f32 %v8086_v29, %v15300_v5 }
0x2448   :  { %v8093_v58 = vadd.f32 %v8085_v50, %v15283_v34  ;;  %v8095_v4 = vadd.f32 %v8087_v42, %v15292_v56 }
0x2449   :  { %v9320_v39 = vmul.f32 -1.442695, %v8092_v41 }
0x244a   :  { %v9321_v60 = vmul.f32 -1.442695, %v8093_v58  ;;  %v9322_v51 = vmul.f32 -1.442695, %v8095_v4 }
0x244b   :  { %12864 = vpow2.f32 %v9320_v39 }
0x244c   :  { %12866 = vpow2.f32 %v9321_v60 }
0x244d   :  { %12868 = vpow2.f32 %v9322_v51 }
0x244e   :  { %12870 = vtanh.f32 %v8094_v43 }
0x2455   :  { %v12865_v28 = vpop.eup %12864 }
0x2456   :  { %v12867_v13 = vpop.eup %12866  ;;  %v8099_v49 = vadd.f32 1.0, %v12865_v28 }
0x2457   :  { %v8105_v30 = vadd.f32 1.0, %v12867_v13  ;;  %v12869_v17 = vpop.eup %12868 }
0x2458   :  { %12872 = vrcp.f32 %v8099_v49  ;;  %v12871_v62 = vpop.eup %12870  ;;  %v8112_v39 = vadd.f32 1.0, %v12869_v17 }
0x2459   :  { %12874 = vrcp.f32 %v8105_v30 }
0x245a   :  { %12876 = vrcp.f32 %v8112_v39 }
0x2462   :  { %v12873_v50 = vpop.eup %12872 }
0x2463   :  { %v12875_v41 = vpop.eup %12874  ;;  %v8119_v58 = vmul.f32 %v12873_v50, %v12871_v62 }
0x2464   :  { %v8118_v8 = vmul.f32 %v12875_v41, %v8116_v27  ;;  %v12877_v42 = vpop.eup %12876 }
0x2466   :  { %v15390_v60 = vadd.f32 %v8119_v58, %v8118_v8 }
0x2468   :  { %12878 = vtanh.f32 %v15390_v60 }
0x2472   :  { %v12879_v4 = vpop.eup %12878 }
0x2473   :  { %v8122_v29 = vmul.f32 %v12879_v4, %v12877_v42 }
0x2475   :  { %v8125_v51 = vrot.slane %v8122_v29, 4  ;;  %8123 = vst [vmem:[#allocation2] sm:$0x30] %v8122_v29 }
0x2477   :  { %8192 = vmatmul.mubr.f32.vlgmr.msra.gmra.mrb[90].mxu0 %v8125_v51  ;;  %8263 = vmatmul.mubr.f32.vlgmr.msra.gmra.mrb[90].mxu1 %v8125_v51 }
0x2478   :  { %12019 = vmatpush1.bf16.msra.mxu0 %v15123_v40  ;;  %12051 = vmatpush1.bf16.msra.mxu1 %v15126_v20 }
0x2479   :  { %12021 = vmatprep.subr.bf16.mxu0 %v15131_v2  ;;  %12053 = vmatprep.subr.bf16.mxu1 %v15133_v16 }
0x247a   :  { %8380 = vmatprep.mubr.f32.mxu0 %v15645_v57  ;;  %8451 = vmatprep.mubr.f32.mxu1 %v15645_v57 }
0x247c   :  { %12023 = vmatpush1.bf16.msra.mxu0 %v15135_v63  ;;  %12055 = vmatpush1.bf16.msra.mxu1 %v15138_v54 }
0x247d   :  { %12025 = vmatprep.subr.bf16.mxu0 %v15143_v19  ;;  %12057 = vmatprep.subr.bf16.mxu1 %v15145_v3 }
0x2480   :  { %12027 = vmatpush1.bf16.msra.mxu0 %v15147_v53  ;;  %12059 = vmatpush1.bf16.msra.mxu1 %v15150_v33 }
0x2481   :  { %12029 = vmatprep.subr.bf16.mxu0 %v15155_v37  ;;  %12061 = vmatprep.subr.bf16.mxu1 %v15157_v44 }
0x2484   :  { %12031 = vmatpush1.bf16.msra.mxu0 %v15159_v1  ;;  %12063 = vmatpush1.bf16.msra.mxu1 %v15162_v0 }
0x2485   :  { %12033 = vmatprep.subr.bf16.mxu0 %v15167_v38  ;;  %12065 = vmatprep.subr.bf16.mxu1 %v15169_v10 }
0x2488   :  { %12035 = vmatpush1.bf16.msra.mxu0 %v15171_v23  ;;  %12067 = vmatpush1.bf16.msra.mxu1 %v15174_v45 }
0x2489   :  { %12037 = vmatprep.subr.bf16.mxu0 %v15179_v12  ;;  %12069 = vmatprep.subr.bf16.mxu1 %v15181_v46 }
0x248c   :  { %12039 = vmatpush1.bf16.msra.mxu0 %v15183_v25  ;;  %12071 = vmatpush1.bf16.msra.mxu1 %v15186_v21 }
0x248d   :  { %12041 = vmatprep.subr.bf16.mxu0 %v15190_v59  ;;  %12073 = vmatprep.subr.bf16.mxu1 %v15192_v18 }
0x2490   :  { %12043 = vmatpush1.bf16.msra.mxu0 %v15195_v35  ;;  %12075 = vmatpush1.bf16.msra.mxu1 %v15199_v22 }
0x2491   :  { %12045 = vmatprep.subr.bf16.mxu0 %v15203_v36  ;;  %12077 = vmatprep.subr.bf16.mxu1 %v15205_v61 }
0x2494   :  { %12047 = vmatpush1.bf16.msra.mxu0 %v15207_v15  ;;  %12079 = vmatpush1.bf16.msra.mxu1 %v15210_v48 }
0x2495   :  { %12081 = vmatprep.subr.bf16.mxu0 %v15119_v24  ;;  %12113 = vmatprep.subr.bf16.mxu1 %v15121_v9 }
0x254a   :  { %v8193_v32 = vpop.f32.mrb[90].mxu0  ;;  %v8264_v43 = vpop.f32.mrb[90].mxu1 }
0x254b   :  { %v8273_v28 = vrot.slane %v8193_v32, 2  ;;  %v8195_v13 = vpop.f32.mrb[91].mxu0  ;;  %v8266_v49 = vpop.f32.mrb[91].mxu1  ;;  %v8275_v39 = vrot.slane %v8264_v43, 2 }
0x254c   :  { %v8274_v30 = vrot.slane %v8195_v13, 2  ;;  %v8276_v41 = vrot.slane %v8266_v49, 2  ;;  %v8305_v13 = vrot.slane %v15390_v60, 6  ;;  %v15471_v60 = vadd.f32 %v15271_v7, %v15266_v26 }
0x254d   :  { %v8281_v17 = vadd.f32 %v8273_v28, %v15280_v6  ;;  %v8283_v42 = vadd.f32 %v8275_v39, %v15300_v5 }
0x254e   :  { %v8282_v62 = vadd.f32 %v8274_v30, %v15283_v34  ;;  %v8284_v58 = vadd.f32 %v8276_v41, %v15292_v56  ;;  %v15475_v41 = vadd.f32 %v15275_v47, %v15269_v31  ;;  %v15486_v31 = vadd.f32 %v15273_v55, %v15295_v52 }
0x254f   :  { %v9323_v50 = vmul.f32 -1.442695, %v8281_v17 }
0x2550   :  { %v9324_v27 = vmul.f32 -1.442695, %v8282_v62  ;;  %v9325_v8 = vmul.f32 -1.442695, %v8284_v58 }
0x2551   :  { %12880 = vpow2.f32 %v9323_v50 }
0x2552   :  { %12882 = vpow2.f32 %v9324_v27 }
0x2553   :  { %12884 = vpow2.f32 %v9325_v8 }
0x2554   :  { %12886 = vtanh.f32 %v8283_v42 }
0x255b   :  { %v12881_v4 = vpop.eup %12880 }
0x255c   :  { %v12883_v29 = vpop.eup %12882  ;;  %v8288_v51 = vadd.f32 1.0, %v12881_v4 }
0x255d   :  { %v8294_v32 = vadd.f32 1.0, %v12883_v29  ;;  %v12885_v6 = vpop.eup %12884 }
0x255e   :  { %12888 = vrcp.f32 %v8288_v51  ;;  %v12887_v34 = vpop.eup %12886  ;;  %v8301_v56 = vadd.f32 1.0, %v12885_v6  ;;  %v15481_v6 = vadd.f32 %v15277_v11, %v15287_v14 }
0x255f   :  { %12890 = vrcp.f32 %v8294_v32 }
0x2560   :  { %12892 = vrcp.f32 %v8301_v56 }
0x2568   :  { %v12889_v28 = vpop.eup %12888 }
0x2569   :  { %v12891_v49 = vpop.eup %12890  ;;  %v8308_v30 = vmul.f32 %v12889_v28, %v12887_v34 }
0x256a   :  { %v8307_v43 = vmul.f32 %v12891_v49, %v8305_v13  ;;  %v12893_v5 = vpop.eup %12892 }
0x256c   :  { %v15432_v17 = vadd.f32 %v8308_v30, %v8307_v43 }
0x256e   :  { %12894 = vtanh.f32 %v15432_v17  ;;  %v8482_v56 = vrot.slane %v15432_v17, 6 }
0x2578   :  { %v12895_v62 = vpop.eup %12894 }
0x2579   :  { %v8311_v50 = vmul.f32 %v12895_v62, %v12893_v5 }
0x257b   :  { %v8314_v27 = vrot.slane %v8311_v50, 6  ;;  %8312 = vst [vmem:[#allocation2] sm:$0xc0] %v8311_v50 }
0x257d   :  { %8381 = vmatmul.mubr.f32.vlgmr.msra.gmra.mrb[92].mxu0 %v8314_v27  ;;  %8452 = vmatmul.mubr.f32.vlgmr.msra.gmra.mrb[92].mxu1 %v8314_v27 }
0x257e   :  { %12083 = vmatpush1.bf16.msra.mxu0 %v15123_v40  ;;  %12115 = vmatpush1.bf16.msra.mxu1 %v15126_v20 }
0x257f   :  { %12085 = vmatprep.subr.bf16.mxu0 %v15131_v2  ;;  %12117 = vmatprep.subr.bf16.mxu1 %v15133_v16 }
0x2580   :  { %8554 = vmatprep.mubr.f32.mxu0 %v15645_v57  ;;  %8625 = vmatprep.mubr.f32.mxu1 %v15645_v57 }
0x2582   :  { %12087 = vmatpush1.bf16.msra.mxu0 %v15135_v63  ;;  %12119 = vmatpush1.bf16.msra.mxu1 %v15138_v54 }
0x2583   :  { %12089 = vmatprep.subr.bf16.mxu0 %v15143_v19  ;;  %12121 = vmatprep.subr.bf16.mxu1 %v15145_v3 }
0x2586   :  { %12091 = vmatpush1.bf16.msra.mxu0 %v15147_v53  ;;  %12123 = vmatpush1.bf16.msra.mxu1 %v15150_v33 }
0x2587   :  { %12093 = vmatprep.subr.bf16.mxu0 %v15155_v37  ;;  %12125 = vmatprep.subr.bf16.mxu1 %v15157_v44 }
0x258a   :  { %12095 = vmatpush1.bf16.msra.mxu0 %v15159_v1  ;;  %12127 = vmatpush1.bf16.msra.mxu1 %v15162_v0 }
0x258b   :  { %12097 = vmatprep.subr.bf16.mxu0 %v15167_v38  ;;  %12129 = vmatprep.subr.bf16.mxu1 %v15169_v10 }
0x258e   :  { %12099 = vmatpush1.bf16.msra.mxu0 %v15171_v23  ;;  %12131 = vmatpush1.bf16.msra.mxu1 %v15174_v45 }
0x258f   :  { %12101 = vmatprep.subr.bf16.mxu0 %v15179_v12  ;;  %12133 = vmatprep.subr.bf16.mxu1 %v15181_v46 }
0x2592   :  { %12103 = vmatpush1.bf16.msra.mxu0 %v15183_v25  ;;  %12135 = vmatpush1.bf16.msra.mxu1 %v15186_v21 }
0x2593   :  { %12105 = vmatprep.subr.bf16.mxu0 %v15190_v59  ;;  %12137 = vmatprep.subr.bf16.mxu1 %v15192_v18 }
0x2596   :  { %12107 = vmatpush1.bf16.msra.mxu0 %v15195_v35  ;;  %12139 = vmatpush1.bf16.msra.mxu1 %v15199_v22 }
0x2597   :  { %12109 = vmatprep.subr.bf16.mxu0 %v15203_v36  ;;  %12141 = vmatprep.subr.bf16.mxu1 %v15205_v61 }
0x259a   :  { %12111 = vmatpush1.bf16.msra.mxu0 %v15207_v15  ;;  %12143 = vmatpush1.bf16.msra.mxu1 %v15210_v48 }
0x259b   :  { %12145 = vmatprep.subr.bf16.mxu0 %v15119_v24  ;;  %12177 = vmatprep.subr.bf16.mxu1 %v15121_v9 }
0x2650   :  { %v8382_v58 = vpop.f32.mrb[92].mxu0  ;;  %v8453_v39 = vpop.f32.mrb[92].mxu1 }
0x2651   :  { %v8458_v8 = vadd.f32 %v8382_v58, %v15471_v60  ;;  %v8384_v42 = vpop.f32.mrb[93].mxu0  ;;  %v8455_v4 = vpop.f32.mrb[93].mxu1  ;;  %v8460_v47 = vadd.f32 %v8453_v39, %v15486_v31 }
0x2652   :  { %v8459_v29 = vadd.f32 %v8384_v42, %v15475_v41  ;;  %v8461_v26 = vadd.f32 %v8455_v4, %v15481_v6 }
0x2653   :  { %v9326_v51 = vmul.f32 -1.442695, %v8458_v8 }
0x2654   :  { %v9327_v32 = vmul.f32 -1.442695, %v8459_v29  ;;  %v9328_v7 = vmul.f32 -1.442695, %v8461_v26 }
0x2655   :  { %12896 = vpow2.f32 %v9326_v51 }
0x2656   :  { %12898 = vpow2.f32 %v9327_v32 }
0x2657   :  { %12900 = vpow2.f32 %v9328_v7 }
0x2658   :  { %12902 = vtanh.f32 %v8460_v47 }
0x265f   :  { %v12897_v34 = vpop.eup %12896 }
0x2660   :  { %v12899_v28 = vpop.eup %12898  ;;  %v8465_v13 = vadd.f32 1.0, %v12897_v34 }
0x2661   :  { %v8471_v49 = vadd.f32 1.0, %v12899_v28  ;;  %v12901_v11 = vpop.eup %12900 }
0x2662   :  { %12904 = vrcp.f32 %v8465_v13  ;;  %v12903_v14 = vpop.eup %12902  ;;  %v8478_v55 = vadd.f32 1.0, %v12901_v11 }
0x2663   :  { %12906 = vrcp.f32 %v8471_v49 }
0x2664   :  { %12908 = vrcp.f32 %v8478_v55 }
0x266c   :  { %v12905_v30 = vpop.eup %12904 }
0x266d   :  { %v12907_v43 = vpop.eup %12906  ;;  %v8485_v5 = vmul.f32 %v12905_v30, %v12903_v14 }
0x266e   :  { %v8484_v52 = vmul.f32 %v12907_v43, %v8482_v56  ;;  %v12909_v50 = vpop.eup %12908 }
0x2670   :  { %v15490_v62 = vadd.f32 %v8485_v5, %v8484_v52 }
0x2672   :  { %12910 = vtanh.f32 %v15490_v62  ;;  %v8668_v5 = vrot.slane %v15490_v62, 6 }
0x267c   :  { %v12911_v27 = vpop.eup %12910 }
0x267d   :  { %v8488_v58 = vmul.f32 %v12911_v27, %v12909_v50 }
0x267f   :  { %8489 = vst [vmem:[#allocation2 + $0x8] sm:$0x3] %v8488_v58  ;;  %8555 = vmatmul.mubr.f32.vlgmr.msra.gmra.mrb[94].mxu0 %v8488_v58  ;;  %8626 = vmatmul.mubr.f32.vlgmr.msra.gmra.mrb[94].mxu1 %v8488_v58 }
0x2680   :  { %12147 = vmatpush1.bf16.msra.mxu0 %v15123_v40  ;;  %12179 = vmatpush1.bf16.msra.mxu1 %v15126_v20 }
0x2681   :  { %12149 = vmatprep.subr.bf16.mxu0 %v15131_v2  ;;  %12181 = vmatprep.subr.bf16.mxu1 %v15133_v16 }
0x2682   :  { %8743 = vmatprep.mubr.f32.mxu0 %v15645_v57  ;;  %8814 = vmatprep.mubr.f32.mxu1 %v15645_v57 }
0x2684   :  { %12151 = vmatpush1.bf16.msra.mxu0 %v15135_v63  ;;  %12183 = vmatpush1.bf16.msra.mxu1 %v15138_v54 }
0x2685   :  { %12153 = vmatprep.subr.bf16.mxu0 %v15143_v19  ;;  %12185 = vmatprep.subr.bf16.mxu1 %v15145_v3 }
0x2688   :  { %12155 = vmatpush1.bf16.msra.mxu0 %v15147_v53  ;;  %12187 = vmatpush1.bf16.msra.mxu1 %v15150_v33 }
0x2689   :  { %12157 = vmatprep.subr.bf16.mxu0 %v15155_v37  ;;  %12189 = vmatprep.subr.bf16.mxu1 %v15157_v44 }
0x268c   :  { %12159 = vmatpush1.bf16.msra.mxu0 %v15159_v1  ;;  %12191 = vmatpush1.bf16.msra.mxu1 %v15162_v0 }
0x268d   :  { %12161 = vmatprep.subr.bf16.mxu0 %v15167_v38  ;;  %12193 = vmatprep.subr.bf16.mxu1 %v15169_v10 }
0x2690   :  { %12163 = vmatpush1.bf16.msra.mxu0 %v15171_v23  ;;  %12195 = vmatpush1.bf16.msra.mxu1 %v15174_v45 }
0x2691   :  { %12165 = vmatprep.subr.bf16.mxu0 %v15179_v12  ;;  %12197 = vmatprep.subr.bf16.mxu1 %v15181_v46 }
0x2694   :  { %12167 = vmatpush1.bf16.msra.mxu0 %v15183_v25  ;;  %12199 = vmatpush1.bf16.msra.mxu1 %v15186_v21 }
0x2695   :  { %12169 = vmatprep.subr.bf16.mxu0 %v15190_v59  ;;  %12201 = vmatprep.subr.bf16.mxu1 %v15192_v18 }
0x2698   :  { %12171 = vmatpush1.bf16.msra.mxu0 %v15195_v35  ;;  %12203 = vmatpush1.bf16.msra.mxu1 %v15199_v22 }
0x2699   :  { %12173 = vmatprep.subr.bf16.mxu0 %v15203_v36  ;;  %12205 = vmatprep.subr.bf16.mxu1 %v15205_v61 }
0x269c   :  { %12175 = vmatpush1.bf16.msra.mxu0 %v15207_v15  ;;  %12207 = vmatpush1.bf16.msra.mxu1 %v15210_v48 }
0x269d   :  { %12209 = vmatprep.subr.bf16.mxu0 %v15119_v24  ;;  %12241 = vmatprep.subr.bf16.mxu1 %v15121_v9 }
0x2752   :  { %v8556_v17 = vpop.f32.mrb[94].mxu0  ;;  %v8627_v39 = vpop.f32.mrb[94].mxu1 }
0x2753   :  { %v8636_v8 = vrot.slane %v8556_v17, 6  ;;  %v8558_v42 = vpop.f32.mrb[95].mxu0  ;;  %v8629_v4 = vpop.f32.mrb[95].mxu1  ;;  %v8638_v24 = vrot.slane %v8627_v39, 6 }
0x2754   :  { %v8637_v29 = vrot.slane %v8558_v42, 6  ;;  %v8639_v47 = vrot.slane %v8629_v4, 6  ;;  %v9058_v4 = vld [vmem:[#allocation2] sm:$0xff] }
0x2755   :  { %v8644_v51 = vadd.f32 %v8636_v8, %v15471_v60  ;;  %v8646_v9 = vadd.f32 %v8638_v24, %v15486_v31  ;;  %v9065_v24 = vld [vmem:[#allocation9 + $0x28] sm:$0xff] }
0x2756   :  { %v8645_v32 = vadd.f32 %v8637_v29, %v15475_v41  ;;  %v8647_v34 = vadd.f32 %v8639_v47, %v15481_v6  ;;  %v9060_v29 = vld [vmem:[#allocation9] sm:$0xff] }
0x2757   :  { %v9329_v26 = vmul.f32 -1.442695, %v8644_v51  ;;  %v9061_v51 = vld [vmem:[#allocation9 + $0x8] sm:$0xff] }
0x2758   :  { %v9330_v7 = vmul.f32 -1.442695, %v8645_v32  ;;  %v9331_v28 = vmul.f32 -1.442695, %v8647_v34  ;;  %v12272_v32 = vpack.c.bf16 %v9061_v51, %v9060_v29  ;;  %v9064_v34 = vld [vmem:[#allocation9 + $0x20] sm:$0xff] }
0x2759   :  { %12912 = vpow2.f32 %v9329_v26  ;;  %v9062_v26 = vld [vmem:[#allocation9 + $0x10] sm:$0xff] }
0x275a   :  { %12914 = vpow2.f32 %v9330_v7  ;;  %v9063_v7 = vld [vmem:[#allocation9 + $0x18] sm:$0xff] }
0x275b   :  { %12916 = vpow2.f32 %v9331_v28  ;;  %v12276_v47 = vpack.c.bf16 %v9063_v7, %v9062_v26  ;;  %v12280_v28 = vpack.c.bf16 %v9065_v24, %v9064_v34 }
0x275c   :  { %12918 = vtanh.f32 %v8646_v9  ;;  %v9066_v9 = vld [vmem:[#allocation9 + $0x30] sm:$0xff] }
0x2763   :  { %v12913_v13 = vpop.eup %12912 }
0x2764   :  { %v12915_v49 = vpop.eup %12914  ;;  %v8651_v11 = vadd.f32 1.0, %v12913_v13  ;;  %v9067_v13 = vld [vmem:[#allocation9 + $0x38] sm:$0xff] }
0x2765   :  { %v8657_v14 = vadd.f32 1.0, %v12915_v49  ;;  %v12917_v30 = vpop.eup %12916  ;;  %v12284_v49 = vpack.c.bf16 %v9067_v13, %v9066_v9 }
0x2766   :  { %12920 = vrcp.f32 %v8651_v11  ;;  %v12919_v56 = vpop.eup %12918  ;;  %v8664_v50 = vadd.f32 1.0, %v12917_v30  ;;  %v9068_v11 = vld [vmem:[#allocation9 + $0x40] sm:$0xff] }
0x2767   :  { %12922 = vrcp.f32 %v8657_v14  ;;  %v9069_v14 = vld [vmem:[#allocation9 + $0x48] sm:$0xff] }
0x2768   :  { %12924 = vrcp.f32 %v8664_v50  ;;  %v12288_v30 = vpack.c.bf16 %v9069_v14, %v9068_v11 }
0x2770   :  { %v12921_v43 = vpop.eup %12920 }
0x2771   :  { %v12923_v55 = vpop.eup %12922  ;;  %v8671_v52 = vmul.f32 %v12921_v43, %v12919_v56  ;;  %v9070_v56 = vld [vmem:[#allocation9 + $0x50] sm:$0xff]  ;;  %v9071_v43 = vld [vmem:[#allocation9 + $0x58] sm:$0xff] }
0x2772   :  { %v8670_v27 = vmul.f32 %v12923_v55, %v8668_v5  ;;  %v12925_v17 = vpop.eup %12924  ;;  %v12292_v5 = vpack.c.bf16 %v9071_v43, %v9070_v56  ;;  %v9072_v55 = vld [vmem:[#allocation9 + $0x60] sm:$0xff] }
0x2774   :  { %v15532_v58 = vadd.f32 %v8671_v52, %v8670_v27  ;;  %v9073_v52 = vld [vmem:[#allocation9 + $0x68] sm:$0xff]  ;;  %v9074_v27 = vld [vmem:[#allocation9 + $0x70] sm:$0xff] }
0x2775   :  { %v12296_v50 = vpack.c.bf16 %v9073_v52, %v9072_v55 }
0x2776   :  { %12926 = vtanh.f32 %v15532_v58 }
0x2780   :  { %v12927_v39 = vpop.eup %12926 }
0x2781   :  { %v8674_v8 = vmul.f32 %v12927_v39, %v12925_v17 }
0x2783   :  { %8675 = vst [vmem:[#allocation2 + $0x8] sm:$0xc] %v8674_v8  ;;  %v8677_v42 = vrot.slane %v8674_v8, 2 }
0x2785   :  { %8744 = vmatmul.mubr.f32.vlgmr.msra.gmra.mrb[96].mxu0 %v8677_v42  ;;  %8815 = vmatmul.mubr.f32.vlgmr.msra.gmra.mrb[96].mxu1 %v8677_v42 }
0x2786   :  { %12211 = vmatpush1.bf16.msra.mxu0 %v15123_v40  ;;  %12243 = vmatpush1.bf16.msra.mxu1 %v15126_v20 }
0x2787   :  { %12213 = vmatprep.subr.bf16.mxu0 %v15131_v2  ;;  %12245 = vmatprep.subr.bf16.mxu1 %v15133_v16 }
0x2788   :  { %8932 = vmatprep.mubr.f32.mxu0 %v15645_v57  ;;  %9003 = vmatprep.mubr.f32.mxu1 %v15645_v57 }
0x278a   :  { %12215 = vmatpush1.bf16.msra.mxu0 %v15135_v63  ;;  %12247 = vmatpush1.bf16.msra.mxu1 %v15138_v54 }
0x278b   :  { %12217 = vmatprep.subr.bf16.mxu0 %v15143_v19  ;;  %12249 = vmatprep.subr.bf16.mxu1 %v15145_v3 }
0x278e   :  { %12219 = vmatpush1.bf16.msra.mxu0 %v15147_v53  ;;  %12251 = vmatpush1.bf16.msra.mxu1 %v15150_v33 }
0x278f   :  { %12221 = vmatprep.subr.bf16.mxu0 %v15155_v37  ;;  %12253 = vmatprep.subr.bf16.mxu1 %v15157_v44 }
0x2792   :  { %12223 = vmatpush1.bf16.msra.mxu0 %v15159_v1  ;;  %12255 = vmatpush1.bf16.msra.mxu1 %v15162_v0 }
0x2793   :  { %12225 = vmatprep.subr.bf16.mxu0 %v15167_v38  ;;  %12257 = vmatprep.subr.bf16.mxu1 %v15169_v10 }
0x2796   :  { %12227 = vmatpush1.bf16.msra.mxu0 %v15171_v23  ;;  %12259 = vmatpush1.bf16.msra.mxu1 %v15174_v45 }
0x2797   :  { %12229 = vmatprep.subr.bf16.mxu0 %v15179_v12  ;;  %12261 = vmatprep.subr.bf16.mxu1 %v15181_v46 }
0x279a   :  { %12231 = vmatpush1.bf16.msra.mxu0 %v15183_v25  ;;  %12263 = vmatpush1.bf16.msra.mxu1 %v15186_v21  ;;  %v8857_v21 = vrot.slane %v15532_v58, 6  ;;  %v9075_v58 = vld [vmem:[#allocation9 + $0x78] sm:$0xff] }
0x279b   :  { %12233 = vmatprep.subr.bf16.mxu0 %v15190_v59  ;;  %12265 = vmatprep.subr.bf16.mxu1 %v15192_v18  ;;  %v12300_v17 = vpack.c.bf16 %v9075_v58, %v9074_v27 }
0x279e   :  { %12235 = vmatpush1.bf16.msra.mxu0 %v15195_v35  ;;  %12267 = vmatpush1.bf16.msra.mxu1 %v15199_v22 }
0x279f   :  { %12237 = vmatprep.subr.bf16.mxu0 %v15203_v36  ;;  %12269 = vmatprep.subr.bf16.mxu1 %v15205_v61 }
0x27a2   :  { %12239 = vmatpush1.bf16.msra.mxu0 %v15207_v15  ;;  %12271 = vmatpush1.bf16.msra.mxu1 %v15210_v48 }
0x27a3   :  { %12273 = vmatprep.subr.bf16.mxu0 %v12272_v32 }
0x2858   :  { %v8745_v57 = vpop.f32.mrb[96].mxu0  ;;  %v8816_v40 = vpop.f32.mrb[96].mxu1 }
0x2859   :  { %v8825_v20 = vrot.slane %v8745_v57, 4  ;;  %v8747_v2 = vpop.f32.mrb[97].mxu0  ;;  %v8818_v16 = vpop.f32.mrb[97].mxu1  ;;  %v8827_v44 = vrot.slane %v8816_v40, 4 }
0x285a   :  { %v8826_v63 = vrot.slane %v8747_v2, 4  ;;  %v8828_v33 = vrot.slane %v8818_v16, 4 }
0x285b   :  { %v8833_v54 = vadd.f32 %v8825_v20, %v15471_v60  ;;  %v8835_v0 = vadd.f32 %v8827_v44, %v15486_v31 }
0x285c   :  { %v8834_v19 = vadd.f32 %v8826_v63, %v15475_v41  ;;  %v8836_v37 = vadd.f32 %v8828_v33, %v15481_v6 }
0x285d   :  { %v9332_v3 = vmul.f32 -1.442695, %v8833_v54 }
0x285e   :  { %v9333_v53 = vmul.f32 -1.442695, %v8834_v19  ;;  %v9334_v1 = vmul.f32 -1.442695, %v8836_v37 }
0x285f   :  { %12928 = vpow2.f32 %v9332_v3 }
0x2860   :  { %12930 = vpow2.f32 %v9333_v53 }
0x2861   :  { %12932 = vpow2.f32 %v9334_v1 }
0x2862   :  { %12934 = vtanh.f32 %v8835_v0 }
0x2869   :  { %v12929_v38 = vpop.eup %12928 }
0x286a   :  { %v12931_v10 = vpop.eup %12930  ;;  %v8840_v23 = vadd.f32 1.0, %v12929_v38 }
0x286b   :  { %v8846_v45 = vadd.f32 1.0, %v12931_v10  ;;  %v12933_v12 = vpop.eup %12932 }
0x286c   :  { %12936 = vrcp.f32 %v8840_v23  ;;  %v12935_v46 = vpop.eup %12934  ;;  %v8853_v35 = vadd.f32 1.0, %v12933_v12 }
0x286d   :  { %12938 = vrcp.f32 %v8846_v45 }
0x286e   :  { %12940 = vrcp.f32 %v8853_v35 }
0x2876   :  { %v12937_v25 = vpop.eup %12936 }
0x2877   :  { %v12939_v59 = vpop.eup %12938  ;;  %v8860_v18 = vmul.f32 %v12937_v25, %v12935_v46 }
0x2878   :  { %v8859_v22 = vmul.f32 %v12939_v59, %v8857_v21  ;;  %v12941_v61 = vpop.eup %12940 }
0x287a   :  { %v15572_v36 = vadd.f32 %v8860_v18, %v8859_v22 }
0x287c   :  { %12942 = vtanh.f32 %v15572_v36  ;;  %v9046_v23 = vrot.slane %v15572_v36, 6 }
0x2886   :  { %v12943_v15 = vpop.eup %12942 }
0x2887   :  { %v8863_v48 = vmul.f32 %v12943_v15, %v12941_v61 }
0x2889   :  { %8864 = vst [vmem:[#allocation2 + $0x8] sm:$0x30] %v8863_v48  ;;  %v8866_v62 = vrot.slane %v8863_v48, 4 }
0x288b   :  { %8933 = vmatmul.mubr.f32.vlgmr.msra.gmra.mrb[98].mxu0 %v8866_v62  ;;  %9004 = vmatmul.mubr.f32.vlgmr.msra.gmra.mrb[98].mxu1 %v8866_v62 }
0x288c   :  { %9389 = vmatprep.mubr.f32.mxu0 %v9058_v4  ;;  %12275 = vmatpush3.bf16.msra.mxu0 %v12272_v32 }
0x288d   :  { %12277 = vmatprep.subr.bf16.mxu0 %v12276_v47 }
0x2890   :  { %12279 = vmatpush3.bf16.msra.mxu0 %v12276_v47 }
0x2891   :  { %12281 = vmatprep.subr.bf16.mxu0 %v12280_v28 }
0x2894   :  { %12283 = vmatpush3.bf16.msra.mxu0 %v12280_v28 }
0x2895   :  { %12285 = vmatprep.subr.bf16.mxu0 %v12284_v49 }
0x2898   :  { %12287 = vmatpush3.bf16.msra.mxu0 %v12284_v49 }
0x2899   :  { %12289 = vmatprep.subr.bf16.mxu0 %v12288_v30 }
0x289c   :  { %12291 = vmatpush3.bf16.msra.mxu0 %v12288_v30 }
0x289d   :  { %12293 = vmatprep.subr.bf16.mxu0 %v12292_v5 }
0x28a0   :  { %12295 = vmatpush3.bf16.msra.mxu0 %v12292_v5 }
0x28a1   :  { %12297 = vmatprep.subr.bf16.mxu0 %v12296_v50 }
0x28a4   :  { %12299 = vmatpush3.bf16.msra.mxu0 %v12296_v50 }
0x28a5   :  { %12301 = vmatprep.subr.bf16.mxu0 %v12300_v17 }
0x28a8   :  { %12303 = vmatpush3.bf16.msra.mxu0 %v12300_v17 }
0x295e   :  { %v8934_v39 = vpop.f32.mrb[98].mxu0  ;;  %v9005_v8 = vpop.f32.mrb[98].mxu1 }
0x295f   :  { %v9014_v42 = vrot.slane %v8934_v39, 2  ;;  %v8936_v57 = vpop.f32.mrb[99].mxu0  ;;  %v9007_v40 = vpop.f32.mrb[99].mxu1  ;;  %v9016_v53 = vrot.slane %v9005_v8, 2 }
0x2960   :  { %v9015_v20 = vrot.slane %v8936_v57, 2  ;;  %v9017_v19 = vrot.slane %v9007_v40, 2 }
0x2961   :  { %v9022_v2 = vadd.f32 %v9014_v42, %v15471_v60  ;;  %v9024_v37 = vadd.f32 %v9016_v53, %v15486_v31 }
0x2962   :  { %v9023_v16 = vadd.f32 %v9015_v20, %v15475_v41  ;;  %v9025_v3 = vadd.f32 %v9017_v19, %v15481_v6 }
0x2963   :  { %v9335_v63 = vmul.f32 -1.442695, %v9022_v2 }
0x2964   :  { %v9336_v54 = vmul.f32 -1.442695, %v9023_v16  ;;  %v9337_v33 = vmul.f32 -1.442695, %v9025_v3 }
0x2965   :  { %12944 = vpow2.f32 %v9335_v63 }
0x2966   :  { %12946 = vpow2.f32 %v9336_v54 }
0x2967   :  { %12948 = vpow2.f32 %v9337_v33 }
0x2968   :  { %12950 = vtanh.f32 %v9024_v37 }
0x296f   :  { %v12945_v44 = vpop.eup %12944 }
0x2970   :  { %v12947_v1 = vpop.eup %12946  ;;  %v9029_v0 = vadd.f32 1.0, %v12945_v44 }
0x2971   :  { %v9035_v38 = vadd.f32 1.0, %v12947_v1  ;;  %v12949_v60 = vpop.eup %12948 }
0x2972   :  { %12952 = vrcp.f32 %v9029_v0  ;;  %v12951_v41 = vpop.eup %12950  ;;  %v9042_v6 = vadd.f32 1.0, %v12949_v60 }
0x2973   :  { %12954 = vrcp.f32 %v9035_v38 }
0x2974   :  { %12956 = vrcp.f32 %v9042_v6 }
0x297c   :  { %v12953_v10 = vpop.eup %12952 }
0x297d   :  { %v12955_v45 = vpop.eup %12954  ;;  %v9049_v12 = vmul.f32 %v12953_v10, %v12951_v41 }
0x297e   :  { %v9048_v46 = vmul.f32 %v12955_v45, %v9046_v23  ;;  %v12957_v31 = vpop.eup %12956 }
0x2980   :  { %v9050_v25 = vadd.f32 %v9049_v12, %v9048_v46 }
0x2982   :  { %12958 = vtanh.f32 %v9050_v25  ;;  %9057 = vst [vmem:[#allocation15 + $0x2] sm:$0xc0] %v9050_v25 }
0x298c   :  { %v12959_v21 = vpop.eup %12958 }
0x298d   :  { %v9052_v59 = vmul.f32 %v12959_v21, %v12957_v31 }
0x298f   :  { %9053 = vst [vmem:[#allocation2 + $0x8] sm:$0xc0] %v9052_v59  ;;  %9055 = vst [vmem:[#allocation13 + $0x2] sm:$0xc0] %v9052_v59 }
0x2996   :  { %v9059_v18 = vld [vmem:[#allocation2 + $0x8] sm:$0xff] }
0x2997   :  { %9390 = vmatmul.mubr.f32.vlgmr.msra.gmra.mrb[100].mxu0 %v9059_v18 }
0x2998   :  { %13081 = shalt.err (!%p13078_p2)
}
0x2999   :  { %s13082_s0 = scalar_lea.hbm %s15632_s9, 160 }
0x299a   :  { %p13083_p3 = scmp.ne.s32.totalorder %s15632_s9, %s13082_s0  ;;  %p13086_p4 = scmp.lt.u32.totalorder %s13082_s0, %s15632_s9 }
0x299c   :  { %p13088_p5 = pnand %p13086_p4, %p13083_p3 }
0x299e   :  { %13091 = shalt.err (!%p13088_p5)
}
0x299f   :  { %s13159_s29 = smov 2   ;;  %s13160_s12 = smov [#allocation15]  }
0x29a0   :  { %9183 = dma.vmem_to_hbm [thread:$0]  %s9178_s7, 160, %s15632_s9, [#allocation14], %s13149_s26, %s13149_s26, %s13159_s29  }
0x29a1   :  { %s9189_s13 = sshll.u32 %s13160_s12, 4  ;;  %s9190_s13 = int_to_ptr.vmem [resolvable:$true] %s9189_s13 }
0x29a2   :  { %s13092_s6 = scalar_lea.vmem %s9190_s13, 160  ;;  %p13097_p7 = scmp.lt.s32.totalorder %s9190_s13, %s9190_s13 }
0x29a3   :  { %p13093_p6 = scmp.ne.s32.totalorder %s9190_s13, %s13092_s6  ;;  %p13098_p8 = scmp.lt.s32.totalorder %s13092_s6, %s13092_s6 }
0x29a5   :  { %p13099_p9 = por %p13098_p8, %p13097_p7 }
0x29a7   :  { %p13100_p10 = pnand %p13099_p9, %p13093_p6 }
0x29a9   :  { %13103 = shalt.err (!%p13100_p10)
}
0x29aa   :  { %s13104_s17 = scalar_lea.hbm %s15633_s10, 160 }
0x29ab   :  { %p13105_p11 = scmp.ne.s32.totalorder %s15633_s10, %s13104_s17  ;;  %p13108_p12 = scmp.lt.u32.totalorder %s13104_s17, %s15633_s10 }
0x29ad   :  { %p13110_p13 = pnand %p13108_p12, %p13105_p11 }
0x29af   :  { %13113 = shalt.err (!%p13110_p13)
}
0x29b0   :  { %9195 = dma.vmem_to_hbm [thread:$0]  %s9190_s13, 160, %s15633_s10, [#allocation14], %s13149_s26, %s13149_s26, %s13159_s29   ;;  %v9338_v35 = vld [vmem:[#allocation11] ss:$0 sm:$0xff] }
0x29b1   :  { %s13161_s20 = smov [#allocation12]  }
0x29b2   :  { %s9165_s2 = sshll.u32 %s13161_s20, 4  ;;  %s9166_s2 = int_to_ptr.vmem [resolvable:$true] %s9165_s2 }
0x29b3   :  { %s13114_s7 = scalar_lea.vmem %s9166_s2, 256  ;;  %p13119_p1 = scmp.lt.s32.totalorder %s9166_s2, %s9166_s2 }
0x29b4   :  { %p13115_p0 = scmp.ne.s32.totalorder %s9166_s2, %s13114_s7  ;;  %p13120_p2 = scmp.lt.s32.totalorder %s13114_s7, %s13114_s7 }
0x29b6   :  { %p13121_p3 = por %p13120_p2, %p13119_p1 }
0x29b8   :  { %p13122_p4 = pnand %p13121_p3, %p13115_p0 }
0x2a6a   :  { %v9391_v22 = vpop.f32.mrb[100].mxu0 }
0x2a6b   :  { %v9155_v36 = vadd.f32 %v9391_v22, %v9338_v35  ;;  %v9149_v61 = vpop.f32.mrb[101].mxu0 }
0x2a6c   :  { %v9150_v15 = vadd.f32 %v9338_v35, %v9149_v61 }
0x2a6d   :  { %9159 = vst [vmem:[#allocation12 + $0x8] sm:$0xff] %v9155_v36 }
0x2a6e   :  { %9158 = vst [vmem:[#allocation12] sm:$0xff] %v9150_v15 }
0x2a6f   :  { %13125 = shalt.err (!%p13122_p4)
}
0x2a70   :  { %s13126_s10 = scalar_lea.hbm %s15631_s8, 256 }
0x2a71   :  { %p13127_p5 = scmp.ne.s32.totalorder %s15631_s8, %s13126_s10  ;;  %p13130_p6 = scmp.lt.u32.totalorder %s13126_s10, %s15631_s8 }
0x2a73   :  { %p13132_p7 = pnand %p13130_p6, %p13127_p5 }
0x2a75   :  { %13135 = shalt.err (!%p13132_p7)
}
0x2a76   :  { %9171 = dma.vmem_to_hbm [thread:$0]  %s9166_s2, 256, %s15631_s8, [#allocation5], %s13150_s4, %s13150_s4, %s13151_s14  }
0x2a77   :  { %13142 = dma.done.wait [#allocation5], 256  }
0x2a78   :  { %13143 = vsyncadd [#allocation5], 4294967040 }
0x2a79   :  { %13144 = dma.done.wait [#allocation14], 320  }
0x2a7a   :  { %13145 = vsyncadd [#allocation14], 4294966976 }
0x2a7b   :  { %9205 = vsyncpa [#allocation4], 1 }
0x2a7c   :  { %9206 = vsyncpa [#allocation7], 1 }
0x2a7d   :  { %9207 = vsyncpa [#allocation10], 1 }
0x2a7e   :  { %9208 = vsyncpa [#allocation5], 1 }
0x2a7f   :  { %9209 = vsyncpa [#allocation14], 1 }

</bundles_post_ra>
